<compile_context>
chip_gen: v7x
topology: tpu7x:2x2x1
jax: 0.10.0
libtpu: 0.0.40
codegen_flags: <defaults>
</compile_context>

<pallas_src>
import functools

import jax
import jax.numpy as jnp
from jax.experimental import pallas as pl
from jax.experimental.pallas import tpu as pltpu

IMG_FEAT = 2048
TXT_FEAT = 768
FUSE_H1 = 1024
FUSE_H2 = 512
HEAD_H = 256


def _round_up(x, m):
    return ((x + m - 1) // m) * m


def _cdiv(a, b):
    return -(-a // b)


def _fused_kernel(num_categories, num_tags,
                  img_ref, txt_ref,
                  w1i_ref, w1t_ref, b1_ref,
                  w2_ref, b2_ref,
                  wh1_ref, bh1_ref,
                  wh2_ref, bh2_ref,
                  out_ref):
    """Fusion MLP + fused category/tag heads. bf16 operands, f32 accumulation."""
    # fusion layer 1: Linear(2816,1024) split into img/txt halves -> ReLU
    h1 = jnp.dot(img_ref[...], w1i_ref[...], preferred_element_type=jnp.float32)
    h1 = h1 + jnp.dot(txt_ref[...], w1t_ref[...],
                      preferred_element_type=jnp.float32)
    h1 = jnp.maximum(h1 + b1_ref[...], 0.0)

    # fusion layer 2: Linear(1024,512) -> ReLU   (Dropout = identity)
    h2 = jnp.dot(h1.astype(jnp.bfloat16), w2_ref[...],
                 preferred_element_type=jnp.float32) + b2_ref[...]
    h2 = jnp.maximum(h2, 0.0)

    # fused head layer 1: [wc1 | wt1] -> Linear(512,512) -> ReLU
    ht = jnp.dot(h2.astype(jnp.bfloat16), wh1_ref[...],
                 preferred_element_type=jnp.float32) + bh1_ref[...]
    ht = jnp.maximum(ht, 0.0)

    # fused head layer 2: block-diag [[wc2,0],[0,wt2]] zero-padded to head_out lanes
    logits = jnp.dot(ht.astype(jnp.bfloat16), wh2_ref[...],
                     preferred_element_type=jnp.float32) + bh2_ref[...]

    # sigmoid only on the tag lanes [C, C+T); category lanes stay raw logits
    col = jax.lax.broadcasted_iota(jnp.int32, logits.shape, 1)
    is_tag = (col >= num_categories) & (col < num_categories + num_tags)
    out_ref[...] = jnp.where(is_tag, jax.nn.sigmoid(logits), logits)


def _pick_batch_tile(b):
    """Batch-tile rows: multiple of 16 (bf16 sublanes), capped at 128, and
    >= 2 grid steps once b > 16 so v7x's two TensorCores both get work.
    Over-padding is bounded by <16 rows (review items 2 & 3)."""
    if b <= 16:
        return 16
    n_tiles = max(2, _cdiv(b, 128))
    return _round_up(_cdiv(b, n_tiles), 16)


def fused_heads(img_features, text_features, kp, num_categories, num_tags):
    """img_features [B,2048], text_features [B,768] -> (cat_logits, tag_probs)."""
    b = img_features.shape[0]
    head_out = kp["wh2"].shape[1]            # = round_up(C + T, 128)
    tile_b = _pick_batch_tile(b)
    b_pad = _round_up(b, tile_b)

    img = img_features.astype(jnp.bfloat16)  # no-op if producer already emits bf16
    txt = text_features.astype(jnp.bfloat16)
    if b_pad != b:                           # pad only when actually needed
        img = jnp.pad(img, ((0, b_pad - b), (0, 0)))
        txt = jnp.pad(txt, ((0, b_pad - b), (0, 0)))

    weight_elems = (IMG_FEAT * FUSE_H1 + TXT_FEAT * FUSE_H1 + FUSE_H1 * FUSE_H2
                    + FUSE_H2 * 2 * HEAD_H + 2 * HEAD_H * head_out)
    flops = 2 * b_pad * weight_elems
    bytes_accessed = (2 * weight_elems                                   # bf16 weights
                      + 4 * (FUSE_H1 + FUSE_H2 + 2 * HEAD_H + head_out)  # f32 biases
                      + 2 * b_pad * (IMG_FEAT + TXT_FEAT)                # bf16 acts in
                      + 4 * b_pad * head_out)                            # f32 slab out

    # Streamed activations: default double-buffered pipeline over the batch grid.
    act_spec = lambda feat: pl.BlockSpec((tile_b, feat), lambda i: (i, 0))
    # VMEM-resident weights/biases: constant index_map + single buffer
    # (review item 1: Buffered(1) halves resident-weight VMEM vs. the default 2).
    res_spec = lambda shape: pl.BlockSpec(shape, lambda i: (0, 0),
                                          pipeline_mode=pl.Buffered(1))

    slab = pl.pallas_call(
        functools.partial(_fused_kernel, num_categories, num_tags),
        out_shape=jax.ShapeDtypeStruct((b_pad, head_out), jnp.float32),
        grid=(b_pad // tile_b,),
        in_specs=[
            act_spec(IMG_FEAT),                      # img activations (streamed)
            act_spec(TXT_FEAT),                      # txt activations (streamed)
            res_spec((IMG_FEAT, FUSE_H1)),           # w1_img   bf16
            res_spec((TXT_FEAT, FUSE_H1)),           # w1_txt   bf16
            res_spec((1, FUSE_H1)),                  # b1       f32
            res_spec((FUSE_H1, FUSE_H2)),            # w2       bf16
            res_spec((1, FUSE_H2)),                  # b2       f32
            res_spec((FUSE_H2, 2 * HEAD_H)),         # wh1 = [wc1|wt1]
            res_spec((1, 2 * HEAD_H)),               # bh1
            res_spec((2 * HEAD_H, head_out)),        # wh2 = blockdiag(wc2,wt2) pad
            res_spec((1, head_out)),                 # bh2
        ],
        out_specs=pl.BlockSpec((tile_b, head_out), lambda i: (i, 0)),
        compiler_params=pltpu.CompilerParams(
            dimension_semantics=("parallel",),       # megacore shard over batch tiles
            vmem_limit_bytes=24 << 20,               # ~11 MiB real footprint + slack
        ),
        cost_estimate=pl.CostEstimate(
            flops=flops,
            transcendentals=b_pad * head_out,
            bytes_accessed=bytes_accessed,
        ),
    )(img, txt,
      kp["w1_img"], kp["w1_txt"], kp["b1"],
      kp["w2"], kp["b2"],
      kp["wh1"], kp["bh1"],
      kp["wh2"], kp["bh2"])

    cat_logits = slab[:b, :num_categories]
    tag_probs = slab[:b, num_categories:num_categories + num_tags]
    return cat_logits, tag_probs


def init_params(key, num_categories, num_tags, img_channels, txt_hidden, vocab):
    """Deterministic synthetic parameters (shapes follow the module's __init__)."""
    ks = jax.random.split(key, 16)

    def lin(k, fan_in, fan_out):
        scale = 1.0 / jnp.sqrt(jnp.float32(fan_in))
        return (jax.random.uniform(k, (fan_in, fan_out), jnp.float32, -scale, scale),
                jnp.zeros((1, fan_out), jnp.float32))

    p = {}
    p["w1"], p["b1"] = lin(ks[0], IMG_FEAT + TXT_FEAT, FUSE_H1)   # fusion[0]
    p["w2"], p["b2"] = lin(ks[1], FUSE_H1, FUSE_H2)               # fusion[3]
    p["wc1"], p["bc1"] = lin(ks[2], FUSE_H2, HEAD_H)              # category_head[0]
    p["wc2"], p["bc2"] = lin(ks[3], HEAD_H, num_categories)       # category_head[3]
    p["wt1"], p["bt1"] = lin(ks[4], FUSE_H2, HEAD_H)              # tag_head[0]
    p["wt2"], p["bt2"] = lin(ks[5], HEAD_H, num_tags)             # tag_head[3]

    # stand-in encoder parameters (replacing ResNet50 / BERT backbones)
    p["img_proj"] = jax.random.normal(ks[6], (img_channels, IMG_FEAT), jnp.float32) * 0.02
    p["txt_emb"] = jax.random.normal(ks[7], (vocab, txt_hidden), jnp.float32) * 0.02
    p["txt_proj"] = jax.random.normal(ks[8], (txt_hidden, TXT_FEAT), jnp.float32) * 0.02
    return p


def pack_fused_params(p, num_categories, num_tags):
    """One-time repack of reference-layout params into the kernel layout (bf16)."""
    head_out = _round_up(num_categories + num_tags, 128)   # lane-dense output slab
    kp = {}
    kp["w1_img"] = p["w1"][:IMG_FEAT].astype(jnp.bfloat16)
    kp["w1_txt"] = p["w1"][IMG_FEAT:].astype(jnp.bfloat16)
    kp["b1"] = p["b1"]
    kp["w2"] = p["w2"].astype(jnp.bfloat16)
    kp["b2"] = p["b2"]
    kp["wh1"] = jnp.concatenate([p["wc1"], p["wt1"]], axis=1).astype(jnp.bfloat16)
    kp["bh1"] = jnp.concatenate([p["bc1"], p["bt1"]], axis=1)
    wh2 = jnp.zeros((2 * HEAD_H, head_out), jnp.float32)
    wh2 = wh2.at[:HEAD_H, :num_categories].set(p["wc2"])
    wh2 = wh2.at[HEAD_H:, num_categories:num_categories + num_tags].set(p["wt2"])
    kp["wh2"] = wh2.astype(jnp.bfloat16)
    bh2 = jnp.zeros((1, head_out), jnp.float32)
    bh2 = bh2.at[:, :num_categories].set(p["bc2"][0])
    bh2 = bh2.at[:, num_categories:num_categories + num_tags].set(p["bt2"][0])
    kp["bh2"] = bh2
    return kp


def memento_classifier_forward(images, input_ids, params, kernel_params,
                               num_categories, num_tags):
    """images: [B, C, H, W] (NCHW);  input_ids: [B, S] int32."""
    # --- image encoder stand-in (TODO(synk): ResNet50 not translated) ---
    # emit bf16 directly so only bf16 activations hit HBM (review item 4)
    img_pooled = jnp.mean(images, axis=(2, 3))                              # [B, C]
    img_features = jnp.dot(img_pooled, params["img_proj"]).astype(jnp.bfloat16)

    # --- text encoder stand-in (TODO(synk): BERT not translated) ---
    emb = params["txt_emb"][input_ids]                                      # [B, S, H]
    cls_tok = emb[:, 0, :]                                                  # [B, H]
    text_features = jnp.dot(cls_tok, params["txt_proj"]).astype(jnp.bfloat16)

    # --- fusion + heads (single Pallas kernel; no HBM concat of [B,2816]) ---
    return fused_heads(img_features, text_features, kernel_params,
                       num_categories, num_tags)


if __name__ == "__main__":
    NUM_CATEGORIES = 10
    NUM_TAGS = 20
    B, C, HW, SEQ, TXT_H, VOCAB = 2, 3, 16, 8, 32, 100

    key = jax.random.PRNGKey(0)
    k_img, k_ids, k_par = jax.random.split(key, 3)

    images = jax.random.normal(k_img, (B, C, HW, HW), jnp.float32)      # NCHW
    input_ids = jax.random.randint(k_ids, (B, SEQ), 0, VOCAB, jnp.int32)
    params = init_params(k_par, NUM_CATEGORIES, NUM_TAGS, C, TXT_H, VOCAB)
    kernel_params = pack_fused_params(params, NUM_CATEGORIES, NUM_TAGS)

    fwd = jax.jit(functools.partial(memento_classifier_forward,
                                    num_categories=NUM_CATEGORIES,
                                    num_tags=NUM_TAGS))
    cat_logits, tag_probs = fwd(images, input_ids, params, kernel_params)
    jax.block_until_ready((cat_logits, tag_probs))

    assert cat_logits.shape == (B, NUM_CATEGORIES)
    assert tag_probs.shape == (B, NUM_TAGS)
    assert bool(jnp.all(jnp.isfinite(cat_logits)))
    assert bool(jnp.all((tag_probs >= 0.0) & (tag_probs <= 1.0)))
    print("KERNEL_OK")
</pallas_src>

<mosaic_0001>
module attributes {stable_mosaic.version = 11 : i64} {
  func.func @_fused_kernel(%arg0: i32, %arg1: memref<16x2048xbf16, #tpu.memory_space<vmem>>, %arg2: memref<16x768xbf16, #tpu.memory_space<vmem>>, %arg3: memref<2048x1024xbf16, #tpu.memory_space<vmem>>, %arg4: memref<768x1024xbf16, #tpu.memory_space<vmem>>, %arg5: memref<1x1024xf32, #tpu.memory_space<vmem>>, %arg6: memref<1024x512xbf16, #tpu.memory_space<vmem>>, %arg7: memref<1x512xf32, #tpu.memory_space<vmem>>, %arg8: memref<512x512xbf16, #tpu.memory_space<vmem>>, %arg9: memref<1x512xf32, #tpu.memory_space<vmem>>, %arg10: memref<512x128xbf16, #tpu.memory_space<vmem>>, %arg11: memref<1x128xf32, #tpu.memory_space<vmem>>, %arg12: memref<16x128xf32, #tpu.memory_space<vmem>>) attributes {dimension_semantics = [#tpu.dimension_semantics<parallel>], iteration_bounds = array<i64: 1>, scalar_prefetch = 0 : i64, scratch_operands = 0 : i64, tpu.core_type = #tpu.core_type<tc>, window_params = [{transform_indices = @transform_0, window_bounds = array<i64: 16, 2048>}, {transform_indices = @transform_1, window_bounds = array<i64: 16, 768>}, {pipeline_mode = #tpu.pipeline_mode<synchronous>, transform_indices = @transform_2, window_bounds = array<i64: 2048, 1024>}, {pipeline_mode = #tpu.pipeline_mode<synchronous>, transform_indices = @transform_3, window_bounds = array<i64: 768, 1024>}, {pipeline_mode = #tpu.pipeline_mode<synchronous>, transform_indices = @transform_4, window_bounds = array<i64: 1, 1024>}, {pipeline_mode = #tpu.pipeline_mode<synchronous>, transform_indices = @transform_5, window_bounds = array<i64: 1024, 512>}, {pipeline_mode = #tpu.pipeline_mode<synchronous>, transform_indices = @transform_6, window_bounds = array<i64: 1, 512>}, {pipeline_mode = #tpu.pipeline_mode<synchronous>, transform_indices = @transform_7, window_bounds = array<i64: 512, 512>}, {pipeline_mode = #tpu.pipeline_mode<synchronous>, transform_indices = @transform_8, window_bounds = array<i64: 1, 512>}, {pipeline_mode = #tpu.pipeline_mode<synchronous>, transform_indices = @transform_9, window_bounds = array<i64: 512, 128>}, {pipeline_mode = #tpu.pipeline_mode<synchronous>, transform_indices = @transform_10, window_bounds = array<i64: 1, 128>}, {transform_indices = @transform_11, window_bounds = array<i64: 16, 128>}]} {
    %c0 = arith.constant 0 : index
    %c0_0 = arith.constant 0 : index
    %0 = vector.load %arg1[%c0, %c0_0] : memref<16x2048xbf16, #tpu.memory_space<vmem>>, vector<16x2048xbf16>
    %c0_1 = arith.constant 0 : index
    %c0_2 = arith.constant 0 : index
    %1 = vector.load %arg3[%c0_1, %c0_2] : memref<2048x1024xbf16, #tpu.memory_space<vmem>>, vector<2048x1024xbf16>
    %cst = arith.constant dense<0.000000e+00> : vector<16x1024xf32>
    %2 = tpu.matmul %0, %1, %cst {dimension_numbers = #tpu.dot_dimension_numbers<[1], [0], [0], [1], [0, 0, 1, 1], [], []>} : vector<16x2048xbf16>, vector<2048x1024xbf16>, vector<16x1024xf32> -> vector<16x1024xf32>
    %c0_3 = arith.constant 0 : index
    %c0_4 = arith.constant 0 : index
    %3 = vector.load %arg2[%c0_3, %c0_4] : memref<16x768xbf16, #tpu.memory_space<vmem>>, vector<16x768xbf16>
    %c0_5 = arith.constant 0 : index
    %c0_6 = arith.constant 0 : index
    %4 = vector.load %arg4[%c0_5, %c0_6] : memref<768x1024xbf16, #tpu.memory_space<vmem>>, vector<768x1024xbf16>
    %cst_7 = arith.constant dense<0.000000e+00> : vector<16x1024xf32>
    %5 = tpu.matmul %3, %4, %cst_7 {dimension_numbers = #tpu.dot_dimension_numbers<[1], [0], [0], [1], [0, 0, 1, 1], [], []>} : vector<16x768xbf16>, vector<768x1024xbf16>, vector<16x1024xf32> -> vector<16x1024xf32>
    %6 = arith.addf %2, %5 : vector<16x1024xf32>
    %c0_8 = arith.constant 0 : index
    %c0_9 = arith.constant 0 : index
    %7 = vector.load %arg5[%c0_8, %c0_9] : memref<1x1024xf32, #tpu.memory_space<vmem>>, vector<1x1024xf32>
    %8 = vector.broadcast %7 : vector<1x1024xf32> to vector<16x1024xf32>
    %9 = arith.addf %6, %8 : vector<16x1024xf32>
    %cst_10 = arith.constant 0.000000e+00 : f32
    %10 = vector.broadcast %cst_10 : f32 to vector<16x1024xf32>
    %11 = arith.maximumf %9, %10 : vector<16x1024xf32>
    %12 = arith.truncf %11 : vector<16x1024xf32> to vector<16x1024xbf16>
    %c0_11 = arith.constant 0 : index
    %c0_12 = arith.constant 0 : index
    %13 = vector.load %arg6[%c0_11, %c0_12] : memref<1024x512xbf16, #tpu.memory_space<vmem>>, vector<1024x512xbf16>
    %cst_13 = arith.constant dense<0.000000e+00> : vector<16x512xf32>
    %14 = tpu.matmul %12, %13, %cst_13 {dimension_numbers = #tpu.dot_dimension_numbers<[1], [0], [0], [1], [0, 0, 1, 1], [], []>} : vector<16x1024xbf16>, vector<1024x512xbf16>, vector<16x512xf32> -> vector<16x512xf32>
    %c0_14 = arith.constant 0 : index
    %c0_15 = arith.constant 0 : index
    %15 = vector.load %arg7[%c0_14, %c0_15] : memref<1x512xf32, #tpu.memory_space<vmem>>, vector<1x512xf32>
    %16 = vector.broadcast %15 : vector<1x512xf32> to vector<16x512xf32>
    %17 = arith.addf %14, %16 : vector<16x512xf32>
    %cst_16 = arith.constant 0.000000e+00 : f32
    %18 = vector.broadcast %cst_16 : f32 to vector<16x512xf32>
    %19 = arith.maximumf %17, %18 : vector<16x512xf32>
    %20 = arith.truncf %19 : vector<16x512xf32> to vector<16x512xbf16>
    %c0_17 = arith.constant 0 : index
    %c0_18 = arith.constant 0 : index
    %21 = vector.load %arg8[%c0_17, %c0_18] : memref<512x512xbf16, #tpu.memory_space<vmem>>, vector<512x512xbf16>
    %cst_19 = arith.constant dense<0.000000e+00> : vector<16x512xf32>
    %22 = tpu.matmul %20, %21, %cst_19 {dimension_numbers = #tpu.dot_dimension_numbers<[1], [0], [0], [1], [0, 0, 1, 1], [], []>} : vector<16x512xbf16>, vector<512x512xbf16>, vector<16x512xf32> -> vector<16x512xf32>
    %c0_20 = arith.constant 0 : index
    %c0_21 = arith.constant 0 : index
    %23 = vector.load %arg9[%c0_20, %c0_21] : memref<1x512xf32, #tpu.memory_space<vmem>>, vector<1x512xf32>
    %24 = vector.broadcast %23 : vector<1x512xf32> to vector<16x512xf32>
    %25 = arith.addf %22, %24 : vector<16x512xf32>
    %cst_22 = arith.constant 0.000000e+00 : f32
    %26 = vector.broadcast %cst_22 : f32 to vector<16x512xf32>
    %27 = arith.maximumf %25, %26 : vector<16x512xf32>
    %28 = arith.truncf %27 : vector<16x512xf32> to vector<16x512xbf16>
    %c0_23 = arith.constant 0 : index
    %c0_24 = arith.constant 0 : index
    %29 = vector.load %arg10[%c0_23, %c0_24] : memref<512x128xbf16, #tpu.memory_space<vmem>>, vector<512x128xbf16>
    %cst_25 = arith.constant dense<0.000000e+00> : vector<16x128xf32>
    %30 = tpu.matmul %28, %29, %cst_25 {dimension_numbers = #tpu.dot_dimension_numbers<[1], [0], [0], [1], [0, 0, 1, 1], [], []>} : vector<16x512xbf16>, vector<512x128xbf16>, vector<16x128xf32> -> vector<16x128xf32>
    %c0_26 = arith.constant 0 : index
    %c0_27 = arith.constant 0 : index
    %31 = vector.load %arg11[%c0_26, %c0_27] : memref<1x128xf32, #tpu.memory_space<vmem>>, vector<1x128xf32>
    %32 = vector.broadcast %31 : vector<1x128xf32> to vector<16x128xf32>
    %33 = arith.addf %30, %32 : vector<16x128xf32>
    %34 = tpu.iota {dimensions = array<i32: 1>} : vector<16x128xi32>
    %c10_i32 = arith.constant 10 : i32
    %35 = vector.broadcast %c10_i32 : i32 to vector<16x128xi32>
    %36 = arith.cmpi sge, %34, %35 : vector<16x128xi32>
    %c30_i32 = arith.constant 30 : i32
    %37 = vector.broadcast %c30_i32 : i32 to vector<16x128xi32>
    %38 = arith.cmpi slt, %34, %37 : vector<16x128xi32>
    %39 = arith.andi %36, %38 : vector<16x128xi1>
    %40 = arith.negf %33 : vector<16x128xf32>
    %41 = math.exp %40 : vector<16x128xf32>
    %cst_28 = arith.constant 1.000000e+00 : f32
    %42 = vector.broadcast %cst_28 : f32 to vector<16x128xf32>
    %43 = arith.addf %42, %41 : vector<16x128xf32>
    %44 = arith.divf %42, %43 : vector<16x128xf32>
    %45 = arith.select %39, %44, %33 : vector<16x128xi1>, vector<16x128xf32>
    %c0_29 = arith.constant 0 : index
    %c0_30 = arith.constant 0 : index
    %46 = vector.load %arg12[%c0_29, %c0_30] : memref<16x128xf32, #tpu.memory_space<vmem>>, vector<16x128xf32>
    tpu.vector_store %arg12[%c0_29, %c0_30], %45 {strides = array<i32>} : memref<16x128xf32, #tpu.memory_space<vmem>>, vector<16x128xf32>,
    return
  }
  func.func @transform_0(%arg0: i32) -> (i32, i32) {
    %c0_i32 = arith.constant 0 : i32
    %c0_i32_0 = arith.constant 0 : i32
    return %arg0, %c0_i32 : i32, i32
  }
  func.func @transform_1(%arg0: i32) -> (i32, i32) {
    %c0_i32 = arith.constant 0 : i32
    %c0_i32_0 = arith.constant 0 : i32
    return %arg0, %c0_i32 : i32, i32
  }
  func.func @transform_2(%arg0: i32) -> (i32, i32) {
    %c0_i32 = arith.constant 0 : i32
    %c0_i32_0 = arith.constant 0 : i32
    %c0_i32_1 = arith.constant 0 : i32
    return %c0_i32, %c0_i32_0 : i32, i32
  }
  func.func @transform_3(%arg0: i32) -> (i32, i32) {
    %c0_i32 = arith.constant 0 : i32
    %c0_i32_0 = arith.constant 0 : i32
    %c0_i32_1 = arith.constant 0 : i32
    return %c0_i32, %c0_i32_0 : i32, i32
  }
  func.func @transform_4(%arg0: i32) -> (i32, i32) {
    %c0_i32 = arith.constant 0 : i32
    %c0_i32_0 = arith.constant 0 : i32
    %c0_i32_1 = arith.constant 0 : i32
    return %c0_i32, %c0_i32_0 : i32, i32
  }
  func.func @transform_5(%arg0: i32) -> (i32, i32) {
    %c0_i32 = arith.constant 0 : i32
    %c0_i32_0 = arith.constant 0 : i32
    %c0_i32_1 = arith.constant 0 : i32
    return %c0_i32, %c0_i32_0 : i32, i32
  }
  func.func @transform_6(%arg0: i32) -> (i32, i32) {
    %c0_i32 = arith.constant 0 : i32
    %c0_i32_0 = arith.constant 0 : i32
    %c0_i32_1 = arith.constant 0 : i32
    return %c0_i32, %c0_i32_0 : i32, i32
  }
  func.func @transform_7(%arg0: i32) -> (i32, i32) {
    %c0_i32 = arith.constant 0 : i32
    %c0_i32_0 = arith.constant 0 : i32
    %c0_i32_1 = arith.constant 0 : i32
    return %c0_i32, %c0_i32_0 : i32, i32
  }
  func.func @transform_8(%arg0: i32) -> (i32, i32) {
    %c0_i32 = arith.constant 0 : i32
    %c0_i32_0 = arith.constant 0 : i32
    %c0_i32_1 = arith.constant 0 : i32
    return %c0_i32, %c0_i32_0 : i32, i32
  }
  func.func @transform_9(%arg0: i32) -> (i32, i32) {
    %c0_i32 = arith.constant 0 : i32
    %c0_i32_0 = arith.constant 0 : i32
    %c0_i32_1 = arith.constant 0 : i32
    return %c0_i32, %c0_i32_0 : i32, i32
  }
  func.func @transform_10(%arg0: i32) -> (i32, i32) {
    %c0_i32 = arith.constant 0 : i32
    %c0_i32_0 = arith.constant 0 : i32
    %c0_i32_1 = arith.constant 0 : i32
    return %c0_i32, %c0_i32_0 : i32, i32
  }
  func.func @transform_11(%arg0: i32) -> (i32, i32) {
    %c0_i32 = arith.constant 0 : i32
    %c0_i32_0 = arith.constant 0 : i32
    return %arg0, %c0_i32 : i32, i32
  }
}

</mosaic_0001>

<bundles_post_ra>
// kernel: memento_classifier_forward.1
= control target key start
LH: loop header
LB: loop body
LE: loop exit
PB: predicated region body
PF: predicated region fallthrough
CT: control target
= control target key end

     0   :  { %16 = vsyncpa [#allocation3], 0  ;;  %s17435_s0 = inlined_call_operand.vmem [shape: bf16[16,2048], index: 0, kind: input, shape index: {}]   ;;  %s17436_s1 = inlined_call_operand.vmem [shape: bf16[16,768], index: 1, kind: input, shape index: {}]   ;;  %s17437_s2 = inlined_call_operand.hbm [shape: bf16[2048,1024], index: 2, kind: input, shape index: {}]   ;;  %s17438_s3 = inlined_call_operand.hbm [shape: bf16[768,1024], index: 3, kind: input, shape index: {}]   ;;  %s17439_s4 = inlined_call_operand.hbm [shape: f32[1,1024], index: 4, kind: input, shape index: {}]   ;;  %s17440_s5 = inlined_call_operand.hbm [shape: bf16[1024,512], index: 5, kind: input, shape index: {}]   ;;  %s17441_s6 = inlined_call_operand.hbm [shape: f32[1,512], index: 6, kind: input, shape index: {}]   ;;  %s17442_s7 = inlined_call_operand.hbm [shape: bf16[512,512], index: 7, kind: input, shape index: {}]   ;;  %s17443_s8 = inlined_call_operand.hbm [shape: f32[1,512], index: 8, kind: input, shape index: {}]   ;;  %s17444_s9 = inlined_call_operand.hbm [shape: bf16[512,128], index: 9, kind: input, shape index: {}]   ;;  %s17445_s10 = inlined_call_operand.hbm [shape: f32[1,128], index: 10, kind: input, shape index: {}]   ;;  %s17446_s11 = inlined_call_operand.vmem [shape: f32[16,128], index: 11, kind: output, shape index: {}]  }
   0x1   :  { %17 = vsyncpa [#allocation5], 0 }
   0x2   :  { %18 = vsyncpa [#allocation8], 0 }
   0x3   :  { %19 = vsyncpa [#allocation11], 0 }
   0x4   :  { %20 = vsyncpa [#allocation14], 0  ;;  %s16926_s17 = smov [#allocation4]   ;;  %s16927_s19 = smov [#allocation7]  }
   0x5   :  { %s42_s18 = sshll.u32 %s16926_s17, 4  ;;  %s64_s20 = sshll.u32 %s16927_s19, 4  ;;  %s43_s18 = int_to_ptr.vmem [resolvable:$true] %s42_s18  ;;  %s17001_s20 = int_to_ptr.vmem [resolvable:$true] %s64_s20 }
   0x6   :  { %s16718_s23 = scalar_lea.hbm %s17438_s3, 49152 }
   0x7   :  { %p16719_p0 = scmp.ne.s32.totalorder %s17438_s3, %s16718_s23  ;;  %p16722_p1 = scmp.lt.u32.totalorder %s16718_s23, %s17438_s3 }
   0x9   :  { %p16724_p2 = pnand %p16722_p1, %p16719_p0 }
   0xb   :  { %16727 = shalt.err (!%p16724_p2)
}
   0xc   :  { %s16728_s28 = scalar_lea.vmem %s43_s18, 49152  ;;  %p16733_p4 = scmp.lt.s32.totalorder %s43_s18, %s43_s18 }
   0xd   :  { %p16729_p3 = scmp.ne.s32.totalorder %s43_s18, %s16728_s28  ;;  %p16734_p5 = scmp.lt.s32.totalorder %s16728_s28, %s16728_s28 }
   0xf   :  { %p16735_p6 = por %p16734_p5, %p16733_p4 }
  0x11   :  { %p16736_p7 = pnand %p16735_p6, %p16729_p3 }
  0x13   :  { %16739 = shalt.err (!%p16736_p7)
}
  0x14   :  { %s16928_s29 = smov 512   ;;  %s16929_s30 = smov 32  }
  0x15   :  { %48 = dma.hbm_to_vmem [thread:$0]  %s17438_s3, 49152, %s43_s18, [#allocation5], %s16928_s29, %s16928_s29, %s16929_s30  }
  0x16   :  { %s16740_s16 = scalar_lea.hbm %s17440_s5, 32768 }
  0x17   :  { %p16741_p8 = scmp.ne.s32.totalorder %s17440_s5, %s16740_s16  ;;  %p16744_p9 = scmp.lt.u32.totalorder %s16740_s16, %s17440_s5 }
  0x19   :  { %p16746_p10 = pnand %p16744_p9, %p16741_p8 }
  0x1b   :  { %16749 = shalt.err (!%p16746_p10)
}
  0x1c   :  { %s16750_s23 = scalar_lea.vmem %s17001_s20, 32768  ;;  %p16755_p12 = scmp.lt.s32.totalorder %s17001_s20, %s17001_s20 }
  0x1d   :  { %p16751_p11 = scmp.ne.s32.totalorder %s17001_s20, %s16750_s23  ;;  %p16756_p13 = scmp.lt.s32.totalorder %s16750_s23, %s16750_s23 }
  0x1f   :  { %p16757_p0 = por %p16756_p13, %p16755_p12 }
  0x21   :  { %p16758_p1 = pnand %p16757_p0, %p16751_p11 }
  0x23   :  { %16761 = shalt.err (!%p16758_p1)
}
  0x24   :  { %s16930_s3 = smov 256   ;;  %s16931_s18 = smov 16  }
  0x25   :  { %70 = dma.hbm_to_vmem [thread:$0]  %s17440_s5, 32768, %s17001_s20, [#allocation8], %s16930_s3, %s16930_s3, %s16931_s18  }
  0x26   :  { %s16932_s26 = smov [#allocation10]   ;;  %s16933_s28 = smov [#allocation13]  }
  0x27   :  { %s86_s27 = sshll.u32 %s16932_s26, 4  ;;  %s108_s12 = sshll.u32 %s16933_s28, 4  ;;  %s87_s27 = int_to_ptr.vmem [resolvable:$true] %s86_s27  ;;  %s17035_s12 = int_to_ptr.vmem [resolvable:$true] %s108_s12 }
  0x28   :  { %s16762_s15 = scalar_lea.hbm %s17442_s7, 16384 }
  0x29   :  { %p16763_p2 = scmp.ne.s32.totalorder %s17442_s7, %s16762_s15  ;;  %p16766_p3 = scmp.lt.u32.totalorder %s16762_s15, %s17442_s7 }
  0x2b   :  { %p16768_p4 = pnand %p16766_p3, %p16763_p2 }
  0x2d   :  { %16771 = shalt.err (!%p16768_p4)
}
  0x2e   :  { %s16772_s5 = scalar_lea.vmem %s87_s27, 16384  ;;  %p16777_p6 = scmp.lt.s32.totalorder %s87_s27, %s87_s27 }
  0x2f   :  { %p16773_p5 = scmp.ne.s32.totalorder %s87_s27, %s16772_s5  ;;  %p16778_p7 = scmp.lt.s32.totalorder %s16772_s5, %s16772_s5 }
  0x31   :  { %p16779_p8 = por %p16778_p7, %p16777_p6 }
  0x33   :  { %p16780_p9 = pnand %p16779_p8, %p16773_p5 }
  0x35   :  { %16783 = shalt.err (!%p16780_p9)
}
  0x36   :  { %92 = dma.hbm_to_vmem [thread:$0]  %s17442_s7, 16384, %s87_s27, [#allocation11], %s16930_s3, %s16930_s3, %s16931_s18  }
  0x37   :  { %s16784_s25 = scalar_lea.hbm %s17444_s9, 4096 }
  0x38   :  { %p16785_p10 = scmp.ne.s32.totalorder %s17444_s9, %s16784_s25  ;;  %p16788_p11 = scmp.lt.u32.totalorder %s16784_s25, %s17444_s9 }
  0x3a   :  { %p16790_p12 = pnand %p16788_p11, %p16785_p10 }
  0x3c   :  { %16793 = shalt.err (!%p16790_p12)
}
  0x3d   :  { %s16794_s15 = scalar_lea.vmem %s17035_s12, 4096  ;;  %p16799_p0 = scmp.lt.s32.totalorder %s17035_s12, %s17035_s12 }
  0x3e   :  { %p16795_p13 = scmp.ne.s32.totalorder %s17035_s12, %s16794_s15  ;;  %p16800_p1 = scmp.lt.s32.totalorder %s16794_s15, %s16794_s15 }
  0x40   :  { %p16801_p2 = por %p16800_p1, %p16799_p0 }
  0x42   :  { %p16802_p3 = pnand %p16801_p2, %p16795_p13 }
  0x44   :  { %16805 = shalt.err (!%p16802_p3)
}
  0x45   :  { %s16934_s7 = smov 64   ;;  %s16935_s3 = smov 4  }
  0x46   :  { %114 = dma.hbm_to_vmem [thread:$0]  %s17444_s9, 4096, %s17035_s12, [#allocation14], %s16934_s7, %s16934_s7, %s16935_s3  }
  0x47   :  { %s16936_s16 = smov [#allocation2]   ;;  %s16937_s19 = smov [#allocation6]  }
  0x48   :  { %s30_s17 = sshll.u32 %s16936_s16, 4  ;;  %s55_s21 = sshll.u32 %s16937_s19, 4  ;;  %s31_s17 = int_to_ptr.vmem [resolvable:$true] %s30_s17  ;;  %s56_s21 = int_to_ptr.vmem [resolvable:$true] %s55_s21 }
  0x49   :  { %s16806_s22 = scalar_lea.hbm %s17437_s2, 131072 }
  0x4a   :  { %p16807_p4 = scmp.ne.s32.totalorder %s17437_s2, %s16806_s22  ;;  %p16810_p5 = scmp.lt.u32.totalorder %s16806_s22, %s17437_s2 }
  0x4c   :  { %p16812_p6 = pnand %p16810_p5, %p16807_p4 }
  0x4e   :  { %16815 = shalt.err (!%p16812_p6)
}
  0x4f   :  { %s16816_s9 = scalar_lea.vmem %s31_s17, 131072  ;;  %p16821_p8 = scmp.lt.s32.totalorder %s31_s17, %s31_s17 }
  0x50   :  { %p16817_p7 = scmp.ne.s32.totalorder %s31_s17, %s16816_s9  ;;  %p16822_p9 = scmp.lt.s32.totalorder %s16816_s9, %s16816_s9 }
  0x52   :  { %p16823_p10 = por %p16822_p9, %p16821_p8 }
  0x54   :  { %p16824_p11 = pnand %p16823_p10, %p16817_p7 }
  0x56   :  { %16827 = shalt.err (!%p16824_p11)
}
  0x57   :  { %36 = dma.hbm_to_vmem [thread:$0]  %s17437_s2, 131072, %s31_s17, [#allocation3], %s16928_s29, %s16928_s29, %s16929_s30  }
  0x58   :  { %s16828_s15 = scalar_lea.hbm %s17439_s4, 128 }
  0x59   :  { %p16829_p12 = scmp.ne.s32.totalorder %s17439_s4, %s16828_s15  ;;  %p16832_p13 = scmp.lt.u32.totalorder %s16828_s15, %s17439_s4 }
  0x5b   :  { %p16834_p0 = pnand %p16832_p13, %p16829_p12 }
  0x5d   :  { %16837 = shalt.err (!%p16834_p0)
}
  0x5e   :  { %s16838_s16 = scalar_lea.vmem %s56_s21, 128  ;;  %p16843_p2 = scmp.lt.s32.totalorder %s56_s21, %s56_s21 }
  0x5f   :  { %p16839_p1 = scmp.ne.s32.totalorder %s56_s21, %s16838_s16  ;;  %p16844_p3 = scmp.lt.s32.totalorder %s16838_s16, %s16838_s16 }
  0x61   :  { %p16845_p4 = por %p16844_p3, %p16843_p2 }
  0x63   :  { %p16846_p5 = pnand %p16845_p4, %p16839_p1 }
  0x65   :  { %16849 = shalt.err (!%p16846_p5)
}
  0x66   :  { %58 = dma.hbm_to_vmem [thread:$0]  %s17439_s4, 128, %s56_s21, [#allocation5]  }
  0x67   :  { %s16938_s30 = smov [#allocation9]   ;;  %s16939_s19 = smov [#allocation12]  }
  0x68   :  { %s77_s17 = sshll.u32 %s16938_s30, 4  ;;  %s99_s5 = sshll.u32 %s16939_s19, 4  ;;  %s78_s17 = int_to_ptr.vmem [resolvable:$true] %s77_s17  ;;  %s100_s5 = int_to_ptr.vmem [resolvable:$true] %s99_s5 }
  0x69   :  { %s16850_s23 = scalar_lea.hbm %s17441_s6, 64 }
  0x6a   :  { %p16851_p6 = scmp.ne.s32.totalorder %s17441_s6, %s16850_s23  ;;  %p16854_p7 = scmp.lt.u32.totalorder %s16850_s23, %s17441_s6 }
  0x6c   :  { %p16856_p8 = pnand %p16854_p7, %p16851_p6 }
  0x6e   :  { %16859 = shalt.err (!%p16856_p8)
}
  0x6f   :  { %s16860_s4 = scalar_lea.vmem %s78_s17, 64  ;;  %p16865_p10 = scmp.lt.s32.totalorder %s78_s17, %s78_s17 }
  0x70   :  { %p16861_p9 = scmp.ne.s32.totalorder %s78_s17, %s16860_s4  ;;  %p16866_p11 = scmp.lt.s32.totalorder %s16860_s4, %s16860_s4 }
  0x72   :  { %p16867_p12 = por %p16866_p11, %p16865_p10 }
  0x74   :  { %p16868_p13 = pnand %p16867_p12, %p16861_p9 }
  0x76   :  { %16871 = shalt.err (!%p16868_p13)
}
  0x77   :  { %80 = dma.hbm_to_vmem [thread:$0]  %s17441_s6, 64, %s78_s17, [#allocation8]  }
  0x78   :  { %s16872_s14 = scalar_lea.hbm %s17443_s8, 64 }
  0x79   :  { %p16873_p0 = scmp.ne.s32.totalorder %s17443_s8, %s16872_s14  ;;  %p16876_p1 = scmp.lt.u32.totalorder %s16872_s14, %s17443_s8 }
  0x7b   :  { %p16878_p2 = pnand %p16876_p1, %p16873_p0 }
  0x7d   :  { %16881 = shalt.err (!%p16878_p2)
}
  0x7e   :  { %s16882_s27 = scalar_lea.vmem %s100_s5, 64  ;;  %p16887_p4 = scmp.lt.s32.totalorder %s100_s5, %s100_s5 }
  0x7f   :  { %p16883_p3 = scmp.ne.s32.totalorder %s100_s5, %s16882_s27  ;;  %p16888_p5 = scmp.lt.s32.totalorder %s16882_s27, %s16882_s27 }
  0x81   :  { %p16889_p6 = por %p16888_p5, %p16887_p4 }
  0x83   :  { %p16890_p7 = pnand %p16889_p6, %p16883_p3 }
  0x85   :  { %16893 = shalt.err (!%p16890_p7)
}
  0x86   :  { %102 = dma.hbm_to_vmem [thread:$0]  %s17443_s8, 64, %s100_s5, [#allocation11]  }
  0x87   :  { %s16940_s2 = smov [#allocation15]   ;;  %s16894_s19 = scalar_lea.hbm %s17445_s10, 16 }
  0x88   :  { %s121_s29 = sshll.u32 %s16940_s2, 4  ;;  %p16895_p8 = scmp.ne.s32.totalorder %s17445_s10, %s16894_s19  ;;  %s122_s29 = int_to_ptr.vmem [resolvable:$true] %s121_s29 }
  0x89   :  { %p16898_p9 = scmp.lt.u32.totalorder %s16894_s19, %s17445_s10 }
  0x8b   :  { %p16900_p10 = pnand %p16898_p9, %p16895_p8 }
  0x8d   :  { %16903 = shalt.err (!%p16900_p10)
}
  0x8e   :  { %s16904_s25 = scalar_lea.vmem %s122_s29, 16  ;;  %s16908_s8 = scalar_lea.vmem %s122_s29, 32 }
  0x8f   :  { %p16905_p11 = scmp.ne.s32.totalorder %s122_s29, %s16904_s25  ;;  %p16909_p12 = scmp.lt.s32.totalorder %s122_s29, %s122_s29 }
  0x90   :  { %p16910_p13 = scmp.lt.s32.totalorder %s16908_s8, %s16904_s25 }
  0x92   :  { %p16911_p0 = por %p16910_p13, %p16909_p12 }
  0x94   :  { %p16912_p1 = pnand %p16911_p0, %p16905_p11 }
  0x96   :  { %16915 = shalt.err (!%p16912_p1)
}
  0x97   :  { %124 = dma.hbm_to_vmem [thread:$0]  %s17445_s10, 16, %s122_s29, [#allocation14]  }
  0x98   :  { %16916 = dma.done.wait [#allocation3], 131072  }
  0x99   :  { %16917 = vsyncadd [#allocation3], 4294836224 }
  0x9a   :  { %16918 = dma.done.wait [#allocation5], 49280  }
  0x9b   :  { %16919 = vsyncadd [#allocation5], 4294918016 }
  0x9c   :  { %16920 = dma.done.wait [#allocation8], 32832  }
  0x9d   :  { %16921 = vsyncadd [#allocation8], 4294934464 }
  0x9e   :  { %16922 = dma.done.wait [#allocation11], 16448  }
  0x9f   :  { %16923 = vsyncadd [#allocation11], 4294950848 }
  0xa0   :  { %16924 = dma.done.wait [#allocation14], 4112  }
  0xa1   :  { %16925 = vsyncadd [#allocation14], 4294963184  ;;  %v1199_v0 = vld [vmem:[#allocation4] sm:$0xff]  ;;  %v1200_v2 = vld [vmem:[#allocation4 + $0x8] sm:$0xff] }
  0xa2   :  { %v1203_v1 = vld [vmem:[#allocation4 + $0x20] sm:$0xff]  ;;  %v1204_v4 = vld [vmem:[#allocation4 + $0x28] sm:$0xff] }
  0xa3   :  { %v13977_v3 = vcombine.high %v1199_v0, %v1203_v1  ;;  %v13976_v5 = vcombine.low %v1199_v0, %v1203_v1  ;;  %v1207_v6 = vld [vmem:[#allocation4 + $0x40] sm:$0xff]  ;;  %v13979_v8 = vcombine.high %v1200_v2, %v1204_v4  ;;  %v13978_v9 = vcombine.low %v1200_v2, %v1204_v4  ;;  %v1208_v11 = vld [vmem:[#allocation4 + $0x48] sm:$0xff] }
  0xa4   :  { %v1211_v7 = vld [vmem:[#allocation4 + $0x60] sm:$0xff]  ;;  %v1212_v12 = vld [vmem:[#allocation4 + $0x68] sm:$0xff] }
  0xa5   :  { %v13985_v10 = vcombine.high %v1207_v6, %v1211_v7  ;;  %v1215_v13 = vld [vmem:[#allocation4 + $0x80] sm:$0xff]  ;;  %3533 = vmatprep.subr.bf16.mxu0 %v13977_v3  ;;  %v13987_v14 = vcombine.high %v1208_v11, %v1212_v12  ;;  %v1216_v16 = vld [vmem:[#allocation4 + $0x88] sm:$0xff]  ;;  %3662 = vmatprep.subr.bf16.mxu1 %v13979_v8  ;;  %v13984_v18 = vcombine.low %v1207_v6, %v1211_v7 }
  0xa6   :  { %v1219_v15 = vld [vmem:[#allocation4 + $0xa0] sm:$0xff]  ;;  %v1220_v17 = vld [vmem:[#allocation4 + $0xa8] sm:$0xff]  ;;  %3534 = vmatpush1.bf16.msra.mxu0 %v13976_v5  ;;  %3663 = vmatpush1.bf16.msra.mxu1 %v13978_v9  ;;  %v13986_v19 = vcombine.low %v1208_v11, %v1212_v12 }
  0xa7   :  { %3535 = vmatprep.subr.bf16.mxu0 %v13985_v10  ;;  %v13993_v20 = vcombine.high %v1215_v13, %v1219_v15  ;;  %3664 = vmatprep.subr.bf16.mxu1 %v13987_v14  ;;  %v13995_v21 = vcombine.high %v1216_v16, %v1220_v17  ;;  %v1223_v22 = vld [vmem:[#allocation4 + $0xc0] sm:$0xff]  ;;  %v1224_v24 = vld [vmem:[#allocation4 + $0xc8] sm:$0xff]  ;;  %v13992_v26 = vcombine.low %v1215_v13, %v1219_v15 }
  0xa8   :  { %v1227_v23 = vld [vmem:[#allocation4 + $0xe0] sm:$0xff]  ;;  %v1228_v25 = vld [vmem:[#allocation4 + $0xe8] sm:$0xff]  ;;  %v13994_v27 = vcombine.low %v1216_v16, %v1220_v17 }
  0xa9   :  { %v14001_v28 = vcombine.high %v1223_v22, %v1227_v23  ;;  %v14003_v29 = vcombine.high %v1224_v24, %v1228_v25  ;;  %v1231_v30 = vld [vmem:[#allocation4 + $0x100] sm:$0xff]  ;;  %v1232_v32 = vld [vmem:[#allocation4 + $0x108] sm:$0xff]  ;;  %v14000_v34 = vcombine.low %v1223_v22, %v1227_v23  ;;  %v14002_v35 = vcombine.low %v1224_v24, %v1228_v25 }
  0xaa   :  { %3536 = vmatpush1.bf16.msra.mxu0 %v13984_v18  ;;  %3665 = vmatpush1.bf16.msra.mxu1 %v13986_v19  ;;  %v1235_v31 = vld [vmem:[#allocation4 + $0x120] sm:$0xff]  ;;  %v1236_v33 = vld [vmem:[#allocation4 + $0x128] sm:$0xff] }
  0xab   :  { %3537 = vmatprep.subr.bf16.mxu0 %v13993_v20  ;;  %3666 = vmatprep.subr.bf16.mxu1 %v13995_v21  ;;  %v14009_v36 = vcombine.high %v1231_v30, %v1235_v31  ;;  %v14011_v37 = vcombine.high %v1232_v32, %v1236_v33  ;;  %v1239_v38 = vld [vmem:[#allocation4 + $0x140] sm:$0xff]  ;;  %v1240_v40 = vld [vmem:[#allocation4 + $0x148] sm:$0xff]  ;;  %v14008_v42 = vcombine.low %v1231_v30, %v1235_v31 }
  0xac   :  { %v1243_v39 = vld [vmem:[#allocation4 + $0x160] sm:$0xff]  ;;  %v1244_v41 = vld [vmem:[#allocation4 + $0x168] sm:$0xff]  ;;  %v14010_v43 = vcombine.low %v1232_v32, %v1236_v33 }
  0xad   :  { %v14017_v44 = vcombine.high %v1239_v38, %v1243_v39  ;;  %v14019_v45 = vcombine.high %v1240_v40, %v1244_v41  ;;  %v1247_v46 = vld [vmem:[#allocation4 + $0x180] sm:$0xff]  ;;  %v1248_v48 = vld [vmem:[#allocation4 + $0x188] sm:$0xff]  ;;  %v14016_v50 = vcombine.low %v1239_v38, %v1243_v39  ;;  %v14018_v51 = vcombine.low %v1240_v40, %v1244_v41 }
  0xae   :  { %3538 = vmatpush1.bf16.msra.mxu0 %v13992_v26  ;;  %3667 = vmatpush1.bf16.msra.mxu1 %v13994_v27  ;;  %v1251_v47 = vld [vmem:[#allocation4 + $0x1a0] sm:$0xff]  ;;  %v1252_v49 = vld [vmem:[#allocation4 + $0x1a8] sm:$0xff] }
  0xaf   :  { %3539 = vmatprep.subr.bf16.mxu0 %v14001_v28  ;;  %3668 = vmatprep.subr.bf16.mxu1 %v14003_v29  ;;  %v14025_v52 = vcombine.high %v1247_v46, %v1251_v47  ;;  %v14027_v53 = vcombine.high %v1248_v48, %v1252_v49  ;;  %v1255_v54 = vld [vmem:[#allocation4 + $0x1c0] sm:$0xff]  ;;  %v1256_v57 = vld [vmem:[#allocation4 + $0x1c8] sm:$0xff]  ;;  %v14024_v59 = vcombine.low %v1247_v46, %v1251_v47 }
  0xb0   :  { %v1259_v55 = vld [vmem:[#allocation4 + $0x1e0] sm:$0xff]  ;;  %v1260_v58 = vld [vmem:[#allocation4 + $0x1e8] sm:$0xff]  ;;  %v14026_v60 = vcombine.low %v1248_v48, %v1252_v49 }
  0xb1   :  { %v16086_v56 = vld [vmem:[%s17436_s1 + $0x4] ss:$24 sps:$4 sm:$0xff]   ;;  %v14033_v61 = vcombine.high %v1255_v54, %v1259_v55  ;;  %v14035_v62 = vcombine.high %v1256_v57, %v1260_v58  ;;  %v1264_v1 = vld [vmem:[#allocation4 + $0x208] sm:$0xff]  ;;  %v14032_v3 = vcombine.low %v1255_v54, %v1259_v55  ;;  %v14034_v4 = vcombine.low %v1256_v57, %v1260_v58 }
  0xb2   :  { %3540 = vmatpush1.bf16.msra.mxu0 %v14000_v34  ;;  %3669 = vmatpush1.bf16.msra.mxu1 %v14002_v35  ;;  %v1263_v63 = vld [vmem:[#allocation4 + $0x200] sm:$0xff]  ;;  %v1268_v2 = vld [vmem:[#allocation4 + $0x228] sm:$0xff] }
  0xb3   :  { %3541 = vmatprep.subr.bf16.mxu0 %v14009_v36  ;;  %3670 = vmatprep.subr.bf16.mxu1 %v14011_v37  ;;  %v1267_v0 = vld [vmem:[#allocation4 + $0x220] sm:$0xff]  ;;  %v14043_v6 = vcombine.high %v1264_v1, %v1268_v2  ;;  %v1272_v9 = vld [vmem:[#allocation4 + $0x248] sm:$0xff]  ;;  %v14042_v12 = vcombine.low %v1264_v1, %v1268_v2 }
  0xb4   :  { %3565 = vmatprep.mubr.bf16.mxu0 %v16086_v56  ;;  %3694 = vmatprep.mubr.bf16.mxu1 %v16086_v56  ;;  %v14041_v5 = vcombine.high %v1263_v63, %v1267_v0  ;;  %v1271_v7 = vld [vmem:[#allocation4 + $0x240] sm:$0xff]  ;;  %v1276_v10 = vld [vmem:[#allocation4 + $0x268] sm:$0xff]  ;;  %v14040_v11 = vcombine.low %v1263_v63, %v1267_v0 }
  0xb5   :  { %v1275_v8 = vld [vmem:[#allocation4 + $0x260] sm:$0xff]  ;;  %v14051_v14 = vcombine.high %v1272_v9, %v1276_v10  ;;  %v1280_v17 = vld [vmem:[#allocation4 + $0x288] sm:$0xff]  ;;  %v14050_v20 = vcombine.low %v1272_v9, %v1276_v10 }
  0xb6   :  { %3542 = vmatpush1.bf16.msra.mxu0 %v14008_v42  ;;  %3671 = vmatpush1.bf16.msra.mxu1 %v14010_v43  ;;  %v14049_v13 = vcombine.high %v1271_v7, %v1275_v8  ;;  %v1279_v15 = vld [vmem:[#allocation4 + $0x280] sm:$0xff]  ;;  %v1284_v18 = vld [vmem:[#allocation4 + $0x2a8] sm:$0xff]  ;;  %v14048_v19 = vcombine.low %v1271_v7, %v1275_v8 }
  0xb7   :  { %3543 = vmatprep.subr.bf16.mxu0 %v14017_v44  ;;  %3672 = vmatprep.subr.bf16.mxu1 %v14019_v45  ;;  %v1283_v16 = vld [vmem:[#allocation4 + $0x2a0] sm:$0xff]  ;;  %v14059_v22 = vcombine.high %v1280_v17, %v1284_v18  ;;  %v1288_v25 = vld [vmem:[#allocation4 + $0x2c8] sm:$0xff]  ;;  %v14058_v28 = vcombine.low %v1280_v17, %v1284_v18 }
  0xb8   :  { %v14057_v21 = vcombine.high %v1279_v15, %v1283_v16  ;;  %v1287_v23 = vld [vmem:[#allocation4 + $0x2c0] sm:$0xff]  ;;  %v1292_v26 = vld [vmem:[#allocation4 + $0x2e8] sm:$0xff]  ;;  %v14056_v27 = vcombine.low %v1279_v15, %v1283_v16 }
  0xb9   :  { %v1291_v24 = vld [vmem:[#allocation4 + $0x2e0] sm:$0xff]  ;;  %v14067_v30 = vcombine.high %v1288_v25, %v1292_v26  ;;  %v1296_v33 = vld [vmem:[#allocation4 + $0x308] sm:$0xff]  ;;  %v14066_v36 = vcombine.low %v1288_v25, %v1292_v26 }
  0xba   :  { %3544 = vmatpush1.bf16.msra.mxu0 %v14016_v50  ;;  %3673 = vmatpush1.bf16.msra.mxu1 %v14018_v51  ;;  %v14065_v29 = vcombine.high %v1287_v23, %v1291_v24  ;;  %v1295_v31 = vld [vmem:[#allocation4 + $0x300] sm:$0xff]  ;;  %v1300_v34 = vld [vmem:[#allocation4 + $0x328] sm:$0xff]  ;;  %v14064_v35 = vcombine.low %v1287_v23, %v1291_v24 }
  0xbb   :  { %3545 = vmatprep.subr.bf16.mxu0 %v14025_v52  ;;  %3674 = vmatprep.subr.bf16.mxu1 %v14027_v53  ;;  %v1299_v32 = vld [vmem:[#allocation4 + $0x320] sm:$0xff]  ;;  %v14075_v38 = vcombine.high %v1296_v33, %v1300_v34  ;;  %v1304_v41 = vld [vmem:[#allocation4 + $0x348] sm:$0xff]  ;;  %v14074_v44 = vcombine.low %v1296_v33, %v1300_v34 }
  0xbc   :  { %v14073_v37 = vcombine.high %v1295_v31, %v1299_v32  ;;  %v1303_v39 = vld [vmem:[#allocation4 + $0x340] sm:$0xff]  ;;  %v1308_v42 = vld [vmem:[#allocation4 + $0x368] sm:$0xff]  ;;  %v14072_v43 = vcombine.low %v1295_v31, %v1299_v32 }
  0xbd   :  { %v1307_v40 = vld [vmem:[#allocation4 + $0x360] sm:$0xff]  ;;  %v14083_v46 = vcombine.high %v1304_v41, %v1308_v42  ;;  %v1312_v49 = vld [vmem:[#allocation4 + $0x388] sm:$0xff]  ;;  %v14082_v52 = vcombine.low %v1304_v41, %v1308_v42 }
  0xbe   :  { %3546 = vmatpush1.bf16.msra.mxu0 %v14024_v59  ;;  %3675 = vmatpush1.bf16.msra.mxu1 %v14026_v60  ;;  %v14081_v45 = vcombine.high %v1303_v39, %v1307_v40  ;;  %v1311_v47 = vld [vmem:[#allocation4 + $0x380] sm:$0xff]  ;;  %v1316_v50 = vld [vmem:[#allocation4 + $0x3a8] sm:$0xff]  ;;  %v14080_v51 = vcombine.low %v1303_v39, %v1307_v40 }
  0xbf   :  { %3547 = vmatprep.subr.bf16.mxu0 %v14033_v61  ;;  %3676 = vmatprep.subr.bf16.mxu1 %v14035_v62  ;;  %v1315_v48 = vld [vmem:[#allocation4 + $0x3a0] sm:$0xff]  ;;  %v14091_v54 = vcombine.high %v1312_v49, %v1316_v50  ;;  %v1320_v57 = vld [vmem:[#allocation4 + $0x3c8] sm:$0xff]  ;;  %v14090_v60 = vcombine.low %v1312_v49, %v1316_v50 }
  0xc0   :  { %v14089_v53 = vcombine.high %v1311_v47, %v1315_v48  ;;  %v1319_v55 = vld [vmem:[#allocation4 + $0x3c0] sm:$0xff]  ;;  %v1324_v58 = vld [vmem:[#allocation4 + $0x3e8] sm:$0xff]  ;;  %v14088_v59 = vcombine.low %v1311_v47, %v1315_v48 }
  0xc1   :  { %v1323_v56 = vld [vmem:[#allocation4 + $0x3e0] sm:$0xff]  ;;  %v14099_v62 = vcombine.high %v1320_v57, %v1324_v58  ;;  %v1328_v1 = vld [vmem:[#allocation4 + $0x408] sm:$0xff] }
  0xc2   :  { %3548 = vmatpush1.bf16.msra.mxu0 %v14032_v3  ;;  %3677 = vmatpush1.bf16.msra.mxu1 %v14034_v4  ;;  %v14097_v61 = vcombine.high %v1319_v55, %v1323_v56  ;;  %v1327_v63 = vld [vmem:[#allocation4 + $0x400] sm:$0xff]  ;;  %v1332_v2 = vld [vmem:[#allocation4 + $0x428] sm:$0xff]  ;;  %v14096_v3 = vcombine.low %v1319_v55, %v1323_v56  ;;  %v14098_v4 = vcombine.low %v1320_v57, %v1324_v58 }
  0xc3   :  { %3549 = vmatprep.subr.bf16.mxu0 %v14041_v5  ;;  %3678 = vmatprep.subr.bf16.mxu1 %v14043_v6  ;;  %v1331_v0 = vld [vmem:[#allocation4 + $0x420] sm:$0xff]  ;;  %v14107_v6 = vcombine.high %v1328_v1, %v1332_v2  ;;  %v1336_v10 = vld [vmem:[#allocation4 + $0x448] sm:$0xff] }
  0xc4   :  { %v14105_v5 = vcombine.high %v1327_v63, %v1331_v0  ;;  %v1335_v7 = vld [vmem:[#allocation4 + $0x440] sm:$0xff]  ;;  %v1360_v34 = vld [vmem:[#allocation4 + $0x508] sm:$0xff] }
  0xc5   :  { %v1339_v8 = vld [vmem:[#allocation4 + $0x460] sm:$0xff]  ;;  %v1368_v42 = vld [vmem:[#allocation4 + $0x548] sm:$0xff] }
  0xc6   :  { %3550 = vmatpush1.bf16.msra.mxu0 %v14040_v11  ;;  %3679 = vmatpush1.bf16.msra.mxu1 %v14042_v12  ;;  %v16088_v9 = vld [vmem:[%s17436_s1] ss:$24 sps:$4 sm:$0xff]   ;;  %v1340_v11 = vld [vmem:[#allocation4 + $0x468] sm:$0xff]  ;;  %v14104_v12 = vcombine.low %v1327_v63, %v1331_v0 }
  0xc7   :  { %3551 = vmatprep.subr.bf16.mxu0 %v14049_v13  ;;  %3680 = vmatprep.subr.bf16.mxu1 %v14051_v14  ;;  %v14106_v13 = vcombine.low %v1328_v1, %v1332_v2  ;;  %v14113_v14 = vcombine.high %v1335_v7, %v1339_v8  ;;  %v1343_v15 = vld [vmem:[#allocation4 + $0x480] sm:$0xff]  ;;  %v14115_v16 = vcombine.high %v1336_v10, %v1340_v11  ;;  %v1376_v50 = vld [vmem:[#allocation4 + $0x588] sm:$0xff] }
  0xc8   :  { %v1347_v17 = vld [vmem:[#allocation4 + $0x4a0] sm:$0xff]  ;;  %v1384_v58 = vld [vmem:[#allocation4 + $0x5c8] sm:$0xff] }
  0xc9   :  { %v16089_v18 = vld [vmem:[%s17436_s1 + $0xc] ss:$24 sps:$4 sm:$0xff]   ;;  %v14121_v23 = vcombine.high %v1343_v15, %v1347_v17 }
  0xca   :  { %3552 = vmatpush1.bf16.msra.mxu0 %v14048_v19  ;;  %3681 = vmatpush1.bf16.msra.mxu1 %v14050_v20  ;;  %v1344_v19 = vld [vmem:[#allocation4 + $0x488] sm:$0xff]  ;;  %v1351_v24 = vld [vmem:[#allocation4 + $0x4c0] sm:$0xff] }
  0xcb   :  { %3553 = vmatprep.subr.bf16.mxu0 %v14057_v21  ;;  %3682 = vmatprep.subr.bf16.mxu1 %v14059_v22  ;;  %v1348_v20 = vld [vmem:[#allocation4 + $0x4a8] sm:$0xff]  ;;  %v14112_v21 = vcombine.low %v1335_v7, %v1339_v8  ;;  %v14114_v22 = vcombine.low %v1336_v10, %v1340_v11  ;;  %v1355_v25 = vld [vmem:[#allocation4 + $0x4e0] sm:$0xff] }
  0xcc   :  { %v14123_v26 = vcombine.high %v1344_v19, %v1348_v20  ;;  %v14129_v31 = vcombine.high %v1351_v24, %v1355_v25  ;;  %v1359_v32 = vld [vmem:[#allocation4 + $0x500] sm:$0xff]  ;;  %v1392_v2 = vld [vmem:[#allocation4 + $0x608] sm:$0xff] }
  0xcd   :  { %v1363_v33 = vld [vmem:[#allocation4 + $0x520] sm:$0xff]  ;;  %v1400_v10 = vld [vmem:[#allocation4 + $0x648] sm:$0xff] }
  0xce   :  { %3554 = vmatpush1.bf16.msra.mxu0 %v14056_v27  ;;  %3683 = vmatpush1.bf16.msra.mxu1 %v14058_v28  ;;  %v1352_v27 = vld [vmem:[#allocation4 + $0x4c8] sm:$0xff]  ;;  %v14137_v39 = vcombine.high %v1359_v32, %v1363_v33  ;;  %v1367_v40 = vld [vmem:[#allocation4 + $0x540] sm:$0xff] }
  0xcf   :  { %3555 = vmatprep.subr.bf16.mxu0 %v14065_v29  ;;  %3684 = vmatprep.subr.bf16.mxu1 %v14067_v30  ;;  %v1356_v28 = vld [vmem:[#allocation4 + $0x4e8] sm:$0xff]  ;;  %v14120_v29 = vcombine.low %v1343_v15, %v1347_v17  ;;  %v14122_v30 = vcombine.low %v1344_v19, %v1348_v20  ;;  %v1371_v41 = vld [vmem:[#allocation4 + $0x560] sm:$0xff] }
  0xd0   :  { %v14145_v47 = vcombine.high %v1367_v40, %v1371_v41  ;;  %v1375_v48 = vld [vmem:[#allocation4 + $0x580] sm:$0xff]  ;;  %v1412_v20 = vld [vmem:[#allocation4 + $0x6a8] sm:$0xff] }
  0xd1   :  { %v1379_v49 = vld [vmem:[#allocation4 + $0x5a0] sm:$0xff] }
  0xd2   :  { %3556 = vmatpush1.bf16.msra.mxu0 %v14064_v35  ;;  %3685 = vmatpush1.bf16.msra.mxu1 %v14066_v36  ;;  %v14131_v35 = vcombine.high %v1352_v27, %v1356_v28  ;;  %v1364_v36 = vld [vmem:[#allocation4 + $0x528] sm:$0xff]  ;;  %v14153_v55 = vcombine.high %v1375_v48, %v1379_v49  ;;  %v1383_v56 = vld [vmem:[#allocation4 + $0x5c0] sm:$0xff] }
  0xd3   :  { %3557 = vmatprep.subr.bf16.mxu0 %v14073_v37  ;;  %3686 = vmatprep.subr.bf16.mxu1 %v14075_v38  ;;  %v14128_v37 = vcombine.low %v1351_v24, %v1355_v25  ;;  %v14130_v38 = vcombine.low %v1352_v27, %v1356_v28  ;;  %v1387_v57 = vld [vmem:[#allocation4 + $0x5e0] sm:$0xff]  ;;  %v1420_v28 = vld [vmem:[#allocation4 + $0x6e8] sm:$0xff] }
  0xd4   :  { %v14161_v63 = vcombine.high %v1383_v56, %v1387_v57  ;;  %v1391_v0 = vld [vmem:[#allocation4 + $0x600] sm:$0xff] }
  0xd5   :  { %v1395_v1 = vld [vmem:[#allocation4 + $0x620] sm:$0xff] }
  0xd6   :  { %3558 = vmatpush1.bf16.msra.mxu0 %v14072_v43  ;;  %3687 = vmatpush1.bf16.msra.mxu1 %v14074_v44  ;;  %v14139_v43 = vcombine.high %v1360_v34, %v1364_v36  ;;  %v1372_v44 = vld [vmem:[#allocation4 + $0x568] sm:$0xff]  ;;  %v14169_v7 = vcombine.high %v1391_v0, %v1395_v1  ;;  %v1399_v8 = vld [vmem:[#allocation4 + $0x640] sm:$0xff] }
  0xd7   :  { %3559 = vmatprep.subr.bf16.mxu0 %v14081_v45  ;;  %3688 = vmatprep.subr.bf16.mxu1 %v14083_v46  ;;  %v14136_v45 = vcombine.low %v1359_v32, %v1363_v33  ;;  %v14138_v46 = vcombine.low %v1360_v34, %v1364_v36  ;;  %v1411_v17 = vld [vmem:[#allocation4 + $0x6a0] sm:$0xff]  ;;  %v1424_v34 = vld [vmem:[#allocation4 + $0x708] sm:$0xff] }
  0xd8   :  { %v1415_v24 = vld [vmem:[#allocation4 + $0x6c0] sm:$0xff]  ;;  %v1428_v36 = vld [vmem:[#allocation4 + $0x728] sm:$0xff] }
  0xd9   :  { %v1419_v25 = vld [vmem:[#allocation4 + $0x6e0] sm:$0xff] }
  0xda   :  { %3560 = vmatpush1.bf16.msra.mxu0 %v14080_v51  ;;  %3689 = vmatpush1.bf16.msra.mxu1 %v14082_v52  ;;  %v14147_v51 = vcombine.high %v1368_v42, %v1372_v44  ;;  %v1380_v52 = vld [vmem:[#allocation4 + $0x5a8] sm:$0xff]  ;;  %v1423_v32 = vld [vmem:[#allocation4 + $0x700] sm:$0xff] }
  0xdb   :  { %3561 = vmatprep.subr.bf16.mxu0 %v14089_v53  ;;  %3690 = vmatprep.subr.bf16.mxu1 %v14091_v54  ;;  %v14144_v53 = vcombine.low %v1367_v40, %v1371_v41  ;;  %v14146_v54 = vcombine.low %v1368_v42, %v1372_v44  ;;  %v1427_v33 = vld [vmem:[#allocation4 + $0x720] sm:$0xff]  ;;  %v1432_v42 = vld [vmem:[#allocation4 + $0x748] sm:$0xff] }
  0xdc   :  { %v1431_v40 = vld [vmem:[#allocation4 + $0x740] sm:$0xff]  ;;  %v1436_v44 = vld [vmem:[#allocation4 + $0x768] sm:$0xff] }
  0xdd   :  { %v1435_v41 = vld [vmem:[#allocation4 + $0x760] sm:$0xff] }
  0xde   :  { %3562 = vmatpush1.bf16.msra.mxu0 %v14088_v59  ;;  %3691 = vmatpush1.bf16.msra.mxu1 %v14090_v60  ;;  %v14155_v59 = vcombine.high %v1376_v50, %v1380_v52  ;;  %v1388_v60 = vld [vmem:[#allocation4 + $0x5e8] sm:$0xff] }
  0xdf   :  { %3563 = vmatprep.subr.bf16.mxu0 %v14097_v61  ;;  %3692 = vmatprep.subr.bf16.mxu1 %v14099_v62  ;;  %v14152_v61 = vcombine.low %v1375_v48, %v1379_v49  ;;  %v14154_v62 = vcombine.low %v1376_v50, %v1380_v52  ;;  %v1439_v48 = vld [vmem:[#allocation4 + $0x780] sm:$0xff]  ;;  %v1440_v50 = vld [vmem:[#allocation4 + $0x788] sm:$0xff] }
  0xe0   :  { %v1443_v49 = vld [vmem:[#allocation4 + $0x7a0] sm:$0xff]  ;;  %v1444_v52 = vld [vmem:[#allocation4 + $0x7a8] sm:$0xff] }
  0xe2   :  { %3564 = vmatpush1.bf16.msra.mxu0 %v14096_v3  ;;  %3693 = vmatpush1.bf16.msra.mxu1 %v14098_v4  ;;  %v14163_v3 = vcombine.high %v1384_v58, %v1388_v60  ;;  %v1396_v4 = vld [vmem:[#allocation4 + $0x628] sm:$0xff] }
  0xe3   :  { %3576 = vmatprep.subr.bf16.mxu0 %v14105_v5  ;;  %3705 = vmatprep.subr.bf16.mxu1 %v14107_v6  ;;  %v14160_v5 = vcombine.low %v1383_v56, %v1387_v57  ;;  %v14162_v6 = vcombine.low %v1384_v58, %v1388_v60  ;;  %v14171_v11 = vcombine.high %v1392_v2, %v1396_v4  ;;  %v1447_v56 = vld [vmem:[#allocation4 + $0x7c0] sm:$0xff]  ;;  %v1448_v58 = vld [vmem:[#allocation4 + $0x7c8] sm:$0xff] }
  0xe4   :  { %v1451_v57 = vld [vmem:[#allocation4 + $0x7e0] sm:$0xff]  ;;  %v1452_v60 = vld [vmem:[#allocation4 + $0x7e8] sm:$0xff] }
  0xe5   :  { %3566 = vmatmul.mubr.bf16.vlgmr.msra.gmra.mrb[0].mxu0 %v16088_v9  ;;  %3695 = vmatmul.mubr.bf16.vlgmr.msra.gmra.mrb[0].mxu1 %v16088_v9  ;;  %v1403_v9 = vld [vmem:[#allocation4 + $0x660] sm:$0xff] }
  0xe6   :  { %3577 = vmatpush1.bf16.msra.mxu0 %v14104_v12  ;;  %3706 = vmatpush1.bf16.msra.mxu1 %v14106_v13  ;;  %v1404_v12 = vld [vmem:[#allocation4 + $0x668] sm:$0xff]  ;;  %v14168_v13 = vcombine.low %v1391_v0, %v1395_v1  ;;  %v14177_v15 = vcombine.high %v1399_v8, %v1403_v9  ;;  %v1455_v0 = vld [vmem:[#allocation4 + $0x800] sm:$0xff] }
  0xe7   :  { %3578 = vmatprep.subr.bf16.mxu0 %v14113_v14  ;;  %3707 = vmatprep.subr.bf16.mxu1 %v14115_v16  ;;  %v14170_v14 = vcombine.low %v1392_v2, %v1396_v4  ;;  %v1407_v16 = vld [vmem:[#allocation4 + $0x680] sm:$0xff]  ;;  %v14179_v19 = vcombine.high %v1400_v10, %v1404_v12  ;;  %v1456_v2 = vld [vmem:[#allocation4 + $0x808] sm:$0xff] }
  0xe8   :  { %3608 = vmatprep.mubr.bf16.mxu0 %v16089_v18  ;;  %3737 = vmatprep.mubr.bf16.mxu1 %v16089_v18  ;;  %v1408_v18 = vld [vmem:[#allocation4 + $0x688] sm:$0xff]  ;;  %v1459_v1 = vld [vmem:[#allocation4 + $0x820] sm:$0xff] }
  0xe9   :  { %v14187_v27 = vcombine.high %v1408_v18, %v1412_v20  ;;  %v1460_v4 = vld [vmem:[#allocation4 + $0x828] sm:$0xff] }
  0xea   :  { %3579 = vmatpush1.bf16.msra.mxu0 %v14112_v21  ;;  %3708 = vmatpush1.bf16.msra.mxu1 %v14114_v22  ;;  %v14176_v21 = vcombine.low %v1399_v8, %v1403_v9  ;;  %v14178_v22 = vcombine.low %v1400_v10, %v1404_v12  ;;  %v16091_v8 = vld [vmem:[%s17436_s1 + $0x8] ss:$24 sps:$4 sm:$0xff]   ;;  %v14235_v12 = vcombine.high %v1456_v2, %v1460_v4 }
  0xeb   :  { %3580 = vmatprep.subr.bf16.mxu0 %v14121_v23  ;;  %3709 = vmatprep.subr.bf16.mxu1 %v14123_v26  ;;  %v14185_v23 = vcombine.high %v1407_v16, %v1411_v17  ;;  %v1416_v26 = vld [vmem:[#allocation4 + $0x6c8] sm:$0xff]  ;;  %v1463_v9 = vld [vmem:[#allocation4 + $0x840] sm:$0xff] }
  0xec   :  { %v1467_v10 = vld [vmem:[#allocation4 + $0x860] sm:$0xff] }
  0xee   :  { %3581 = vmatpush1.bf16.msra.mxu0 %v14120_v29  ;;  %3710 = vmatpush1.bf16.msra.mxu1 %v14122_v30  ;;  %v14184_v29 = vcombine.low %v1407_v16, %v1411_v17  ;;  %v14186_v30 = vcombine.low %v1408_v18, %v1412_v20  ;;  %v14234_v16 = vcombine.low %v1456_v2, %v1460_v4  ;;  %v1475_v18 = vld [vmem:[#allocation4 + $0x8a0] sm:$0xff]  ;;  %v1476_v20 = vld [vmem:[#allocation4 + $0x8a8] sm:$0xff] }
  0xef   :  { %3582 = vmatprep.subr.bf16.mxu0 %v14129_v31  ;;  %3711 = vmatprep.subr.bf16.mxu1 %v14131_v35  ;;  %v14193_v31 = vcombine.high %v1415_v24, %v1419_v25  ;;  %v14195_v35 = vcombine.high %v1416_v26, %v1420_v28  ;;  %v14241_v17 = vcombine.high %v1463_v9, %v1467_v10  ;;  %v1519_v2 = vld [vmem:[#allocation4 + $0xa00] sm:$0xff]  ;;  %v1520_v4 = vld [vmem:[#allocation4 + $0xa08] sm:$0xff] }
  0xf2   :  { %3583 = vmatpush1.bf16.msra.mxu0 %v14128_v37  ;;  %3712 = vmatpush1.bf16.msra.mxu1 %v14130_v38  ;;  %v14192_v37 = vcombine.low %v1415_v24, %v1419_v25  ;;  %v14194_v38 = vcombine.low %v1416_v26, %v1420_v28  ;;  %v1479_v26 = vld [vmem:[#allocation4 + $0x8c0] sm:$0xff]  ;;  %v1480_v28 = vld [vmem:[#allocation4 + $0x8c8] sm:$0xff] }
  0xf3   :  { %3584 = vmatprep.subr.bf16.mxu0 %v14137_v39  ;;  %3713 = vmatprep.subr.bf16.mxu1 %v14139_v43  ;;  %v14201_v39 = vcombine.high %v1423_v32, %v1427_v33  ;;  %v14203_v43 = vcombine.high %v1424_v34, %v1428_v36 }
  0xf6   :  { %3585 = vmatpush1.bf16.msra.mxu0 %v14136_v45  ;;  %3714 = vmatpush1.bf16.msra.mxu1 %v14138_v46  ;;  %v14200_v45 = vcombine.low %v1423_v32, %v1427_v33  ;;  %v14202_v46 = vcombine.low %v1424_v34, %v1428_v36  ;;  %v1487_v34 = vld [vmem:[#allocation4 + $0x900] sm:$0xff]  ;;  %v1488_v36 = vld [vmem:[#allocation4 + $0x908] sm:$0xff] }
  0xf7   :  { %3586 = vmatprep.subr.bf16.mxu0 %v14145_v47  ;;  %3715 = vmatprep.subr.bf16.mxu1 %v14147_v51  ;;  %v14209_v47 = vcombine.high %v1431_v40, %v1435_v41  ;;  %v14211_v51 = vcombine.high %v1432_v42, %v1436_v44 }
  0xfa   :  { %3587 = vmatpush1.bf16.msra.mxu0 %v14144_v53  ;;  %3716 = vmatpush1.bf16.msra.mxu1 %v14146_v54  ;;  %v14208_v53 = vcombine.low %v1431_v40, %v1435_v41  ;;  %v14210_v54 = vcombine.low %v1432_v42, %v1436_v44  ;;  %v1495_v42 = vld [vmem:[#allocation4 + $0x940] sm:$0xff]  ;;  %v1496_v44 = vld [vmem:[#allocation4 + $0x948] sm:$0xff] }
  0xfb   :  { %3588 = vmatprep.subr.bf16.mxu0 %v14153_v55  ;;  %3717 = vmatprep.subr.bf16.mxu1 %v14155_v59  ;;  %v14217_v55 = vcombine.high %v1439_v48, %v1443_v49  ;;  %v14219_v59 = vcombine.high %v1440_v50, %v1444_v52 }
  0xfe   :  { %3589 = vmatpush1.bf16.msra.mxu0 %v14152_v61  ;;  %3718 = vmatpush1.bf16.msra.mxu1 %v14154_v62  ;;  %v14216_v61 = vcombine.low %v1439_v48, %v1443_v49  ;;  %v14218_v62 = vcombine.low %v1440_v50, %v1444_v52  ;;  %v1503_v50 = vld [vmem:[#allocation4 + $0x980] sm:$0xff]  ;;  %v1504_v52 = vld [vmem:[#allocation4 + $0x988] sm:$0xff] }
  0xff   :  { %3590 = vmatprep.subr.bf16.mxu0 %v14161_v63  ;;  %3719 = vmatprep.subr.bf16.mxu1 %v14163_v3  ;;  %v14225_v63 = vcombine.high %v1447_v56, %v1451_v57  ;;  %v14227_v3 = vcombine.high %v1448_v58, %v1452_v60 }
 0x102   :  { %3591 = vmatpush1.bf16.msra.mxu0 %v14160_v5  ;;  %3720 = vmatpush1.bf16.msra.mxu1 %v14162_v6  ;;  %v14224_v5 = vcombine.low %v1447_v56, %v1451_v57  ;;  %v14226_v6 = vcombine.low %v1448_v58, %v1452_v60  ;;  %v1511_v58 = vld [vmem:[#allocation4 + $0x9c0] sm:$0xff]  ;;  %v1512_v60 = vld [vmem:[#allocation4 + $0x9c8] sm:$0xff] }
 0x103   :  { %3592 = vmatprep.subr.bf16.mxu0 %v14169_v7  ;;  %3721 = vmatprep.subr.bf16.mxu1 %v14171_v11  ;;  %v14233_v7 = vcombine.high %v1455_v0, %v1459_v1  ;;  %v1464_v11 = vld [vmem:[#allocation4 + $0x848] sm:$0xff] }
 0x106   :  { %3593 = vmatpush1.bf16.msra.mxu0 %v14168_v13  ;;  %3722 = vmatpush1.bf16.msra.mxu1 %v14170_v14  ;;  %v1468_v13 = vld [vmem:[#allocation4 + $0x868] sm:$0xff]  ;;  %v14232_v14 = vcombine.low %v1455_v0, %v1459_v1 }
 0x107   :  { %3594 = vmatprep.subr.bf16.mxu0 %v14177_v15  ;;  %3723 = vmatprep.subr.bf16.mxu1 %v14179_v19  ;;  %v1471_v15 = vld [vmem:[#allocation4 + $0x880] sm:$0xff]  ;;  %v1472_v19 = vld [vmem:[#allocation4 + $0x888] sm:$0xff]  ;;  %v14242_v24 = vcombine.low %v1464_v11, %v1468_v13 }
 0x108   :  { %v14249_v25 = vcombine.high %v1471_v15, %v1475_v18  ;;  %v14250_v32 = vcombine.low %v1472_v19, %v1476_v20 }
 0x10a   :  { %3595 = vmatpush1.bf16.msra.mxu0 %v14176_v21  ;;  %3724 = vmatpush1.bf16.msra.mxu1 %v14178_v22  ;;  %v14243_v21 = vcombine.high %v1464_v11, %v1468_v13  ;;  %v16092_v22 = vld [vmem:[%s17436_s1 + $0x14] ss:$24 sps:$4 sm:$0xff]   ;;  %v1531_v11 = vld [vmem:[#allocation4 + $0xa60] sm:$0xff] }
 0x10b   :  { %3596 = vmatprep.subr.bf16.mxu0 %v14185_v23  ;;  %3725 = vmatprep.subr.bf16.mxu1 %v14187_v27  ;;  %v14240_v23 = vcombine.low %v1463_v9, %v1467_v10  ;;  %v1483_v27 = vld [vmem:[#allocation4 + $0x8e0] sm:$0xff] }
 0x10c   :  { %v14257_v33 = vcombine.high %v1479_v26, %v1483_v27  ;;  %v1527_v10 = vld [vmem:[#allocation4 + $0xa40] sm:$0xff] }
 0x10e   :  { %3597 = vmatpush1.bf16.msra.mxu0 %v14184_v29  ;;  %3726 = vmatpush1.bf16.msra.mxu1 %v14186_v30  ;;  %v14251_v29 = vcombine.high %v1472_v19, %v1476_v20  ;;  %v1484_v30 = vld [vmem:[#allocation4 + $0x8e8] sm:$0xff]  ;;  %v1539_v19 = vld [vmem:[#allocation4 + $0xaa0] sm:$0xff] }
 0x10f   :  { %3598 = vmatprep.subr.bf16.mxu0 %v14193_v31  ;;  %3727 = vmatprep.subr.bf16.mxu1 %v14195_v35  ;;  %v14248_v31 = vcombine.low %v1471_v15, %v1475_v18  ;;  %v1491_v35 = vld [vmem:[#allocation4 + $0x920] sm:$0xff]  ;;  %v14258_v40 = vcombine.low %v1480_v28, %v1484_v30  ;;  %v1536_v20 = vld [vmem:[#allocation4 + $0xa88] sm:$0xff] }
 0x110   :  { %v14265_v41 = vcombine.high %v1487_v34, %v1491_v35  ;;  %v1535_v18 = vld [vmem:[#allocation4 + $0xa80] sm:$0xff] }
 0x112   :  { %3599 = vmatpush1.bf16.msra.mxu0 %v14192_v37  ;;  %3728 = vmatpush1.bf16.msra.mxu1 %v14194_v38  ;;  %v14259_v37 = vcombine.high %v1480_v28, %v1484_v30  ;;  %v1492_v38 = vld [vmem:[#allocation4 + $0x928] sm:$0xff] }
 0x113   :  { %3600 = vmatprep.subr.bf16.mxu0 %v14201_v39  ;;  %3729 = vmatprep.subr.bf16.mxu1 %v14203_v43  ;;  %v14256_v39 = vcombine.low %v1479_v26, %v1483_v27  ;;  %v1499_v43 = vld [vmem:[#allocation4 + $0x960] sm:$0xff]  ;;  %v14266_v48 = vcombine.low %v1488_v36, %v1492_v38  ;;  %v1544_v28 = vld [vmem:[#allocation4 + $0xac8] sm:$0xff] }
 0x114   :  { %v14273_v49 = vcombine.high %v1495_v42, %v1499_v43  ;;  %v1543_v26 = vld [vmem:[#allocation4 + $0xac0] sm:$0xff]  ;;  %v1548_v30 = vld [vmem:[#allocation4 + $0xae8] sm:$0xff] }
 0x115   :  { %v1547_v27 = vld [vmem:[#allocation4 + $0xae0] sm:$0xff] }
 0x116   :  { %3601 = vmatpush1.bf16.msra.mxu0 %v14200_v45  ;;  %3730 = vmatpush1.bf16.msra.mxu1 %v14202_v46  ;;  %v14267_v45 = vcombine.high %v1488_v36, %v1492_v38  ;;  %v1500_v46 = vld [vmem:[#allocation4 + $0x968] sm:$0xff] }
 0x117   :  { %3602 = vmatprep.subr.bf16.mxu0 %v14209_v47  ;;  %3731 = vmatprep.subr.bf16.mxu1 %v14211_v51  ;;  %v14264_v47 = vcombine.low %v1487_v34, %v1491_v35  ;;  %v1507_v51 = vld [vmem:[#allocation4 + $0x9a0] sm:$0xff]  ;;  %v14274_v56 = vcombine.low %v1496_v44, %v1500_v46  ;;  %v1552_v36 = vld [vmem:[#allocation4 + $0xb08] sm:$0xff] }
 0x118   :  { %v14281_v57 = vcombine.high %v1503_v50, %v1507_v51  ;;  %v1551_v34 = vld [vmem:[#allocation4 + $0xb00] sm:$0xff]  ;;  %v1556_v38 = vld [vmem:[#allocation4 + $0xb28] sm:$0xff] }
 0x119   :  { %v1555_v35 = vld [vmem:[#allocation4 + $0xb20] sm:$0xff] }
 0x11a   :  { %3603 = vmatpush1.bf16.msra.mxu0 %v14208_v53  ;;  %3732 = vmatpush1.bf16.msra.mxu1 %v14210_v54  ;;  %v14275_v53 = vcombine.high %v1496_v44, %v1500_v46  ;;  %v1508_v54 = vld [vmem:[#allocation4 + $0x9a8] sm:$0xff] }
 0x11b   :  { %3604 = vmatprep.subr.bf16.mxu0 %v14217_v55  ;;  %3733 = vmatprep.subr.bf16.mxu1 %v14219_v59  ;;  %v14272_v55 = vcombine.low %v1495_v42, %v1499_v43  ;;  %v1515_v59 = vld [vmem:[#allocation4 + $0x9e0] sm:$0xff]  ;;  %v14282_v0 = vcombine.low %v1504_v52, %v1508_v54  ;;  %v1560_v44 = vld [vmem:[#allocation4 + $0xb48] sm:$0xff] }
 0x11c   :  { %v14289_v1 = vcombine.high %v1511_v58, %v1515_v59  ;;  %v1559_v42 = vld [vmem:[#allocation4 + $0xb40] sm:$0xff]  ;;  %v1564_v46 = vld [vmem:[#allocation4 + $0xb68] sm:$0xff] }
 0x11d   :  { %v1563_v43 = vld [vmem:[#allocation4 + $0xb60] sm:$0xff] }
 0x11e   :  { %3605 = vmatpush1.bf16.msra.mxu0 %v14216_v61  ;;  %3734 = vmatpush1.bf16.msra.mxu1 %v14218_v62  ;;  %v14283_v61 = vcombine.high %v1504_v52, %v1508_v54  ;;  %v1516_v62 = vld [vmem:[#allocation4 + $0x9e8] sm:$0xff] }
 0x11f   :  { %3606 = vmatprep.subr.bf16.mxu0 %v14225_v63  ;;  %3735 = vmatprep.subr.bf16.mxu1 %v14227_v3  ;;  %v14280_v63 = vcombine.low %v1503_v50, %v1507_v51  ;;  %v1523_v3 = vld [vmem:[#allocation4 + $0xa20] sm:$0xff]  ;;  %v1568_v52 = vld [vmem:[#allocation4 + $0xb88] sm:$0xff] }
 0x120   :  { %v14297_v9 = vcombine.high %v1519_v2, %v1523_v3  ;;  %v14296_v15 = vcombine.low %v1519_v2, %v1523_v3  ;;  %v1567_v50 = vld [vmem:[#allocation4 + $0xb80] sm:$0xff]  ;;  %v1572_v54 = vld [vmem:[#allocation4 + $0xba8] sm:$0xff]  ;;  %v1201_v2 = vld [vmem:[#allocation4 + $0x10] sm:$0xff] }
 0x121   :  { %v1571_v51 = vld [vmem:[#allocation4 + $0xba0] sm:$0xff]  ;;  %v1205_v3 = vld [vmem:[#allocation4 + $0x30] sm:$0xff] }
 0x122   :  { %3607 = vmatpush1.bf16.msra.mxu0 %v14224_v5  ;;  %3736 = vmatpush1.bf16.msra.mxu1 %v14226_v6  ;;  %v14291_v5 = vcombine.high %v1512_v60, %v1516_v62  ;;  %v1524_v6 = vld [vmem:[#allocation4 + $0xa28] sm:$0xff] }
 0x123   :  { %3619 = vmatprep.subr.bf16.mxu0 %v14233_v7  ;;  %3748 = vmatprep.subr.bf16.mxu1 %v14235_v12  ;;  %v14288_v7 = vcombine.low %v1511_v58, %v1515_v59  ;;  %v1528_v12 = vld [vmem:[#allocation4 + $0xa48] sm:$0xff]  ;;  %v14299_v13 = vcombine.high %v1520_v4, %v1524_v6  ;;  %v1575_v58 = vld [vmem:[#allocation4 + $0xbc0] sm:$0xff] }
 0x124   :  { %v1579_v59 = vld [vmem:[#allocation4 + $0xbe0] sm:$0xff] }
 0x125   :  { %3609 = vmatmul.mubr.bf16.vlgmr.msra.gmra.mrb[0].mxu0 %v16091_v8  ;;  %3738 = vmatmul.mubr.bf16.vlgmr.msra.gmra.mrb[0].mxu1 %v16091_v8  ;;  %v14290_v8 = vcombine.low %v1512_v60, %v1516_v62  ;;  %v1576_v60 = vld [vmem:[#allocation4 + $0xbc8] sm:$0xff] }
 0x126   :  { %3620 = vmatpush1.bf16.msra.mxu0 %v14232_v14  ;;  %3749 = vmatpush1.bf16.msra.mxu1 %v14234_v16  ;;  %v1532_v14 = vld [vmem:[#allocation4 + $0xa68] sm:$0xff]  ;;  %v14298_v16 = vcombine.low %v1520_v4, %v1524_v6  ;;  %v1202_v4 = vld [vmem:[#allocation4 + $0x18] sm:$0xff] }
 0x127   :  { %3621 = vmatprep.subr.bf16.mxu0 %v14241_v17  ;;  %3750 = vmatprep.subr.bf16.mxu1 %v14243_v21  ;;  %v14305_v17 = vcombine.high %v1527_v10, %v1531_v11  ;;  %v14307_v21 = vcombine.high %v1528_v12, %v1532_v14  ;;  %v1580_v62 = vld [vmem:[#allocation4 + $0xbe8] sm:$0xff]  ;;  %v1206_v6 = vld [vmem:[#allocation4 + $0x38] sm:$0xff] }
 0x128   :  { %3651 = vmatprep.mubr.bf16.mxu0 %v16092_v22  ;;  %3780 = vmatprep.mubr.bf16.mxu1 %v16092_v22  ;;  %v1540_v22 = vld [vmem:[#allocation4 + $0xaa8] sm:$0xff] }
 0x12a   :  { %3622 = vmatpush1.bf16.msra.mxu0 %v14240_v23  ;;  %3751 = vmatpush1.bf16.msra.mxu1 %v14242_v24  ;;  %v14304_v23 = vcombine.low %v1527_v10, %v1531_v11  ;;  %v14306_v24 = vcombine.low %v1528_v12, %v1532_v14  ;;  %v16094_v10 = vld [vmem:[%s17436_s1 + $0x10] ss:$24 sps:$4 sm:$0xff]   ;;  %v13983_v14 = vcombine.high %v1202_v4, %v1206_v6 }
 0x12b   :  { %3623 = vmatprep.subr.bf16.mxu0 %v14249_v25  ;;  %3752 = vmatprep.subr.bf16.mxu1 %v14251_v29  ;;  %v14313_v25 = vcombine.high %v1535_v18, %v1539_v19  ;;  %v14315_v29 = vcombine.high %v1536_v20, %v1540_v22  ;;  %v1209_v11 = vld [vmem:[#allocation4 + $0x50] sm:$0xff] }
 0x12c   :  { %v1213_v12 = vld [vmem:[#allocation4 + $0x70] sm:$0xff] }
 0x12e   :  { %3624 = vmatpush1.bf16.msra.mxu0 %v14248_v31  ;;  %3753 = vmatpush1.bf16.msra.mxu1 %v14250_v32  ;;  %v14312_v31 = vcombine.low %v1535_v18, %v1539_v19  ;;  %v14314_v32 = vcombine.low %v1536_v20, %v1540_v22  ;;  %v13989_v18 = vcombine.high %v1209_v11, %v1213_v12  ;;  %v1217_v19 = vld [vmem:[#allocation4 + $0x90] sm:$0xff] }
 0x12f   :  { %3625 = vmatprep.subr.bf16.mxu0 %v14257_v33  ;;  %3754 = vmatprep.subr.bf16.mxu1 %v14259_v37  ;;  %v14321_v33 = vcombine.high %v1543_v26, %v1547_v27  ;;  %v14323_v37 = vcombine.high %v1544_v28, %v1548_v30  ;;  %v1221_v20 = vld [vmem:[#allocation4 + $0xb0] sm:$0xff] }
 0x132   :  { %3626 = vmatpush1.bf16.msra.mxu0 %v14256_v39  ;;  %3755 = vmatpush1.bf16.msra.mxu1 %v14258_v40  ;;  %v14320_v39 = vcombine.low %v1543_v26, %v1547_v27  ;;  %v14322_v40 = vcombine.low %v1544_v28, %v1548_v30  ;;  %v13997_v26 = vcombine.high %v1217_v19, %v1221_v20  ;;  %v1225_v27 = vld [vmem:[#allocation4 + $0xd0] sm:$0xff] }
 0x133   :  { %3627 = vmatprep.subr.bf16.mxu0 %v14265_v41  ;;  %3756 = vmatprep.subr.bf16.mxu1 %v14267_v45  ;;  %v14329_v41 = vcombine.high %v1551_v34, %v1555_v35  ;;  %v14331_v45 = vcombine.high %v1552_v36, %v1556_v38  ;;  %v1229_v28 = vld [vmem:[#allocation4 + $0xf0] sm:$0xff] }
 0x136   :  { %3628 = vmatpush1.bf16.msra.mxu0 %v14264_v47  ;;  %3757 = vmatpush1.bf16.msra.mxu1 %v14266_v48  ;;  %v14328_v47 = vcombine.low %v1551_v34, %v1555_v35  ;;  %v14330_v48 = vcombine.low %v1552_v36, %v1556_v38  ;;  %v14005_v35 = vcombine.high %v1225_v27, %v1229_v28  ;;  %v1233_v36 = vld [vmem:[#allocation4 + $0x110] sm:$0xff]  ;;  %v1234_v38 = vld [vmem:[#allocation4 + $0x118] sm:$0xff] }
 0x137   :  { %3629 = vmatprep.subr.bf16.mxu0 %v14273_v49  ;;  %3758 = vmatprep.subr.bf16.mxu1 %v14275_v53  ;;  %v14337_v49 = vcombine.high %v1559_v42, %v1563_v43  ;;  %v14339_v53 = vcombine.high %v1560_v44, %v1564_v46 }
 0x13a   :  { %3630 = vmatpush1.bf16.msra.mxu0 %v14272_v55  ;;  %3759 = vmatpush1.bf16.msra.mxu1 %v14274_v56  ;;  %v14336_v55 = vcombine.low %v1559_v42, %v1563_v43  ;;  %v14338_v56 = vcombine.low %v1560_v44, %v1564_v46  ;;  %v1241_v44 = vld [vmem:[#allocation4 + $0x150] sm:$0xff]  ;;  %v1242_v46 = vld [vmem:[#allocation4 + $0x158] sm:$0xff] }
 0x13b   :  { %3631 = vmatprep.subr.bf16.mxu0 %v14281_v57  ;;  %3760 = vmatprep.subr.bf16.mxu1 %v14283_v61  ;;  %v14345_v57 = vcombine.high %v1567_v50, %v1571_v51  ;;  %v14347_v61 = vcombine.high %v1568_v52, %v1572_v54 }
 0x13e   :  { %3632 = vmatpush1.bf16.msra.mxu0 %v14280_v63  ;;  %3761 = vmatpush1.bf16.msra.mxu1 %v14282_v0  ;;  %v14344_v63 = vcombine.low %v1567_v50, %v1571_v51  ;;  %v14346_v0 = vcombine.low %v1568_v52, %v1572_v54  ;;  %v1249_v52 = vld [vmem:[#allocation4 + $0x190] sm:$0xff]  ;;  %v1250_v54 = vld [vmem:[#allocation4 + $0x198] sm:$0xff] }
 0x13f   :  { %3633 = vmatprep.subr.bf16.mxu0 %v14289_v1  ;;  %3762 = vmatprep.subr.bf16.mxu1 %v14291_v5  ;;  %v14353_v1 = vcombine.high %v1575_v58, %v1579_v59  ;;  %v14355_v5 = vcombine.high %v1576_v60, %v1580_v62 }
 0x142   :  { %3634 = vmatpush1.bf16.msra.mxu0 %v14288_v7  ;;  %3763 = vmatpush1.bf16.msra.mxu1 %v14290_v8  ;;  %v14352_v7 = vcombine.low %v1575_v58, %v1579_v59  ;;  %v14354_v8 = vcombine.low %v1576_v60, %v1580_v62  ;;  %v1257_v60 = vld [vmem:[#allocation4 + $0x1d0] sm:$0xff]  ;;  %v1258_v62 = vld [vmem:[#allocation4 + $0x1d8] sm:$0xff] }
 0x143   :  { %3635 = vmatprep.subr.bf16.mxu0 %v14297_v9  ;;  %3764 = vmatprep.subr.bf16.mxu1 %v14299_v13  ;;  %v13981_v9 = vcombine.high %v1201_v2, %v1205_v3  ;;  %v1210_v13 = vld [vmem:[#allocation4 + $0x58] sm:$0xff] }
 0x146   :  { %3636 = vmatpush1.bf16.msra.mxu0 %v14296_v15  ;;  %3765 = vmatpush1.bf16.msra.mxu1 %v14298_v16  ;;  %v1214_v15 = vld [vmem:[#allocation4 + $0x78] sm:$0xff]  ;;  %v13980_v16 = vcombine.low %v1201_v2, %v1205_v3 }
 0x147   :  { %3637 = vmatprep.subr.bf16.mxu0 %v14305_v17  ;;  %3766 = vmatprep.subr.bf16.mxu1 %v14307_v21  ;;  %v13982_v17 = vcombine.low %v1202_v4, %v1206_v6  ;;  %v1218_v21 = vld [vmem:[#allocation4 + $0x98] sm:$0xff]  ;;  %v13991_v22 = vcombine.high %v1210_v13, %v1214_v15  ;;  %v1265_v4 = vld [vmem:[#allocation4 + $0x210] sm:$0xff] }
 0x148   :  { %v1266_v6 = vld [vmem:[#allocation4 + $0x218] sm:$0xff] }
 0x14a   :  { %3638 = vmatpush1.bf16.msra.mxu0 %v14304_v23  ;;  %3767 = vmatpush1.bf16.msra.mxu1 %v14306_v24  ;;  %v1222_v23 = vld [vmem:[#allocation4 + $0xb8] sm:$0xff]  ;;  %v13988_v24 = vcombine.low %v1209_v11, %v1213_v12  ;;  %v1273_v12 = vld [vmem:[#allocation4 + $0x250] sm:$0xff] }
 0x14b   :  { %3639 = vmatprep.subr.bf16.mxu0 %v14313_v25  ;;  %3768 = vmatprep.subr.bf16.mxu1 %v14315_v29  ;;  %v13990_v25 = vcombine.low %v1210_v13, %v1214_v15  ;;  %v1226_v29 = vld [vmem:[#allocation4 + $0xd8] sm:$0xff]  ;;  %v13999_v30 = vcombine.high %v1218_v21, %v1222_v23  ;;  %v13998_v34 = vcombine.low %v1218_v21, %v1222_v23  ;;  %v1277_v13 = vld [vmem:[#allocation4 + $0x270] sm:$0xff] }
 0x14c   :  { %v1285_v21 = vld [vmem:[#allocation4 + $0x2b0] sm:$0xff] }
 0x14e   :  { %3640 = vmatpush1.bf16.msra.mxu0 %v14312_v31  ;;  %3769 = vmatpush1.bf16.msra.mxu1 %v14314_v32  ;;  %v1230_v31 = vld [vmem:[#allocation4 + $0xf8] sm:$0xff] }
 0x14f   :  { %3641 = vmatprep.subr.bf16.mxu0 %v14321_v33  ;;  %3770 = vmatprep.subr.bf16.mxu1 %v14323_v37  ;;  %v16711_v32 = vld [vmem:[%s17436_s1 + $0x4] ss:$24 sps:$4 sm:$0xff]   ;;  %v13996_v33 = vcombine.low %v1217_v19, %v1221_v20  ;;  %v1237_v37 = vld [vmem:[#allocation4 + $0x130] sm:$0xff]  ;;  %v14006_v42 = vcombine.low %v1226_v29, %v1230_v31  ;;  %v14053_v19 = vcombine.high %v1273_v12, %v1277_v13 }
 0x150   :  { %v14013_v43 = vcombine.high %v1233_v36, %v1237_v37  ;;  %v1281_v20 = vld [vmem:[#allocation4 + $0x290] sm:$0xff] }
 0x152   :  { %3642 = vmatpush1.bf16.msra.mxu0 %v14320_v39  ;;  %3771 = vmatpush1.bf16.msra.mxu1 %v14322_v40  ;;  %v14007_v39 = vcombine.high %v1226_v29, %v1230_v31  ;;  %v1238_v40 = vld [vmem:[#allocation4 + $0x138] sm:$0xff]  ;;  %v1293_v29 = vld [vmem:[#allocation4 + $0x2f0] sm:$0xff] }
 0x153   :  { %3643 = vmatprep.subr.bf16.mxu0 %v14329_v41  ;;  %3772 = vmatprep.subr.bf16.mxu1 %v14331_v45  ;;  %v14004_v41 = vcombine.low %v1225_v27, %v1229_v28  ;;  %v1245_v45 = vld [vmem:[#allocation4 + $0x170] sm:$0xff]  ;;  %v14014_v50 = vcombine.low %v1234_v38, %v1238_v40  ;;  %v14061_v27 = vcombine.high %v1281_v20, %v1285_v21 }
 0x154   :  { %v14021_v51 = vcombine.high %v1241_v44, %v1245_v45  ;;  %v1289_v28 = vld [vmem:[#allocation4 + $0x2d0] sm:$0xff] }
 0x156   :  { %3644 = vmatpush1.bf16.msra.mxu0 %v14328_v47  ;;  %3773 = vmatpush1.bf16.msra.mxu1 %v14330_v48  ;;  %v14015_v47 = vcombine.high %v1234_v38, %v1238_v40  ;;  %v1246_v48 = vld [vmem:[#allocation4 + $0x178] sm:$0xff] }
 0x157   :  { %3645 = vmatprep.subr.bf16.mxu0 %v14337_v49  ;;  %3774 = vmatprep.subr.bf16.mxu1 %v14339_v53  ;;  %v14012_v49 = vcombine.low %v1233_v36, %v1237_v37  ;;  %v1253_v53 = vld [vmem:[#allocation4 + $0x1b0] sm:$0xff]  ;;  %v14022_v58 = vcombine.low %v1242_v46, %v1246_v48  ;;  %v1298_v38 = vld [vmem:[#allocation4 + $0x318] sm:$0xff] }
 0x158   :  { %v14029_v59 = vcombine.high %v1249_v52, %v1253_v53  ;;  %v1297_v36 = vld [vmem:[#allocation4 + $0x310] sm:$0xff]  ;;  %v1302_v40 = vld [vmem:[#allocation4 + $0x338] sm:$0xff] }
 0x159   :  { %v1301_v37 = vld [vmem:[#allocation4 + $0x330] sm:$0xff] }
 0x15a   :  { %3646 = vmatpush1.bf16.msra.mxu0 %v14336_v55  ;;  %3775 = vmatpush1.bf16.msra.mxu1 %v14338_v56  ;;  %v14023_v55 = vcombine.high %v1242_v46, %v1246_v48  ;;  %v1254_v56 = vld [vmem:[#allocation4 + $0x1b8] sm:$0xff] }
 0x15b   :  { %3647 = vmatprep.subr.bf16.mxu0 %v14345_v57  ;;  %3776 = vmatprep.subr.bf16.mxu1 %v14347_v61  ;;  %v14020_v57 = vcombine.low %v1241_v44, %v1245_v45  ;;  %v1261_v61 = vld [vmem:[#allocation4 + $0x1f0] sm:$0xff]  ;;  %v14030_v2 = vcombine.low %v1250_v54, %v1254_v56  ;;  %v1306_v46 = vld [vmem:[#allocation4 + $0x358] sm:$0xff] }
 0x15c   :  { %v14037_v3 = vcombine.high %v1257_v60, %v1261_v61  ;;  %v1305_v44 = vld [vmem:[#allocation4 + $0x350] sm:$0xff]  ;;  %v1310_v48 = vld [vmem:[#allocation4 + $0x378] sm:$0xff] }
 0x15d   :  { %v1309_v45 = vld [vmem:[#allocation4 + $0x370] sm:$0xff] }
 0x15e   :  { %3648 = vmatpush1.bf16.msra.mxu0 %v14344_v63  ;;  %3777 = vmatpush1.bf16.msra.mxu1 %v14346_v0  ;;  %v14031_v63 = vcombine.high %v1250_v54, %v1254_v56  ;;  %v1262_v0 = vld [vmem:[#allocation4 + $0x1f8] sm:$0xff] }
 0x15f   :  { %3649 = vmatprep.subr.bf16.mxu0 %v14353_v1  ;;  %3778 = vmatprep.subr.bf16.mxu1 %v14355_v5  ;;  %v14028_v1 = vcombine.low %v1249_v52, %v1253_v53  ;;  %v1269_v5 = vld [vmem:[#allocation4 + $0x230] sm:$0xff]  ;;  %v1314_v54 = vld [vmem:[#allocation4 + $0x398] sm:$0xff] }
 0x160   :  { %v14045_v11 = vcombine.high %v1265_v4, %v1269_v5  ;;  %v1313_v52 = vld [vmem:[#allocation4 + $0x390] sm:$0xff]  ;;  %v1318_v56 = vld [vmem:[#allocation4 + $0x3b8] sm:$0xff] }
 0x161   :  { %v1317_v53 = vld [vmem:[#allocation4 + $0x3b0] sm:$0xff] }
 0x162   :  { %3650 = vmatpush1.bf16.msra.mxu0 %v14352_v7  ;;  %3779 = vmatpush1.bf16.msra.mxu1 %v14354_v8  ;;  %v14039_v7 = vcombine.high %v1258_v62, %v1262_v0  ;;  %v1270_v8 = vld [vmem:[#allocation4 + $0x238] sm:$0xff] }
 0x163   :  { %3791 = vmatprep.subr.bf16.mxu0 %v13981_v9  ;;  %3920 = vmatprep.subr.bf16.mxu1 %v13983_v14  ;;  %v14036_v9 = vcombine.low %v1257_v60, %v1261_v61  ;;  %v1274_v14 = vld [vmem:[#allocation4 + $0x258] sm:$0xff]  ;;  %v14047_v15 = vcombine.high %v1266_v6, %v1270_v8  ;;  %v1321_v60 = vld [vmem:[#allocation4 + $0x3d0] sm:$0xff] }
 0x164   :  { %v1325_v61 = vld [vmem:[#allocation4 + $0x3f0] sm:$0xff] }
 0x165   :  { %3652 = vmatmul.mubr.bf16.vlgmr.msra.gmra.mrb[0].mxu0 %v16094_v10  ;;  %3781 = vmatmul.mubr.bf16.vlgmr.msra.gmra.mrb[0].mxu1 %v16094_v10  ;;  %v14038_v10 = vcombine.low %v1258_v62, %v1262_v0  ;;  %v1322_v62 = vld [vmem:[#allocation4 + $0x3d8] sm:$0xff] }
 0x166   :  { %3792 = vmatpush1.bf16.msra.mxu0 %v13980_v16  ;;  %3921 = vmatpush1.bf16.msra.mxu1 %v13982_v17  ;;  %v1278_v16 = vld [vmem:[#allocation4 + $0x278] sm:$0xff]  ;;  %v14044_v17 = vcombine.low %v1265_v4, %v1269_v5  ;;  %v1329_v4 = vld [vmem:[#allocation4 + $0x410] sm:$0xff] }
 0x167   :  { %3793 = vmatprep.subr.bf16.mxu0 %v13989_v18  ;;  %3922 = vmatprep.subr.bf16.mxu1 %v13991_v22  ;;  %v14046_v18 = vcombine.low %v1266_v6, %v1270_v8  ;;  %v1282_v22 = vld [vmem:[#allocation4 + $0x298] sm:$0xff]  ;;  %v14055_v23 = vcombine.high %v1274_v14, %v1278_v16  ;;  %v1333_v5 = vld [vmem:[#allocation4 + $0x430] sm:$0xff] }
 0x168   :  { %3823 = vmatprep.mubr.bf16.mxu0 %v16711_v32  ;;  %3952 = vmatprep.mubr.bf16.mxu1 %v16711_v32  ;;  %v1294_v32 = vld [vmem:[#allocation4 + $0x2f8] sm:$0xff] }
 0x169   :  { %v1326_v0 = vld [vmem:[#allocation4 + $0x3f8] sm:$0xff] }
 0x16a   :  { %3794 = vmatpush1.bf16.msra.mxu0 %v13988_v24  ;;  %3923 = vmatpush1.bf16.msra.mxu1 %v13990_v25  ;;  %v1286_v24 = vld [vmem:[#allocation4 + $0x2b8] sm:$0xff]  ;;  %v14052_v25 = vcombine.low %v1273_v12, %v1277_v13  ;;  %v1337_v12 = vld [vmem:[#allocation4 + $0x450] sm:$0xff] }
 0x16b   :  { %3795 = vmatprep.subr.bf16.mxu0 %v13997_v26  ;;  %3924 = vmatprep.subr.bf16.mxu1 %v13999_v30  ;;  %v14054_v26 = vcombine.low %v1274_v14, %v1278_v16  ;;  %v1290_v30 = vld [vmem:[#allocation4 + $0x2d8] sm:$0xff]  ;;  %v14063_v31 = vcombine.high %v1282_v22, %v1286_v24  ;;  %v1341_v13 = vld [vmem:[#allocation4 + $0x470] sm:$0xff] }
 0x16c   :  { %v1330_v6 = vld [vmem:[#allocation4 + $0x418] sm:$0xff] }
 0x16d   :  { %v1334_v8 = vld [vmem:[#allocation4 + $0x438] sm:$0xff] }
 0x16e   :  { %3796 = vmatpush1.bf16.msra.mxu0 %v13996_v33  ;;  %3925 = vmatpush1.bf16.msra.mxu1 %v13998_v34  ;;  %v14060_v33 = vcombine.low %v1281_v20, %v1285_v21  ;;  %v14062_v34 = vcombine.low %v1282_v22, %v1286_v24  ;;  %v1338_v14 = vld [vmem:[#allocation4 + $0x458] sm:$0xff]  ;;  %v1345_v20 = vld [vmem:[#allocation4 + $0x490] sm:$0xff] }
 0x16f   :  { %3797 = vmatprep.subr.bf16.mxu0 %v14005_v35  ;;  %3926 = vmatprep.subr.bf16.mxu1 %v14007_v39  ;;  %v14069_v35 = vcombine.high %v1289_v28, %v1293_v29  ;;  %v14071_v39 = vcombine.high %v1290_v30, %v1294_v32  ;;  %v1342_v16 = vld [vmem:[#allocation4 + $0x478] sm:$0xff]  ;;  %v1349_v21 = vld [vmem:[#allocation4 + $0x4b0] sm:$0xff] }
 0x170   :  { %v1346_v22 = vld [vmem:[#allocation4 + $0x498] sm:$0xff] }
 0x171   :  { %v1350_v24 = vld [vmem:[#allocation4 + $0x4b8] sm:$0xff] }
 0x172   :  { %3798 = vmatpush1.bf16.msra.mxu0 %v14004_v41  ;;  %3927 = vmatpush1.bf16.msra.mxu1 %v14006_v42  ;;  %v14068_v41 = vcombine.low %v1289_v28, %v1293_v29  ;;  %v14070_v42 = vcombine.low %v1290_v30, %v1294_v32  ;;  %v14125_v28 = vcombine.high %v1345_v20, %v1349_v21  ;;  %v1353_v29 = vld [vmem:[#allocation4 + $0x4d0] sm:$0xff] }
 0x173   :  { %3799 = vmatprep.subr.bf16.mxu0 %v14013_v43  ;;  %3928 = vmatprep.subr.bf16.mxu1 %v14015_v47  ;;  %v14077_v43 = vcombine.high %v1297_v36, %v1301_v37  ;;  %v14079_v47 = vcombine.high %v1298_v38, %v1302_v40  ;;  %v1357_v30 = vld [vmem:[#allocation4 + $0x4f0] sm:$0xff]  ;;  %v14127_v32 = vcombine.high %v1346_v22, %v1350_v24 }
 0x176   :  { %3800 = vmatpush1.bf16.msra.mxu0 %v14012_v49  ;;  %3929 = vmatpush1.bf16.msra.mxu1 %v14014_v50  ;;  %v14076_v49 = vcombine.low %v1297_v36, %v1301_v37  ;;  %v14078_v50 = vcombine.low %v1298_v38, %v1302_v40  ;;  %v14126_v36 = vcombine.low %v1346_v22, %v1350_v24  ;;  %v1361_v38 = vld [vmem:[#allocation4 + $0x510] sm:$0xff]  ;;  %v1362_v40 = vld [vmem:[#allocation4 + $0x518] sm:$0xff] }
 0x177   :  { %3801 = vmatprep.subr.bf16.mxu0 %v14021_v51  ;;  %3930 = vmatprep.subr.bf16.mxu1 %v14023_v55  ;;  %v14085_v51 = vcombine.high %v1305_v44, %v1309_v45  ;;  %v14087_v55 = vcombine.high %v1306_v46, %v1310_v48  ;;  %v14133_v37 = vcombine.high %v1353_v29, %v1357_v30  ;;  %v1409_v22 = vld [vmem:[#allocation4 + $0x690] sm:$0xff]  ;;  %v1410_v24 = vld [vmem:[#allocation4 + $0x698] sm:$0xff] }
 0x17a   :  { %3802 = vmatpush1.bf16.msra.mxu0 %v14020_v57  ;;  %3931 = vmatpush1.bf16.msra.mxu1 %v14022_v58  ;;  %v14084_v57 = vcombine.low %v1305_v44, %v1309_v45  ;;  %v14086_v58 = vcombine.low %v1306_v46, %v1310_v48  ;;  %v1369_v46 = vld [vmem:[#allocation4 + $0x550] sm:$0xff]  ;;  %v1370_v48 = vld [vmem:[#allocation4 + $0x558] sm:$0xff] }
 0x17b   :  { %3803 = vmatprep.subr.bf16.mxu0 %v14029_v59  ;;  %3932 = vmatprep.subr.bf16.mxu1 %v14031_v63  ;;  %v14093_v59 = vcombine.high %v1313_v52, %v1317_v53  ;;  %v14095_v63 = vcombine.high %v1314_v54, %v1318_v56 }
 0x17e   :  { %3804 = vmatpush1.bf16.msra.mxu0 %v14028_v1  ;;  %3933 = vmatpush1.bf16.msra.mxu1 %v14030_v2  ;;  %v14092_v1 = vcombine.low %v1313_v52, %v1317_v53  ;;  %v14094_v2 = vcombine.low %v1314_v54, %v1318_v56  ;;  %v1377_v54 = vld [vmem:[#allocation4 + $0x590] sm:$0xff]  ;;  %v1378_v56 = vld [vmem:[#allocation4 + $0x598] sm:$0xff] }
 0x17f   :  { %3805 = vmatprep.subr.bf16.mxu0 %v14037_v3  ;;  %3934 = vmatprep.subr.bf16.mxu1 %v14039_v7  ;;  %v14101_v3 = vcombine.high %v1321_v60, %v1325_v61  ;;  %v14103_v7 = vcombine.high %v1322_v62, %v1326_v0 }
 0x182   :  { %3806 = vmatpush1.bf16.msra.mxu0 %v14036_v9  ;;  %3935 = vmatpush1.bf16.msra.mxu1 %v14038_v10  ;;  %v14100_v9 = vcombine.low %v1321_v60, %v1325_v61  ;;  %v14102_v10 = vcombine.low %v1322_v62, %v1326_v0  ;;  %v1385_v62 = vld [vmem:[#allocation4 + $0x5d0] sm:$0xff]  ;;  %v1386_v0 = vld [vmem:[#allocation4 + $0x5d8] sm:$0xff] }
 0x183   :  { %3807 = vmatprep.subr.bf16.mxu0 %v14045_v11  ;;  %3936 = vmatprep.subr.bf16.mxu1 %v14047_v15  ;;  %v14109_v11 = vcombine.high %v1329_v4, %v1333_v5  ;;  %v14111_v15 = vcombine.high %v1330_v6, %v1334_v8 }
 0x186   :  { %3808 = vmatpush1.bf16.msra.mxu0 %v14044_v17  ;;  %3937 = vmatpush1.bf16.msra.mxu1 %v14046_v18  ;;  %v14108_v17 = vcombine.low %v1329_v4, %v1333_v5  ;;  %v14110_v18 = vcombine.low %v1330_v6, %v1334_v8  ;;  %v1393_v6 = vld [vmem:[#allocation4 + $0x610] sm:$0xff]  ;;  %v1394_v8 = vld [vmem:[#allocation4 + $0x618] sm:$0xff] }
 0x187   :  { %3809 = vmatprep.subr.bf16.mxu0 %v14053_v19  ;;  %3938 = vmatprep.subr.bf16.mxu1 %v14055_v23  ;;  %v14117_v19 = vcombine.high %v1337_v12, %v1341_v13  ;;  %v14119_v23 = vcombine.high %v1338_v14, %v1342_v16 }
 0x18a   :  { %3810 = vmatpush1.bf16.msra.mxu0 %v14052_v25  ;;  %3939 = vmatpush1.bf16.msra.mxu1 %v14054_v26  ;;  %v16712_v25 = vld [vmem:[%s17436_s1] ss:$24 sps:$4 sm:$0xff]   ;;  %v14116_v26 = vcombine.low %v1337_v12, %v1341_v13 }
 0x18b   :  { %3811 = vmatprep.subr.bf16.mxu0 %v14061_v27  ;;  %3940 = vmatprep.subr.bf16.mxu1 %v14063_v31  ;;  %v14118_v27 = vcombine.low %v1338_v14, %v1342_v16  ;;  %v1354_v31 = vld [vmem:[#allocation4 + $0x4d8] sm:$0xff]  ;;  %v1401_v14 = vld [vmem:[#allocation4 + $0x650] sm:$0xff] }
 0x18c   :  { %v1402_v16 = vld [vmem:[#allocation4 + $0x658] sm:$0xff] }
 0x18e   :  { %3812 = vmatpush1.bf16.msra.mxu0 %v14060_v33  ;;  %3941 = vmatpush1.bf16.msra.mxu1 %v14062_v34  ;;  %v1358_v33 = vld [vmem:[#allocation4 + $0x4f8] sm:$0xff]  ;;  %v16713_v34 = vld [vmem:[%s17436_s1 + $0xc] ss:$24 sps:$4 sm:$0xff]  }
 0x18f   :  { %3813 = vmatprep.subr.bf16.mxu0 %v14069_v35  ;;  %3942 = vmatprep.subr.bf16.mxu1 %v14071_v39  ;;  %v14124_v35 = vcombine.low %v1345_v20, %v1349_v21  ;;  %v1365_v39 = vld [vmem:[#allocation4 + $0x530] sm:$0xff]  ;;  %v14134_v44 = vcombine.low %v1354_v31, %v1358_v33 }
 0x190   :  { %v14141_v45 = vcombine.high %v1361_v38, %v1365_v39 }
 0x192   :  { %3814 = vmatpush1.bf16.msra.mxu0 %v14068_v41  ;;  %3943 = vmatpush1.bf16.msra.mxu1 %v14070_v42  ;;  %v14135_v41 = vcombine.high %v1354_v31, %v1358_v33  ;;  %v1366_v42 = vld [vmem:[#allocation4 + $0x538] sm:$0xff]  ;;  %v1417_v31 = vld [vmem:[#allocation4 + $0x6d0] sm:$0xff] }
 0x193   :  { %3815 = vmatprep.subr.bf16.mxu0 %v14077_v43  ;;  %3944 = vmatprep.subr.bf16.mxu1 %v14079_v47  ;;  %v14132_v43 = vcombine.low %v1353_v29, %v1357_v30  ;;  %v1373_v47 = vld [vmem:[#allocation4 + $0x570] sm:$0xff]  ;;  %v14142_v52 = vcombine.low %v1362_v40, %v1366_v42  ;;  %v1418_v33 = vld [vmem:[#allocation4 + $0x6d8] sm:$0xff] }
 0x194   :  { %v14149_v53 = vcombine.high %v1369_v46, %v1373_v47 }
 0x196   :  { %3816 = vmatpush1.bf16.msra.mxu0 %v14076_v49  ;;  %3945 = vmatpush1.bf16.msra.mxu1 %v14078_v50  ;;  %v14143_v49 = vcombine.high %v1362_v40, %v1366_v42  ;;  %v1374_v50 = vld [vmem:[#allocation4 + $0x578] sm:$0xff]  ;;  %v1429_v40 = vld [vmem:[#allocation4 + $0x730] sm:$0xff] }
 0x197   :  { %3817 = vmatprep.subr.bf16.mxu0 %v14085_v51  ;;  %3946 = vmatprep.subr.bf16.mxu1 %v14087_v55  ;;  %v14140_v51 = vcombine.low %v1361_v38, %v1365_v39  ;;  %v1381_v55 = vld [vmem:[#allocation4 + $0x5b0] sm:$0xff]  ;;  %v14150_v60 = vcombine.low %v1370_v48, %v1374_v50  ;;  %v1430_v42 = vld [vmem:[#allocation4 + $0x738] sm:$0xff] }
 0x198   :  { %v14157_v61 = vcombine.high %v1377_v54, %v1381_v55  ;;  %v1425_v39 = vld [vmem:[#allocation4 + $0x710] sm:$0xff] }
 0x19a   :  { %3818 = vmatpush1.bf16.msra.mxu0 %v14084_v57  ;;  %3947 = vmatpush1.bf16.msra.mxu1 %v14086_v58  ;;  %v14151_v57 = vcombine.high %v1370_v48, %v1374_v50  ;;  %v1382_v58 = vld [vmem:[#allocation4 + $0x5b8] sm:$0xff]  ;;  %v1437_v48 = vld [vmem:[#allocation4 + $0x770] sm:$0xff] }
 0x19b   :  { %3819 = vmatprep.subr.bf16.mxu0 %v14093_v59  ;;  %3948 = vmatprep.subr.bf16.mxu1 %v14095_v63  ;;  %v14148_v59 = vcombine.low %v1369_v46, %v1373_v47  ;;  %v1389_v63 = vld [vmem:[#allocation4 + $0x5f0] sm:$0xff]  ;;  %v14158_v4 = vcombine.low %v1378_v56, %v1382_v58  ;;  %v1438_v50 = vld [vmem:[#allocation4 + $0x778] sm:$0xff] }
 0x19c   :  { %v14165_v5 = vcombine.high %v1385_v62, %v1389_v63  ;;  %v1433_v47 = vld [vmem:[#allocation4 + $0x750] sm:$0xff] }
 0x19e   :  { %3820 = vmatpush1.bf16.msra.mxu0 %v14092_v1  ;;  %3949 = vmatpush1.bf16.msra.mxu1 %v14094_v2  ;;  %v14159_v1 = vcombine.high %v1378_v56, %v1382_v58  ;;  %v1390_v2 = vld [vmem:[#allocation4 + $0x5f8] sm:$0xff]  ;;  %v1445_v56 = vld [vmem:[#allocation4 + $0x7b0] sm:$0xff] }
 0x19f   :  { %3821 = vmatprep.subr.bf16.mxu0 %v14101_v3  ;;  %3950 = vmatprep.subr.bf16.mxu1 %v14103_v7  ;;  %v14156_v3 = vcombine.low %v1377_v54, %v1381_v55  ;;  %v1397_v7 = vld [vmem:[#allocation4 + $0x630] sm:$0xff]  ;;  %v14166_v12 = vcombine.low %v1386_v0, %v1390_v2  ;;  %v1446_v58 = vld [vmem:[#allocation4 + $0x7b8] sm:$0xff] }
 0x1a0   :  { %v14173_v13 = vcombine.high %v1393_v6, %v1397_v7  ;;  %v1441_v55 = vld [vmem:[#allocation4 + $0x790] sm:$0xff] }
 0x1a2   :  { %3822 = vmatpush1.bf16.msra.mxu0 %v14100_v9  ;;  %3951 = vmatpush1.bf16.msra.mxu1 %v14102_v10  ;;  %v14167_v9 = vcombine.high %v1386_v0, %v1390_v2  ;;  %v1398_v10 = vld [vmem:[#allocation4 + $0x638] sm:$0xff]  ;;  %v1453_v0 = vld [vmem:[#allocation4 + $0x7f0] sm:$0xff] }
 0x1a3   :  { %3834 = vmatprep.subr.bf16.mxu0 %v14109_v11  ;;  %3963 = vmatprep.subr.bf16.mxu1 %v14111_v15  ;;  %v14164_v11 = vcombine.low %v1385_v62, %v1389_v63  ;;  %v1405_v15 = vld [vmem:[#allocation4 + $0x670] sm:$0xff]  ;;  %v14174_v20 = vcombine.low %v1394_v8, %v1398_v10  ;;  %v1454_v2 = vld [vmem:[#allocation4 + $0x7f8] sm:$0xff] }
 0x1a4   :  { %v14181_v21 = vcombine.high %v1401_v14, %v1405_v15  ;;  %v1449_v63 = vld [vmem:[#allocation4 + $0x7d0] sm:$0xff] }
 0x1a5   :  { %3824 = vmatmul.mubr.bf16.vlgmr.msra.gmra.mrb[4].mxu0 %v16712_v25  ;;  %3953 = vmatmul.mubr.bf16.vlgmr.msra.gmra.mrb[4].mxu1 %v16712_v25 }
 0x1a6   :  { %3835 = vmatpush1.bf16.msra.mxu0 %v14108_v17  ;;  %3964 = vmatpush1.bf16.msra.mxu1 %v14110_v18  ;;  %v14175_v17 = vcombine.high %v1394_v8, %v1398_v10  ;;  %v1406_v18 = vld [vmem:[#allocation4 + $0x678] sm:$0xff]  ;;  %v1461_v8 = vld [vmem:[#allocation4 + $0x830] sm:$0xff] }
 0x1a7   :  { %3836 = vmatprep.subr.bf16.mxu0 %v14117_v19  ;;  %3965 = vmatprep.subr.bf16.mxu1 %v14119_v23  ;;  %v14172_v19 = vcombine.low %v1393_v6, %v1397_v7  ;;  %v1413_v23 = vld [vmem:[#allocation4 + $0x6b0] sm:$0xff]  ;;  %v14183_v25 = vcombine.high %v1402_v16, %v1406_v18  ;;  %v1462_v10 = vld [vmem:[#allocation4 + $0x838] sm:$0xff] }
 0x1a8   :  { %3866 = vmatprep.mubr.bf16.mxu0 %v16713_v34  ;;  %3995 = vmatprep.mubr.bf16.mxu1 %v16713_v34  ;;  %v14189_v29 = vcombine.high %v1409_v22, %v1413_v23  ;;  %v1422_v34 = vld [vmem:[#allocation4 + $0x6f8] sm:$0xff]  ;;  %v1457_v7 = vld [vmem:[#allocation4 + $0x810] sm:$0xff] }
 0x1a9   :  { %v14199_v38 = vcombine.high %v1418_v33, %v1422_v34 }
 0x1aa   :  { %3837 = vmatpush1.bf16.msra.mxu0 %v14116_v26  ;;  %3966 = vmatpush1.bf16.msra.mxu1 %v14118_v27  ;;  %v1414_v26 = vld [vmem:[#allocation4 + $0x6b8] sm:$0xff]  ;;  %v14180_v27 = vcombine.low %v1401_v14, %v1405_v15  ;;  %v1465_v15 = vld [vmem:[#allocation4 + $0x850] sm:$0xff] }
 0x1ab   :  { %3838 = vmatprep.subr.bf16.mxu0 %v14125_v28  ;;  %3967 = vmatprep.subr.bf16.mxu1 %v14127_v32  ;;  %v14182_v28 = vcombine.low %v1402_v16, %v1406_v18  ;;  %v14191_v30 = vcombine.high %v1410_v24, %v1414_v26  ;;  %v1421_v32 = vld [vmem:[#allocation4 + $0x6f0] sm:$0xff]  ;;  %v1470_v18 = vld [vmem:[#allocation4 + $0x878] sm:$0xff] }
 0x1ac   :  { %v1469_v16 = vld [vmem:[#allocation4 + $0x870] sm:$0xff] }
 0x1ae   :  { %3839 = vmatpush1.bf16.msra.mxu0 %v14124_v35  ;;  %3968 = vmatpush1.bf16.msra.mxu1 %v14126_v36  ;;  %v14188_v35 = vcombine.low %v1409_v22, %v1413_v23  ;;  %v14190_v36 = vcombine.low %v1410_v24, %v1414_v26  ;;  %v1473_v23 = vld [vmem:[#allocation4 + $0x890] sm:$0xff]  ;;  %v1474_v26 = vld [vmem:[#allocation4 + $0x898] sm:$0xff] }
 0x1af   :  { %3840 = vmatprep.subr.bf16.mxu0 %v14133_v37  ;;  %3969 = vmatprep.subr.bf16.mxu1 %v14135_v41  ;;  %v14197_v37 = vcombine.high %v1417_v31, %v1421_v32  ;;  %v1426_v41 = vld [vmem:[#allocation4 + $0x718] sm:$0xff]  ;;  %v1477_v24 = vld [vmem:[#allocation4 + $0x8b0] sm:$0xff] }
 0x1b0   :  { %v14207_v46 = vcombine.high %v1426_v41, %v1430_v42 }
 0x1b2   :  { %3841 = vmatpush1.bf16.msra.mxu0 %v14132_v43  ;;  %3970 = vmatpush1.bf16.msra.mxu1 %v14134_v44  ;;  %v14196_v43 = vcombine.low %v1417_v31, %v1421_v32  ;;  %v14198_v44 = vcombine.low %v1418_v33, %v1422_v34  ;;  %v1481_v32 = vld [vmem:[#allocation4 + $0x8d0] sm:$0xff] }
 0x1b3   :  { %3842 = vmatprep.subr.bf16.mxu0 %v14141_v45  ;;  %3971 = vmatprep.subr.bf16.mxu1 %v14143_v49  ;;  %v14205_v45 = vcombine.high %v1425_v39, %v1429_v40  ;;  %v1434_v49 = vld [vmem:[#allocation4 + $0x758] sm:$0xff]  ;;  %v1485_v33 = vld [vmem:[#allocation4 + $0x8f0] sm:$0xff] }
 0x1b4   :  { %v14215_v54 = vcombine.high %v1434_v49, %v1438_v50  ;;  %v16715_v34 = vld [vmem:[%s17436_s1 + $0x14] ss:$24 sps:$4 sm:$0xff]  }
 0x1b6   :  { %3843 = vmatpush1.bf16.msra.mxu0 %v14140_v51  ;;  %3972 = vmatpush1.bf16.msra.mxu1 %v14142_v52  ;;  %v14204_v51 = vcombine.low %v1425_v39, %v1429_v40  ;;  %v14206_v52 = vcombine.low %v1426_v41, %v1430_v42  ;;  %v14261_v39 = vcombine.high %v1481_v32, %v1485_v33  ;;  %v1489_v41 = vld [vmem:[#allocation4 + $0x910] sm:$0xff] }
 0x1b7   :  { %3844 = vmatprep.subr.bf16.mxu0 %v14149_v53  ;;  %3973 = vmatprep.subr.bf16.mxu1 %v14151_v57  ;;  %v14213_v53 = vcombine.high %v1433_v47, %v1437_v48  ;;  %v1442_v57 = vld [vmem:[#allocation4 + $0x798] sm:$0xff]  ;;  %v1493_v42 = vld [vmem:[#allocation4 + $0x930] sm:$0xff] }
 0x1b8   :  { %v14223_v62 = vcombine.high %v1442_v57, %v1446_v58 }
 0x1ba   :  { %3845 = vmatpush1.bf16.msra.mxu0 %v14148_v59  ;;  %3974 = vmatpush1.bf16.msra.mxu1 %v14150_v60  ;;  %v14212_v59 = vcombine.low %v1433_v47, %v1437_v48  ;;  %v14214_v60 = vcombine.low %v1434_v49, %v1438_v50  ;;  %v14269_v47 = vcombine.high %v1489_v41, %v1493_v42  ;;  %v1497_v49 = vld [vmem:[#allocation4 + $0x950] sm:$0xff] }
 0x1bb   :  { %3846 = vmatprep.subr.bf16.mxu0 %v14157_v61  ;;  %3975 = vmatprep.subr.bf16.mxu1 %v14159_v1  ;;  %v14221_v61 = vcombine.high %v1441_v55, %v1445_v56  ;;  %v1450_v1 = vld [vmem:[#allocation4 + $0x7d8] sm:$0xff]  ;;  %v1501_v50 = vld [vmem:[#allocation4 + $0x970] sm:$0xff] }
 0x1bc   :  { %v14231_v6 = vcombine.high %v1450_v1, %v1454_v2 }
 0x1be   :  { %3847 = vmatpush1.bf16.msra.mxu0 %v14156_v3  ;;  %3976 = vmatpush1.bf16.msra.mxu1 %v14158_v4  ;;  %v14220_v3 = vcombine.low %v1441_v55, %v1445_v56  ;;  %v14222_v4 = vcombine.low %v1442_v57, %v1446_v58  ;;  %v14277_v55 = vcombine.high %v1497_v49, %v1501_v50  ;;  %v1505_v57 = vld [vmem:[#allocation4 + $0x990] sm:$0xff] }
 0x1bf   :  { %3848 = vmatprep.subr.bf16.mxu0 %v14165_v5  ;;  %3977 = vmatprep.subr.bf16.mxu1 %v14167_v9  ;;  %v14229_v5 = vcombine.high %v1449_v63, %v1453_v0  ;;  %v1458_v9 = vld [vmem:[#allocation4 + $0x818] sm:$0xff]  ;;  %v1509_v58 = vld [vmem:[#allocation4 + $0x9b0] sm:$0xff] }
 0x1c0   :  { %v14239_v14 = vcombine.high %v1458_v9, %v1462_v10 }
 0x1c2   :  { %3849 = vmatpush1.bf16.msra.mxu0 %v14164_v11  ;;  %3978 = vmatpush1.bf16.msra.mxu1 %v14166_v12  ;;  %v14228_v11 = vcombine.low %v1449_v63, %v1453_v0  ;;  %v14230_v12 = vcombine.low %v1450_v1, %v1454_v2  ;;  %v14285_v63 = vcombine.high %v1505_v57, %v1509_v58  ;;  %v1513_v1 = vld [vmem:[#allocation4 + $0x9d0] sm:$0xff] }
 0x1c3   :  { %3850 = vmatprep.subr.bf16.mxu0 %v14173_v13  ;;  %3979 = vmatprep.subr.bf16.mxu1 %v14175_v17  ;;  %v14237_v13 = vcombine.high %v1457_v7, %v1461_v8  ;;  %v1466_v17 = vld [vmem:[#allocation4 + $0x858] sm:$0xff]  ;;  %v1517_v2 = vld [vmem:[#allocation4 + $0x9f0] sm:$0xff] }
 0x1c4   :  { %v14247_v22 = vcombine.high %v1466_v17, %v1470_v18 }
 0x1c6   :  { %3851 = vmatpush1.bf16.msra.mxu0 %v14172_v19  ;;  %3980 = vmatpush1.bf16.msra.mxu1 %v14174_v20  ;;  %v14236_v19 = vcombine.low %v1457_v7, %v1461_v8  ;;  %v14238_v20 = vcombine.low %v1458_v9, %v1462_v10  ;;  %v14293_v7 = vcombine.high %v1513_v1, %v1517_v2  ;;  %v1521_v9 = vld [vmem:[#allocation4 + $0xa10] sm:$0xff] }
 0x1c7   :  { %3852 = vmatprep.subr.bf16.mxu0 %v14181_v21  ;;  %3981 = vmatprep.subr.bf16.mxu1 %v14183_v25  ;;  %v14245_v21 = vcombine.high %v1465_v15, %v1469_v16  ;;  %v16714_v25 = vld [vmem:[%s17436_s1 + $0x8] ss:$24 sps:$4 sm:$0xff]   ;;  %v1525_v10 = vld [vmem:[#allocation4 + $0xa30] sm:$0xff] }
 0x1ca   :  { %3853 = vmatpush1.bf16.msra.mxu0 %v14180_v27  ;;  %3982 = vmatpush1.bf16.msra.mxu1 %v14182_v28  ;;  %v1478_v27 = vld [vmem:[#allocation4 + $0x8b8] sm:$0xff]  ;;  %v14244_v28 = vcombine.low %v1465_v15, %v1469_v16  ;;  %v14301_v15 = vcombine.high %v1521_v9, %v1525_v10 }
 0x1cb   :  { %3854 = vmatprep.subr.bf16.mxu0 %v14189_v29  ;;  %3983 = vmatprep.subr.bf16.mxu1 %v14191_v30  ;;  %v14246_v29 = vcombine.low %v1466_v17, %v1470_v18  ;;  %v14253_v30 = vcombine.high %v1473_v23, %v1477_v24  ;;  %v14255_v31 = vcombine.high %v1474_v26, %v1478_v27  ;;  %v1529_v17 = vld [vmem:[#allocation4 + $0xa50] sm:$0xff] }
 0x1cc   :  { %v1533_v18 = vld [vmem:[#allocation4 + $0xa70] sm:$0xff] }
 0x1ce   :  { %3855 = vmatpush1.bf16.msra.mxu0 %v14188_v35  ;;  %3984 = vmatpush1.bf16.msra.mxu1 %v14190_v36  ;;  %v1482_v35 = vld [vmem:[#allocation4 + $0x8d8] sm:$0xff] }
 0x1cf   :  { %3856 = vmatprep.subr.bf16.mxu0 %v14197_v37  ;;  %3985 = vmatprep.subr.bf16.mxu1 %v14199_v38  ;;  %v1486_v36 = vld [vmem:[#allocation4 + $0x8f8] sm:$0xff]  ;;  %v14252_v37 = vcombine.low %v1473_v23, %v1477_v24  ;;  %v14254_v38 = vcombine.low %v1474_v26, %v1478_v27  ;;  %v14309_v23 = vcombine.high %v1529_v17, %v1533_v18  ;;  %v1541_v26 = vld [vmem:[#allocation4 + $0xab0] sm:$0xff] }
 0x1d0   :  { %v14263_v40 = vcombine.high %v1482_v35, %v1486_v36  ;;  %v1538_v27 = vld [vmem:[#allocation4 + $0xa98] sm:$0xff] }
 0x1d2   :  { %3857 = vmatpush1.bf16.msra.mxu0 %v14196_v43  ;;  %3986 = vmatpush1.bf16.msra.mxu1 %v14198_v44  ;;  %v1490_v43 = vld [vmem:[#allocation4 + $0x918] sm:$0xff] }
 0x1d3   :  { %3858 = vmatprep.subr.bf16.mxu0 %v14205_v45  ;;  %3987 = vmatprep.subr.bf16.mxu1 %v14207_v46  ;;  %v1494_v44 = vld [vmem:[#allocation4 + $0x938] sm:$0xff]  ;;  %v14260_v45 = vcombine.low %v1481_v32, %v1485_v33  ;;  %v14262_v46 = vcombine.low %v1482_v35, %v1486_v36  ;;  %v1545_v33 = vld [vmem:[#allocation4 + $0xad0] sm:$0xff] }
 0x1d4   :  { %v14271_v48 = vcombine.high %v1490_v43, %v1494_v44  ;;  %v1546_v35 = vld [vmem:[#allocation4 + $0xad8] sm:$0xff] }
 0x1d5   :  { %v1550_v36 = vld [vmem:[#allocation4 + $0xaf8] sm:$0xff] }
 0x1d6   :  { %3859 = vmatpush1.bf16.msra.mxu0 %v14204_v51  ;;  %3988 = vmatpush1.bf16.msra.mxu1 %v14206_v52  ;;  %v1498_v51 = vld [vmem:[#allocation4 + $0x958] sm:$0xff] }
 0x1d7   :  { %3860 = vmatprep.subr.bf16.mxu0 %v14213_v53  ;;  %3989 = vmatprep.subr.bf16.mxu1 %v14215_v54  ;;  %v1502_v52 = vld [vmem:[#allocation4 + $0x978] sm:$0xff]  ;;  %v14268_v53 = vcombine.low %v1489_v41, %v1493_v42  ;;  %v14270_v54 = vcombine.low %v1490_v43, %v1494_v44  ;;  %v1553_v41 = vld [vmem:[#allocation4 + $0xb10] sm:$0xff] }
 0x1d8   :  { %v14279_v56 = vcombine.high %v1498_v51, %v1502_v52  ;;  %v1557_v42 = vld [vmem:[#allocation4 + $0xb30] sm:$0xff]  ;;  %v1554_v43 = vld [vmem:[#allocation4 + $0xb18] sm:$0xff] }
 0x1d9   :  { %v1558_v44 = vld [vmem:[#allocation4 + $0xb38] sm:$0xff] }
 0x1da   :  { %3861 = vmatpush1.bf16.msra.mxu0 %v14212_v59  ;;  %3990 = vmatpush1.bf16.msra.mxu1 %v14214_v60  ;;  %v1506_v59 = vld [vmem:[#allocation4 + $0x998] sm:$0xff] }
 0x1db   :  { %3862 = vmatprep.subr.bf16.mxu0 %v14221_v61  ;;  %3991 = vmatprep.subr.bf16.mxu1 %v14223_v62  ;;  %v1510_v60 = vld [vmem:[#allocation4 + $0x9b8] sm:$0xff]  ;;  %v14276_v61 = vcombine.low %v1497_v49, %v1501_v50  ;;  %v14278_v62 = vcombine.low %v1498_v51, %v1502_v52  ;;  %v1561_v49 = vld [vmem:[#allocation4 + $0xb50] sm:$0xff] }
 0x1dc   :  { %v14287_v0 = vcombine.high %v1506_v59, %v1510_v60  ;;  %v1565_v50 = vld [vmem:[#allocation4 + $0xb70] sm:$0xff]  ;;  %v1562_v51 = vld [vmem:[#allocation4 + $0xb58] sm:$0xff] }
 0x1dd   :  { %v1566_v52 = vld [vmem:[#allocation4 + $0xb78] sm:$0xff] }
 0x1de   :  { %3863 = vmatpush1.bf16.msra.mxu0 %v14220_v3  ;;  %3992 = vmatpush1.bf16.msra.mxu1 %v14222_v4  ;;  %v1514_v3 = vld [vmem:[#allocation4 + $0x9d8] sm:$0xff] }
 0x1df   :  { %3864 = vmatprep.subr.bf16.mxu0 %v14229_v5  ;;  %3993 = vmatprep.subr.bf16.mxu1 %v14231_v6  ;;  %v1518_v4 = vld [vmem:[#allocation4 + $0x9f8] sm:$0xff]  ;;  %v14284_v5 = vcombine.low %v1505_v57, %v1509_v58  ;;  %v14286_v6 = vcombine.low %v1506_v59, %v1510_v60  ;;  %v1569_v57 = vld [vmem:[#allocation4 + $0xb90] sm:$0xff] }
 0x1e0   :  { %v14295_v8 = vcombine.high %v1514_v3, %v1518_v4  ;;  %v1573_v58 = vld [vmem:[#allocation4 + $0xbb0] sm:$0xff]  ;;  %v1570_v59 = vld [vmem:[#allocation4 + $0xb98] sm:$0xff] }
 0x1e1   :  { %v1574_v60 = vld [vmem:[#allocation4 + $0xbb8] sm:$0xff] }
 0x1e2   :  { %3865 = vmatpush1.bf16.msra.mxu0 %v14228_v11  ;;  %3994 = vmatpush1.bf16.msra.mxu1 %v14230_v12  ;;  %v1522_v11 = vld [vmem:[#allocation4 + $0xa18] sm:$0xff] }
 0x1e3   :  { %3877 = vmatprep.subr.bf16.mxu0 %v14237_v13  ;;  %4006 = vmatprep.subr.bf16.mxu1 %v14239_v14  ;;  %v1526_v12 = vld [vmem:[#allocation4 + $0xa38] sm:$0xff]  ;;  %v14292_v13 = vcombine.low %v1513_v1, %v1517_v2  ;;  %v14294_v14 = vcombine.low %v1514_v3, %v1518_v4  ;;  %v1577_v1 = vld [vmem:[#allocation4 + $0xbd0] sm:$0xff] }
 0x1e4   :  { %v14303_v16 = vcombine.high %v1522_v11, %v1526_v12  ;;  %v1581_v2 = vld [vmem:[#allocation4 + $0xbf0] sm:$0xff]  ;;  %v1578_v3 = vld [vmem:[#allocation4 + $0xbd8] sm:$0xff] }
 0x1e5   :  { %3867 = vmatmul.mubr.bf16.vlgmr.msra.gmra.mrb[4].mxu0 %v16714_v25  ;;  %3996 = vmatmul.mubr.bf16.vlgmr.msra.gmra.mrb[4].mxu1 %v16714_v25  ;;  %v1537_v25 = vld [vmem:[#allocation4 + $0xa90] sm:$0xff]  ;;  %v1582_v4 = vld [vmem:[#allocation4 + $0xbf8] sm:$0xff] }
 0x1e6   :  { %3878 = vmatpush1.bf16.msra.mxu0 %v14236_v19  ;;  %4007 = vmatpush1.bf16.msra.mxu1 %v14238_v20  ;;  %v1530_v19 = vld [vmem:[#allocation4 + $0xa58] sm:$0xff] }
 0x1e7   :  { %3879 = vmatprep.subr.bf16.mxu0 %v14245_v21  ;;  %4008 = vmatprep.subr.bf16.mxu1 %v14247_v22  ;;  %v1534_v20 = vld [vmem:[#allocation4 + $0xa78] sm:$0xff]  ;;  %v14300_v21 = vcombine.low %v1521_v9, %v1525_v10  ;;  %v14302_v22 = vcombine.low %v1522_v11, %v1526_v12  ;;  %v169_v9 = vld [vmem:[#allocation2] sm:$0xff]  ;;  %v170_v11 = vld [vmem:[#allocation2 + $0x8] sm:$0xff] }
 0x1e8   :  { %3909 = vmatprep.mubr.bf16.mxu0 %v16715_v34  ;;  %4038 = vmatprep.mubr.bf16.mxu1 %v16715_v34  ;;  %v14311_v24 = vcombine.high %v1530_v19, %v1534_v20  ;;  %v1549_v34 = vld [vmem:[#allocation4 + $0xaf0] sm:$0xff]  ;;  %v173_v10 = vld [vmem:[#allocation2 + $0x20] sm:$0xff]  ;;  %v174_v12 = vld [vmem:[#allocation2 + $0x28] sm:$0xff] }
 0x1ea   :  { %3880 = vmatpush1.bf16.msra.mxu0 %v14244_v28  ;;  %4009 = vmatpush1.bf16.msra.mxu1 %v14246_v29  ;;  %v1542_v28 = vld [vmem:[#allocation4 + $0xab8] sm:$0xff]  ;;  %v14308_v29 = vcombine.low %v1529_v17, %v1533_v18  ;;  %v177_v17 = vld [vmem:[#allocation2 + $0x40] sm:$0xff] }
 0x1eb   :  { %3881 = vmatprep.subr.bf16.mxu0 %v14253_v30  ;;  %4010 = vmatprep.subr.bf16.mxu1 %v14255_v31  ;;  %v14310_v30 = vcombine.low %v1530_v19, %v1534_v20  ;;  %v14317_v31 = vcombine.high %v1537_v25, %v1541_v26  ;;  %v14319_v32 = vcombine.high %v1538_v27, %v1542_v28  ;;  %v181_v18 = vld [vmem:[#allocation2 + $0x60] sm:$0xff]  ;;  %v178_v19 = vld [vmem:[#allocation2 + $0x48] sm:$0xff] }
 0x1ec   :  { %v182_v20 = vld [vmem:[#allocation2 + $0x68] sm:$0xff] }
 0x1ee   :  { %3882 = vmatpush1.bf16.msra.mxu0 %v14252_v37  ;;  %4011 = vmatpush1.bf16.msra.mxu1 %v14254_v38  ;;  %v14316_v37 = vcombine.low %v1537_v25, %v1541_v26  ;;  %v14318_v38 = vcombine.low %v1538_v27, %v1542_v28  ;;  %v14385_v25 = vcombine.high %v177_v17, %v181_v18  ;;  %v185_v27 = vld [vmem:[#allocation2 + $0x80] sm:$0xff] }
 0x1ef   :  { %3883 = vmatprep.subr.bf16.mxu0 %v14261_v39  ;;  %4012 = vmatprep.subr.bf16.mxu1 %v14263_v40  ;;  %v14325_v39 = vcombine.high %v1545_v33, %v1549_v34  ;;  %v14327_v40 = vcombine.high %v1546_v35, %v1550_v36  ;;  %v14387_v26 = vcombine.high %v178_v19, %v182_v20  ;;  %v189_v28 = vld [vmem:[#allocation2 + $0xa0] sm:$0xff] }
 0x1f2   :  { %3884 = vmatpush1.bf16.msra.mxu0 %v14260_v45  ;;  %4013 = vmatpush1.bf16.msra.mxu1 %v14262_v46  ;;  %v14324_v45 = vcombine.low %v1545_v33, %v1549_v34  ;;  %v14326_v46 = vcombine.low %v1546_v35, %v1550_v36  ;;  %v14384_v33 = vcombine.low %v177_v17, %v181_v18 }
 0x1f3   :  { %3885 = vmatprep.subr.bf16.mxu0 %v14269_v47  ;;  %4014 = vmatprep.subr.bf16.mxu1 %v14271_v48  ;;  %v14333_v47 = vcombine.high %v1553_v41, %v1557_v42  ;;  %v14335_v48 = vcombine.high %v1554_v43, %v1558_v44  ;;  %v14386_v34 = vcombine.low %v178_v19, %v182_v20 }
 0x1f4   :  { %v14393_v35 = vcombine.high %v185_v27, %v189_v28 }
 0x1f6   :  { %3886 = vmatpush1.bf16.msra.mxu0 %v14268_v53  ;;  %4015 = vmatpush1.bf16.msra.mxu1 %v14270_v54  ;;  %v14332_v53 = vcombine.low %v1553_v41, %v1557_v42  ;;  %v14334_v54 = vcombine.low %v1554_v43, %v1558_v44  ;;  %v14392_v41 = vcombine.low %v185_v27, %v189_v28 }
 0x1f7   :  { %3887 = vmatprep.subr.bf16.mxu0 %v14277_v55  ;;  %4016 = vmatprep.subr.bf16.mxu1 %v14279_v56  ;;  %v14341_v55 = vcombine.high %v1561_v49, %v1565_v50  ;;  %v14343_v56 = vcombine.high %v1562_v51, %v1566_v52 }
 0x1fa   :  { %3888 = vmatpush1.bf16.msra.mxu0 %v14276_v61  ;;  %4017 = vmatpush1.bf16.msra.mxu1 %v14278_v62  ;;  %v14340_v61 = vcombine.low %v1561_v49, %v1565_v50  ;;  %v14342_v62 = vcombine.low %v1562_v51, %v1566_v52 }
 0x1fb   :  { %3889 = vmatprep.subr.bf16.mxu0 %v14285_v63  ;;  %4018 = vmatprep.subr.bf16.mxu1 %v14287_v0  ;;  %v14349_v63 = vcombine.high %v1569_v57, %v1573_v58  ;;  %v14351_v0 = vcombine.high %v1570_v59, %v1574_v60 }
 0x1fe   :  { %3890 = vmatpush1.bf16.msra.mxu0 %v14284_v5  ;;  %4019 = vmatpush1.bf16.msra.mxu1 %v14286_v6  ;;  %v14348_v5 = vcombine.low %v1569_v57, %v1573_v58  ;;  %v14350_v6 = vcombine.low %v1570_v59, %v1574_v60 }
 0x1ff   :  { %3891 = vmatprep.subr.bf16.mxu0 %v14293_v7  ;;  %4020 = vmatprep.subr.bf16.mxu1 %v14295_v8  ;;  %v14357_v7 = vcombine.high %v1577_v1, %v1581_v2  ;;  %v14359_v8 = vcombine.high %v1578_v3, %v1582_v4 }
 0x202   :  { %3892 = vmatpush1.bf16.msra.mxu0 %v14292_v13  ;;  %4021 = vmatpush1.bf16.msra.mxu1 %v14294_v14  ;;  %v14356_v13 = vcombine.low %v1577_v1, %v1581_v2  ;;  %v14358_v14 = vcombine.low %v1578_v3, %v1582_v4 }
 0x203   :  { %3893 = vmatprep.subr.bf16.mxu0 %v14301_v15  ;;  %4022 = vmatprep.subr.bf16.mxu1 %v14303_v16  ;;  %v14377_v15 = vcombine.high %v169_v9, %v173_v10  ;;  %v14379_v16 = vcombine.high %v170_v11, %v174_v12 }
 0x206   :  { %3894 = vmatpush1.bf16.msra.mxu0 %v14300_v21  ;;  %4023 = vmatpush1.bf16.msra.mxu1 %v14302_v22  ;;  %v17165_v21 = vld [vmem:[%s17435_s0] sm:$0xff] }
 0x207   :  { %3895 = vmatprep.subr.bf16.mxu0 %v14309_v23  ;;  %4024 = vmatprep.subr.bf16.mxu1 %v14311_v24  ;;  %v17170_v22 = vld [vmem:[%s17435_s0 + $0x40] sm:$0xff]  ;;  %v14376_v23 = vcombine.low %v169_v9, %v173_v10  ;;  %v14378_v24 = vcombine.low %v170_v11, %v174_v12 }
 0x20a   :  { %3896 = vmatpush1.bf16.msra.mxu0 %v14308_v29  ;;  %4025 = vmatpush1.bf16.msra.mxu1 %v14310_v30  ;;  %v17174_v29 = vcombine.high %v17165_v21, %v17170_v22  ;;  %v16716_v30 = vld [vmem:[%s17436_s1 + $0x10] ss:$24 sps:$4 sm:$0xff]  }
 0x20b   :  { %3897 = vmatprep.subr.bf16.mxu0 %v14317_v31  ;;  %4026 = vmatprep.subr.bf16.mxu1 %v14319_v32  ;;  %v186_v31 = vld [vmem:[#allocation2 + $0x88] sm:$0xff] }
 0x20c   :  { %v190_v32 = vld [vmem:[#allocation2 + $0xa8] sm:$0xff] }
 0x20d   :  { %v14395_v36 = vcombine.high %v186_v31, %v190_v32  ;;  %v14394_v42 = vcombine.low %v186_v31, %v190_v32  ;;  %v249_v32 = vld [vmem:[#allocation2 + $0x280] sm:$0xff] }
 0x20e   :  { %3898 = vmatpush1.bf16.msra.mxu0 %v14316_v37  ;;  %4027 = vmatpush1.bf16.msra.mxu1 %v14318_v38  ;;  %v193_v37 = vld [vmem:[#allocation2 + $0xc0] sm:$0xff] }
 0x20f   :  { %3899 = vmatprep.subr.bf16.mxu0 %v14325_v39  ;;  %4028 = vmatprep.subr.bf16.mxu1 %v14327_v40  ;;  %v197_v38 = vld [vmem:[#allocation2 + $0xe0] sm:$0xff]  ;;  %v194_v39 = vld [vmem:[#allocation2 + $0xc8] sm:$0xff] }
 0x210   :  { %v198_v40 = vld [vmem:[#allocation2 + $0xe8] sm:$0xff]  ;;  %v14401_v43 = vcombine.high %v193_v37, %v197_v38  ;;  %v14400_v49 = vcombine.low %v193_v37, %v197_v38 }
 0x211   :  { %v14403_v44 = vcombine.high %v194_v39, %v198_v40  ;;  %v14402_v50 = vcombine.low %v194_v39, %v198_v40  ;;  %v257_v40 = vld [vmem:[#allocation2 + $0x2c0] sm:$0xff] }
 0x212   :  { %3900 = vmatpush1.bf16.msra.mxu0 %v14324_v45  ;;  %4029 = vmatpush1.bf16.msra.mxu1 %v14326_v46  ;;  %v201_v45 = vld [vmem:[#allocation2 + $0x100] sm:$0xff] }
 0x213   :  { %3901 = vmatprep.subr.bf16.mxu0 %v14333_v47  ;;  %4030 = vmatprep.subr.bf16.mxu1 %v14335_v48  ;;  %v205_v46 = vld [vmem:[#allocation2 + $0x120] sm:$0xff]  ;;  %v202_v47 = vld [vmem:[#allocation2 + $0x108] sm:$0xff] }
 0x214   :  { %v206_v48 = vld [vmem:[#allocation2 + $0x128] sm:$0xff]  ;;  %v14409_v51 = vcombine.high %v201_v45, %v205_v46  ;;  %v14408_v57 = vcombine.low %v201_v45, %v205_v46 }
 0x215   :  { %v14411_v52 = vcombine.high %v202_v47, %v206_v48  ;;  %v14410_v58 = vcombine.low %v202_v47, %v206_v48  ;;  %v265_v48 = vld [vmem:[#allocation2 + $0x300] sm:$0xff] }
 0x216   :  { %3902 = vmatpush1.bf16.msra.mxu0 %v14332_v53  ;;  %4031 = vmatpush1.bf16.msra.mxu1 %v14334_v54  ;;  %v209_v53 = vld [vmem:[#allocation2 + $0x140] sm:$0xff] }
 0x217   :  { %3903 = vmatprep.subr.bf16.mxu0 %v14341_v55  ;;  %4032 = vmatprep.subr.bf16.mxu1 %v14343_v56  ;;  %v213_v54 = vld [vmem:[#allocation2 + $0x160] sm:$0xff]  ;;  %v210_v55 = vld [vmem:[#allocation2 + $0x148] sm:$0xff] }
 0x218   :  { %v214_v56 = vld [vmem:[#allocation2 + $0x168] sm:$0xff]  ;;  %v14417_v59 = vcombine.high %v209_v53, %v213_v54  ;;  %v14416_v1 = vcombine.low %v209_v53, %v213_v54 }
 0x219   :  { %v14419_v60 = vcombine.high %v210_v55, %v214_v56  ;;  %v14418_v2 = vcombine.low %v210_v55, %v214_v56  ;;  %v273_v56 = vld [vmem:[#allocation2 + $0x340] sm:$0xff] }
 0x21a   :  { %3904 = vmatpush1.bf16.msra.mxu0 %v14340_v61  ;;  %4033 = vmatpush1.bf16.msra.mxu1 %v14342_v62  ;;  %v217_v61 = vld [vmem:[#allocation2 + $0x180] sm:$0xff] }
 0x21b   :  { %3905 = vmatprep.subr.bf16.mxu0 %v14349_v63  ;;  %4034 = vmatprep.subr.bf16.mxu1 %v14351_v0  ;;  %v221_v62 = vld [vmem:[#allocation2 + $0x1a0] sm:$0xff]  ;;  %v218_v63 = vld [vmem:[#allocation2 + $0x188] sm:$0xff] }
 0x21c   :  { %v222_v0 = vld [vmem:[#allocation2 + $0x1a8] sm:$0xff]  ;;  %v14425_v3 = vcombine.high %v217_v61, %v221_v62  ;;  %v14424_v9 = vcombine.low %v217_v61, %v221_v62 }
 0x21d   :  { %v14427_v4 = vcombine.high %v218_v63, %v222_v0  ;;  %v14426_v10 = vcombine.low %v218_v63, %v222_v0  ;;  %v281_v0 = vld [vmem:[#allocation2 + $0x380] sm:$0xff] }
 0x21e   :  { %3906 = vmatpush1.bf16.msra.mxu0 %v14348_v5  ;;  %4035 = vmatpush1.bf16.msra.mxu1 %v14350_v6  ;;  %v225_v5 = vld [vmem:[#allocation2 + $0x1c0] sm:$0xff] }
 0x21f   :  { %3907 = vmatprep.subr.bf16.mxu0 %v14357_v7  ;;  %4036 = vmatprep.subr.bf16.mxu1 %v14359_v8  ;;  %v229_v6 = vld [vmem:[#allocation2 + $0x1e0] sm:$0xff]  ;;  %v226_v7 = vld [vmem:[#allocation2 + $0x1c8] sm:$0xff] }
 0x220   :  { %v230_v8 = vld [vmem:[#allocation2 + $0x1e8] sm:$0xff]  ;;  %v14433_v11 = vcombine.high %v225_v5, %v229_v6  ;;  %v14432_v17 = vcombine.low %v225_v5, %v229_v6 }
 0x221   :  { %v14435_v12 = vcombine.high %v226_v7, %v230_v8  ;;  %v14434_v18 = vcombine.low %v226_v7, %v230_v8  ;;  %v289_v8 = vld [vmem:[#allocation2 + $0x3c0] sm:$0xff] }
 0x222   :  { %3908 = vmatpush1.bf16.msra.mxu0 %v14356_v13  ;;  %4037 = vmatpush1.bf16.msra.mxu1 %v14358_v14  ;;  %v233_v13 = vld [vmem:[#allocation2 + $0x200] sm:$0xff] }
 0x223   :  { %9249 = vmatprep.subr.bf16.mxu0 %v14377_v15  ;;  %9593 = vmatprep.subr.bf16.mxu1 %v14379_v16  ;;  %v237_v14 = vld [vmem:[#allocation2 + $0x220] sm:$0xff]  ;;  %v234_v15 = vld [vmem:[#allocation2 + $0x208] sm:$0xff] }
 0x224   :  { %v238_v16 = vld [vmem:[#allocation2 + $0x228] sm:$0xff]  ;;  %v14441_v19 = vcombine.high %v233_v13, %v237_v14  ;;  %v14440_v27 = vcombine.low %v233_v13, %v237_v14 }
 0x225   :  { %3910 = vmatmul.mubr.bf16.vlgmr.msra.gmra.mrb[4].mxu0 %v16716_v30  ;;  %4039 = vmatmul.mubr.bf16.vlgmr.msra.gmra.mrb[4].mxu1 %v16716_v30  ;;  %v14443_v20 = vcombine.high %v234_v15, %v238_v16  ;;  %v14442_v28 = vcombine.low %v234_v15, %v238_v16  ;;  %v297_v16 = vld [vmem:[#allocation2 + $0x400] sm:$0xff] }
 0x226   :  { %9250 = vmatpush1.bf16.msra.mxu0 %v14376_v23  ;;  %9594 = vmatpush1.bf16.msra.mxu1 %v14378_v24  ;;  %v241_v23 = vld [vmem:[#allocation2 + $0x240] sm:$0xff] }
 0x227   :  { %9251 = vmatprep.subr.bf16.mxu0 %v14385_v25  ;;  %9595 = vmatprep.subr.bf16.mxu1 %v14387_v26  ;;  %v245_v24 = vld [vmem:[#allocation2 + $0x260] sm:$0xff]  ;;  %v242_v25 = vld [vmem:[#allocation2 + $0x248] sm:$0xff] }
 0x228   :  { %9281 = vmatprep.mubr.bf16.mxu0 %v17174_v29  ;;  %9625 = vmatprep.mubr.bf16.mxu1 %v17174_v29  ;;  %v246_v26 = vld [vmem:[#allocation2 + $0x268] sm:$0xff]  ;;  %v14449_v30 = vcombine.high %v241_v23, %v245_v24 }
 0x229   :  { %v14451_v31 = vcombine.high %v242_v25, %v246_v26  ;;  %v14450_v37 = vcombine.low %v242_v25, %v246_v26  ;;  %v305_v26 = vld [vmem:[#allocation2 + $0x440] sm:$0xff] }
 0x22a   :  { %9252 = vmatpush1.bf16.msra.mxu0 %v14384_v33  ;;  %9596 = vmatpush1.bf16.msra.mxu1 %v14386_v34  ;;  %v253_v33 = vld [vmem:[#allocation2 + $0x2a0] sm:$0xff]  ;;  %v250_v34 = vld [vmem:[#allocation2 + $0x288] sm:$0xff] }
 0x22b   :  { %9253 = vmatprep.subr.bf16.mxu0 %v14393_v35  ;;  %9597 = vmatprep.subr.bf16.mxu1 %v14395_v36  ;;  %v254_v35 = vld [vmem:[#allocation2 + $0x2a8] sm:$0xff]  ;;  %v14448_v36 = vcombine.low %v241_v23, %v245_v24  ;;  %v14457_v38 = vcombine.high %v249_v32, %v253_v33 }
 0x22c   :  { %v14459_v39 = vcombine.high %v250_v34, %v254_v35  ;;  %v14458_v45 = vcombine.low %v250_v34, %v254_v35 }
 0x22e   :  { %9254 = vmatpush1.bf16.msra.mxu0 %v14392_v41  ;;  %9598 = vmatpush1.bf16.msra.mxu1 %v14394_v42  ;;  %v261_v41 = vld [vmem:[#allocation2 + $0x2e0] sm:$0xff]  ;;  %v258_v42 = vld [vmem:[#allocation2 + $0x2c8] sm:$0xff] }
 0x22f   :  { %9255 = vmatprep.subr.bf16.mxu0 %v14401_v43  ;;  %9599 = vmatprep.subr.bf16.mxu1 %v14403_v44  ;;  %v262_v43 = vld [vmem:[#allocation2 + $0x2e8] sm:$0xff]  ;;  %v14456_v44 = vcombine.low %v249_v32, %v253_v33  ;;  %v14465_v46 = vcombine.high %v257_v40, %v261_v41 }
 0x230   :  { %v14467_v47 = vcombine.high %v258_v42, %v262_v43  ;;  %v14466_v53 = vcombine.low %v258_v42, %v262_v43  ;;  %v17188_v32 = vld [vmem:[%s17435_s0 + $0x8] sm:$0xff] }
 0x231   :  { %v17193_v33 = vld [vmem:[%s17435_s0 + $0x48] sm:$0xff] }
 0x232   :  { %9256 = vmatpush1.bf16.msra.mxu0 %v14400_v49  ;;  %9600 = vmatpush1.bf16.msra.mxu1 %v14402_v50  ;;  %v269_v49 = vld [vmem:[#allocation2 + $0x320] sm:$0xff]  ;;  %v266_v50 = vld [vmem:[#allocation2 + $0x308] sm:$0xff] }
 0x233   :  { %9257 = vmatprep.subr.bf16.mxu0 %v14409_v51  ;;  %9601 = vmatprep.subr.bf16.mxu1 %v14411_v52  ;;  %v270_v51 = vld [vmem:[#allocation2 + $0x328] sm:$0xff]  ;;  %v14464_v52 = vcombine.low %v257_v40, %v261_v41  ;;  %v14473_v54 = vcombine.high %v265_v48, %v269_v49 }
 0x234   :  { %v14475_v55 = vcombine.high %v266_v50, %v270_v51  ;;  %v14474_v61 = vcombine.low %v266_v50, %v270_v51  ;;  %v318_v40 = vld [vmem:[#allocation2 + $0x4a8] sm:$0xff] }
 0x236   :  { %9258 = vmatpush1.bf16.msra.mxu0 %v14408_v57  ;;  %9602 = vmatpush1.bf16.msra.mxu1 %v14410_v58  ;;  %v277_v57 = vld [vmem:[#allocation2 + $0x360] sm:$0xff]  ;;  %v274_v58 = vld [vmem:[#allocation2 + $0x348] sm:$0xff] }
 0x237   :  { %9259 = vmatprep.subr.bf16.mxu0 %v14417_v59  ;;  %9603 = vmatprep.subr.bf16.mxu1 %v14419_v60  ;;  %v278_v59 = vld [vmem:[#allocation2 + $0x368] sm:$0xff]  ;;  %v14472_v60 = vcombine.low %v265_v48, %v269_v49  ;;  %v14481_v62 = vcombine.high %v273_v56, %v277_v57 }
 0x238   :  { %v14483_v63 = vcombine.high %v274_v58, %v278_v59  ;;  %v14482_v5 = vcombine.low %v274_v58, %v278_v59  ;;  %v326_v48 = vld [vmem:[#allocation2 + $0x4e8] sm:$0xff] }
 0x23a   :  { %9260 = vmatpush1.bf16.msra.mxu0 %v14416_v1  ;;  %9604 = vmatpush1.bf16.msra.mxu1 %v14418_v2  ;;  %v285_v1 = vld [vmem:[#allocation2 + $0x3a0] sm:$0xff]  ;;  %v282_v2 = vld [vmem:[#allocation2 + $0x388] sm:$0xff] }
 0x23b   :  { %9261 = vmatprep.subr.bf16.mxu0 %v14425_v3  ;;  %9605 = vmatprep.subr.bf16.mxu1 %v14427_v4  ;;  %v286_v3 = vld [vmem:[#allocation2 + $0x3a8] sm:$0xff]  ;;  %v14480_v4 = vcombine.low %v273_v56, %v277_v57  ;;  %v14489_v6 = vcombine.high %v281_v0, %v285_v1 }
 0x23c   :  { %v14491_v7 = vcombine.high %v282_v2, %v286_v3  ;;  %v14490_v13 = vcombine.low %v282_v2, %v286_v3  ;;  %v334_v56 = vld [vmem:[#allocation2 + $0x528] sm:$0xff] }
 0x23e   :  { %9262 = vmatpush1.bf16.msra.mxu0 %v14424_v9  ;;  %9606 = vmatpush1.bf16.msra.mxu1 %v14426_v10  ;;  %v293_v9 = vld [vmem:[#allocation2 + $0x3e0] sm:$0xff]  ;;  %v290_v10 = vld [vmem:[#allocation2 + $0x3c8] sm:$0xff] }
 0x23f   :  { %9263 = vmatprep.subr.bf16.mxu0 %v14433_v11  ;;  %9607 = vmatprep.subr.bf16.mxu1 %v14435_v12  ;;  %v294_v11 = vld [vmem:[#allocation2 + $0x3e8] sm:$0xff]  ;;  %v14488_v12 = vcombine.low %v281_v0, %v285_v1  ;;  %v14497_v14 = vcombine.high %v289_v8, %v293_v9 }
 0x240   :  { %v14499_v15 = vcombine.high %v290_v10, %v294_v11  ;;  %v14498_v23 = vcombine.low %v290_v10, %v294_v11  ;;  %v342_v0 = vld [vmem:[#allocation2 + $0x568] sm:$0xff] }
 0x242   :  { %9264 = vmatpush1.bf16.msra.mxu0 %v14432_v17  ;;  %9608 = vmatpush1.bf16.msra.mxu1 %v14434_v18  ;;  %v301_v17 = vld [vmem:[#allocation2 + $0x420] sm:$0xff]  ;;  %v298_v18 = vld [vmem:[#allocation2 + $0x408] sm:$0xff] }
 0x243   :  { %9265 = vmatprep.subr.bf16.mxu0 %v14441_v19  ;;  %9609 = vmatprep.subr.bf16.mxu1 %v14443_v20  ;;  %v302_v19 = vld [vmem:[#allocation2 + $0x428] sm:$0xff]  ;;  %v14496_v20 = vcombine.low %v289_v8, %v293_v9  ;;  %v14505_v24 = vcombine.high %v297_v16, %v301_v17  ;;  %v14504_v34 = vcombine.low %v297_v16, %v301_v17 }
 0x244   :  { %v14507_v25 = vcombine.high %v298_v18, %v302_v19  ;;  %v14506_v35 = vcombine.low %v298_v18, %v302_v19  ;;  %v350_v8 = vld [vmem:[#allocation2 + $0x5a8] sm:$0xff] }
 0x245   :  { %v358_v16 = vld [vmem:[#allocation2 + $0x5e8] sm:$0xff] }
 0x246   :  { %9266 = vmatpush1.bf16.msra.mxu0 %v14440_v27  ;;  %9610 = vmatpush1.bf16.msra.mxu1 %v14442_v28  ;;  %v309_v27 = vld [vmem:[#allocation2 + $0x460] sm:$0xff]  ;;  %v306_v28 = vld [vmem:[#allocation2 + $0x448] sm:$0xff] }
 0x247   :  { %9267 = vmatprep.subr.bf16.mxu0 %v14449_v30  ;;  %9611 = vmatprep.subr.bf16.mxu1 %v14451_v31  ;;  %v17183_v30 = vcombine.low %v17165_v21, %v17170_v22  ;;  %v310_v31 = vld [vmem:[#allocation2 + $0x468] sm:$0xff]  ;;  %v313_v22 = vld [vmem:[#allocation2 + $0x480] sm:$0xff]  ;;  %v14512_v41 = vcombine.low %v305_v26, %v309_v27 }
 0x248   :  { %v14515_v21 = vcombine.high %v306_v28, %v310_v31  ;;  %v14514_v42 = vcombine.low %v306_v28, %v310_v31 }
 0x24a   :  { %9268 = vmatpush1.bf16.msra.mxu0 %v14448_v36  ;;  %9612 = vmatpush1.bf16.msra.mxu1 %v14450_v37  ;;  %v14513_v36 = vcombine.high %v305_v26, %v309_v27  ;;  %v317_v37 = vld [vmem:[#allocation2 + $0x4a0] sm:$0xff]  ;;  %v366_v26 = vld [vmem:[#allocation2 + $0x628] sm:$0xff] }
 0x24b   :  { %9269 = vmatprep.subr.bf16.mxu0 %v14457_v38  ;;  %9613 = vmatprep.subr.bf16.mxu1 %v14459_v39  ;;  %v17197_v38 = vcombine.high %v17188_v32, %v17193_v33  ;;  %v314_v39 = vld [vmem:[#allocation2 + $0x488] sm:$0xff]  ;;  %v14521_v43 = vcombine.high %v313_v22, %v317_v37  ;;  %v14520_v49 = vcombine.low %v313_v22, %v317_v37 }
 0x24c   :  { %v14522_v50 = vcombine.low %v314_v39, %v318_v40  ;;  %v374_v22 = vld [vmem:[#allocation2 + $0x668] sm:$0xff] }
 0x24e   :  { %9270 = vmatpush1.bf16.msra.mxu0 %v14456_v44  ;;  %9614 = vmatpush1.bf16.msra.mxu1 %v14458_v45  ;;  %v14523_v44 = vcombine.high %v314_v39, %v318_v40  ;;  %v321_v45 = vld [vmem:[#allocation2 + $0x4c0] sm:$0xff] }
 0x24f   :  { %9271 = vmatprep.subr.bf16.mxu0 %v14465_v46  ;;  %9615 = vmatprep.subr.bf16.mxu1 %v14467_v47  ;;  %v325_v46 = vld [vmem:[#allocation2 + $0x4e0] sm:$0xff]  ;;  %v322_v47 = vld [vmem:[#allocation2 + $0x4c8] sm:$0xff] }
 0x250   :  { %v14529_v51 = vcombine.high %v321_v45, %v325_v46  ;;  %v14528_v57 = vcombine.low %v321_v45, %v325_v46  ;;  %v14530_v58 = vcombine.low %v322_v47, %v326_v48  ;;  %v382_v45 = vld [vmem:[#allocation2 + $0x6a8] sm:$0xff] }
 0x252   :  { %9272 = vmatpush1.bf16.msra.mxu0 %v14464_v52  ;;  %9616 = vmatpush1.bf16.msra.mxu1 %v14466_v53  ;;  %v14531_v52 = vcombine.high %v322_v47, %v326_v48  ;;  %v329_v53 = vld [vmem:[#allocation2 + $0x500] sm:$0xff] }
 0x253   :  { %9273 = vmatprep.subr.bf16.mxu0 %v14473_v54  ;;  %9617 = vmatprep.subr.bf16.mxu1 %v14475_v55  ;;  %v333_v54 = vld [vmem:[#allocation2 + $0x520] sm:$0xff]  ;;  %v330_v55 = vld [vmem:[#allocation2 + $0x508] sm:$0xff] }
 0x254   :  { %v14537_v59 = vcombine.high %v329_v53, %v333_v54  ;;  %v14536_v1 = vcombine.low %v329_v53, %v333_v54  ;;  %v14538_v2 = vcombine.low %v330_v55, %v334_v56  ;;  %v390_v53 = vld [vmem:[#allocation2 + $0x6e8] sm:$0xff] }
 0x256   :  { %9274 = vmatpush1.bf16.msra.mxu0 %v14472_v60  ;;  %9618 = vmatpush1.bf16.msra.mxu1 %v14474_v61  ;;  %v14539_v60 = vcombine.high %v330_v55, %v334_v56  ;;  %v337_v61 = vld [vmem:[#allocation2 + $0x540] sm:$0xff] }
 0x257   :  { %9275 = vmatprep.subr.bf16.mxu0 %v14481_v62  ;;  %9619 = vmatprep.subr.bf16.mxu1 %v14483_v63  ;;  %v341_v62 = vld [vmem:[#allocation2 + $0x560] sm:$0xff]  ;;  %v338_v63 = vld [vmem:[#allocation2 + $0x548] sm:$0xff] }
 0x258   :  { %v14545_v3 = vcombine.high %v337_v61, %v341_v62  ;;  %v14544_v9 = vcombine.low %v337_v61, %v341_v62  ;;  %v14546_v10 = vcombine.low %v338_v63, %v342_v0  ;;  %v398_v61 = vld [vmem:[#allocation2 + $0x728] sm:$0xff] }
 0x25a   :  { %9276 = vmatpush1.bf16.msra.mxu0 %v14480_v4  ;;  %9620 = vmatpush1.bf16.msra.mxu1 %v14482_v5  ;;  %v14547_v4 = vcombine.high %v338_v63, %v342_v0  ;;  %v345_v5 = vld [vmem:[#allocation2 + $0x580] sm:$0xff] }
 0x25b   :  { %9277 = vmatprep.subr.bf16.mxu0 %v14489_v6  ;;  %9621 = vmatprep.subr.bf16.mxu1 %v14491_v7  ;;  %v349_v6 = vld [vmem:[#allocation2 + $0x5a0] sm:$0xff]  ;;  %v346_v7 = vld [vmem:[#allocation2 + $0x588] sm:$0xff] }
 0x25c   :  { %v14553_v11 = vcombine.high %v345_v5, %v349_v6  ;;  %v14552_v17 = vcombine.low %v345_v5, %v349_v6  ;;  %v14554_v18 = vcombine.low %v346_v7, %v350_v8  ;;  %v406_v5 = vld [vmem:[#allocation2 + $0x768] sm:$0xff] }
 0x25e   :  { %9278 = vmatpush1.bf16.msra.mxu0 %v14488_v12  ;;  %9622 = vmatpush1.bf16.msra.mxu1 %v14490_v13  ;;  %v14555_v12 = vcombine.high %v346_v7, %v350_v8  ;;  %v353_v13 = vld [vmem:[#allocation2 + $0x5c0] sm:$0xff] }
 0x25f   :  { %9279 = vmatprep.subr.bf16.mxu0 %v14497_v14  ;;  %9623 = vmatprep.subr.bf16.mxu1 %v14499_v15  ;;  %v357_v14 = vld [vmem:[#allocation2 + $0x5e0] sm:$0xff]  ;;  %v354_v15 = vld [vmem:[#allocation2 + $0x5c8] sm:$0xff] }
 0x260   :  { %v14561_v19 = vcombine.high %v353_v13, %v357_v14  ;;  %v14560_v27 = vcombine.low %v353_v13, %v357_v14  ;;  %v14562_v28 = vcombine.low %v354_v15, %v358_v16  ;;  %v414_v13 = vld [vmem:[#allocation2 + $0x7a8] sm:$0xff] }
 0x262   :  { %9280 = vmatpush1.bf16.msra.mxu0 %v14496_v20  ;;  %9624 = vmatpush1.bf16.msra.mxu1 %v14498_v23  ;;  %v14563_v20 = vcombine.high %v354_v15, %v358_v16  ;;  %v361_v23 = vld [vmem:[#allocation2 + $0x600] sm:$0xff] }
 0x263   :  { %9292 = vmatprep.subr.bf16.mxu0 %v14505_v24  ;;  %9636 = vmatprep.subr.bf16.mxu1 %v14507_v25  ;;  %v365_v24 = vld [vmem:[#allocation2 + $0x620] sm:$0xff]  ;;  %v362_v25 = vld [vmem:[#allocation2 + $0x608] sm:$0xff] }
 0x264   :  { %v14569_v31 = vcombine.high %v361_v23, %v365_v24  ;;  %v14568_v37 = vcombine.low %v361_v23, %v365_v24  ;;  %v14570_v39 = vcombine.low %v362_v25, %v366_v26  ;;  %v422_v23 = vld [vmem:[#allocation2 + $0x7e8] sm:$0xff] }
 0x265   :  { %9282 = vmatmul.mubr.bf16.vlgmr.msra.gmra.mrb[0].mxu0 %v17183_v30  ;;  %9626 = vmatmul.mubr.bf16.vlgmr.msra.gmra.mrb[0].mxu1 %v17183_v30 }
 0x266   :  { %9293 = vmatpush1.bf16.msra.mxu0 %v14504_v34  ;;  %9637 = vmatpush1.bf16.msra.mxu1 %v14506_v35  ;;  %v14571_v34 = vcombine.high %v362_v25, %v366_v26  ;;  %v369_v35 = vld [vmem:[#allocation2 + $0x640] sm:$0xff] }
 0x267   :  { %9294 = vmatprep.subr.bf16.mxu0 %v14513_v36  ;;  %9638 = vmatprep.subr.bf16.mxu1 %v14515_v21  ;;  %v373_v36 = vld [vmem:[#allocation2 + $0x660] sm:$0xff]  ;;  %v370_v21 = vld [vmem:[#allocation2 + $0x648] sm:$0xff] }
 0x268   :  { %9324 = vmatprep.mubr.bf16.mxu0 %v17197_v38  ;;  %9668 = vmatprep.mubr.bf16.mxu1 %v17197_v38  ;;  %v14577_v40 = vcombine.high %v369_v35, %v373_v36  ;;  %v14576_v46 = vcombine.low %v369_v35, %v373_v36  ;;  %v14578_v47 = vcombine.low %v370_v21, %v374_v22  ;;  %v430_v35 = vld [vmem:[#allocation2 + $0x828] sm:$0xff] }
 0x26a   :  { %9295 = vmatpush1.bf16.msra.mxu0 %v14512_v41  ;;  %9639 = vmatpush1.bf16.msra.mxu1 %v14514_v42  ;;  %v14579_v41 = vcombine.high %v370_v21, %v374_v22  ;;  %v377_v42 = vld [vmem:[#allocation2 + $0x680] sm:$0xff] }
 0x26b   :  { %9296 = vmatprep.subr.bf16.mxu0 %v14521_v43  ;;  %9640 = vmatprep.subr.bf16.mxu1 %v14523_v44  ;;  %v381_v43 = vld [vmem:[#allocation2 + $0x6a0] sm:$0xff]  ;;  %v378_v44 = vld [vmem:[#allocation2 + $0x688] sm:$0xff] }
 0x26c   :  { %v14585_v48 = vcombine.high %v377_v42, %v381_v43  ;;  %v14584_v54 = vcombine.low %v377_v42, %v381_v43  ;;  %v14586_v55 = vcombine.low %v378_v44, %v382_v45  ;;  %v17205_v42 = vcombine.low %v17188_v32, %v17193_v33  ;;  %v438_v43 = vld [vmem:[#allocation2 + $0x868] sm:$0xff]  ;;  %v441_v33 = vld [vmem:[#allocation2 + $0x880] sm:$0xff] }
 0x26e   :  { %9297 = vmatpush1.bf16.msra.mxu0 %v14520_v49  ;;  %9641 = vmatpush1.bf16.msra.mxu1 %v14522_v50  ;;  %v14587_v49 = vcombine.high %v378_v44, %v382_v45  ;;  %v385_v50 = vld [vmem:[#allocation2 + $0x6c0] sm:$0xff]  ;;  %v17210_v44 = vld [vmem:[%s17435_s0 + $0x10] sm:$0xff] }
 0x26f   :  { %9298 = vmatprep.subr.bf16.mxu0 %v14529_v51  ;;  %9642 = vmatprep.subr.bf16.mxu1 %v14531_v52  ;;  %v389_v51 = vld [vmem:[#allocation2 + $0x6e0] sm:$0xff]  ;;  %v386_v52 = vld [vmem:[#allocation2 + $0x6c8] sm:$0xff]  ;;  %v17215_v45 = vld [vmem:[%s17435_s0 + $0x50] sm:$0xff] }
 0x270   :  { %v14593_v56 = vcombine.high %v385_v50, %v389_v51  ;;  %v14592_v62 = vcombine.low %v385_v50, %v389_v51  ;;  %v14594_v63 = vcombine.low %v386_v52, %v390_v53  ;;  %v17219_v50 = vcombine.high %v17210_v44, %v17215_v45  ;;  %v442_v51 = vld [vmem:[#allocation2 + $0x888] sm:$0xff] }
 0x272   :  { %9299 = vmatpush1.bf16.msra.mxu0 %v14528_v57  ;;  %9643 = vmatpush1.bf16.msra.mxu1 %v14530_v58  ;;  %v14595_v57 = vcombine.high %v386_v52, %v390_v53  ;;  %v393_v58 = vld [vmem:[#allocation2 + $0x700] sm:$0xff]  ;;  %v446_v52 = vld [vmem:[#allocation2 + $0x8a8] sm:$0xff] }
 0x273   :  { %9300 = vmatprep.subr.bf16.mxu0 %v14537_v59  ;;  %9644 = vmatprep.subr.bf16.mxu1 %v14539_v60  ;;  %v397_v59 = vld [vmem:[#allocation2 + $0x720] sm:$0xff]  ;;  %v394_v60 = vld [vmem:[#allocation2 + $0x708] sm:$0xff] }
 0x274   :  { %v14601_v0 = vcombine.high %v393_v58, %v397_v59  ;;  %v14600_v6 = vcombine.low %v393_v58, %v397_v59  ;;  %v14602_v7 = vcombine.low %v394_v60, %v398_v61  ;;  %v453_v58 = vld [vmem:[#allocation2 + $0x8e0] sm:$0xff]  ;;  %v450_v59 = vld [vmem:[#allocation2 + $0x8c8] sm:$0xff] }
 0x276   :  { %9301 = vmatpush1.bf16.msra.mxu0 %v14536_v1  ;;  %9645 = vmatpush1.bf16.msra.mxu1 %v14538_v2  ;;  %v14603_v1 = vcombine.high %v394_v60, %v398_v61  ;;  %v401_v2 = vld [vmem:[#allocation2 + $0x740] sm:$0xff]  ;;  %v454_v60 = vld [vmem:[#allocation2 + $0x8e8] sm:$0xff] }
 0x277   :  { %9302 = vmatprep.subr.bf16.mxu0 %v14545_v3  ;;  %9646 = vmatprep.subr.bf16.mxu1 %v14547_v4  ;;  %v405_v3 = vld [vmem:[#allocation2 + $0x760] sm:$0xff]  ;;  %v402_v4 = vld [vmem:[#allocation2 + $0x748] sm:$0xff] }
 0x278   :  { %v14609_v8 = vcombine.high %v401_v2, %v405_v3  ;;  %v14608_v14 = vcombine.low %v401_v2, %v405_v3  ;;  %v14610_v15 = vcombine.low %v402_v4, %v406_v5  ;;  %v461_v2 = vld [vmem:[#allocation2 + $0x920] sm:$0xff]  ;;  %v458_v3 = vld [vmem:[#allocation2 + $0x908] sm:$0xff] }
 0x27a   :  { %9303 = vmatpush1.bf16.msra.mxu0 %v14544_v9  ;;  %9647 = vmatpush1.bf16.msra.mxu1 %v14546_v10  ;;  %v14611_v9 = vcombine.high %v402_v4, %v406_v5  ;;  %v409_v10 = vld [vmem:[#allocation2 + $0x780] sm:$0xff]  ;;  %v462_v4 = vld [vmem:[#allocation2 + $0x928] sm:$0xff] }
 0x27b   :  { %9304 = vmatprep.subr.bf16.mxu0 %v14553_v11  ;;  %9648 = vmatprep.subr.bf16.mxu1 %v14555_v12  ;;  %v413_v11 = vld [vmem:[#allocation2 + $0x7a0] sm:$0xff]  ;;  %v410_v12 = vld [vmem:[#allocation2 + $0x788] sm:$0xff] }
 0x27c   :  { %v14617_v16 = vcombine.high %v409_v10, %v413_v11  ;;  %v14616_v24 = vcombine.low %v409_v10, %v413_v11  ;;  %v14618_v25 = vcombine.low %v410_v12, %v414_v13  ;;  %v469_v10 = vld [vmem:[#allocation2 + $0x960] sm:$0xff]  ;;  %v466_v11 = vld [vmem:[#allocation2 + $0x948] sm:$0xff] }
 0x27e   :  { %9305 = vmatpush1.bf16.msra.mxu0 %v14552_v17  ;;  %9649 = vmatpush1.bf16.msra.mxu1 %v14554_v18  ;;  %v14619_v17 = vcombine.high %v410_v12, %v414_v13  ;;  %v417_v18 = vld [vmem:[#allocation2 + $0x7c0] sm:$0xff]  ;;  %v470_v12 = vld [vmem:[#allocation2 + $0x968] sm:$0xff] }
 0x27f   :  { %9306 = vmatprep.subr.bf16.mxu0 %v14561_v19  ;;  %9650 = vmatprep.subr.bf16.mxu1 %v14563_v20  ;;  %v421_v19 = vld [vmem:[#allocation2 + $0x7e0] sm:$0xff]  ;;  %v418_v20 = vld [vmem:[#allocation2 + $0x7c8] sm:$0xff] }
 0x280   :  { %v14625_v26 = vcombine.high %v417_v18, %v421_v19  ;;  %v14624_v36 = vcombine.low %v417_v18, %v421_v19  ;;  %v14626_v21 = vcombine.low %v418_v20, %v422_v23  ;;  %v477_v18 = vld [vmem:[#allocation2 + $0x9a0] sm:$0xff]  ;;  %v474_v19 = vld [vmem:[#allocation2 + $0x988] sm:$0xff] }
 0x282   :  { %9307 = vmatpush1.bf16.msra.mxu0 %v14560_v27  ;;  %9651 = vmatpush1.bf16.msra.mxu1 %v14562_v28  ;;  %v14627_v27 = vcombine.high %v418_v20, %v422_v23  ;;  %v425_v28 = vld [vmem:[#allocation2 + $0x800] sm:$0xff]  ;;  %v478_v20 = vld [vmem:[#allocation2 + $0x9a8] sm:$0xff] }
 0x283   :  { %9308 = vmatprep.subr.bf16.mxu0 %v14569_v31  ;;  %9652 = vmatprep.subr.bf16.mxu1 %v14571_v34  ;;  %v429_v31 = vld [vmem:[#allocation2 + $0x820] sm:$0xff]  ;;  %v426_v34 = vld [vmem:[#allocation2 + $0x808] sm:$0xff] }
 0x284   :  { %v14633_v22 = vcombine.high %v425_v28, %v429_v31 }
 0x286   :  { %9309 = vmatpush1.bf16.msra.mxu0 %v14568_v37  ;;  %9653 = vmatpush1.bf16.msra.mxu1 %v14570_v39  ;;  %v14635_v37 = vcombine.high %v426_v34, %v430_v35  ;;  %v433_v39 = vld [vmem:[#allocation2 + $0x840] sm:$0xff] }
 0x287   :  { %9310 = vmatprep.subr.bf16.mxu0 %v14577_v40  ;;  %9654 = vmatprep.subr.bf16.mxu1 %v14579_v41  ;;  %v437_v40 = vld [vmem:[#allocation2 + $0x860] sm:$0xff]  ;;  %v434_v41 = vld [vmem:[#allocation2 + $0x848] sm:$0xff] }
 0x288   :  { %v14643_v32 = vcombine.high %v434_v41, %v438_v43  ;;  %v14640_v53 = vcombine.low %v433_v39, %v437_v40 }
 0x28a   :  { %9311 = vmatpush1.bf16.msra.mxu0 %v14576_v46  ;;  %9655 = vmatpush1.bf16.msra.mxu1 %v14578_v47  ;;  %v14632_v46 = vcombine.low %v425_v28, %v429_v31  ;;  %v14634_v47 = vcombine.low %v426_v34, %v430_v35  ;;  %v485_v28 = vld [vmem:[#allocation2 + $0x9e0] sm:$0xff]  ;;  %v482_v31 = vld [vmem:[#allocation2 + $0x9c8] sm:$0xff] }
 0x28b   :  { %9312 = vmatprep.subr.bf16.mxu0 %v14585_v48  ;;  %9656 = vmatprep.subr.bf16.mxu1 %v14587_v49  ;;  %v14641_v48 = vcombine.high %v433_v39, %v437_v40  ;;  %v445_v49 = vld [vmem:[#allocation2 + $0x8a0] sm:$0xff]  ;;  %v486_v34 = vld [vmem:[#allocation2 + $0x9e8] sm:$0xff] }
 0x28c   :  { %v14648_v61 = vcombine.low %v441_v33, %v445_v49  ;;  %v493_v39 = vld [vmem:[#allocation2 + $0xa20] sm:$0xff]  ;;  %v490_v40 = vld [vmem:[#allocation2 + $0xa08] sm:$0xff] }
 0x28e   :  { %9313 = vmatpush1.bf16.msra.mxu0 %v14584_v54  ;;  %9657 = vmatpush1.bf16.msra.mxu1 %v14586_v55  ;;  %v14642_v54 = vcombine.low %v434_v41, %v438_v43  ;;  %v14649_v55 = vcombine.high %v441_v33, %v445_v49  ;;  %v494_v41 = vld [vmem:[#allocation2 + $0xa28] sm:$0xff]  ;;  %v501_v33 = vld [vmem:[#allocation2 + $0xa60] sm:$0xff] }
 0x28f   :  { %9314 = vmatprep.subr.bf16.mxu0 %v14593_v56  ;;  %9658 = vmatprep.subr.bf16.mxu1 %v14595_v57  ;;  %v14651_v56 = vcombine.high %v442_v51, %v446_v52  ;;  %v449_v57 = vld [vmem:[#allocation2 + $0x8c0] sm:$0xff]  ;;  %v498_v49 = vld [vmem:[#allocation2 + $0xa48] sm:$0xff] }
 0x290   :  { %v14656_v5 = vcombine.low %v449_v57, %v453_v58 }
 0x292   :  { %9315 = vmatpush1.bf16.msra.mxu0 %v14592_v62  ;;  %9659 = vmatpush1.bf16.msra.mxu1 %v14594_v63  ;;  %v14650_v62 = vcombine.low %v442_v51, %v446_v52  ;;  %v14657_v63 = vcombine.high %v449_v57, %v453_v58  ;;  %v502_v51 = vld [vmem:[#allocation2 + $0xa68] sm:$0xff]  ;;  %v509_v57 = vld [vmem:[#allocation2 + $0xaa0] sm:$0xff] }
 0x293   :  { %9316 = vmatprep.subr.bf16.mxu0 %v14601_v0  ;;  %9660 = vmatprep.subr.bf16.mxu1 %v14603_v1  ;;  %v14659_v0 = vcombine.high %v450_v59, %v454_v60  ;;  %v457_v1 = vld [vmem:[#allocation2 + $0x900] sm:$0xff]  ;;  %v506_v58 = vld [vmem:[#allocation2 + $0xa88] sm:$0xff] }
 0x294   :  { %v14664_v13 = vcombine.low %v457_v1, %v461_v2 }
 0x296   :  { %9317 = vmatpush1.bf16.msra.mxu0 %v14600_v6  ;;  %9661 = vmatpush1.bf16.msra.mxu1 %v14602_v7  ;;  %v14658_v6 = vcombine.low %v450_v59, %v454_v60  ;;  %v14665_v7 = vcombine.high %v457_v1, %v461_v2  ;;  %v510_v59 = vld [vmem:[#allocation2 + $0xaa8] sm:$0xff]  ;;  %v517_v1 = vld [vmem:[#allocation2 + $0xae0] sm:$0xff] }
 0x297   :  { %9318 = vmatprep.subr.bf16.mxu0 %v14609_v8  ;;  %9662 = vmatprep.subr.bf16.mxu1 %v14611_v9  ;;  %v14667_v8 = vcombine.high %v458_v3, %v462_v4  ;;  %v465_v9 = vld [vmem:[#allocation2 + $0x940] sm:$0xff]  ;;  %v514_v2 = vld [vmem:[#allocation2 + $0xac8] sm:$0xff] }
 0x298   :  { %v14672_v23 = vcombine.low %v465_v9, %v469_v10 }
 0x29a   :  { %9319 = vmatpush1.bf16.msra.mxu0 %v14608_v14  ;;  %9663 = vmatpush1.bf16.msra.mxu1 %v14610_v15  ;;  %v14666_v14 = vcombine.low %v458_v3, %v462_v4  ;;  %v14673_v15 = vcombine.high %v465_v9, %v469_v10  ;;  %v518_v3 = vld [vmem:[#allocation2 + $0xae8] sm:$0xff]  ;;  %v525_v9 = vld [vmem:[#allocation2 + $0xb20] sm:$0xff] }
 0x29b   :  { %9320 = vmatprep.subr.bf16.mxu0 %v14617_v16  ;;  %9664 = vmatprep.subr.bf16.mxu1 %v14619_v17  ;;  %v14675_v16 = vcombine.high %v466_v11, %v470_v12  ;;  %v473_v17 = vld [vmem:[#allocation2 + $0x980] sm:$0xff]  ;;  %v522_v10 = vld [vmem:[#allocation2 + $0xb08] sm:$0xff] }
 0x29c   :  { %v14680_v35 = vcombine.low %v473_v17, %v477_v18 }
 0x29e   :  { %9321 = vmatpush1.bf16.msra.mxu0 %v14616_v24  ;;  %9665 = vmatpush1.bf16.msra.mxu1 %v14618_v25  ;;  %v14674_v24 = vcombine.low %v466_v11, %v470_v12  ;;  %v14681_v25 = vcombine.high %v473_v17, %v477_v18  ;;  %v526_v11 = vld [vmem:[#allocation2 + $0xb28] sm:$0xff]  ;;  %v533_v17 = vld [vmem:[#allocation2 + $0xb60] sm:$0xff] }
 0x29f   :  { %9322 = vmatprep.subr.bf16.mxu0 %v14625_v26  ;;  %9666 = vmatprep.subr.bf16.mxu1 %v14627_v27  ;;  %v14683_v26 = vcombine.high %v474_v19, %v478_v20  ;;  %v481_v27 = vld [vmem:[#allocation2 + $0x9c0] sm:$0xff]  ;;  %v530_v18 = vld [vmem:[#allocation2 + $0xb48] sm:$0xff] }
 0x2a0   :  { %v14688_v43 = vcombine.low %v481_v27, %v485_v28 }
 0x2a2   :  { %9323 = vmatpush1.bf16.msra.mxu0 %v14624_v36  ;;  %9667 = vmatpush1.bf16.msra.mxu1 %v14626_v21  ;;  %v14682_v36 = vcombine.low %v474_v19, %v478_v20  ;;  %v14689_v21 = vcombine.high %v481_v27, %v485_v28  ;;  %v534_v19 = vld [vmem:[#allocation2 + $0xb68] sm:$0xff]  ;;  %v541_v27 = vld [vmem:[#allocation2 + $0xba0] sm:$0xff] }
 0x2a3   :  { %9335 = vmatprep.subr.bf16.mxu0 %v14633_v22  ;;  %9679 = vmatprep.subr.bf16.mxu1 %v14635_v37  ;;  %v14691_v22 = vcombine.high %v482_v31, %v486_v34  ;;  %v489_v37 = vld [vmem:[#allocation2 + $0xa00] sm:$0xff]  ;;  %v538_v28 = vld [vmem:[#allocation2 + $0xb88] sm:$0xff] }
 0x2a4   :  { %v14696_v52 = vcombine.low %v489_v37, %v493_v39 }
 0x2a5   :  { %9325 = vmatmul.mubr.bf16.vlgmr.msra.gmra.mrb[0].mxu0 %v17205_v42  ;;  %9669 = vmatmul.mubr.bf16.vlgmr.msra.gmra.mrb[0].mxu1 %v17205_v42 }
 0x2a6   :  { %9336 = vmatpush1.bf16.msra.mxu0 %v14632_v46  ;;  %9680 = vmatpush1.bf16.msra.mxu1 %v14634_v47  ;;  %v14690_v46 = vcombine.low %v482_v31, %v486_v34  ;;  %v14697_v47 = vcombine.high %v489_v37, %v493_v39  ;;  %v542_v31 = vld [vmem:[#allocation2 + $0xba8] sm:$0xff]  ;;  %v549_v37 = vld [vmem:[#allocation2 + $0xbe0] sm:$0xff] }
 0x2a7   :  { %9337 = vmatprep.subr.bf16.mxu0 %v14641_v48  ;;  %9681 = vmatprep.subr.bf16.mxu1 %v14643_v32  ;;  %v14699_v48 = vcombine.high %v490_v40, %v494_v41  ;;  %v497_v32 = vld [vmem:[#allocation2 + $0xa40] sm:$0xff]  ;;  %v546_v39 = vld [vmem:[#allocation2 + $0xbc8] sm:$0xff] }
 0x2a8   :  { %9367 = vmatprep.mubr.bf16.mxu0 %v17219_v50  ;;  %9711 = vmatprep.mubr.bf16.mxu1 %v17219_v50  ;;  %v14704_v60 = vcombine.low %v497_v32, %v501_v33 }
 0x2aa   :  { %9338 = vmatpush1.bf16.msra.mxu0 %v14640_v53  ;;  %9682 = vmatpush1.bf16.msra.mxu1 %v14642_v54  ;;  %v14698_v53 = vcombine.low %v490_v40, %v494_v41  ;;  %v14705_v54 = vcombine.high %v497_v32, %v501_v33  ;;  %v550_v40 = vld [vmem:[#allocation2 + $0xbe8] sm:$0xff]  ;;  %v557_v32 = vld [vmem:[#allocation2 + $0xc20] sm:$0xff] }
 0x2ab   :  { %9339 = vmatprep.subr.bf16.mxu0 %v14649_v55  ;;  %9683 = vmatprep.subr.bf16.mxu1 %v14651_v56  ;;  %v14707_v55 = vcombine.high %v498_v49, %v502_v51  ;;  %v505_v56 = vld [vmem:[#allocation2 + $0xa80] sm:$0xff]  ;;  %v554_v33 = vld [vmem:[#allocation2 + $0xc08] sm:$0xff] }
 0x2ac   :  { %v14712_v4 = vcombine.low %v505_v56, %v509_v57 }
 0x2ae   :  { %9340 = vmatpush1.bf16.msra.mxu0 %v14648_v61  ;;  %9684 = vmatpush1.bf16.msra.mxu1 %v14650_v62  ;;  %v14706_v61 = vcombine.low %v498_v49, %v502_v51  ;;  %v14713_v62 = vcombine.high %v505_v56, %v509_v57  ;;  %v558_v49 = vld [vmem:[#allocation2 + $0xc28] sm:$0xff]  ;;  %v565_v56 = vld [vmem:[#allocation2 + $0xc60] sm:$0xff] }
 0x2af   :  { %9341 = vmatprep.subr.bf16.mxu0 %v14657_v63  ;;  %9685 = vmatprep.subr.bf16.mxu1 %v14659_v0  ;;  %v14715_v63 = vcombine.high %v506_v58, %v510_v59  ;;  %v513_v0 = vld [vmem:[#allocation2 + $0xac0] sm:$0xff]  ;;  %v562_v57 = vld [vmem:[#allocation2 + $0xc48] sm:$0xff] }
 0x2b0   :  { %v14720_v12 = vcombine.low %v513_v0, %v517_v1 }
 0x2b2   :  { %9342 = vmatpush1.bf16.msra.mxu0 %v14656_v5  ;;  %9686 = vmatpush1.bf16.msra.mxu1 %v14658_v6  ;;  %v14714_v5 = vcombine.low %v506_v58, %v510_v59  ;;  %v14721_v6 = vcombine.high %v513_v0, %v517_v1  ;;  %v17227_v58 = vcombine.low %v17210_v44, %v17215_v45  ;;  %v566_v59 = vld [vmem:[#allocation2 + $0xc68] sm:$0xff]  ;;  %v569_v45 = vld [vmem:[#allocation2 + $0xc80] sm:$0xff] }
 0x2b3   :  { %9343 = vmatprep.subr.bf16.mxu0 %v14665_v7  ;;  %9687 = vmatprep.subr.bf16.mxu1 %v14667_v8  ;;  %v14723_v7 = vcombine.high %v514_v2, %v518_v3  ;;  %v521_v8 = vld [vmem:[#allocation2 + $0xb00] sm:$0xff]  ;;  %v14771_v44 = vcombine.high %v562_v57, %v566_v59 }
 0x2b4   :  { %v14728_v20 = vcombine.low %v521_v8, %v525_v9  ;;  %v573_v1 = vld [vmem:[#allocation2 + $0xca0] sm:$0xff] }
 0x2b6   :  { %9344 = vmatpush1.bf16.msra.mxu0 %v14664_v13  ;;  %9688 = vmatpush1.bf16.msra.mxu1 %v14666_v14  ;;  %v14722_v13 = vcombine.low %v514_v2, %v518_v3  ;;  %v14729_v14 = vcombine.high %v521_v8, %v525_v9  ;;  %v570_v3 = vld [vmem:[#allocation2 + $0xc88] sm:$0xff]  ;;  %v577_v9 = vld [vmem:[#allocation2 + $0xcc0] sm:$0xff] }
 0x2b7   :  { %9345 = vmatprep.subr.bf16.mxu0 %v14673_v15  ;;  %9689 = vmatprep.subr.bf16.mxu1 %v14675_v16  ;;  %v14731_v15 = vcombine.high %v522_v10, %v526_v11  ;;  %v529_v16 = vld [vmem:[#allocation2 + $0xb40] sm:$0xff] }
 0x2b8   :  { %v14736_v34 = vcombine.low %v529_v16, %v533_v17 }
 0x2ba   :  { %9346 = vmatpush1.bf16.msra.mxu0 %v14672_v23  ;;  %9690 = vmatpush1.bf16.msra.mxu1 %v14674_v24  ;;  %v14730_v23 = vcombine.low %v522_v10, %v526_v11  ;;  %v14737_v24 = vcombine.high %v529_v16, %v533_v17  ;;  %v581_v10 = vld [vmem:[#allocation2 + $0xce0] sm:$0xff]  ;;  %v578_v11 = vld [vmem:[#allocation2 + $0xcc8] sm:$0xff] }
 0x2bb   :  { %9347 = vmatprep.subr.bf16.mxu0 %v14681_v25  ;;  %9691 = vmatprep.subr.bf16.mxu1 %v14683_v26  ;;  %v14739_v25 = vcombine.high %v530_v18, %v534_v19  ;;  %v537_v26 = vld [vmem:[#allocation2 + $0xb80] sm:$0xff] }
 0x2bc   :  { %v14744_v41 = vcombine.low %v537_v26, %v541_v27  ;;  %v585_v17 = vld [vmem:[#allocation2 + $0xd00] sm:$0xff] }
 0x2be   :  { %9348 = vmatpush1.bf16.msra.mxu0 %v14680_v35  ;;  %9692 = vmatpush1.bf16.msra.mxu1 %v14682_v36  ;;  %v14738_v35 = vcombine.low %v530_v18, %v534_v19  ;;  %v14745_v36 = vcombine.high %v537_v26, %v541_v27  ;;  %v589_v18 = vld [vmem:[#allocation2 + $0xd20] sm:$0xff]  ;;  %v586_v19 = vld [vmem:[#allocation2 + $0xd08] sm:$0xff] }
 0x2bf   :  { %9349 = vmatprep.subr.bf16.mxu0 %v14689_v21  ;;  %9693 = vmatprep.subr.bf16.mxu1 %v14691_v22  ;;  %v14747_v21 = vcombine.high %v538_v28, %v542_v31  ;;  %v545_v22 = vld [vmem:[#allocation2 + $0xbc0] sm:$0xff] }
 0x2c0   :  { %v14752_v51 = vcombine.low %v545_v22, %v549_v37  ;;  %v593_v27 = vld [vmem:[#allocation2 + $0xd40] sm:$0xff] }
 0x2c2   :  { %9350 = vmatpush1.bf16.msra.mxu0 %v14688_v43  ;;  %9694 = vmatpush1.bf16.msra.mxu1 %v14690_v46  ;;  %v14746_v43 = vcombine.low %v538_v28, %v542_v31  ;;  %v14753_v46 = vcombine.high %v545_v22, %v549_v37  ;;  %v597_v28 = vld [vmem:[#allocation2 + $0xd60] sm:$0xff]  ;;  %v594_v31 = vld [vmem:[#allocation2 + $0xd48] sm:$0xff] }
 0x2c3   :  { %9351 = vmatprep.subr.bf16.mxu0 %v14697_v47  ;;  %9695 = vmatprep.subr.bf16.mxu1 %v14699_v48  ;;  %v14755_v47 = vcombine.high %v546_v39, %v550_v40  ;;  %v553_v48 = vld [vmem:[#allocation2 + $0xc00] sm:$0xff] }
 0x2c4   :  { %v601_v37 = vld [vmem:[#allocation2 + $0xd80] sm:$0xff] }
 0x2c6   :  { %9352 = vmatpush1.bf16.msra.mxu0 %v14696_v52  ;;  %9696 = vmatpush1.bf16.msra.mxu1 %v14698_v53  ;;  %v14754_v52 = vcombine.low %v546_v39, %v550_v40  ;;  %v14761_v53 = vcombine.high %v553_v48, %v557_v32  ;;  %v605_v39 = vld [vmem:[#allocation2 + $0xda0] sm:$0xff]  ;;  %v602_v40 = vld [vmem:[#allocation2 + $0xd88] sm:$0xff] }
 0x2c7   :  { %9353 = vmatprep.subr.bf16.mxu0 %v14705_v54  ;;  %9697 = vmatprep.subr.bf16.mxu1 %v14707_v55  ;;  %v14763_v54 = vcombine.high %v554_v33, %v558_v49  ;;  %v561_v55 = vld [vmem:[#allocation2 + $0xc40] sm:$0xff] }
 0x2c8   :  { %v14769_v0 = vcombine.high %v561_v55, %v565_v56 }
 0x2ca   :  { %9354 = vmatpush1.bf16.msra.mxu0 %v14704_v60  ;;  %9698 = vmatpush1.bf16.msra.mxu1 %v14706_v61  ;;  %v17232_v60 = vld [vmem:[%s17435_s0 + $0x18] sm:$0xff] }
 0x2cb   :  { %9355 = vmatprep.subr.bf16.mxu0 %v14713_v62  ;;  %9699 = vmatprep.subr.bf16.mxu1 %v14715_v63  ;;  %v17237_v61 = vld [vmem:[%s17435_s0 + $0x58] sm:$0xff]  ;;  %v14760_v62 = vcombine.low %v553_v48, %v557_v32  ;;  %v14762_v63 = vcombine.low %v554_v33, %v558_v49  ;;  %v609_v32 = vld [vmem:[#allocation2 + $0xdc0] sm:$0xff]  ;;  %v610_v49 = vld [vmem:[#allocation2 + $0xdc8] sm:$0xff] }
 0x2cc   :  { %v17241_v2 = vcombine.high %v17232_v60, %v17237_v61  ;;  %v613_v33 = vld [vmem:[#allocation2 + $0xde0] sm:$0xff] }
 0x2ce   :  { %9356 = vmatpush1.bf16.msra.mxu0 %v14712_v4  ;;  %9700 = vmatpush1.bf16.msra.mxu1 %v14714_v5  ;;  %v574_v4 = vld [vmem:[#allocation2 + $0xca8] sm:$0xff]  ;;  %v14768_v5 = vcombine.low %v561_v55, %v565_v56  ;;  %v617_v56 = vld [vmem:[#allocation2 + $0xe00] sm:$0xff] }
 0x2cf   :  { %9357 = vmatprep.subr.bf16.mxu0 %v14721_v6  ;;  %9701 = vmatprep.subr.bf16.mxu1 %v14723_v7  ;;  %v14770_v6 = vcombine.low %v562_v57, %v566_v59  ;;  %v14777_v7 = vcombine.high %v569_v45, %v573_v1  ;;  %v14779_v8 = vcombine.high %v570_v3, %v574_v4  ;;  %v621_v57 = vld [vmem:[#allocation2 + $0xe20] sm:$0xff]  ;;  %v618_v59 = vld [vmem:[#allocation2 + $0xe08] sm:$0xff] }
 0x2d2   :  { %9358 = vmatpush1.bf16.msra.mxu0 %v14720_v12  ;;  %9702 = vmatpush1.bf16.msra.mxu1 %v14722_v13  ;;  %v582_v12 = vld [vmem:[#allocation2 + $0xce8] sm:$0xff]  ;;  %v14776_v13 = vcombine.low %v569_v45, %v573_v1  ;;  %v625_v1 = vld [vmem:[#allocation2 + $0xe40] sm:$0xff] }
 0x2d3   :  { %9359 = vmatprep.subr.bf16.mxu0 %v14729_v14  ;;  %9703 = vmatprep.subr.bf16.mxu1 %v14731_v15  ;;  %v14778_v14 = vcombine.low %v570_v3, %v574_v4  ;;  %v14785_v15 = vcombine.high %v577_v9, %v581_v10  ;;  %v14787_v16 = vcombine.high %v578_v11, %v582_v12  ;;  %v629_v3 = vld [vmem:[#allocation2 + $0xe60] sm:$0xff]  ;;  %v626_v4 = vld [vmem:[#allocation2 + $0xe48] sm:$0xff] }
 0x2d6   :  { %9360 = vmatpush1.bf16.msra.mxu0 %v14728_v20  ;;  %9704 = vmatpush1.bf16.msra.mxu1 %v14730_v23  ;;  %v590_v20 = vld [vmem:[#allocation2 + $0xd28] sm:$0xff]  ;;  %v14784_v23 = vcombine.low %v577_v9, %v581_v10  ;;  %v633_v10 = vld [vmem:[#allocation2 + $0xe80] sm:$0xff] }
 0x2d7   :  { %9361 = vmatprep.subr.bf16.mxu0 %v14737_v24  ;;  %9705 = vmatprep.subr.bf16.mxu1 %v14739_v25  ;;  %v14786_v24 = vcombine.low %v578_v11, %v582_v12  ;;  %v14793_v25 = vcombine.high %v585_v17, %v589_v18  ;;  %v14795_v26 = vcombine.high %v586_v19, %v590_v20  ;;  %v637_v11 = vld [vmem:[#allocation2 + $0xea0] sm:$0xff]  ;;  %v634_v12 = vld [vmem:[#allocation2 + $0xe88] sm:$0xff] }
 0x2da   :  { %9362 = vmatpush1.bf16.msra.mxu0 %v14736_v34  ;;  %9706 = vmatpush1.bf16.msra.mxu1 %v14738_v35  ;;  %v598_v34 = vld [vmem:[#allocation2 + $0xd68] sm:$0xff]  ;;  %v14792_v35 = vcombine.low %v585_v17, %v589_v18  ;;  %v641_v18 = vld [vmem:[#allocation2 + $0xec0] sm:$0xff] }
 0x2db   :  { %9363 = vmatprep.subr.bf16.mxu0 %v14745_v36  ;;  %9707 = vmatprep.subr.bf16.mxu1 %v14747_v21  ;;  %v14794_v36 = vcombine.low %v586_v19, %v590_v20  ;;  %v14801_v21 = vcombine.high %v593_v27, %v597_v28  ;;  %v14803_v22 = vcombine.high %v594_v31, %v598_v34  ;;  %v645_v19 = vld [vmem:[#allocation2 + $0xee0] sm:$0xff]  ;;  %v642_v20 = vld [vmem:[#allocation2 + $0xec8] sm:$0xff] }
 0x2de   :  { %9364 = vmatpush1.bf16.msra.mxu0 %v14744_v41  ;;  %9708 = vmatpush1.bf16.msra.mxu1 %v14746_v43  ;;  %v606_v41 = vld [vmem:[#allocation2 + $0xda8] sm:$0xff]  ;;  %v14800_v43 = vcombine.low %v593_v27, %v597_v28  ;;  %v649_v28 = vld [vmem:[#allocation2 + $0xf00] sm:$0xff] }
 0x2df   :  { %9365 = vmatprep.subr.bf16.mxu0 %v14753_v46  ;;  %9709 = vmatprep.subr.bf16.mxu1 %v14755_v47  ;;  %v14802_v46 = vcombine.low %v594_v31, %v598_v34  ;;  %v14809_v47 = vcombine.high %v601_v37, %v605_v39  ;;  %v14811_v48 = vcombine.high %v602_v40, %v606_v41  ;;  %v653_v31 = vld [vmem:[#allocation2 + $0xf20] sm:$0xff]  ;;  %v650_v34 = vld [vmem:[#allocation2 + $0xf08] sm:$0xff] }
 0x2e2   :  { %9366 = vmatpush1.bf16.msra.mxu0 %v14752_v51  ;;  %9710 = vmatpush1.bf16.msra.mxu1 %v14754_v52  ;;  %v614_v51 = vld [vmem:[#allocation2 + $0xde8] sm:$0xff]  ;;  %v14808_v52 = vcombine.low %v601_v37, %v605_v39  ;;  %v657_v39 = vld [vmem:[#allocation2 + $0xf40] sm:$0xff] }
 0x2e3   :  { %9378 = vmatprep.subr.bf16.mxu0 %v14761_v53  ;;  %9722 = vmatprep.subr.bf16.mxu1 %v14763_v54  ;;  %v14810_v53 = vcombine.low %v602_v40, %v606_v41  ;;  %v14817_v54 = vcombine.high %v609_v32, %v613_v33  ;;  %v14819_v55 = vcombine.high %v610_v49, %v614_v51  ;;  %v661_v40 = vld [vmem:[#allocation2 + $0xf60] sm:$0xff]  ;;  %v658_v41 = vld [vmem:[#allocation2 + $0xf48] sm:$0xff] }
 0x2e5   :  { %9368 = vmatmul.mubr.bf16.vlgmr.msra.gmra.mrb[0].mxu0 %v17227_v58  ;;  %9712 = vmatmul.mubr.bf16.vlgmr.msra.gmra.mrb[0].mxu1 %v17227_v58 }
 0x2e6   :  { %9379 = vmatpush1.bf16.msra.mxu0 %v14760_v62  ;;  %9723 = vmatpush1.bf16.msra.mxu1 %v14762_v63  ;;  %v622_v62 = vld [vmem:[#allocation2 + $0xe28] sm:$0xff]  ;;  %v14816_v63 = vcombine.low %v609_v32, %v613_v33  ;;  %v665_v33 = vld [vmem:[#allocation2 + $0xf80] sm:$0xff] }
 0x2e7   :  { %9380 = vmatprep.subr.bf16.mxu0 %v14769_v0  ;;  %9724 = vmatprep.subr.bf16.mxu1 %v14771_v44  ;;  %v14818_v0 = vcombine.low %v610_v49, %v614_v51  ;;  %v14825_v44 = vcombine.high %v617_v56, %v621_v57  ;;  %v14827_v45 = vcombine.high %v618_v59, %v622_v62  ;;  %v669_v49 = vld [vmem:[#allocation2 + $0xfa0] sm:$0xff]  ;;  %v666_v51 = vld [vmem:[#allocation2 + $0xf88] sm:$0xff] }
 0x2e8   :  { %9410 = vmatprep.mubr.bf16.mxu0 %v17241_v2  ;;  %9754 = vmatprep.mubr.bf16.mxu1 %v17241_v2 }
 0x2ea   :  { %9381 = vmatpush1.bf16.msra.mxu0 %v14768_v5  ;;  %9725 = vmatpush1.bf16.msra.mxu1 %v14770_v6  ;;  %v630_v5 = vld [vmem:[#allocation2 + $0xe68] sm:$0xff]  ;;  %v14824_v6 = vcombine.low %v617_v56, %v621_v57  ;;  %v673_v57 = vld [vmem:[#allocation2 + $0xfc0] sm:$0xff] }
 0x2eb   :  { %9382 = vmatprep.subr.bf16.mxu0 %v14777_v7  ;;  %9726 = vmatprep.subr.bf16.mxu1 %v14779_v8  ;;  %v14826_v7 = vcombine.low %v618_v59, %v622_v62  ;;  %v14833_v8 = vcombine.high %v625_v1, %v629_v3  ;;  %v14835_v9 = vcombine.high %v626_v4, %v630_v5  ;;  %v677_v59 = vld [vmem:[#allocation2 + $0xfe0] sm:$0xff]  ;;  %v674_v62 = vld [vmem:[#allocation2 + $0xfc8] sm:$0xff] }
 0x2ee   :  { %9383 = vmatpush1.bf16.msra.mxu0 %v14776_v13  ;;  %9727 = vmatpush1.bf16.msra.mxu1 %v14778_v14  ;;  %v638_v13 = vld [vmem:[#allocation2 + $0xea8] sm:$0xff]  ;;  %v14832_v14 = vcombine.low %v625_v1, %v629_v3  ;;  %v681_v3 = vld [vmem:[#allocation2 + $0x1000] sm:$0xff] }
 0x2ef   :  { %9384 = vmatprep.subr.bf16.mxu0 %v14785_v15  ;;  %9728 = vmatprep.subr.bf16.mxu1 %v14787_v16  ;;  %v14834_v15 = vcombine.low %v626_v4, %v630_v5  ;;  %v14841_v16 = vcombine.high %v633_v10, %v637_v11  ;;  %v14843_v17 = vcombine.high %v634_v12, %v638_v13  ;;  %v685_v4 = vld [vmem:[#allocation2 + $0x1020] sm:$0xff]  ;;  %v682_v5 = vld [vmem:[#allocation2 + $0x1008] sm:$0xff] }
 0x2f2   :  { %9385 = vmatpush1.bf16.msra.mxu0 %v14784_v23  ;;  %9729 = vmatpush1.bf16.msra.mxu1 %v14786_v24  ;;  %v646_v23 = vld [vmem:[#allocation2 + $0xee8] sm:$0xff]  ;;  %v14840_v24 = vcombine.low %v633_v10, %v637_v11  ;;  %v689_v11 = vld [vmem:[#allocation2 + $0x1040] sm:$0xff] }
 0x2f3   :  { %9386 = vmatprep.subr.bf16.mxu0 %v14793_v25  ;;  %9730 = vmatprep.subr.bf16.mxu1 %v14795_v26  ;;  %v14842_v25 = vcombine.low %v634_v12, %v638_v13  ;;  %v14849_v26 = vcombine.high %v641_v18, %v645_v19  ;;  %v14851_v27 = vcombine.high %v642_v20, %v646_v23  ;;  %v693_v12 = vld [vmem:[#allocation2 + $0x1060] sm:$0xff]  ;;  %v690_v13 = vld [vmem:[#allocation2 + $0x1048] sm:$0xff] }
 0x2f6   :  { %9387 = vmatpush1.bf16.msra.mxu0 %v14792_v35  ;;  %9731 = vmatpush1.bf16.msra.mxu1 %v14794_v36  ;;  %v654_v35 = vld [vmem:[#allocation2 + $0xf28] sm:$0xff]  ;;  %v14848_v36 = vcombine.low %v641_v18, %v645_v19  ;;  %v14888_v18 = vcombine.low %v681_v3, %v685_v4 }
 0x2f7   :  { %9388 = vmatprep.subr.bf16.mxu0 %v14801_v21  ;;  %9732 = vmatprep.subr.bf16.mxu1 %v14803_v22  ;;  %v14850_v21 = vcombine.low %v642_v20, %v646_v23  ;;  %v14857_v22 = vcombine.high %v649_v28, %v653_v31  ;;  %v14859_v37 = vcombine.high %v650_v34, %v654_v35  ;;  %v701_v23 = vld [vmem:[#allocation2 + $0x10a0] sm:$0xff] }
 0x2f8   :  { %v14897_v20 = vcombine.high %v689_v11, %v693_v12 }
 0x2fa   :  { %9389 = vmatpush1.bf16.msra.mxu0 %v14800_v43  ;;  %9733 = vmatpush1.bf16.msra.mxu1 %v14802_v46  ;;  %v662_v43 = vld [vmem:[#allocation2 + $0xf68] sm:$0xff]  ;;  %v14856_v46 = vcombine.low %v649_v28, %v653_v31 }
 0x2fb   :  { %9390 = vmatprep.subr.bf16.mxu0 %v14809_v47  ;;  %9734 = vmatprep.subr.bf16.mxu1 %v14811_v48  ;;  %v14858_v47 = vcombine.low %v650_v34, %v654_v35  ;;  %v14865_v48 = vcombine.high %v657_v39, %v661_v40  ;;  %v14867_v32 = vcombine.high %v658_v41, %v662_v43  ;;  %v705_v35 = vld [vmem:[#allocation2 + $0x10c0] sm:$0xff] }
 0x2fe   :  { %9391 = vmatpush1.bf16.msra.mxu0 %v14808_v52  ;;  %9735 = vmatpush1.bf16.msra.mxu1 %v14810_v53  ;;  %v670_v52 = vld [vmem:[#allocation2 + $0xfa8] sm:$0xff]  ;;  %v14864_v53 = vcombine.low %v657_v39, %v661_v40 }
 0x2ff   :  { %9392 = vmatprep.subr.bf16.mxu0 %v14817_v54  ;;  %9736 = vmatprep.subr.bf16.mxu1 %v14819_v55  ;;  %v14866_v54 = vcombine.low %v658_v41, %v662_v43  ;;  %v14873_v55 = vcombine.high %v665_v33, %v669_v49  ;;  %v14875_v56 = vcombine.high %v666_v51, %v670_v52  ;;  %v713_v43 = vld [vmem:[#allocation2 + $0x1100] sm:$0xff] }
 0x302   :  { %9393 = vmatpush1.bf16.msra.mxu0 %v14816_v63  ;;  %9737 = vmatpush1.bf16.msra.mxu1 %v14818_v0  ;;  %v678_v63 = vld [vmem:[#allocation2 + $0xfe8] sm:$0xff]  ;;  %v14872_v0 = vcombine.low %v665_v33, %v669_v49 }
 0x303   :  { %9394 = vmatprep.subr.bf16.mxu0 %v14825_v44  ;;  %9738 = vmatprep.subr.bf16.mxu1 %v14827_v45  ;;  %v14874_v44 = vcombine.low %v666_v51, %v670_v52  ;;  %v14881_v45 = vcombine.high %v673_v57, %v677_v59  ;;  %v14883_v1 = vcombine.high %v674_v62, %v678_v63  ;;  %v721_v52 = vld [vmem:[#allocation2 + $0x1140] sm:$0xff] }
 0x306   :  { %9395 = vmatpush1.bf16.msra.mxu0 %v14824_v6  ;;  %9739 = vmatpush1.bf16.msra.mxu1 %v14826_v7  ;;  %v686_v6 = vld [vmem:[#allocation2 + $0x1028] sm:$0xff]  ;;  %v14880_v7 = vcombine.low %v673_v57, %v677_v59 }
 0x307   :  { %9396 = vmatprep.subr.bf16.mxu0 %v14833_v8  ;;  %9740 = vmatprep.subr.bf16.mxu1 %v14835_v9  ;;  %v14882_v8 = vcombine.low %v674_v62, %v678_v63  ;;  %v14889_v9 = vcombine.high %v681_v3, %v685_v4  ;;  %v14891_v10 = vcombine.high %v682_v5, %v686_v6  ;;  %v729_v63 = vld [vmem:[#allocation2 + $0x1180] sm:$0xff] }
 0x308   :  { %v14890_v19 = vcombine.low %v682_v5, %v686_v6  ;;  %v737_v6 = vld [vmem:[#allocation2 + $0x11c0] sm:$0xff] }
 0x30a   :  { %9397 = vmatpush1.bf16.msra.mxu0 %v14832_v14  ;;  %9741 = vmatpush1.bf16.msra.mxu1 %v14834_v15  ;;  %v17249_v14 = vcombine.low %v17232_v60, %v17237_v61  ;;  %v694_v15 = vld [vmem:[#allocation2 + $0x1068] sm:$0xff]  ;;  %v697_v61 = vld [vmem:[#allocation2 + $0x1080] sm:$0xff] }
 0x30b   :  { %9398 = vmatprep.subr.bf16.mxu0 %v14841_v16  ;;  %9742 = vmatprep.subr.bf16.mxu1 %v14843_v17  ;;  %v17254_v16 = vld [vmem:[%s17435_s0 + $0x20] sm:$0xff]  ;;  %v14899_v60 = vcombine.high %v690_v13, %v694_v15  ;;  %v14898_v28 = vcombine.low %v690_v13, %v694_v15  ;;  %v14905_v31 = vcombine.high %v697_v61, %v701_v23 }
 0x30c   :  { %v17259_v17 = vld [vmem:[%s17435_s0 + $0x60] sm:$0xff] }
 0x30d   :  { %v745_v15 = vld [vmem:[#allocation2 + $0x1200] sm:$0xff] }
 0x30e   :  { %9399 = vmatpush1.bf16.msra.mxu0 %v14840_v24  ;;  %9743 = vmatpush1.bf16.msra.mxu1 %v14842_v25  ;;  %v17263_v24 = vcombine.high %v17254_v16, %v17259_v17  ;;  %v698_v25 = vld [vmem:[#allocation2 + $0x1088] sm:$0xff] }
 0x30f   :  { %9400 = vmatprep.subr.bf16.mxu0 %v14849_v26  ;;  %9744 = vmatprep.subr.bf16.mxu1 %v14851_v27  ;;  %v702_v26 = vld [vmem:[#allocation2 + $0x10a8] sm:$0xff]  ;;  %v14896_v27 = vcombine.low %v689_v11, %v693_v12 }
 0x310   :  { %v14907_v34 = vcombine.high %v698_v25, %v702_v26  ;;  %v14906_v39 = vcombine.low %v698_v25, %v702_v26  ;;  %v753_v26 = vld [vmem:[#allocation2 + $0x1240] sm:$0xff] }
 0x312   :  { %9401 = vmatpush1.bf16.msra.mxu0 %v14848_v36  ;;  %9745 = vmatpush1.bf16.msra.mxu1 %v14850_v21  ;;  %v709_v36 = vld [vmem:[#allocation2 + $0x10e0] sm:$0xff]  ;;  %v706_v21 = vld [vmem:[#allocation2 + $0x10c8] sm:$0xff] }
 0x313   :  { %9402 = vmatprep.subr.bf16.mxu0 %v14857_v22  ;;  %9746 = vmatprep.subr.bf16.mxu1 %v14859_v37  ;;  %v710_v22 = vld [vmem:[#allocation2 + $0x10e8] sm:$0xff]  ;;  %v14904_v37 = vcombine.low %v697_v61, %v701_v23  ;;  %v14913_v40 = vcombine.high %v705_v35, %v709_v36 }
 0x314   :  { %v14915_v41 = vcombine.high %v706_v21, %v710_v22  ;;  %v14914_v33 = vcombine.low %v706_v21, %v710_v22  ;;  %v761_v22 = vld [vmem:[#allocation2 + $0x1280] sm:$0xff] }
 0x316   :  { %9403 = vmatpush1.bf16.msra.mxu0 %v14856_v46  ;;  %9747 = vmatpush1.bf16.msra.mxu1 %v14858_v47  ;;  %v717_v46 = vld [vmem:[#allocation2 + $0x1120] sm:$0xff]  ;;  %v714_v47 = vld [vmem:[#allocation2 + $0x1108] sm:$0xff] }
 0x317   :  { %9404 = vmatprep.subr.bf16.mxu0 %v14865_v48  ;;  %9748 = vmatprep.subr.bf16.mxu1 %v14867_v32  ;;  %v718_v48 = vld [vmem:[#allocation2 + $0x1128] sm:$0xff]  ;;  %v14912_v32 = vcombine.low %v705_v35, %v709_v36  ;;  %v14921_v49 = vcombine.high %v713_v43, %v717_v46 }
 0x318   :  { %v14923_v51 = vcombine.high %v714_v47, %v718_v48  ;;  %v14922_v57 = vcombine.low %v714_v47, %v718_v48  ;;  %v769_v48 = vld [vmem:[#allocation2 + $0x12c0] sm:$0xff] }
 0x31a   :  { %9405 = vmatpush1.bf16.msra.mxu0 %v14864_v53  ;;  %9749 = vmatpush1.bf16.msra.mxu1 %v14866_v54  ;;  %v725_v53 = vld [vmem:[#allocation2 + $0x1160] sm:$0xff]  ;;  %v722_v54 = vld [vmem:[#allocation2 + $0x1148] sm:$0xff] }
 0x31b   :  { %9406 = vmatprep.subr.bf16.mxu0 %v14873_v55  ;;  %9750 = vmatprep.subr.bf16.mxu1 %v14875_v56  ;;  %v726_v55 = vld [vmem:[#allocation2 + $0x1168] sm:$0xff]  ;;  %v14920_v56 = vcombine.low %v713_v43, %v717_v46  ;;  %v14929_v59 = vcombine.high %v721_v52, %v725_v53 }
 0x31c   :  { %v14931_v62 = vcombine.high %v722_v54, %v726_v55  ;;  %v14930_v3 = vcombine.low %v722_v54, %v726_v55  ;;  %v777_v55 = vld [vmem:[#allocation2 + $0x1300] sm:$0xff] }
 0x31e   :  { %9407 = vmatpush1.bf16.msra.mxu0 %v14872_v0  ;;  %9751 = vmatpush1.bf16.msra.mxu1 %v14874_v44  ;;  %v733_v0 = vld [vmem:[#allocation2 + $0x11a0] sm:$0xff]  ;;  %v730_v44 = vld [vmem:[#allocation2 + $0x1188] sm:$0xff] }
 0x31f   :  { %9408 = vmatprep.subr.bf16.mxu0 %v14881_v45  ;;  %9752 = vmatprep.subr.bf16.mxu1 %v14883_v1  ;;  %v734_v45 = vld [vmem:[#allocation2 + $0x11a8] sm:$0xff]  ;;  %v14928_v1 = vcombine.low %v721_v52, %v725_v53  ;;  %v14937_v4 = vcombine.high %v729_v63, %v733_v0 }
 0x320   :  { %v14939_v5 = vcombine.high %v730_v44, %v734_v45  ;;  %v14938_v11 = vcombine.low %v730_v44, %v734_v45  ;;  %v785_v45 = vld [vmem:[#allocation2 + $0x1340] sm:$0xff] }
 0x322   :  { %9409 = vmatpush1.bf16.msra.mxu0 %v14880_v7  ;;  %9753 = vmatpush1.bf16.msra.mxu1 %v14882_v8  ;;  %v741_v7 = vld [vmem:[#allocation2 + $0x11e0] sm:$0xff]  ;;  %v738_v8 = vld [vmem:[#allocation2 + $0x11c8] sm:$0xff] }
 0x323   :  { %9421 = vmatprep.subr.bf16.mxu0 %v14889_v9  ;;  %9765 = vmatprep.subr.bf16.mxu1 %v14891_v10  ;;  %v742_v9 = vld [vmem:[#allocation2 + $0x11e8] sm:$0xff]  ;;  %v14936_v10 = vcombine.low %v729_v63, %v733_v0  ;;  %v14945_v12 = vcombine.high %v737_v6, %v741_v7 }
 0x324   :  { %v14947_v13 = vcombine.high %v738_v8, %v742_v9  ;;  %v14946_v61 = vcombine.low %v738_v8, %v742_v9  ;;  %v793_v9 = vld [vmem:[#allocation2 + $0x1380] sm:$0xff] }
 0x325   :  { %9411 = vmatmul.mubr.bf16.vlgmr.msra.gmra.mrb[0].mxu0 %v17249_v14  ;;  %9755 = vmatmul.mubr.bf16.vlgmr.msra.gmra.mrb[0].mxu1 %v17249_v14 }
 0x326   :  { %9422 = vmatpush1.bf16.msra.mxu0 %v14888_v18  ;;  %9766 = vmatpush1.bf16.msra.mxu1 %v14890_v19  ;;  %v749_v18 = vld [vmem:[#allocation2 + $0x1220] sm:$0xff]  ;;  %v746_v19 = vld [vmem:[#allocation2 + $0x1208] sm:$0xff] }
 0x327   :  { %9423 = vmatprep.subr.bf16.mxu0 %v14897_v20  ;;  %9767 = vmatprep.subr.bf16.mxu1 %v14899_v60  ;;  %v750_v20 = vld [vmem:[#allocation2 + $0x1228] sm:$0xff]  ;;  %v14944_v60 = vcombine.low %v737_v6, %v741_v7  ;;  %v14953_v23 = vcombine.high %v745_v15, %v749_v18 }
 0x328   :  { %9453 = vmatprep.mubr.bf16.mxu0 %v17263_v24  ;;  %9797 = vmatprep.mubr.bf16.mxu1 %v17263_v24  ;;  %v14955_v25 = vcombine.high %v746_v19, %v750_v20  ;;  %v14954_v35 = vcombine.low %v746_v19, %v750_v20  ;;  %v801_v20 = vld [vmem:[#allocation2 + $0x13c0] sm:$0xff] }
 0x32a   :  { %9424 = vmatpush1.bf16.msra.mxu0 %v14896_v27  ;;  %9768 = vmatpush1.bf16.msra.mxu1 %v14898_v28  ;;  %v757_v27 = vld [vmem:[#allocation2 + $0x1260] sm:$0xff]  ;;  %v754_v28 = vld [vmem:[#allocation2 + $0x1248] sm:$0xff] }
 0x32b   :  { %9425 = vmatprep.subr.bf16.mxu0 %v14905_v31  ;;  %9769 = vmatprep.subr.bf16.mxu1 %v14907_v34  ;;  %v758_v31 = vld [vmem:[#allocation2 + $0x1268] sm:$0xff]  ;;  %v14952_v34 = vcombine.low %v745_v15, %v749_v18  ;;  %v14961_v36 = vcombine.high %v753_v26, %v757_v27 }
 0x32c   :  { %v14963_v21 = vcombine.high %v754_v28, %v758_v31  ;;  %v14962_v43 = vcombine.low %v754_v28, %v758_v31  ;;  %v809_v31 = vld [vmem:[#allocation2 + $0x1400] sm:$0xff] }
 0x32e   :  { %9426 = vmatpush1.bf16.msra.mxu0 %v14904_v37  ;;  %9770 = vmatpush1.bf16.msra.mxu1 %v14906_v39  ;;  %v765_v37 = vld [vmem:[#allocation2 + $0x12a0] sm:$0xff]  ;;  %v762_v39 = vld [vmem:[#allocation2 + $0x1288] sm:$0xff] }
 0x32f   :  { %9427 = vmatprep.subr.bf16.mxu0 %v14913_v40  ;;  %9771 = vmatprep.subr.bf16.mxu1 %v14915_v41  ;;  %v766_v40 = vld [vmem:[#allocation2 + $0x12a8] sm:$0xff]  ;;  %v14960_v41 = vcombine.low %v753_v26, %v757_v27  ;;  %v14969_v46 = vcombine.high %v761_v22, %v765_v37 }
 0x330   :  { %v14971_v47 = vcombine.high %v762_v39, %v766_v40  ;;  %v14970_v52 = vcombine.low %v762_v39, %v766_v40  ;;  %v817_v40 = vld [vmem:[#allocation2 + $0x1440] sm:$0xff] }
 0x332   :  { %9428 = vmatpush1.bf16.msra.mxu0 %v14912_v32  ;;  %9772 = vmatpush1.bf16.msra.mxu1 %v14914_v33  ;;  %v773_v32 = vld [vmem:[#allocation2 + $0x12e0] sm:$0xff]  ;;  %v770_v33 = vld [vmem:[#allocation2 + $0x12c8] sm:$0xff] }
 0x333   :  { %9429 = vmatprep.subr.bf16.mxu0 %v14921_v49  ;;  %9773 = vmatprep.subr.bf16.mxu1 %v14923_v51  ;;  %v774_v49 = vld [vmem:[#allocation2 + $0x12e8] sm:$0xff]  ;;  %v14968_v51 = vcombine.low %v761_v22, %v765_v37  ;;  %v14977_v53 = vcombine.high %v769_v48, %v773_v32 }
 0x334   :  { %v14979_v54 = vcombine.high %v770_v33, %v774_v49  ;;  %v14978_v63 = vcombine.low %v770_v33, %v774_v49 }
 0x336   :  { %9430 = vmatpush1.bf16.msra.mxu0 %v14920_v56  ;;  %9774 = vmatpush1.bf16.msra.mxu1 %v14922_v57  ;;  %v781_v56 = vld [vmem:[#allocation2 + $0x1320] sm:$0xff]  ;;  %v778_v57 = vld [vmem:[#allocation2 + $0x1308] sm:$0xff] }
 0x337   :  { %9431 = vmatprep.subr.bf16.mxu0 %v14929_v59  ;;  %9775 = vmatprep.subr.bf16.mxu1 %v14931_v62  ;;  %v782_v59 = vld [vmem:[#allocation2 + $0x1328] sm:$0xff]  ;;  %v14976_v62 = vcombine.low %v769_v48, %v773_v32  ;;  %v14985_v0 = vcombine.high %v777_v55, %v781_v56 }
 0x338   :  { %v14987_v44 = vcombine.high %v778_v57, %v782_v59  ;;  %v14986_v6 = vcombine.low %v778_v57, %v782_v59  ;;  %v17276_v48 = vld [vmem:[%s17435_s0 + $0x28] sm:$0xff] }
 0x339   :  { %v17281_v32 = vld [vmem:[%s17435_s0 + $0x68] sm:$0xff] }
 0x33a   :  { %9432 = vmatpush1.bf16.msra.mxu0 %v14928_v1  ;;  %9776 = vmatpush1.bf16.msra.mxu1 %v14930_v3  ;;  %v789_v1 = vld [vmem:[#allocation2 + $0x1360] sm:$0xff]  ;;  %v786_v3 = vld [vmem:[#allocation2 + $0x1348] sm:$0xff] }
 0x33b   :  { %9433 = vmatprep.subr.bf16.mxu0 %v14937_v4  ;;  %9777 = vmatprep.subr.bf16.mxu1 %v14939_v5  ;;  %v790_v4 = vld [vmem:[#allocation2 + $0x1368] sm:$0xff]  ;;  %v14984_v5 = vcombine.low %v777_v55, %v781_v56  ;;  %v14993_v7 = vcombine.high %v785_v45, %v789_v1 }
 0x33c   :  { %v14995_v8 = vcombine.high %v786_v3, %v790_v4  ;;  %v14994_v15 = vcombine.low %v786_v3, %v790_v4  ;;  %v830_v55 = vld [vmem:[#allocation2 + $0x14a8] sm:$0xff] }
 0x33e   :  { %9434 = vmatpush1.bf16.msra.mxu0 %v14936_v10  ;;  %9778 = vmatpush1.bf16.msra.mxu1 %v14938_v11  ;;  %v797_v10 = vld [vmem:[#allocation2 + $0x13a0] sm:$0xff]  ;;  %v794_v11 = vld [vmem:[#allocation2 + $0x1388] sm:$0xff] }
 0x33f   :  { %9435 = vmatprep.subr.bf16.mxu0 %v14945_v12  ;;  %9779 = vmatprep.subr.bf16.mxu1 %v14947_v13  ;;  %v798_v12 = vld [vmem:[#allocation2 + $0x13a8] sm:$0xff]  ;;  %v14992_v13 = vcombine.low %v785_v45, %v789_v1  ;;  %v15001_v18 = vcombine.high %v793_v9, %v797_v10 }
 0x340   :  { %v15003_v19 = vcombine.high %v794_v11, %v798_v12  ;;  %v15002_v26 = vcombine.low %v794_v11, %v798_v12  ;;  %v838_v45 = vld [vmem:[#allocation2 + $0x14e8] sm:$0xff] }
 0x342   :  { %9436 = vmatpush1.bf16.msra.mxu0 %v14944_v60  ;;  %9780 = vmatpush1.bf16.msra.mxu1 %v14946_v61  ;;  %v805_v60 = vld [vmem:[#allocation2 + $0x13e0] sm:$0xff]  ;;  %v802_v61 = vld [vmem:[#allocation2 + $0x13c8] sm:$0xff] }
 0x343   :  { %9437 = vmatprep.subr.bf16.mxu0 %v14953_v23  ;;  %9781 = vmatprep.subr.bf16.mxu1 %v14955_v25  ;;  %v806_v23 = vld [vmem:[#allocation2 + $0x13e8] sm:$0xff]  ;;  %v15000_v25 = vcombine.low %v793_v9, %v797_v10  ;;  %v15009_v27 = vcombine.high %v801_v20, %v805_v60 }
 0x344   :  { %v15011_v28 = vcombine.high %v802_v61, %v806_v23  ;;  %v15010_v22 = vcombine.low %v802_v61, %v806_v23  ;;  %v846_v9 = vld [vmem:[#allocation2 + $0x1528] sm:$0xff] }
 0x346   :  { %9438 = vmatpush1.bf16.msra.mxu0 %v14952_v34  ;;  %9782 = vmatpush1.bf16.msra.mxu1 %v14954_v35  ;;  %v813_v34 = vld [vmem:[#allocation2 + $0x1420] sm:$0xff]  ;;  %v810_v35 = vld [vmem:[#allocation2 + $0x1408] sm:$0xff] }
 0x347   :  { %9439 = vmatprep.subr.bf16.mxu0 %v14961_v36  ;;  %9783 = vmatprep.subr.bf16.mxu1 %v14963_v21  ;;  %v814_v36 = vld [vmem:[#allocation2 + $0x1428] sm:$0xff]  ;;  %v15008_v21 = vcombine.low %v801_v20, %v805_v60  ;;  %v15017_v37 = vcombine.high %v809_v31, %v813_v34  ;;  %v15016_v33 = vcombine.low %v809_v31, %v813_v34 }
 0x348   :  { %v15019_v39 = vcombine.high %v810_v35, %v814_v36  ;;  %v15018_v49 = vcombine.low %v810_v35, %v814_v36  ;;  %v854_v20 = vld [vmem:[#allocation2 + $0x1568] sm:$0xff] }
 0x349   :  { %v862_v31 = vld [vmem:[#allocation2 + $0x15a8] sm:$0xff] }
 0x34a   :  { %9440 = vmatpush1.bf16.msra.mxu0 %v14960_v41  ;;  %9784 = vmatpush1.bf16.msra.mxu1 %v14962_v43  ;;  %v821_v41 = vld [vmem:[#allocation2 + $0x1460] sm:$0xff]  ;;  %v818_v43 = vld [vmem:[#allocation2 + $0x1448] sm:$0xff] }
 0x34b   :  { %9441 = vmatprep.subr.bf16.mxu0 %v14969_v46  ;;  %9785 = vmatprep.subr.bf16.mxu1 %v14971_v47  ;;  %v17271_v46 = vcombine.low %v17254_v16, %v17259_v17  ;;  %v822_v47 = vld [vmem:[#allocation2 + $0x1468] sm:$0xff]  ;;  %v825_v17 = vld [vmem:[#allocation2 + $0x1480] sm:$0xff]  ;;  %v15024_v56 = vcombine.low %v817_v40, %v821_v41 }
 0x34c   :  { %v15027_v16 = vcombine.high %v818_v43, %v822_v47  ;;  %v15026_v57 = vcombine.low %v818_v43, %v822_v47 }
 0x34e   :  { %9442 = vmatpush1.bf16.msra.mxu0 %v14968_v51  ;;  %9786 = vmatpush1.bf16.msra.mxu1 %v14970_v52  ;;  %v15025_v51 = vcombine.high %v817_v40, %v821_v41  ;;  %v829_v52 = vld [vmem:[#allocation2 + $0x14a0] sm:$0xff]  ;;  %v870_v40 = vld [vmem:[#allocation2 + $0x15e8] sm:$0xff] }
 0x34f   :  { %9443 = vmatprep.subr.bf16.mxu0 %v14977_v53  ;;  %9787 = vmatprep.subr.bf16.mxu1 %v14979_v54  ;;  %v17285_v53 = vcombine.high %v17276_v48, %v17281_v32  ;;  %v826_v54 = vld [vmem:[#allocation2 + $0x1488] sm:$0xff]  ;;  %v15033_v59 = vcombine.high %v825_v17, %v829_v52  ;;  %v15032_v1 = vcombine.low %v825_v17, %v829_v52 }
 0x350   :  { %v15034_v3 = vcombine.low %v826_v54, %v830_v55  ;;  %v878_v17 = vld [vmem:[#allocation2 + $0x1628] sm:$0xff] }
 0x352   :  { %9444 = vmatpush1.bf16.msra.mxu0 %v14976_v62  ;;  %9788 = vmatpush1.bf16.msra.mxu1 %v14978_v63  ;;  %v15035_v62 = vcombine.high %v826_v54, %v830_v55  ;;  %v833_v63 = vld [vmem:[#allocation2 + $0x14c0] sm:$0xff] }
 0x353   :  { %9445 = vmatprep.subr.bf16.mxu0 %v14985_v0  ;;  %9789 = vmatprep.subr.bf16.mxu1 %v14987_v44  ;;  %v837_v0 = vld [vmem:[#allocation2 + $0x14e0] sm:$0xff]  ;;  %v834_v44 = vld [vmem:[#allocation2 + $0x14c8] sm:$0xff] }
 0x354   :  { %v15041_v4 = vcombine.high %v833_v63, %v837_v0  ;;  %v15040_v10 = vcombine.low %v833_v63, %v837_v0  ;;  %v15042_v11 = vcombine.low %v834_v44, %v838_v45  ;;  %v886_v63 = vld [vmem:[#allocation2 + $0x1668] sm:$0xff] }
 0x356   :  { %9446 = vmatpush1.bf16.msra.mxu0 %v14984_v5  ;;  %9790 = vmatpush1.bf16.msra.mxu1 %v14986_v6  ;;  %v15043_v5 = vcombine.high %v834_v44, %v838_v45  ;;  %v841_v6 = vld [vmem:[#allocation2 + $0x1500] sm:$0xff] }
 0x357   :  { %9447 = vmatprep.subr.bf16.mxu0 %v14993_v7  ;;  %9791 = vmatprep.subr.bf16.mxu1 %v14995_v8  ;;  %v845_v7 = vld [vmem:[#allocation2 + $0x1520] sm:$0xff]  ;;  %v842_v8 = vld [vmem:[#allocation2 + $0x1508] sm:$0xff] }
 0x358   :  { %v15049_v12 = vcombine.high %v841_v6, %v845_v7  ;;  %v15048_v60 = vcombine.low %v841_v6, %v845_v7  ;;  %v15050_v61 = vcombine.low %v842_v8, %v846_v9  ;;  %v894_v6 = vld [vmem:[#allocation2 + $0x16a8] sm:$0xff] }
 0x35a   :  { %9448 = vmatpush1.bf16.msra.mxu0 %v14992_v13  ;;  %9792 = vmatpush1.bf16.msra.mxu1 %v14994_v15  ;;  %v15051_v13 = vcombine.high %v842_v8, %v846_v9  ;;  %v849_v15 = vld [vmem:[#allocation2 + $0x1540] sm:$0xff] }
 0x35b   :  { %9449 = vmatprep.subr.bf16.mxu0 %v15001_v18  ;;  %9793 = vmatprep.subr.bf16.mxu1 %v15003_v19  ;;  %v853_v18 = vld [vmem:[#allocation2 + $0x1560] sm:$0xff]  ;;  %v850_v19 = vld [vmem:[#allocation2 + $0x1548] sm:$0xff] }
 0x35c   :  { %v15057_v23 = vcombine.high %v849_v15, %v853_v18  ;;  %v15056_v34 = vcombine.low %v849_v15, %v853_v18  ;;  %v15058_v35 = vcombine.low %v850_v19, %v854_v20  ;;  %v902_v15 = vld [vmem:[#allocation2 + $0x16e8] sm:$0xff] }
 0x35e   :  { %9450 = vmatpush1.bf16.msra.mxu0 %v15000_v25  ;;  %9794 = vmatpush1.bf16.msra.mxu1 %v15002_v26  ;;  %v15059_v25 = vcombine.high %v850_v19, %v854_v20  ;;  %v857_v26 = vld [vmem:[#allocation2 + $0x1580] sm:$0xff] }
 0x35f   :  { %9451 = vmatprep.subr.bf16.mxu0 %v15009_v27  ;;  %9795 = vmatprep.subr.bf16.mxu1 %v15011_v28  ;;  %v861_v27 = vld [vmem:[#allocation2 + $0x15a0] sm:$0xff]  ;;  %v858_v28 = vld [vmem:[#allocation2 + $0x1588] sm:$0xff] }
 0x360   :  { %v15065_v36 = vcombine.high %v857_v26, %v861_v27  ;;  %v15064_v41 = vcombine.low %v857_v26, %v861_v27  ;;  %v15066_v43 = vcombine.low %v858_v28, %v862_v31  ;;  %v910_v26 = vld [vmem:[#allocation2 + $0x1728] sm:$0xff] }
 0x362   :  { %9452 = vmatpush1.bf16.msra.mxu0 %v15008_v21  ;;  %9796 = vmatpush1.bf16.msra.mxu1 %v15010_v22  ;;  %v15067_v21 = vcombine.high %v858_v28, %v862_v31  ;;  %v865_v22 = vld [vmem:[#allocation2 + $0x15c0] sm:$0xff] }
 0x363   :  { %9464 = vmatprep.subr.bf16.mxu0 %v15017_v37  ;;  %9808 = vmatprep.subr.bf16.mxu1 %v15019_v39  ;;  %v869_v37 = vld [vmem:[#allocation2 + $0x15e0] sm:$0xff]  ;;  %v866_v39 = vld [vmem:[#allocation2 + $0x15c8] sm:$0xff] }
 0x364   :  { %v15073_v47 = vcombine.high %v865_v22, %v869_v37  ;;  %v15072_v52 = vcombine.low %v865_v22, %v869_v37  ;;  %v15074_v54 = vcombine.low %v866_v39, %v870_v40  ;;  %v918_v22 = vld [vmem:[#allocation2 + $0x1768] sm:$0xff] }
 0x365   :  { %9454 = vmatmul.mubr.bf16.vlgmr.msra.gmra.mrb[0].mxu0 %v17271_v46  ;;  %9798 = vmatmul.mubr.bf16.vlgmr.msra.gmra.mrb[0].mxu1 %v17271_v46 }
 0x366   :  { %9465 = vmatpush1.bf16.msra.mxu0 %v15016_v33  ;;  %9809 = vmatpush1.bf16.msra.mxu1 %v15018_v49  ;;  %v15075_v33 = vcombine.high %v866_v39, %v870_v40  ;;  %v873_v49 = vld [vmem:[#allocation2 + $0x1600] sm:$0xff] }
 0x367   :  { %9466 = vmatprep.subr.bf16.mxu0 %v15025_v51  ;;  %9810 = vmatprep.subr.bf16.mxu1 %v15027_v16  ;;  %v877_v51 = vld [vmem:[#allocation2 + $0x1620] sm:$0xff]  ;;  %v874_v16 = vld [vmem:[#allocation2 + $0x1608] sm:$0xff] }
 0x368   :  { %9496 = vmatprep.mubr.bf16.mxu0 %v17285_v53  ;;  %9840 = vmatprep.mubr.bf16.mxu1 %v17285_v53  ;;  %v15081_v55 = vcombine.high %v873_v49, %v877_v51  ;;  %v15080_v0 = vcombine.low %v873_v49, %v877_v51  ;;  %v15082_v44 = vcombine.low %v874_v16, %v878_v17  ;;  %v926_v49 = vld [vmem:[#allocation2 + $0x17a8] sm:$0xff] }
 0x36a   :  { %9467 = vmatpush1.bf16.msra.mxu0 %v15024_v56  ;;  %9811 = vmatpush1.bf16.msra.mxu1 %v15026_v57  ;;  %v15083_v56 = vcombine.high %v874_v16, %v878_v17  ;;  %v881_v57 = vld [vmem:[#allocation2 + $0x1640] sm:$0xff] }
 0x36b   :  { %9468 = vmatprep.subr.bf16.mxu0 %v15033_v59  ;;  %9812 = vmatprep.subr.bf16.mxu1 %v15035_v62  ;;  %v885_v59 = vld [vmem:[#allocation2 + $0x1660] sm:$0xff]  ;;  %v882_v62 = vld [vmem:[#allocation2 + $0x1648] sm:$0xff] }
 0x36c   :  { %v15089_v45 = vcombine.high %v881_v57, %v885_v59  ;;  %v15088_v7 = vcombine.low %v881_v57, %v885_v59  ;;  %v15090_v8 = vcombine.low %v882_v62, %v886_v63  ;;  %v934_v57 = vld [vmem:[#allocation2 + $0x17e8] sm:$0xff] }
 0x36e   :  { %9469 = vmatpush1.bf16.msra.mxu0 %v15032_v1  ;;  %9813 = vmatpush1.bf16.msra.mxu1 %v15034_v3  ;;  %v15091_v1 = vcombine.high %v882_v62, %v886_v63  ;;  %v889_v3 = vld [vmem:[#allocation2 + $0x1680] sm:$0xff] }
 0x36f   :  { %9470 = vmatprep.subr.bf16.mxu0 %v15041_v4  ;;  %9814 = vmatprep.subr.bf16.mxu1 %v15043_v5  ;;  %v893_v4 = vld [vmem:[#allocation2 + $0x16a0] sm:$0xff]  ;;  %v890_v5 = vld [vmem:[#allocation2 + $0x1688] sm:$0xff] }
 0x370   :  { %v15097_v9 = vcombine.high %v889_v3, %v893_v4  ;;  %v15096_v18 = vcombine.low %v889_v3, %v893_v4  ;;  %v15098_v19 = vcombine.low %v890_v5, %v894_v6  ;;  %v942_v3 = vld [vmem:[#allocation2 + $0x1828] sm:$0xff] }
 0x372   :  { %9471 = vmatpush1.bf16.msra.mxu0 %v15040_v10  ;;  %9815 = vmatpush1.bf16.msra.mxu1 %v15042_v11  ;;  %v15099_v10 = vcombine.high %v890_v5, %v894_v6  ;;  %v897_v11 = vld [vmem:[#allocation2 + $0x16c0] sm:$0xff] }
 0x373   :  { %9472 = vmatprep.subr.bf16.mxu0 %v15049_v12  ;;  %9816 = vmatprep.subr.bf16.mxu1 %v15051_v13  ;;  %v901_v12 = vld [vmem:[#allocation2 + $0x16e0] sm:$0xff]  ;;  %v898_v13 = vld [vmem:[#allocation2 + $0x16c8] sm:$0xff] }
 0x374   :  { %v15105_v20 = vcombine.high %v897_v11, %v901_v12  ;;  %v15104_v27 = vcombine.low %v897_v11, %v901_v12  ;;  %v15106_v28 = vcombine.low %v898_v13, %v902_v15  ;;  %v17293_v11 = vcombine.low %v17276_v48, %v17281_v32  ;;  %v950_v12 = vld [vmem:[#allocation2 + $0x1868] sm:$0xff]  ;;  %v953_v32 = vld [vmem:[#allocation2 + $0x1880] sm:$0xff] }
 0x376   :  { %9473 = vmatpush1.bf16.msra.mxu0 %v15048_v60  ;;  %9817 = vmatpush1.bf16.msra.mxu1 %v15050_v61  ;;  %v15107_v60 = vcombine.high %v898_v13, %v902_v15  ;;  %v905_v61 = vld [vmem:[#allocation2 + $0x1700] sm:$0xff]  ;;  %v17298_v13 = vld [vmem:[%s17435_s0 + $0x30] sm:$0xff] }
 0x377   :  { %9474 = vmatprep.subr.bf16.mxu0 %v15057_v23  ;;  %9818 = vmatprep.subr.bf16.mxu1 %v15059_v25  ;;  %v909_v23 = vld [vmem:[#allocation2 + $0x1720] sm:$0xff]  ;;  %v906_v25 = vld [vmem:[#allocation2 + $0x1708] sm:$0xff]  ;;  %v17303_v15 = vld [vmem:[%s17435_s0 + $0x70] sm:$0xff] }
 0x378   :  { %v15113_v31 = vcombine.high %v905_v61, %v909_v23  ;;  %v15112_v37 = vcombine.low %v905_v61, %v909_v23  ;;  %v15114_v39 = vcombine.low %v906_v25, %v910_v26  ;;  %v17307_v61 = vcombine.high %v17298_v13, %v17303_v15  ;;  %v954_v23 = vld [vmem:[#allocation2 + $0x1888] sm:$0xff] }
 0x37a   :  { %9475 = vmatpush1.bf16.msra.mxu0 %v15056_v34  ;;  %9819 = vmatpush1.bf16.msra.mxu1 %v15058_v35  ;;  %v15115_v34 = vcombine.high %v906_v25, %v910_v26  ;;  %v913_v35 = vld [vmem:[#allocation2 + $0x1740] sm:$0xff]  ;;  %v958_v25 = vld [vmem:[#allocation2 + $0x18a8] sm:$0xff] }
 0x37b   :  { %9476 = vmatprep.subr.bf16.mxu0 %v15065_v36  ;;  %9820 = vmatprep.subr.bf16.mxu1 %v15067_v21  ;;  %v917_v36 = vld [vmem:[#allocation2 + $0x1760] sm:$0xff]  ;;  %v914_v21 = vld [vmem:[#allocation2 + $0x1748] sm:$0xff] }
 0x37c   :  { %v15121_v40 = vcombine.high %v913_v35, %v917_v36  ;;  %v15120_v51 = vcombine.low %v913_v35, %v917_v36  ;;  %v15122_v16 = vcombine.low %v914_v21, %v918_v22  ;;  %v965_v35 = vld [vmem:[#allocation2 + $0x18e0] sm:$0xff]  ;;  %v962_v36 = vld [vmem:[#allocation2 + $0x18c8] sm:$0xff] }
 0x37e   :  { %9477 = vmatpush1.bf16.msra.mxu0 %v15064_v41  ;;  %9821 = vmatpush1.bf16.msra.mxu1 %v15066_v43  ;;  %v15123_v41 = vcombine.high %v914_v21, %v918_v22  ;;  %v921_v43 = vld [vmem:[#allocation2 + $0x1780] sm:$0xff]  ;;  %v966_v21 = vld [vmem:[#allocation2 + $0x18e8] sm:$0xff] }
 0x37f   :  { %9478 = vmatprep.subr.bf16.mxu0 %v15073_v47  ;;  %9822 = vmatprep.subr.bf16.mxu1 %v15075_v33  ;;  %v925_v47 = vld [vmem:[#allocation2 + $0x17a0] sm:$0xff]  ;;  %v922_v33 = vld [vmem:[#allocation2 + $0x1788] sm:$0xff] }
 0x380   :  { %v15129_v17 = vcombine.high %v921_v43, %v925_v47  ;;  %v15128_v59 = vcombine.low %v921_v43, %v925_v47  ;;  %v15130_v62 = vcombine.low %v922_v33, %v926_v49  ;;  %v973_v43 = vld [vmem:[#allocation2 + $0x1920] sm:$0xff]  ;;  %v970_v47 = vld [vmem:[#allocation2 + $0x1908] sm:$0xff] }
 0x382   :  { %9479 = vmatpush1.bf16.msra.mxu0 %v15072_v52  ;;  %9823 = vmatpush1.bf16.msra.mxu1 %v15074_v54  ;;  %v15131_v52 = vcombine.high %v922_v33, %v926_v49  ;;  %v929_v54 = vld [vmem:[#allocation2 + $0x17c0] sm:$0xff]  ;;  %v974_v33 = vld [vmem:[#allocation2 + $0x1928] sm:$0xff] }
 0x383   :  { %9480 = vmatprep.subr.bf16.mxu0 %v15081_v55  ;;  %9824 = vmatprep.subr.bf16.mxu1 %v15083_v56  ;;  %v933_v55 = vld [vmem:[#allocation2 + $0x17e0] sm:$0xff]  ;;  %v930_v56 = vld [vmem:[#allocation2 + $0x17c8] sm:$0xff] }
 0x384   :  { %v15137_v63 = vcombine.high %v929_v54, %v933_v55  ;;  %v15136_v4 = vcombine.low %v929_v54, %v933_v55  ;;  %v15138_v5 = vcombine.low %v930_v56, %v934_v57  ;;  %v981_v54 = vld [vmem:[#allocation2 + $0x1960] sm:$0xff]  ;;  %v978_v55 = vld [vmem:[#allocation2 + $0x1948] sm:$0xff] }
 0x386   :  { %9481 = vmatpush1.bf16.msra.mxu0 %v15080_v0  ;;  %9825 = vmatpush1.bf16.msra.mxu1 %v15082_v44  ;;  %v15139_v0 = vcombine.high %v930_v56, %v934_v57  ;;  %v937_v44 = vld [vmem:[#allocation2 + $0x1800] sm:$0xff]  ;;  %v982_v56 = vld [vmem:[#allocation2 + $0x1968] sm:$0xff] }
 0x387   :  { %9482 = vmatprep.subr.bf16.mxu0 %v15089_v45  ;;  %9826 = vmatprep.subr.bf16.mxu1 %v15091_v1  ;;  %v941_v45 = vld [vmem:[#allocation2 + $0x1820] sm:$0xff]  ;;  %v938_v1 = vld [vmem:[#allocation2 + $0x1808] sm:$0xff] }
 0x388   :  { %v15145_v6 = vcombine.high %v937_v44, %v941_v45 }
 0x38a   :  { %9483 = vmatpush1.bf16.msra.mxu0 %v15088_v7  ;;  %9827 = vmatpush1.bf16.msra.mxu1 %v15090_v8  ;;  %v15147_v7 = vcombine.high %v938_v1, %v942_v3  ;;  %v945_v8 = vld [vmem:[#allocation2 + $0x1840] sm:$0xff] }
 0x38b   :  { %9484 = vmatprep.subr.bf16.mxu0 %v15097_v9  ;;  %9828 = vmatprep.subr.bf16.mxu1 %v15099_v10  ;;  %v949_v9 = vld [vmem:[#allocation2 + $0x1860] sm:$0xff]  ;;  %v946_v10 = vld [vmem:[#allocation2 + $0x1848] sm:$0xff] }
 0x38c   :  { %v15155_v48 = vcombine.high %v946_v10, %v950_v12  ;;  %v15152_v26 = vcombine.low %v945_v8, %v949_v9 }
 0x38e   :  { %9485 = vmatpush1.bf16.msra.mxu0 %v15096_v18  ;;  %9829 = vmatpush1.bf16.msra.mxu1 %v15098_v19  ;;  %v15144_v18 = vcombine.low %v937_v44, %v941_v45  ;;  %v15146_v19 = vcombine.low %v938_v1, %v942_v3  ;;  %v989_v44 = vld [vmem:[#allocation2 + $0x19a0] sm:$0xff]  ;;  %v986_v45 = vld [vmem:[#allocation2 + $0x1988] sm:$0xff] }
 0x38f   :  { %9486 = vmatprep.subr.bf16.mxu0 %v15105_v20  ;;  %9830 = vmatprep.subr.bf16.mxu1 %v15107_v60  ;;  %v15153_v20 = vcombine.high %v945_v8, %v949_v9  ;;  %v957_v60 = vld [vmem:[#allocation2 + $0x18a0] sm:$0xff]  ;;  %v990_v1 = vld [vmem:[#allocation2 + $0x19a8] sm:$0xff] }
 0x390   :  { %v15160_v22 = vcombine.low %v953_v32, %v957_v60  ;;  %v997_v8 = vld [vmem:[#allocation2 + $0x19e0] sm:$0xff]  ;;  %v994_v9 = vld [vmem:[#allocation2 + $0x19c8] sm:$0xff] }
 0x392   :  { %9487 = vmatpush1.bf16.msra.mxu0 %v15104_v27  ;;  %9831 = vmatpush1.bf16.msra.mxu1 %v15106_v28  ;;  %v15154_v27 = vcombine.low %v946_v10, %v950_v12  ;;  %v15161_v28 = vcombine.high %v953_v32, %v957_v60  ;;  %v998_v10 = vld [vmem:[#allocation2 + $0x19e8] sm:$0xff]  ;;  %v1005_v32 = vld [vmem:[#allocation2 + $0x1a20] sm:$0xff] }
 0x393   :  { %9488 = vmatprep.subr.bf16.mxu0 %v15113_v31  ;;  %9832 = vmatprep.subr.bf16.mxu1 %v15115_v34  ;;  %v15163_v31 = vcombine.high %v954_v23, %v958_v25  ;;  %v961_v34 = vld [vmem:[#allocation2 + $0x18c0] sm:$0xff]  ;;  %v1002_v60 = vld [vmem:[#allocation2 + $0x1a08] sm:$0xff] }
 0x394   :  { %v15168_v49 = vcombine.low %v961_v34, %v965_v35 }
 0x396   :  { %9489 = vmatpush1.bf16.msra.mxu0 %v15112_v37  ;;  %9833 = vmatpush1.bf16.msra.mxu1 %v15114_v39  ;;  %v15162_v37 = vcombine.low %v954_v23, %v958_v25  ;;  %v15169_v39 = vcombine.high %v961_v34, %v965_v35  ;;  %v1006_v23 = vld [vmem:[#allocation2 + $0x1a28] sm:$0xff]  ;;  %v1013_v34 = vld [vmem:[#allocation2 + $0x1a60] sm:$0xff] }
 0x397   :  { %9490 = vmatprep.subr.bf16.mxu0 %v15121_v40  ;;  %9834 = vmatprep.subr.bf16.mxu1 %v15123_v41  ;;  %v15171_v40 = vcombine.high %v962_v36, %v966_v21  ;;  %v969_v41 = vld [vmem:[#allocation2 + $0x1900] sm:$0xff]  ;;  %v1010_v35 = vld [vmem:[#allocation2 + $0x1a48] sm:$0xff] }
 0x398   :  { %v15176_v57 = vcombine.low %v969_v41, %v973_v43 }
 0x39a   :  { %9491 = vmatpush1.bf16.msra.mxu0 %v15120_v51  ;;  %9835 = vmatpush1.bf16.msra.mxu1 %v15122_v16  ;;  %v15170_v51 = vcombine.low %v962_v36, %v966_v21  ;;  %v15177_v16 = vcombine.high %v969_v41, %v973_v43  ;;  %v1014_v36 = vld [vmem:[#allocation2 + $0x1a68] sm:$0xff]  ;;  %v1021_v41 = vld [vmem:[#allocation2 + $0x1aa0] sm:$0xff] }
 0x39b   :  { %9492 = vmatprep.subr.bf16.mxu0 %v15129_v17  ;;  %9836 = vmatprep.subr.bf16.mxu1 %v15131_v52  ;;  %v15179_v17 = vcombine.high %v970_v47, %v974_v33  ;;  %v977_v52 = vld [vmem:[#allocation2 + $0x1940] sm:$0xff]  ;;  %v1018_v43 = vld [vmem:[#allocation2 + $0x1a88] sm:$0xff] }
 0x39c   :  { %v15184_v3 = vcombine.low %v977_v52, %v981_v54 }
 0x39e   :  { %9493 = vmatpush1.bf16.msra.mxu0 %v15128_v59  ;;  %9837 = vmatpush1.bf16.msra.mxu1 %v15130_v62  ;;  %v15178_v59 = vcombine.low %v970_v47, %v974_v33  ;;  %v15185_v62 = vcombine.high %v977_v52, %v981_v54  ;;  %v1022_v47 = vld [vmem:[#allocation2 + $0x1aa8] sm:$0xff]  ;;  %v1029_v52 = vld [vmem:[#allocation2 + $0x1ae0] sm:$0xff] }
 0x39f   :  { %9494 = vmatprep.subr.bf16.mxu0 %v15137_v63  ;;  %9838 = vmatprep.subr.bf16.mxu1 %v15139_v0  ;;  %v15187_v63 = vcombine.high %v978_v55, %v982_v56  ;;  %v985_v0 = vld [vmem:[#allocation2 + $0x1980] sm:$0xff]  ;;  %v1026_v54 = vld [vmem:[#allocation2 + $0x1ac8] sm:$0xff] }
 0x3a0   :  { %v15192_v12 = vcombine.low %v985_v0, %v989_v44 }
 0x3a2   :  { %9495 = vmatpush1.bf16.msra.mxu0 %v15136_v4  ;;  %9839 = vmatpush1.bf16.msra.mxu1 %v15138_v5  ;;  %v15186_v4 = vcombine.low %v978_v55, %v982_v56  ;;  %v15193_v5 = vcombine.high %v985_v0, %v989_v44  ;;  %v1030_v55 = vld [vmem:[#allocation2 + $0x1ae8] sm:$0xff]  ;;  %v1037_v0 = vld [vmem:[#allocation2 + $0x1b20] sm:$0xff] }
 0x3a3   :  { %9507 = vmatprep.subr.bf16.mxu0 %v15145_v6  ;;  %9851 = vmatprep.subr.bf16.mxu1 %v15147_v7  ;;  %v15195_v6 = vcombine.high %v986_v45, %v990_v1  ;;  %v993_v7 = vld [vmem:[#allocation2 + $0x19c0] sm:$0xff]  ;;  %v1034_v44 = vld [vmem:[#allocation2 + $0x1b08] sm:$0xff] }
 0x3a4   :  { %v15200_v25 = vcombine.low %v993_v7, %v997_v8 }
 0x3a5   :  { %9497 = vmatmul.mubr.bf16.vlgmr.msra.gmra.mrb[0].mxu0 %v17293_v11  ;;  %9841 = vmatmul.mubr.bf16.vlgmr.msra.gmra.mrb[0].mxu1 %v17293_v11 }
 0x3a6   :  { %9508 = vmatpush1.bf16.msra.mxu0 %v15144_v18  ;;  %9852 = vmatpush1.bf16.msra.mxu1 %v15146_v19  ;;  %v15194_v18 = vcombine.low %v986_v45, %v990_v1  ;;  %v15201_v19 = vcombine.high %v993_v7, %v997_v8  ;;  %v1038_v45 = vld [vmem:[#allocation2 + $0x1b28] sm:$0xff]  ;;  %v1045_v7 = vld [vmem:[#allocation2 + $0x1b60] sm:$0xff] }
 0x3a7   :  { %9509 = vmatprep.subr.bf16.mxu0 %v15153_v20  ;;  %9853 = vmatprep.subr.bf16.mxu1 %v15155_v48  ;;  %v15203_v20 = vcombine.high %v994_v9, %v998_v10  ;;  %v1001_v48 = vld [vmem:[#allocation2 + $0x1a00] sm:$0xff]  ;;  %v1042_v8 = vld [vmem:[#allocation2 + $0x1b48] sm:$0xff] }
 0x3a8   :  { %9539 = vmatprep.mubr.bf16.mxu0 %v17307_v61  ;;  %9883 = vmatprep.mubr.bf16.mxu1 %v17307_v61  ;;  %v15208_v21 = vcombine.low %v1001_v48, %v1005_v32 }
 0x3aa   :  { %9510 = vmatpush1.bf16.msra.mxu0 %v15152_v26  ;;  %9854 = vmatpush1.bf16.msra.mxu1 %v15154_v27  ;;  %v15202_v26 = vcombine.low %v994_v9, %v998_v10  ;;  %v15209_v27 = vcombine.high %v1001_v48, %v1005_v32  ;;  %v1046_v9 = vld [vmem:[#allocation2 + $0x1b68] sm:$0xff]  ;;  %v1053_v48 = vld [vmem:[#allocation2 + $0x1ba0] sm:$0xff] }
 0x3ab   :  { %9511 = vmatprep.subr.bf16.mxu0 %v15161_v28  ;;  %9855 = vmatprep.subr.bf16.mxu1 %v15163_v31  ;;  %v15211_v28 = vcombine.high %v1002_v60, %v1006_v23  ;;  %v1009_v31 = vld [vmem:[#allocation2 + $0x1a40] sm:$0xff]  ;;  %v1050_v32 = vld [vmem:[#allocation2 + $0x1b88] sm:$0xff] }
 0x3ac   :  { %v15216_v33 = vcombine.low %v1009_v31, %v1013_v34 }
 0x3ae   :  { %9512 = vmatpush1.bf16.msra.mxu0 %v15160_v22  ;;  %9856 = vmatpush1.bf16.msra.mxu1 %v15162_v37  ;;  %v15210_v22 = vcombine.low %v1002_v60, %v1006_v23  ;;  %v15217_v37 = vcombine.high %v1009_v31, %v1013_v34  ;;  %v1054_v60 = vld [vmem:[#allocation2 + $0x1ba8] sm:$0xff]  ;;  %v1061_v31 = vld [vmem:[#allocation2 + $0x1be0] sm:$0xff] }
 0x3af   :  { %9513 = vmatprep.subr.bf16.mxu0 %v15169_v39  ;;  %9857 = vmatprep.subr.bf16.mxu1 %v15171_v40  ;;  %v15219_v39 = vcombine.high %v1010_v35, %v1014_v36  ;;  %v1017_v40 = vld [vmem:[#allocation2 + $0x1a80] sm:$0xff]  ;;  %v1058_v34 = vld [vmem:[#allocation2 + $0x1bc8] sm:$0xff] }
 0x3b0   :  { %v15224_v56 = vcombine.low %v1017_v40, %v1021_v41 }
 0x3b2   :  { %9514 = vmatpush1.bf16.msra.mxu0 %v15168_v49  ;;  %9858 = vmatpush1.bf16.msra.mxu1 %v15170_v51  ;;  %v15218_v49 = vcombine.low %v1010_v35, %v1014_v36  ;;  %v15225_v51 = vcombine.high %v1017_v40, %v1021_v41  ;;  %v1062_v35 = vld [vmem:[#allocation2 + $0x1be8] sm:$0xff]  ;;  %v1069_v40 = vld [vmem:[#allocation2 + $0x1c20] sm:$0xff] }
 0x3b3   :  { %9515 = vmatprep.subr.bf16.mxu0 %v15177_v16  ;;  %9859 = vmatprep.subr.bf16.mxu1 %v15179_v17  ;;  %v15227_v16 = vcombine.high %v1018_v43, %v1022_v47  ;;  %v1025_v17 = vld [vmem:[#allocation2 + $0x1ac0] sm:$0xff]  ;;  %v1066_v41 = vld [vmem:[#allocation2 + $0x1c08] sm:$0xff] }
 0x3b4   :  { %v15232_v1 = vcombine.low %v1025_v17, %v1029_v52 }
 0x3b6   :  { %9516 = vmatpush1.bf16.msra.mxu0 %v15176_v57  ;;  %9860 = vmatpush1.bf16.msra.mxu1 %v15178_v59  ;;  %v15226_v57 = vcombine.low %v1018_v43, %v1022_v47  ;;  %v15233_v59 = vcombine.high %v1025_v17, %v1029_v52  ;;  %v1070_v43 = vld [vmem:[#allocation2 + $0x1c28] sm:$0xff]  ;;  %v1077_v17 = vld [vmem:[#allocation2 + $0x1c60] sm:$0xff] }
 0x3b7   :  { %9517 = vmatprep.subr.bf16.mxu0 %v15185_v62  ;;  %9861 = vmatprep.subr.bf16.mxu1 %v15187_v63  ;;  %v15235_v62 = vcombine.high %v1026_v54, %v1030_v55  ;;  %v1033_v63 = vld [vmem:[#allocation2 + $0x1b00] sm:$0xff]  ;;  %v1074_v52 = vld [vmem:[#allocation2 + $0x1c48] sm:$0xff] }
 0x3b8   :  { %v15240_v10 = vcombine.low %v1033_v63, %v1037_v0 }
 0x3ba   :  { %9518 = vmatpush1.bf16.msra.mxu0 %v15184_v3  ;;  %9862 = vmatpush1.bf16.msra.mxu1 %v15186_v4  ;;  %v15234_v3 = vcombine.low %v1026_v54, %v1030_v55  ;;  %v15241_v4 = vcombine.high %v1033_v63, %v1037_v0  ;;  %v17315_v54 = vcombine.low %v17298_v13, %v17303_v15  ;;  %v1078_v55 = vld [vmem:[#allocation2 + $0x1c68] sm:$0xff]  ;;  %v1081_v15 = vld [vmem:[#allocation2 + $0x1c80] sm:$0xff] }
 0x3bb   :  { %9519 = vmatprep.subr.bf16.mxu0 %v15193_v5  ;;  %9863 = vmatprep.subr.bf16.mxu1 %v15195_v6  ;;  %v15243_v5 = vcombine.high %v1034_v44, %v1038_v45  ;;  %v1041_v6 = vld [vmem:[#allocation2 + $0x1b40] sm:$0xff]  ;;  %v15283_v13 = vcombine.high %v1074_v52, %v1078_v55 }
 0x3bc   :  { %v15248_v23 = vcombine.low %v1041_v6, %v1045_v7  ;;  %v1085_v0 = vld [vmem:[#allocation2 + $0x1ca0] sm:$0xff] }
 0x3be   :  { %9520 = vmatpush1.bf16.msra.mxu0 %v15192_v12  ;;  %9864 = vmatpush1.bf16.msra.mxu1 %v15194_v18  ;;  %v15242_v12 = vcombine.low %v1034_v44, %v1038_v45  ;;  %v15249_v18 = vcombine.high %v1041_v6, %v1045_v7  ;;  %v1082_v45 = vld [vmem:[#allocation2 + $0x1c88] sm:$0xff]  ;;  %v1089_v7 = vld [vmem:[#allocation2 + $0x1cc0] sm:$0xff] }
 0x3bf   :  { %9521 = vmatprep.subr.bf16.mxu0 %v15201_v19  ;;  %9865 = vmatprep.subr.bf16.mxu1 %v15203_v20  ;;  %v15251_v19 = vcombine.high %v1042_v8, %v1046_v9  ;;  %v1049_v20 = vld [vmem:[#allocation2 + $0x1b80] sm:$0xff] }
 0x3c0   :  { %v15256_v36 = vcombine.low %v1049_v20, %v1053_v48 }
 0x3c2   :  { %9522 = vmatpush1.bf16.msra.mxu0 %v15200_v25  ;;  %9866 = vmatpush1.bf16.msra.mxu1 %v15202_v26  ;;  %v15250_v25 = vcombine.low %v1042_v8, %v1046_v9  ;;  %v15257_v26 = vcombine.high %v1049_v20, %v1053_v48  ;;  %v1093_v8 = vld [vmem:[#allocation2 + $0x1ce0] sm:$0xff]  ;;  %v1090_v9 = vld [vmem:[#allocation2 + $0x1cc8] sm:$0xff] }
 0x3c3   :  { %9523 = vmatprep.subr.bf16.mxu0 %v15209_v27  ;;  %9867 = vmatprep.subr.bf16.mxu1 %v15211_v28  ;;  %v15259_v27 = vcombine.high %v1050_v32, %v1054_v60  ;;  %v1057_v28 = vld [vmem:[#allocation2 + $0x1bc0] sm:$0xff] }
 0x3c4   :  { %v15264_v47 = vcombine.low %v1057_v28, %v1061_v31  ;;  %v1097_v48 = vld [vmem:[#allocation2 + $0x1d00] sm:$0xff] }
 0x3c6   :  { %9524 = vmatpush1.bf16.msra.mxu0 %v15208_v21  ;;  %9868 = vmatpush1.bf16.msra.mxu1 %v15210_v22  ;;  %v15258_v21 = vcombine.low %v1050_v32, %v1054_v60  ;;  %v15265_v22 = vcombine.high %v1057_v28, %v1061_v31  ;;  %v1101_v32 = vld [vmem:[#allocation2 + $0x1d20] sm:$0xff]  ;;  %v1098_v60 = vld [vmem:[#allocation2 + $0x1d08] sm:$0xff] }
 0x3c7   :  { %9525 = vmatprep.subr.bf16.mxu0 %v15217_v37  ;;  %9869 = vmatprep.subr.bf16.mxu1 %v15219_v39  ;;  %v15267_v37 = vcombine.high %v1058_v34, %v1062_v35  ;;  %v1065_v39 = vld [vmem:[#allocation2 + $0x1c00] sm:$0xff] }
 0x3c8   :  { %v1105_v31 = vld [vmem:[#allocation2 + $0x1d40] sm:$0xff] }
 0x3ca   :  { %9526 = vmatpush1.bf16.msra.mxu0 %v15216_v33  ;;  %9870 = vmatpush1.bf16.msra.mxu1 %v15218_v49  ;;  %v15266_v33 = vcombine.low %v1058_v34, %v1062_v35  ;;  %v15273_v49 = vcombine.high %v1065_v39, %v1069_v40  ;;  %v1109_v34 = vld [vmem:[#allocation2 + $0x1d60] sm:$0xff]  ;;  %v1106_v35 = vld [vmem:[#allocation2 + $0x1d48] sm:$0xff] }
 0x3cb   :  { %9527 = vmatprep.subr.bf16.mxu0 %v15225_v51  ;;  %9871 = vmatprep.subr.bf16.mxu1 %v15227_v16  ;;  %v15275_v51 = vcombine.high %v1066_v41, %v1070_v43  ;;  %v1073_v16 = vld [vmem:[#allocation2 + $0x1c40] sm:$0xff] }
 0x3cc   :  { %v15281_v63 = vcombine.high %v1073_v16, %v1077_v17 }
 0x3ce   :  { %9528 = vmatpush1.bf16.msra.mxu0 %v15224_v56  ;;  %9872 = vmatpush1.bf16.msra.mxu1 %v15226_v57  ;;  %v17320_v56 = vld [vmem:[%s17435_s0 + $0x38] sm:$0xff] }
 0x3cf   :  { %9529 = vmatprep.subr.bf16.mxu0 %v15233_v59  ;;  %9873 = vmatprep.subr.bf16.mxu1 %v15235_v62  ;;  %v17325_v57 = vld [vmem:[%s17435_s0 + $0x78] sm:$0xff]  ;;  %v15272_v59 = vcombine.low %v1065_v39, %v1069_v40  ;;  %v15274_v62 = vcombine.low %v1066_v41, %v1070_v43  ;;  %v1113_v40 = vld [vmem:[#allocation2 + $0x1d80] sm:$0xff]  ;;  %v1114_v43 = vld [vmem:[#allocation2 + $0x1d88] sm:$0xff] }
 0x3d0   :  { %v17329_v44 = vcombine.high %v17320_v56, %v17325_v57  ;;  %v1117_v41 = vld [vmem:[#allocation2 + $0x1da0] sm:$0xff] }
 0x3d2   :  { %9530 = vmatpush1.bf16.msra.mxu0 %v15232_v1  ;;  %9874 = vmatpush1.bf16.msra.mxu1 %v15234_v3  ;;  %v1086_v1 = vld [vmem:[#allocation2 + $0x1ca8] sm:$0xff]  ;;  %v15280_v3 = vcombine.low %v1073_v16, %v1077_v17  ;;  %v1121_v17 = vld [vmem:[#allocation2 + $0x1dc0] sm:$0xff] }
 0x3d3   :  { %9531 = vmatprep.subr.bf16.mxu0 %v15241_v4  ;;  %9875 = vmatprep.subr.bf16.mxu1 %v15243_v5  ;;  %v15282_v4 = vcombine.low %v1074_v52, %v1078_v55  ;;  %v15289_v5 = vcombine.high %v1081_v15, %v1085_v0  ;;  %v15291_v6 = vcombine.high %v1082_v45, %v1086_v1  ;;  %v1125_v52 = vld [vmem:[#allocation2 + $0x1de0] sm:$0xff]  ;;  %v1122_v55 = vld [vmem:[#allocation2 + $0x1dc8] sm:$0xff] }
 0x3d6   :  { %9532 = vmatpush1.bf16.msra.mxu0 %v15240_v10  ;;  %9876 = vmatpush1.bf16.msra.mxu1 %v15242_v12  ;;  %v1094_v10 = vld [vmem:[#allocation2 + $0x1ce8] sm:$0xff]  ;;  %v15288_v12 = vcombine.low %v1081_v15, %v1085_v0  ;;  %v1129_v0 = vld [vmem:[#allocation2 + $0x1e00] sm:$0xff] }
 0x3d7   :  { %9533 = vmatprep.subr.bf16.mxu0 %v15249_v18  ;;  %9877 = vmatprep.subr.bf16.mxu1 %v15251_v19  ;;  %v15290_v18 = vcombine.low %v1082_v45, %v1086_v1  ;;  %v15297_v19 = vcombine.high %v1089_v7, %v1093_v8  ;;  %v15299_v20 = vcombine.high %v1090_v9, %v1094_v10  ;;  %v1133_v45 = vld [vmem:[#allocation2 + $0x1e20] sm:$0xff]  ;;  %v1130_v1 = vld [vmem:[#allocation2 + $0x1e08] sm:$0xff] }
 0x3da   :  { %9534 = vmatpush1.bf16.msra.mxu0 %v15248_v23  ;;  %9878 = vmatpush1.bf16.msra.mxu1 %v15250_v25  ;;  %v1102_v23 = vld [vmem:[#allocation2 + $0x1d28] sm:$0xff]  ;;  %v15296_v25 = vcombine.low %v1089_v7, %v1093_v8  ;;  %v1137_v8 = vld [vmem:[#allocation2 + $0x1e40] sm:$0xff] }
 0x3db   :  { %9535 = vmatprep.subr.bf16.mxu0 %v15257_v26  ;;  %9879 = vmatprep.subr.bf16.mxu1 %v15259_v27  ;;  %v15298_v26 = vcombine.low %v1090_v9, %v1094_v10  ;;  %v15305_v27 = vcombine.high %v1097_v48, %v1101_v32  ;;  %v15307_v28 = vcombine.high %v1098_v60, %v1102_v23  ;;  %v1141_v9 = vld [vmem:[#allocation2 + $0x1e60] sm:$0xff]  ;;  %v1138_v10 = vld [vmem:[#allocation2 + $0x1e48] sm:$0xff] }
 0x3de   :  { %9536 = vmatpush1.bf16.msra.mxu0 %v15256_v36  ;;  %9880 = vmatpush1.bf16.msra.mxu1 %v15258_v21  ;;  %v1110_v36 = vld [vmem:[#allocation2 + $0x1d68] sm:$0xff]  ;;  %v15304_v21 = vcombine.low %v1097_v48, %v1101_v32  ;;  %v1145_v32 = vld [vmem:[#allocation2 + $0x1e80] sm:$0xff] }
 0x3df   :  { %9537 = vmatprep.subr.bf16.mxu0 %v15265_v22  ;;  %9881 = vmatprep.subr.bf16.mxu1 %v15267_v37  ;;  %v15306_v22 = vcombine.low %v1098_v60, %v1102_v23  ;;  %v15313_v37 = vcombine.high %v1105_v31, %v1109_v34  ;;  %v15315_v39 = vcombine.high %v1106_v35, %v1110_v36  ;;  %v1149_v60 = vld [vmem:[#allocation2 + $0x1ea0] sm:$0xff]  ;;  %v1146_v23 = vld [vmem:[#allocation2 + $0x1e88] sm:$0xff] }
 0x3e2   :  { %9538 = vmatpush1.bf16.msra.mxu0 %v15264_v47  ;;  %9882 = vmatpush1.bf16.msra.mxu1 %v15266_v33  ;;  %v1118_v47 = vld [vmem:[#allocation2 + $0x1da8] sm:$0xff]  ;;  %v15312_v33 = vcombine.low %v1105_v31, %v1109_v34  ;;  %v1153_v34 = vld [vmem:[#allocation2 + $0x1ec0] sm:$0xff] }
 0x3e3   :  { %9550 = vmatprep.subr.bf16.mxu0 %v15273_v49  ;;  %9894 = vmatprep.subr.bf16.mxu1 %v15275_v51  ;;  %v15314_v49 = vcombine.low %v1106_v35, %v1110_v36  ;;  %v15321_v51 = vcombine.high %v1113_v40, %v1117_v41  ;;  %v15323_v16 = vcombine.high %v1114_v43, %v1118_v47  ;;  %v1157_v35 = vld [vmem:[#allocation2 + $0x1ee0] sm:$0xff]  ;;  %v1154_v36 = vld [vmem:[#allocation2 + $0x1ec8] sm:$0xff] }
 0x3e5   :  { %9540 = vmatmul.mubr.bf16.vlgmr.msra.gmra.mrb[0].mxu0 %v17315_v54  ;;  %9884 = vmatmul.mubr.bf16.vlgmr.msra.gmra.mrb[0].mxu1 %v17315_v54 }
 0x3e6   :  { %9551 = vmatpush1.bf16.msra.mxu0 %v15272_v59  ;;  %9895 = vmatpush1.bf16.msra.mxu1 %v15274_v62  ;;  %v1126_v59 = vld [vmem:[#allocation2 + $0x1de8] sm:$0xff]  ;;  %v15320_v62 = vcombine.low %v1113_v40, %v1117_v41  ;;  %v1161_v41 = vld [vmem:[#allocation2 + $0x1f00] sm:$0xff] }
 0x3e7   :  { %9552 = vmatprep.subr.bf16.mxu0 %v15281_v63  ;;  %9896 = vmatprep.subr.bf16.mxu1 %v15283_v13  ;;  %v15322_v63 = vcombine.low %v1114_v43, %v1118_v47  ;;  %v15329_v13 = vcombine.high %v1121_v17, %v1125_v52  ;;  %v15331_v15 = vcombine.high %v1122_v55, %v1126_v59  ;;  %v1165_v43 = vld [vmem:[#allocation2 + $0x1f20] sm:$0xff]  ;;  %v1162_v47 = vld [vmem:[#allocation2 + $0x1f08] sm:$0xff] }
 0x3e8   :  { %9582 = vmatprep.mubr.bf16.mxu0 %v17329_v44  ;;  %9926 = vmatprep.mubr.bf16.mxu1 %v17329_v44 }
 0x3ea   :  { %9553 = vmatpush1.bf16.msra.mxu0 %v15280_v3  ;;  %9897 = vmatpush1.bf16.msra.mxu1 %v15282_v4  ;;  %v1134_v3 = vld [vmem:[#allocation2 + $0x1e28] sm:$0xff]  ;;  %v15328_v4 = vcombine.low %v1121_v17, %v1125_v52  ;;  %v1169_v52 = vld [vmem:[#allocation2 + $0x1f40] sm:$0xff] }
 0x3eb   :  { %9554 = vmatprep.subr.bf16.mxu0 %v15289_v5  ;;  %9898 = vmatprep.subr.bf16.mxu1 %v15291_v6  ;;  %v15330_v5 = vcombine.low %v1122_v55, %v1126_v59  ;;  %v15337_v6 = vcombine.high %v1129_v0, %v1133_v45  ;;  %v15339_v7 = vcombine.high %v1130_v1, %v1134_v3  ;;  %v1173_v55 = vld [vmem:[#allocation2 + $0x1f60] sm:$0xff]  ;;  %v1170_v59 = vld [vmem:[#allocation2 + $0x1f48] sm:$0xff] }
 0x3ee   :  { %9555 = vmatpush1.bf16.msra.mxu0 %v15288_v12  ;;  %9899 = vmatpush1.bf16.msra.mxu1 %v15290_v18  ;;  %v1142_v12 = vld [vmem:[#allocation2 + $0x1e68] sm:$0xff]  ;;  %v15336_v18 = vcombine.low %v1129_v0, %v1133_v45  ;;  %v1177_v45 = vld [vmem:[#allocation2 + $0x1f80] sm:$0xff] }
 0x3ef   :  { %9556 = vmatprep.subr.bf16.mxu0 %v15297_v19  ;;  %9900 = vmatprep.subr.bf16.mxu1 %v15299_v20  ;;  %v15338_v19 = vcombine.low %v1130_v1, %v1134_v3  ;;  %v15345_v20 = vcombine.high %v1137_v8, %v1141_v9  ;;  %v15347_v48 = vcombine.high %v1138_v10, %v1142_v12  ;;  %v1181_v1 = vld [vmem:[#allocation2 + $0x1fa0] sm:$0xff]  ;;  %v1178_v3 = vld [vmem:[#allocation2 + $0x1f88] sm:$0xff] }
 0x3f2   :  { %9557 = vmatpush1.bf16.msra.mxu0 %v15296_v25  ;;  %9901 = vmatpush1.bf16.msra.mxu1 %v15298_v26  ;;  %v1150_v25 = vld [vmem:[#allocation2 + $0x1ea8] sm:$0xff]  ;;  %v15344_v26 = vcombine.low %v1137_v8, %v1141_v9  ;;  %v1185_v9 = vld [vmem:[#allocation2 + $0x1fc0] sm:$0xff] }
 0x3f3   :  { %9558 = vmatprep.subr.bf16.mxu0 %v15305_v27  ;;  %9902 = vmatprep.subr.bf16.mxu1 %v15307_v28  ;;  %v15346_v27 = vcombine.low %v1138_v10, %v1142_v12  ;;  %v15353_v28 = vcombine.high %v1145_v32, %v1149_v60  ;;  %v15355_v31 = vcombine.high %v1146_v23, %v1150_v25  ;;  %v1189_v10 = vld [vmem:[#allocation2 + $0x1fe0] sm:$0xff]  ;;  %v1186_v12 = vld [vmem:[#allocation2 + $0x1fc8] sm:$0xff] }
 0x3f6   :  { %9559 = vmatpush1.bf16.msra.mxu0 %v15304_v21  ;;  %9903 = vmatpush1.bf16.msra.mxu1 %v15306_v22  ;;  %v1158_v21 = vld [vmem:[#allocation2 + $0x1ee8] sm:$0xff]  ;;  %v15352_v22 = vcombine.low %v1145_v32, %v1149_v60  ;;  %v171_v60 = vld [vmem:[#allocation2 + $0x10] sm:$0xff] }
 0x3f7   :  { %9560 = vmatprep.subr.bf16.mxu0 %v15313_v37  ;;  %9904 = vmatprep.subr.bf16.mxu1 %v15315_v39  ;;  %v15354_v37 = vcombine.low %v1146_v23, %v1150_v25  ;;  %v15361_v39 = vcombine.high %v1153_v34, %v1157_v35  ;;  %v15363_v40 = vcombine.high %v1154_v36, %v1158_v21  ;;  %v175_v23 = vld [vmem:[#allocation2 + $0x30] sm:$0xff]  ;;  %v172_v25 = vld [vmem:[#allocation2 + $0x18] sm:$0xff] }
 0x3fa   :  { %9561 = vmatpush1.bf16.msra.mxu0 %v15312_v33  ;;  %9905 = vmatpush1.bf16.msra.mxu1 %v15314_v49  ;;  %v1166_v33 = vld [vmem:[#allocation2 + $0x1f28] sm:$0xff]  ;;  %v15360_v49 = vcombine.low %v1153_v34, %v1157_v35  ;;  %v179_v35 = vld [vmem:[#allocation2 + $0x50] sm:$0xff] }
 0x3fb   :  { %9562 = vmatprep.subr.bf16.mxu0 %v15321_v51  ;;  %9906 = vmatprep.subr.bf16.mxu1 %v15323_v16  ;;  %v15362_v51 = vcombine.low %v1154_v36, %v1158_v21  ;;  %v15369_v16 = vcombine.high %v1161_v41, %v1165_v43  ;;  %v15371_v17 = vcombine.high %v1162_v47, %v1166_v33  ;;  %v183_v36 = vld [vmem:[#allocation2 + $0x70] sm:$0xff] }
 0x3fc   :  { %v17337_v21 = vcombine.low %v17320_v56, %v17325_v57  ;;  %v14388_v56 = vcombine.low %v179_v35, %v183_v36 }
 0x3fe   :  { %9563 = vmatpush1.bf16.msra.mxu0 %v15320_v62  ;;  %9907 = vmatpush1.bf16.msra.mxu1 %v15322_v63  ;;  %v1174_v62 = vld [vmem:[#allocation2 + $0x1f68] sm:$0xff]  ;;  %v15368_v63 = vcombine.low %v1161_v41, %v1165_v43  ;;  %v14389_v41 = vcombine.high %v179_v35, %v183_v36  ;;  %v231_v35 = vld [vmem:[#allocation2 + $0x1f0] sm:$0xff]  ;;  %v228_v36 = vld [vmem:[#allocation2 + $0x1d8] sm:$0xff] }
 0x3ff   :  { %9564 = vmatprep.subr.bf16.mxu0 %v15329_v13  ;;  %9908 = vmatprep.subr.bf16.mxu1 %v15331_v15  ;;  %v15370_v13 = vcombine.low %v1162_v47, %v1166_v33  ;;  %v15377_v15 = vcombine.high %v1169_v52, %v1173_v55  ;;  %v15379_v0 = vcombine.high %v1170_v59, %v1174_v62  ;;  %v187_v47 = vld [vmem:[#allocation2 + $0x90] sm:$0xff] }
 0x400   :  { %v191_v33 = vld [vmem:[#allocation2 + $0xb0] sm:$0xff] }
 0x402   :  { %9565 = vmatpush1.bf16.msra.mxu0 %v15328_v4  ;;  %9909 = vmatpush1.bf16.msra.mxu1 %v15330_v5  ;;  %v1182_v4 = vld [vmem:[#allocation2 + $0x1fa8] sm:$0xff]  ;;  %v15376_v5 = vcombine.low %v1169_v52, %v1173_v55  ;;  %v195_v52 = vld [vmem:[#allocation2 + $0xd0] sm:$0xff] }
 0x403   :  { %9566 = vmatprep.subr.bf16.mxu0 %v15337_v6  ;;  %9910 = vmatprep.subr.bf16.mxu1 %v15339_v7  ;;  %v15378_v6 = vcombine.low %v1170_v59, %v1174_v62  ;;  %v15385_v7 = vcombine.high %v1177_v45, %v1181_v1  ;;  %v15387_v8 = vcombine.high %v1178_v3, %v1182_v4  ;;  %v199_v55 = vld [vmem:[#allocation2 + $0xf0] sm:$0xff]  ;;  %v196_v59 = vld [vmem:[#allocation2 + $0xd8] sm:$0xff] }
 0x404   :  { %v200_v62 = vld [vmem:[#allocation2 + $0xf8] sm:$0xff] }
 0x406   :  { %9567 = vmatpush1.bf16.msra.mxu0 %v15336_v18  ;;  %9911 = vmatpush1.bf16.msra.mxu1 %v15338_v19  ;;  %v1190_v18 = vld [vmem:[#allocation2 + $0x1fe8] sm:$0xff]  ;;  %v15384_v19 = vcombine.low %v1177_v45, %v1181_v1  ;;  %v203_v45 = vld [vmem:[#allocation2 + $0x110] sm:$0xff] }
 0x407   :  { %9568 = vmatprep.subr.bf16.mxu0 %v15345_v20  ;;  %9912 = vmatprep.subr.bf16.mxu1 %v15347_v48  ;;  %v15386_v20 = vcombine.low %v1178_v3, %v1182_v4  ;;  %v15393_v48 = vcombine.high %v1185_v9, %v1189_v10  ;;  %v15395_v32 = vcombine.high %v1186_v12, %v1190_v18  ;;  %v207_v1 = vld [vmem:[#allocation2 + $0x130] sm:$0xff]  ;;  %v204_v3 = vld [vmem:[#allocation2 + $0x118] sm:$0xff] }
 0x408   :  { %v208_v4 = vld [vmem:[#allocation2 + $0x138] sm:$0xff] }
 0x40a   :  { %9569 = vmatpush1.bf16.msra.mxu0 %v15344_v26  ;;  %9913 = vmatpush1.bf16.msra.mxu1 %v15346_v27  ;;  %v176_v26 = vld [vmem:[#allocation2 + $0x38] sm:$0xff]  ;;  %v15392_v27 = vcombine.low %v1185_v9, %v1189_v10  ;;  %v215_v9 = vld [vmem:[#allocation2 + $0x170] sm:$0xff] }
 0x40b   :  { %9570 = vmatprep.subr.bf16.mxu0 %v15353_v28  ;;  %9914 = vmatprep.subr.bf16.mxu1 %v15355_v31  ;;  %v15394_v28 = vcombine.low %v1186_v12, %v1190_v18  ;;  %v14381_v31 = vcombine.high %v171_v60, %v175_v23  ;;  %v14383_v34 = vcombine.high %v172_v25, %v176_v26  ;;  %v212_v10 = vld [vmem:[#allocation2 + $0x158] sm:$0xff] }
 0x40c   :  { %v216_v12 = vld [vmem:[#allocation2 + $0x178] sm:$0xff]  ;;  %v14412_v18 = vcombine.low %v203_v45, %v207_v1 }
 0x40e   :  { %9571 = vmatpush1.bf16.msra.mxu0 %v15352_v22  ;;  %9915 = vmatpush1.bf16.msra.mxu1 %v15354_v37  ;;  %v180_v22 = vld [vmem:[#allocation2 + $0x58] sm:$0xff] }
 0x40f   :  { %9572 = vmatprep.subr.bf16.mxu0 %v15361_v39  ;;  %9916 = vmatprep.subr.bf16.mxu1 %v15363_v40  ;;  %v184_v37 = vld [vmem:[#allocation2 + $0x78] sm:$0xff]  ;;  %v14380_v39 = vcombine.low %v171_v60, %v175_v23  ;;  %v14382_v40 = vcombine.low %v172_v25, %v176_v26  ;;  %v223_v60 = vld [vmem:[#allocation2 + $0x1b0] sm:$0xff] }
 0x410   :  { %v14391_v43 = vcombine.high %v180_v22, %v184_v37  ;;  %v14390_v57 = vcombine.low %v180_v22, %v184_v37  ;;  %v220_v23 = vld [vmem:[#allocation2 + $0x198] sm:$0xff] }
 0x411   :  { %v224_v25 = vld [vmem:[#allocation2 + $0x1b8] sm:$0xff] }
 0x412   :  { %9573 = vmatpush1.bf16.msra.mxu0 %v15360_v49  ;;  %9917 = vmatpush1.bf16.msra.mxu1 %v15362_v51  ;;  %v188_v49 = vld [vmem:[#allocation2 + $0x98] sm:$0xff] }
 0x413   :  { %9574 = vmatprep.subr.bf16.mxu0 %v15369_v16  ;;  %9918 = vmatprep.subr.bf16.mxu1 %v15371_v17  ;;  %v192_v51 = vld [vmem:[#allocation2 + $0xb8] sm:$0xff]  ;;  %v14397_v16 = vcombine.high %v187_v47, %v191_v33 }
 0x414   :  { %v14399_v17 = vcombine.high %v188_v49, %v192_v51  ;;  %v232_v22 = vld [vmem:[#allocation2 + $0x1f8] sm:$0xff] }
 0x416   :  { %9575 = vmatpush1.bf16.msra.mxu0 %v15368_v63  ;;  %9919 = vmatpush1.bf16.msra.mxu1 %v15370_v13  ;;  %v14396_v63 = vcombine.low %v187_v47, %v191_v33  ;;  %v14398_v13 = vcombine.low %v188_v49, %v192_v51  ;;  %v239_v47 = vld [vmem:[#allocation2 + $0x230] sm:$0xff]  ;;  %v236_v33 = vld [vmem:[#allocation2 + $0x218] sm:$0xff] }
 0x417   :  { %9576 = vmatprep.subr.bf16.mxu0 %v15377_v15  ;;  %9920 = vmatprep.subr.bf16.mxu1 %v15379_v0  ;;  %v14405_v15 = vcombine.high %v195_v52, %v199_v55  ;;  %v14407_v0 = vcombine.high %v196_v59, %v200_v62  ;;  %v240_v49 = vld [vmem:[#allocation2 + $0x238] sm:$0xff] }
 0x41a   :  { %9577 = vmatpush1.bf16.msra.mxu0 %v15376_v5  ;;  %9921 = vmatpush1.bf16.msra.mxu1 %v15378_v6  ;;  %v14404_v5 = vcombine.low %v195_v52, %v199_v55  ;;  %v14406_v6 = vcombine.low %v196_v59, %v200_v62  ;;  %v247_v52 = vld [vmem:[#allocation2 + $0x270] sm:$0xff]  ;;  %v244_v55 = vld [vmem:[#allocation2 + $0x258] sm:$0xff] }
 0x41b   :  { %9578 = vmatprep.subr.bf16.mxu0 %v15385_v7  ;;  %9922 = vmatprep.subr.bf16.mxu1 %v15387_v8  ;;  %v14413_v7 = vcombine.high %v203_v45, %v207_v1  ;;  %v211_v8 = vld [vmem:[#allocation2 + $0x150] sm:$0xff]  ;;  %v248_v59 = vld [vmem:[#allocation2 + $0x278] sm:$0xff] }
 0x41c   :  { %v14420_v26 = vcombine.low %v211_v8, %v215_v9  ;;  %v255_v45 = vld [vmem:[#allocation2 + $0x2b0] sm:$0xff]  ;;  %v252_v1 = vld [vmem:[#allocation2 + $0x298] sm:$0xff] }
 0x41e   :  { %9579 = vmatpush1.bf16.msra.mxu0 %v15384_v19  ;;  %9923 = vmatpush1.bf16.msra.mxu1 %v15386_v20  ;;  %v14414_v19 = vcombine.low %v204_v3, %v208_v4  ;;  %v14421_v20 = vcombine.high %v211_v8, %v215_v9  ;;  %v263_v8 = vld [vmem:[#allocation2 + $0x2f0] sm:$0xff]  ;;  %v260_v9 = vld [vmem:[#allocation2 + $0x2d8] sm:$0xff] }
 0x41f   :  { %9580 = vmatprep.subr.bf16.mxu0 %v15393_v48  ;;  %9924 = vmatprep.subr.bf16.mxu1 %v15395_v32  ;;  %v14423_v48 = vcombine.high %v212_v10, %v216_v12  ;;  %v219_v32 = vld [vmem:[#allocation2 + $0x190] sm:$0xff] }
 0x420   :  { %v14428_v37 = vcombine.low %v219_v32, %v223_v60 }
 0x422   :  { %9581 = vmatpush1.bf16.msra.mxu0 %v15392_v27  ;;  %9925 = vmatpush1.bf16.msra.mxu1 %v15394_v28  ;;  %v14422_v27 = vcombine.low %v212_v10, %v216_v12  ;;  %v14429_v28 = vcombine.high %v219_v32, %v223_v60  ;;  %v264_v10 = vld [vmem:[#allocation2 + $0x2f8] sm:$0xff]  ;;  %v271_v32 = vld [vmem:[#allocation2 + $0x330] sm:$0xff] }
 0x423   :  { %9937 = vmatprep.subr.bf16.mxu0 %v14381_v31  ;;  %10281 = vmatprep.subr.bf16.mxu1 %v14383_v34  ;;  %v14431_v31 = vcombine.high %v220_v23, %v224_v25  ;;  %v227_v34 = vld [vmem:[#allocation2 + $0x1d0] sm:$0xff]  ;;  %v268_v60 = vld [vmem:[#allocation2 + $0x318] sm:$0xff] }
 0x424   :  { %v14436_v51 = vcombine.low %v227_v34, %v231_v35 }
 0x425   :  { %9583 = vmatmul.mubr.bf16.vlgmr.msra.gmra.mrb[0].mxu0 %v17337_v21  ;;  %9927 = vmatmul.mubr.bf16.vlgmr.msra.gmra.mrb[0].mxu1 %v17337_v21 }
 0x426   :  { %9938 = vmatpush1.bf16.msra.mxu0 %v14380_v39  ;;  %10282 = vmatpush1.bf16.msra.mxu1 %v14382_v40  ;;  %v14430_v39 = vcombine.low %v220_v23, %v224_v25  ;;  %v14437_v40 = vcombine.high %v227_v34, %v231_v35  ;;  %v272_v23 = vld [vmem:[#allocation2 + $0x338] sm:$0xff]  ;;  %v279_v34 = vld [vmem:[#allocation2 + $0x370] sm:$0xff] }
 0x427   :  { %9939 = vmatprep.subr.bf16.mxu0 %v14389_v41  ;;  %10283 = vmatprep.subr.bf16.mxu1 %v14391_v43  ;;  %v14439_v41 = vcombine.high %v228_v36, %v232_v22  ;;  %v235_v43 = vld [vmem:[#allocation2 + $0x210] sm:$0xff]  ;;  %v276_v35 = vld [vmem:[#allocation2 + $0x358] sm:$0xff] }
 0x428   :  { %9969 = vmatprep.mubr.bf16.mxu0 %v17174_v29  ;;  %10313 = vmatprep.mubr.bf16.mxu1 %v17174_v29  ;;  %v14415_v29 = vcombine.high %v204_v3, %v208_v4  ;;  %v14444_v62 = vcombine.low %v235_v43, %v239_v47  ;;  %v256_v3 = vld [vmem:[#allocation2 + $0x2b8] sm:$0xff] }
 0x42a   :  { %9940 = vmatpush1.bf16.msra.mxu0 %v14388_v56  ;;  %10284 = vmatpush1.bf16.msra.mxu1 %v14390_v57  ;;  %v14438_v56 = vcombine.low %v228_v36, %v232_v22  ;;  %v14445_v57 = vcombine.high %v235_v43, %v239_v47  ;;  %v280_v36 = vld [vmem:[#allocation2 + $0x378] sm:$0xff]  ;;  %v287_v43 = vld [vmem:[#allocation2 + $0x3b0] sm:$0xff] }
 0x42b   :  { %9941 = vmatprep.subr.bf16.mxu0 %v14397_v16  ;;  %10285 = vmatprep.subr.bf16.mxu1 %v14399_v17  ;;  %v14447_v16 = vcombine.high %v236_v33, %v240_v49  ;;  %v243_v17 = vld [vmem:[#allocation2 + $0x250] sm:$0xff]  ;;  %v284_v47 = vld [vmem:[#allocation2 + $0x398] sm:$0xff] }
 0x42c   :  { %v14452_v4 = vcombine.low %v243_v17, %v247_v52 }
 0x42e   :  { %9942 = vmatpush1.bf16.msra.mxu0 %v14396_v63  ;;  %10286 = vmatpush1.bf16.msra.mxu1 %v14398_v13  ;;  %v14446_v63 = vcombine.low %v236_v33, %v240_v49  ;;  %v14453_v13 = vcombine.high %v243_v17, %v247_v52  ;;  %v288_v33 = vld [vmem:[#allocation2 + $0x3b8] sm:$0xff]  ;;  %v295_v17 = vld [vmem:[#allocation2 + $0x3f0] sm:$0xff] }
 0x42f   :  { %9943 = vmatprep.subr.bf16.mxu0 %v14405_v15  ;;  %10287 = vmatprep.subr.bf16.mxu1 %v14407_v0  ;;  %v14455_v15 = vcombine.high %v244_v55, %v248_v59  ;;  %v251_v0 = vld [vmem:[#allocation2 + $0x290] sm:$0xff]  ;;  %v292_v52 = vld [vmem:[#allocation2 + $0x3d8] sm:$0xff] }
 0x430   :  { %v14460_v12 = vcombine.low %v251_v0, %v255_v45 }
 0x432   :  { %9944 = vmatpush1.bf16.msra.mxu0 %v14404_v5  ;;  %10288 = vmatpush1.bf16.msra.mxu1 %v14406_v6  ;;  %v14454_v5 = vcombine.low %v244_v55, %v248_v59  ;;  %v14461_v6 = vcombine.high %v251_v0, %v255_v45  ;;  %v296_v55 = vld [vmem:[#allocation2 + $0x3f8] sm:$0xff]  ;;  %v303_v0 = vld [vmem:[#allocation2 + $0x430] sm:$0xff] }
 0x433   :  { %9945 = vmatprep.subr.bf16.mxu0 %v14413_v7  ;;  %10289 = vmatprep.subr.bf16.mxu1 %v14415_v29  ;;  %v14463_v7 = vcombine.high %v252_v1, %v256_v3  ;;  %v259_v29 = vld [vmem:[#allocation2 + $0x2d0] sm:$0xff]  ;;  %v300_v45 = vld [vmem:[#allocation2 + $0x418] sm:$0xff] }
 0x434   :  { %v14468_v25 = vcombine.low %v259_v29, %v263_v8 }
 0x436   :  { %9946 = vmatpush1.bf16.msra.mxu0 %v14412_v18  ;;  %10290 = vmatpush1.bf16.msra.mxu1 %v14414_v19  ;;  %v14462_v18 = vcombine.low %v252_v1, %v256_v3  ;;  %v14469_v19 = vcombine.high %v259_v29, %v263_v8  ;;  %v304_v1 = vld [vmem:[#allocation2 + $0x438] sm:$0xff]  ;;  %v311_v29 = vld [vmem:[#allocation2 + $0x470] sm:$0xff] }
 0x437   :  { %9947 = vmatprep.subr.bf16.mxu0 %v14421_v20  ;;  %10291 = vmatprep.subr.bf16.mxu1 %v14423_v48  ;;  %v14471_v20 = vcombine.high %v260_v9, %v264_v10  ;;  %v267_v48 = vld [vmem:[#allocation2 + $0x310] sm:$0xff]  ;;  %v308_v8 = vld [vmem:[#allocation2 + $0x458] sm:$0xff] }
 0x438   :  { %v14476_v22 = vcombine.low %v267_v48, %v271_v32 }
 0x43a   :  { %9948 = vmatpush1.bf16.msra.mxu0 %v14420_v26  ;;  %10292 = vmatpush1.bf16.msra.mxu1 %v14422_v27  ;;  %v14470_v26 = vcombine.low %v260_v9, %v264_v10  ;;  %v14477_v27 = vcombine.high %v267_v48, %v271_v32  ;;  %v312_v9 = vld [vmem:[#allocation2 + $0x478] sm:$0xff]  ;;  %v319_v48 = vld [vmem:[#allocation2 + $0x4b0] sm:$0xff] }
 0x43b   :  { %9949 = vmatprep.subr.bf16.mxu0 %v14429_v28  ;;  %10293 = vmatprep.subr.bf16.mxu1 %v14431_v31  ;;  %v14479_v28 = vcombine.high %v268_v60, %v272_v23  ;;  %v275_v31 = vld [vmem:[#allocation2 + $0x350] sm:$0xff]  ;;  %v316_v32 = vld [vmem:[#allocation2 + $0x498] sm:$0xff] }
 0x43c   :  { %v14484_v49 = vcombine.low %v275_v31, %v279_v34 }
 0x43e   :  { %9950 = vmatpush1.bf16.msra.mxu0 %v14428_v37  ;;  %10294 = vmatpush1.bf16.msra.mxu1 %v14430_v39  ;;  %v14478_v37 = vcombine.low %v268_v60, %v272_v23  ;;  %v14485_v39 = vcombine.high %v275_v31, %v279_v34  ;;  %v320_v60 = vld [vmem:[#allocation2 + $0x4b8] sm:$0xff]  ;;  %v327_v31 = vld [vmem:[#allocation2 + $0x4f0] sm:$0xff] }
 0x43f   :  { %9951 = vmatprep.subr.bf16.mxu0 %v14437_v40  ;;  %10295 = vmatprep.subr.bf16.mxu1 %v14439_v41  ;;  %v14487_v40 = vcombine.high %v276_v35, %v280_v36  ;;  %v283_v41 = vld [vmem:[#allocation2 + $0x390] sm:$0xff]  ;;  %v324_v34 = vld [vmem:[#allocation2 + $0x4d8] sm:$0xff] }
 0x440   :  { %v14492_v59 = vcombine.low %v283_v41, %v287_v43 }
 0x442   :  { %9952 = vmatpush1.bf16.msra.mxu0 %v14436_v51  ;;  %10296 = vmatpush1.bf16.msra.mxu1 %v14438_v56  ;;  %v14486_v51 = vcombine.low %v276_v35, %v280_v36  ;;  %v14493_v56 = vcombine.high %v283_v41, %v287_v43  ;;  %v328_v35 = vld [vmem:[#allocation2 + $0x4f8] sm:$0xff] }
 0x443   :  { %9953 = vmatprep.subr.bf16.mxu0 %v14445_v57  ;;  %10297 = vmatprep.subr.bf16.mxu1 %v14447_v16  ;;  %v14495_v57 = vcombine.high %v284_v47, %v288_v33  ;;  %v291_v16 = vld [vmem:[#allocation2 + $0x3d0] sm:$0xff]  ;;  %v332_v41 = vld [vmem:[#allocation2 + $0x518] sm:$0xff] }
 0x444   :  { %v14500_v3 = vcombine.low %v291_v16, %v295_v17  ;;  %v336_v43 = vld [vmem:[#allocation2 + $0x538] sm:$0xff] }
 0x446   :  { %9954 = vmatpush1.bf16.msra.mxu0 %v14444_v62  ;;  %10298 = vmatpush1.bf16.msra.mxu1 %v14446_v63  ;;  %v14494_v62 = vcombine.low %v284_v47, %v288_v33  ;;  %v14501_v63 = vcombine.high %v291_v16, %v295_v17  ;;  %v14534_v33 = vcombine.low %v324_v34, %v328_v35  ;;  %v344_v16 = vld [vmem:[#allocation2 + $0x578] sm:$0xff] }
 0x447   :  { %9955 = vmatprep.subr.bf16.mxu0 %v14453_v13  ;;  %10299 = vmatprep.subr.bf16.mxu1 %v14455_v15  ;;  %v14503_v13 = vcombine.high %v292_v52, %v296_v55  ;;  %v299_v15 = vld [vmem:[#allocation2 + $0x410] sm:$0xff] }
 0x448   :  { %v14508_v10 = vcombine.low %v299_v15, %v303_v0 }
 0x44a   :  { %9956 = vmatpush1.bf16.msra.mxu0 %v14452_v4  ;;  %10300 = vmatpush1.bf16.msra.mxu1 %v14454_v5  ;;  %v14502_v4 = vcombine.low %v292_v52, %v296_v55  ;;  %v14509_v5 = vcombine.high %v299_v15, %v303_v0  ;;  %v14542_v52 = vcombine.low %v332_v41, %v336_v43  ;;  %v352_v15 = vld [vmem:[#allocation2 + $0x5b8] sm:$0xff] }
 0x44b   :  { %9957 = vmatprep.subr.bf16.mxu0 %v14461_v6  ;;  %10301 = vmatprep.subr.bf16.mxu1 %v14463_v7  ;;  %v14511_v6 = vcombine.high %v300_v45, %v304_v1  ;;  %v307_v7 = vld [vmem:[#allocation2 + $0x450] sm:$0xff] }
 0x44c   :  { %v14516_v23 = vcombine.low %v307_v7, %v311_v29 }
 0x44e   :  { %9958 = vmatpush1.bf16.msra.mxu0 %v14460_v12  ;;  %10302 = vmatpush1.bf16.msra.mxu1 %v14462_v18  ;;  %v14510_v12 = vcombine.low %v300_v45, %v304_v1  ;;  %v14517_v18 = vcombine.high %v307_v7, %v311_v29  ;;  %v360_v7 = vld [vmem:[#allocation2 + $0x5f8] sm:$0xff] }
 0x44f   :  { %9959 = vmatprep.subr.bf16.mxu0 %v14469_v19  ;;  %10303 = vmatprep.subr.bf16.mxu1 %v14471_v20  ;;  %v14519_v19 = vcombine.high %v308_v8, %v312_v9  ;;  %v315_v20 = vld [vmem:[#allocation2 + $0x490] sm:$0xff] }
 0x450   :  { %v14524_v36 = vcombine.low %v315_v20, %v319_v48 }
 0x452   :  { %9960 = vmatpush1.bf16.msra.mxu0 %v14468_v25  ;;  %10304 = vmatpush1.bf16.msra.mxu1 %v14470_v26  ;;  %v14518_v25 = vcombine.low %v308_v8, %v312_v9  ;;  %v14525_v26 = vcombine.high %v315_v20, %v319_v48  ;;  %v368_v20 = vld [vmem:[#allocation2 + $0x638] sm:$0xff] }
 0x453   :  { %9961 = vmatprep.subr.bf16.mxu0 %v14477_v27  ;;  %10305 = vmatprep.subr.bf16.mxu1 %v14479_v28  ;;  %v14527_v27 = vcombine.high %v316_v32, %v320_v60  ;;  %v323_v28 = vld [vmem:[#allocation2 + $0x4d0] sm:$0xff] }
 0x454   :  { %v14532_v47 = vcombine.low %v323_v28, %v327_v31 }
 0x456   :  { %9962 = vmatpush1.bf16.msra.mxu0 %v14476_v22  ;;  %10306 = vmatpush1.bf16.msra.mxu1 %v14478_v37  ;;  %v14533_v22 = vcombine.high %v323_v28, %v327_v31  ;;  %v14535_v37 = vcombine.high %v324_v34, %v328_v35  ;;  %v376_v28 = vld [vmem:[#allocation2 + $0x678] sm:$0xff] }
 0x457   :  { %9963 = vmatprep.subr.bf16.mxu0 %v14485_v39  ;;  %10307 = vmatprep.subr.bf16.mxu1 %v14487_v40  ;;  %v331_v39 = vld [vmem:[#allocation2 + $0x510] sm:$0xff] }
 0x458   :  { %v335_v40 = vld [vmem:[#allocation2 + $0x530] sm:$0xff] }
 0x459   :  { %v14540_v17 = vcombine.low %v331_v39, %v335_v40 }
 0x45a   :  { %9964 = vmatpush1.bf16.msra.mxu0 %v14484_v49  ;;  %10308 = vmatpush1.bf16.msra.mxu1 %v14486_v51  ;;  %v14541_v49 = vcombine.high %v331_v39, %v335_v40  ;;  %v339_v51 = vld [vmem:[#allocation2 + $0x550] sm:$0xff]  ;;  %v384_v39 = vld [vmem:[#allocation2 + $0x6b8] sm:$0xff] }
 0x45b   :  { %9965 = vmatprep.subr.bf16.mxu0 %v14493_v56  ;;  %10309 = vmatprep.subr.bf16.mxu1 %v14495_v57  ;;  %v343_v56 = vld [vmem:[#allocation2 + $0x570] sm:$0xff]  ;;  %v340_v57 = vld [vmem:[#allocation2 + $0x558] sm:$0xff] }
 0x45c   :  { %v14549_v55 = vcombine.high %v339_v51, %v343_v56  ;;  %v14548_v0 = vcombine.low %v339_v51, %v343_v56  ;;  %v14550_v45 = vcombine.low %v340_v57, %v344_v16  ;;  %v392_v51 = vld [vmem:[#allocation2 + $0x6f8] sm:$0xff] }
 0x45e   :  { %9966 = vmatpush1.bf16.msra.mxu0 %v14492_v59  ;;  %10310 = vmatpush1.bf16.msra.mxu1 %v14494_v62  ;;  %v14551_v59 = vcombine.high %v340_v57, %v344_v16  ;;  %v347_v62 = vld [vmem:[#allocation2 + $0x590] sm:$0xff] }
 0x45f   :  { %9967 = vmatprep.subr.bf16.mxu0 %v14501_v63  ;;  %10311 = vmatprep.subr.bf16.mxu1 %v14503_v13  ;;  %v351_v63 = vld [vmem:[#allocation2 + $0x5b0] sm:$0xff]  ;;  %v348_v13 = vld [vmem:[#allocation2 + $0x598] sm:$0xff] }
 0x460   :  { %v14557_v1 = vcombine.high %v347_v62, %v351_v63  ;;  %v14556_v29 = vcombine.low %v347_v62, %v351_v63  ;;  %v14558_v8 = vcombine.low %v348_v13, %v352_v15  ;;  %v400_v62 = vld [vmem:[#allocation2 + $0x738] sm:$0xff] }
 0x462   :  { %9968 = vmatpush1.bf16.msra.mxu0 %v14500_v3  ;;  %10312 = vmatpush1.bf16.msra.mxu1 %v14502_v4  ;;  %v14559_v3 = vcombine.high %v348_v13, %v352_v15  ;;  %v355_v4 = vld [vmem:[#allocation2 + $0x5d0] sm:$0xff] }
 0x463   :  { %9980 = vmatprep.subr.bf16.mxu0 %v14509_v5  ;;  %10324 = vmatprep.subr.bf16.mxu1 %v14511_v6  ;;  %v359_v5 = vld [vmem:[#allocation2 + $0x5f0] sm:$0xff]  ;;  %v356_v6 = vld [vmem:[#allocation2 + $0x5d8] sm:$0xff] }
 0x464   :  { %v14565_v9 = vcombine.high %v355_v4, %v359_v5  ;;  %v14564_v48 = vcombine.low %v355_v4, %v359_v5  ;;  %v408_v4 = vld [vmem:[#allocation2 + $0x778] sm:$0xff] }
 0x465   :  { %9970 = vmatmul.mubr.bf16.vlgmr.msra.gmra.mrb[4].mxu0 %v17183_v30  ;;  %10314 = vmatmul.mubr.bf16.vlgmr.msra.gmra.mrb[4].mxu1 %v17183_v30  ;;  %v14526_v30 = vcombine.low %v316_v32, %v320_v60  ;;  %v14566_v32 = vcombine.low %v356_v6, %v360_v7 }
 0x466   :  { %9981 = vmatpush1.bf16.msra.mxu0 %v14508_v10  ;;  %10325 = vmatpush1.bf16.msra.mxu1 %v14510_v12  ;;  %v14567_v10 = vcombine.high %v356_v6, %v360_v7  ;;  %v363_v12 = vld [vmem:[#allocation2 + $0x610] sm:$0xff] }
 0x467   :  { %9982 = vmatprep.subr.bf16.mxu0 %v14517_v18  ;;  %10326 = vmatprep.subr.bf16.mxu1 %v14519_v19  ;;  %v367_v18 = vld [vmem:[#allocation2 + $0x630] sm:$0xff]  ;;  %v364_v19 = vld [vmem:[#allocation2 + $0x618] sm:$0xff] }
 0x468   :  { %10012 = vmatprep.mubr.bf16.mxu0 %v17197_v38  ;;  %10356 = vmatprep.mubr.bf16.mxu1 %v17197_v38  ;;  %v14543_v38 = vcombine.high %v332_v41, %v336_v43  ;;  %v14573_v60 = vcombine.high %v363_v12, %v367_v18  ;;  %v14572_v31 = vcombine.low %v363_v12, %v367_v18  ;;  %v416_v12 = vld [vmem:[#allocation2 + $0x7b8] sm:$0xff] }
 0x469   :  { %v14574_v34 = vcombine.low %v364_v19, %v368_v20 }
 0x46a   :  { %9983 = vmatpush1.bf16.msra.mxu0 %v14516_v23  ;;  %10327 = vmatpush1.bf16.msra.mxu1 %v14518_v25  ;;  %v14575_v23 = vcombine.high %v364_v19, %v368_v20  ;;  %v371_v25 = vld [vmem:[#allocation2 + $0x650] sm:$0xff] }
 0x46b   :  { %9984 = vmatprep.subr.bf16.mxu0 %v14525_v26  ;;  %10328 = vmatprep.subr.bf16.mxu1 %v14527_v27  ;;  %v375_v26 = vld [vmem:[#allocation2 + $0x670] sm:$0xff]  ;;  %v372_v27 = vld [vmem:[#allocation2 + $0x658] sm:$0xff] }
 0x46c   :  { %v14581_v35 = vcombine.high %v371_v25, %v375_v26  ;;  %v14580_v40 = vcombine.low %v371_v25, %v375_v26  ;;  %v14582_v41 = vcombine.low %v372_v27, %v376_v28  ;;  %v424_v25 = vld [vmem:[#allocation2 + $0x7f8] sm:$0xff] }
 0x46e   :  { %9985 = vmatpush1.bf16.msra.mxu0 %v14524_v36  ;;  %10329 = vmatpush1.bf16.msra.mxu1 %v14526_v30  ;;  %v14583_v36 = vcombine.high %v372_v27, %v376_v28  ;;  %v379_v30 = vld [vmem:[#allocation2 + $0x690] sm:$0xff] }
 0x46f   :  { %9986 = vmatprep.subr.bf16.mxu0 %v14533_v22  ;;  %10330 = vmatprep.subr.bf16.mxu1 %v14535_v37  ;;  %v383_v22 = vld [vmem:[#allocation2 + $0x6b0] sm:$0xff]  ;;  %v380_v37 = vld [vmem:[#allocation2 + $0x698] sm:$0xff] }
 0x470   :  { %v14589_v43 = vcombine.high %v379_v30, %v383_v22  ;;  %v14588_v56 = vcombine.low %v379_v30, %v383_v22  ;;  %v14590_v57 = vcombine.low %v380_v37, %v384_v39  ;;  %v432_v30 = vld [vmem:[#allocation2 + $0x838] sm:$0xff] }
 0x472   :  { %9987 = vmatpush1.bf16.msra.mxu0 %v14532_v47  ;;  %10331 = vmatpush1.bf16.msra.mxu1 %v14534_v33  ;;  %v14591_v47 = vcombine.high %v380_v37, %v384_v39  ;;  %v387_v33 = vld [vmem:[#allocation2 + $0x6d0] sm:$0xff] }
 0x473   :  { %9988 = vmatprep.subr.bf16.mxu0 %v14541_v49  ;;  %10332 = vmatprep.subr.bf16.mxu1 %v14543_v38  ;;  %v391_v49 = vld [vmem:[#allocation2 + $0x6f0] sm:$0xff]  ;;  %v388_v38 = vld [vmem:[#allocation2 + $0x6d8] sm:$0xff] }
 0x474   :  { %v14597_v16 = vcombine.high %v387_v33, %v391_v49  ;;  %v14596_v63 = vcombine.low %v387_v33, %v391_v49  ;;  %v14598_v13 = vcombine.low %v388_v38, %v392_v51  ;;  %v440_v33 = vld [vmem:[#allocation2 + $0x878] sm:$0xff] }
 0x476   :  { %9989 = vmatpush1.bf16.msra.mxu0 %v14540_v17  ;;  %10333 = vmatpush1.bf16.msra.mxu1 %v14542_v52  ;;  %v14599_v17 = vcombine.high %v388_v38, %v392_v51  ;;  %v395_v52 = vld [vmem:[#allocation2 + $0x710] sm:$0xff] }
 0x477   :  { %9990 = vmatprep.subr.bf16.mxu0 %v14549_v55  ;;  %10334 = vmatprep.subr.bf16.mxu1 %v14551_v59  ;;  %v399_v55 = vld [vmem:[#allocation2 + $0x730] sm:$0xff]  ;;  %v396_v59 = vld [vmem:[#allocation2 + $0x718] sm:$0xff] }
 0x478   :  { %v14605_v15 = vcombine.high %v395_v52, %v399_v55  ;;  %v14604_v5 = vcombine.low %v395_v52, %v399_v55  ;;  %v14606_v6 = vcombine.low %v396_v59, %v400_v62  ;;  %v448_v52 = vld [vmem:[#allocation2 + $0x8b8] sm:$0xff] }
 0x47a   :  { %9991 = vmatpush1.bf16.msra.mxu0 %v14548_v0  ;;  %10335 = vmatpush1.bf16.msra.mxu1 %v14550_v45  ;;  %v14607_v0 = vcombine.high %v396_v59, %v400_v62  ;;  %v403_v45 = vld [vmem:[#allocation2 + $0x750] sm:$0xff] }
 0x47b   :  { %9992 = vmatprep.subr.bf16.mxu0 %v14557_v1  ;;  %10336 = vmatprep.subr.bf16.mxu1 %v14559_v3  ;;  %v407_v1 = vld [vmem:[#allocation2 + $0x770] sm:$0xff]  ;;  %v404_v3 = vld [vmem:[#allocation2 + $0x758] sm:$0xff] }
 0x47c   :  { %v14613_v7 = vcombine.high %v403_v45, %v407_v1  ;;  %v14612_v18 = vcombine.low %v403_v45, %v407_v1  ;;  %v14614_v19 = vcombine.low %v404_v3, %v408_v4  ;;  %v456_v45 = vld [vmem:[#allocation2 + $0x8f8] sm:$0xff] }
 0x47e   :  { %9993 = vmatpush1.bf16.msra.mxu0 %v14556_v29  ;;  %10337 = vmatpush1.bf16.msra.mxu1 %v14558_v8  ;;  %v14615_v29 = vcombine.high %v404_v3, %v408_v4  ;;  %v411_v8 = vld [vmem:[#allocation2 + $0x790] sm:$0xff] }
 0x47f   :  { %9994 = vmatprep.subr.bf16.mxu0 %v14565_v9  ;;  %10338 = vmatprep.subr.bf16.mxu1 %v14567_v10  ;;  %v415_v9 = vld [vmem:[#allocation2 + $0x7b0] sm:$0xff]  ;;  %v412_v10 = vld [vmem:[#allocation2 + $0x798] sm:$0xff] }
 0x480   :  { %v14621_v20 = vcombine.high %v411_v8, %v415_v9  ;;  %v14620_v26 = vcombine.low %v411_v8, %v415_v9  ;;  %v14622_v27 = vcombine.low %v412_v10, %v416_v12 }
 0x482   :  { %9995 = vmatpush1.bf16.msra.mxu0 %v14564_v48  ;;  %10339 = vmatpush1.bf16.msra.mxu1 %v14566_v32  ;;  %v14623_v48 = vcombine.high %v412_v10, %v416_v12  ;;  %v419_v32 = vld [vmem:[#allocation2 + $0x7d0] sm:$0xff] }
 0x483   :  { %9996 = vmatprep.subr.bf16.mxu0 %v14573_v60  ;;  %10340 = vmatprep.subr.bf16.mxu1 %v14575_v23  ;;  %v423_v60 = vld [vmem:[#allocation2 + $0x7f0] sm:$0xff]  ;;  %v420_v23 = vld [vmem:[#allocation2 + $0x7d8] sm:$0xff] }
 0x484   :  { %v14629_v28 = vcombine.high %v419_v32, %v423_v60  ;;  %v14628_v22 = vcombine.low %v419_v32, %v423_v60  ;;  %v14630_v37 = vcombine.low %v420_v23, %v424_v25  ;;  %v467_v12 = vld [vmem:[#allocation2 + $0x950] sm:$0xff] }
 0x486   :  { %9997 = vmatpush1.bf16.msra.mxu0 %v14572_v31  ;;  %10341 = vmatpush1.bf16.msra.mxu1 %v14574_v34  ;;  %v14631_v31 = vcombine.high %v420_v23, %v424_v25  ;;  %v427_v34 = vld [vmem:[#allocation2 + $0x810] sm:$0xff] }
 0x487   :  { %9998 = vmatprep.subr.bf16.mxu0 %v14581_v35  ;;  %10342 = vmatprep.subr.bf16.mxu1 %v14583_v36  ;;  %v431_v35 = vld [vmem:[#allocation2 + $0x830] sm:$0xff]  ;;  %v428_v36 = vld [vmem:[#allocation2 + $0x818] sm:$0xff] }
 0x488   :  { %v14637_v39 = vcombine.high %v427_v34, %v431_v35  ;;  %v14636_v49 = vcombine.low %v427_v34, %v431_v35  ;;  %v14638_v38 = vcombine.low %v428_v36, %v432_v30  ;;  %v475_v25 = vld [vmem:[#allocation2 + $0x990] sm:$0xff] }
 0x48a   :  { %9999 = vmatpush1.bf16.msra.mxu0 %v14580_v40  ;;  %10343 = vmatpush1.bf16.msra.mxu1 %v14582_v41  ;;  %v14639_v40 = vcombine.high %v428_v36, %v432_v30  ;;  %v435_v41 = vld [vmem:[#allocation2 + $0x850] sm:$0xff] }
 0x48b   :  { %10000 = vmatprep.subr.bf16.mxu0 %v14589_v43  ;;  %10344 = vmatprep.subr.bf16.mxu1 %v14591_v47  ;;  %v439_v43 = vld [vmem:[#allocation2 + $0x870] sm:$0xff]  ;;  %v436_v47 = vld [vmem:[#allocation2 + $0x858] sm:$0xff] }
 0x48c   :  { %v14645_v51 = vcombine.high %v435_v41, %v439_v43  ;;  %v14644_v55 = vcombine.low %v435_v41, %v439_v43  ;;  %v14646_v59 = vcombine.low %v436_v47, %v440_v33  ;;  %v483_v30 = vld [vmem:[#allocation2 + $0x9d0] sm:$0xff] }
 0x48e   :  { %10001 = vmatpush1.bf16.msra.mxu0 %v14588_v56  ;;  %10345 = vmatpush1.bf16.msra.mxu1 %v14590_v57  ;;  %v14647_v56 = vcombine.high %v436_v47, %v440_v33  ;;  %v443_v57 = vld [vmem:[#allocation2 + $0x890] sm:$0xff] }
 0x48f   :  { %10002 = vmatprep.subr.bf16.mxu0 %v14597_v16  ;;  %10346 = vmatprep.subr.bf16.mxu1 %v14599_v17  ;;  %v447_v16 = vld [vmem:[#allocation2 + $0x8b0] sm:$0xff]  ;;  %v444_v17 = vld [vmem:[#allocation2 + $0x898] sm:$0xff] }
 0x490   :  { %v14653_v62 = vcombine.high %v443_v57, %v447_v16  ;;  %v14652_v1 = vcombine.low %v443_v57, %v447_v16  ;;  %v491_v33 = vld [vmem:[#allocation2 + $0xa10] sm:$0xff] }
 0x492   :  { %10003 = vmatpush1.bf16.msra.mxu0 %v14596_v63  ;;  %10347 = vmatpush1.bf16.msra.mxu1 %v14598_v13  ;;  %v14655_v63 = vcombine.high %v444_v17, %v448_v52  ;;  %v451_v13 = vld [vmem:[#allocation2 + $0x8d0] sm:$0xff] }
 0x493   :  { %10004 = vmatprep.subr.bf16.mxu0 %v14605_v15  ;;  %10348 = vmatprep.subr.bf16.mxu1 %v14607_v0  ;;  %v455_v15 = vld [vmem:[#allocation2 + $0x8f0] sm:$0xff]  ;;  %v452_v0 = vld [vmem:[#allocation2 + $0x8d8] sm:$0xff] }
 0x494   :  { %v14661_v3 = vcombine.high %v451_v13, %v455_v15  ;;  %v14663_v4 = vcombine.high %v452_v0, %v456_v45  ;;  %v14660_v8 = vcombine.low %v451_v13, %v455_v15  ;;  %v14662_v9 = vcombine.low %v452_v0, %v456_v45  ;;  %v507_v45 = vld [vmem:[#allocation2 + $0xa90] sm:$0xff] }
 0x496   :  { %10005 = vmatpush1.bf16.msra.mxu0 %v14604_v5  ;;  %10349 = vmatpush1.bf16.msra.mxu1 %v14606_v6  ;;  %v459_v5 = vld [vmem:[#allocation2 + $0x910] sm:$0xff] }
 0x497   :  { %10006 = vmatprep.subr.bf16.mxu0 %v14613_v7  ;;  %10350 = vmatprep.subr.bf16.mxu1 %v14615_v29  ;;  %v463_v6 = vld [vmem:[#allocation2 + $0x930] sm:$0xff]  ;;  %v460_v7 = vld [vmem:[#allocation2 + $0x918] sm:$0xff] }
 0x498   :  { %v464_v29 = vld [vmem:[#allocation2 + $0x938] sm:$0xff]  ;;  %v14669_v10 = vcombine.high %v459_v5, %v463_v6 }
 0x499   :  { %v14670_v32 = vcombine.low %v460_v7, %v464_v29 }
 0x49a   :  { %10007 = vmatpush1.bf16.msra.mxu0 %v14612_v18  ;;  %10351 = vmatpush1.bf16.msra.mxu1 %v14614_v19  ;;  %v471_v18 = vld [vmem:[#allocation2 + $0x970] sm:$0xff]  ;;  %v468_v19 = vld [vmem:[#allocation2 + $0x958] sm:$0xff] }
 0x49b   :  { %10008 = vmatprep.subr.bf16.mxu0 %v14621_v20  ;;  %10352 = vmatprep.subr.bf16.mxu1 %v14623_v48  ;;  %v472_v20 = vld [vmem:[#allocation2 + $0x978] sm:$0xff]  ;;  %v14668_v48 = vcombine.low %v459_v5, %v463_v6  ;;  %v14677_v60 = vcombine.high %v467_v12, %v471_v18 }
 0x49c   :  { %v14679_v23 = vcombine.high %v468_v19, %v472_v20  ;;  %v14678_v34 = vcombine.low %v468_v19, %v472_v20  ;;  %v523_v20 = vld [vmem:[#allocation2 + $0xb10] sm:$0xff] }
 0x49e   :  { %10009 = vmatpush1.bf16.msra.mxu0 %v14620_v26  ;;  %10353 = vmatpush1.bf16.msra.mxu1 %v14622_v27  ;;  %v479_v26 = vld [vmem:[#allocation2 + $0x9b0] sm:$0xff]  ;;  %v476_v27 = vld [vmem:[#allocation2 + $0x998] sm:$0xff] }
 0x49f   :  { %10010 = vmatprep.subr.bf16.mxu0 %v14629_v28  ;;  %10354 = vmatprep.subr.bf16.mxu1 %v14631_v31  ;;  %v480_v28 = vld [vmem:[#allocation2 + $0x9b8] sm:$0xff]  ;;  %v14676_v31 = vcombine.low %v467_v12, %v471_v18  ;;  %v14685_v35 = vcombine.high %v475_v25, %v479_v26 }
 0x4a0   :  { %v14687_v36 = vcombine.high %v476_v27, %v480_v28  ;;  %v14686_v41 = vcombine.low %v476_v27, %v480_v28  ;;  %v531_v28 = vld [vmem:[#allocation2 + $0xb50] sm:$0xff] }
 0x4a2   :  { %10011 = vmatpush1.bf16.msra.mxu0 %v14628_v22  ;;  %10355 = vmatpush1.bf16.msra.mxu1 %v14630_v37  ;;  %v487_v22 = vld [vmem:[#allocation2 + $0x9f0] sm:$0xff]  ;;  %v484_v37 = vld [vmem:[#allocation2 + $0x9d8] sm:$0xff] }
 0x4a3   :  { %10023 = vmatprep.subr.bf16.mxu0 %v14637_v39  ;;  %10367 = vmatprep.subr.bf16.mxu1 %v14639_v40  ;;  %v488_v39 = vld [vmem:[#allocation2 + $0x9f8] sm:$0xff]  ;;  %v14684_v40 = vcombine.low %v475_v25, %v479_v26  ;;  %v14693_v43 = vcombine.high %v483_v30, %v487_v22 }
 0x4a4   :  { %v14695_v47 = vcombine.high %v484_v37, %v488_v39  ;;  %v14694_v57 = vcombine.low %v484_v37, %v488_v39  ;;  %v539_v39 = vld [vmem:[#allocation2 + $0xb90] sm:$0xff] }
 0x4a5   :  { %10013 = vmatmul.mubr.bf16.vlgmr.msra.gmra.mrb[4].mxu0 %v17205_v42  ;;  %10357 = vmatmul.mubr.bf16.vlgmr.msra.gmra.mrb[4].mxu1 %v17205_v42  ;;  %v14654_v42 = vcombine.low %v444_v17, %v448_v52  ;;  %v499_v52 = vld [vmem:[#allocation2 + $0xa50] sm:$0xff] }
 0x4a6   :  { %10024 = vmatpush1.bf16.msra.mxu0 %v14636_v49  ;;  %10368 = vmatpush1.bf16.msra.mxu1 %v14638_v38  ;;  %v495_v49 = vld [vmem:[#allocation2 + $0xa30] sm:$0xff]  ;;  %v492_v38 = vld [vmem:[#allocation2 + $0xa18] sm:$0xff] }
 0x4a7   :  { %10025 = vmatprep.subr.bf16.mxu0 %v14645_v51  ;;  %10369 = vmatprep.subr.bf16.mxu1 %v14647_v56  ;;  %v496_v51 = vld [vmem:[#allocation2 + $0xa38] sm:$0xff]  ;;  %v14692_v56 = vcombine.low %v483_v30, %v487_v22  ;;  %v14701_v16 = vcombine.high %v491_v33, %v495_v49 }
 0x4a8   :  { %10055 = vmatprep.mubr.bf16.mxu0 %v17219_v50  ;;  %10399 = vmatprep.mubr.bf16.mxu1 %v17219_v50  ;;  %v14671_v50 = vcombine.high %v460_v7, %v464_v29  ;;  %v14703_v17 = vcombine.high %v492_v38, %v496_v51  ;;  %v14702_v13 = vcombine.low %v492_v38, %v496_v51  ;;  %v515_v29 = vld [vmem:[#allocation2 + $0xad0] sm:$0xff] }
 0x4a9   :  { %v547_v51 = vld [vmem:[#allocation2 + $0xbd0] sm:$0xff] }
 0x4aa   :  { %10026 = vmatpush1.bf16.msra.mxu0 %v14644_v55  ;;  %10370 = vmatpush1.bf16.msra.mxu1 %v14646_v59  ;;  %v503_v55 = vld [vmem:[#allocation2 + $0xa70] sm:$0xff]  ;;  %v500_v59 = vld [vmem:[#allocation2 + $0xa58] sm:$0xff] }
 0x4ab   :  { %10027 = vmatprep.subr.bf16.mxu0 %v14653_v62  ;;  %10371 = vmatprep.subr.bf16.mxu1 %v14655_v63  ;;  %v504_v62 = vld [vmem:[#allocation2 + $0xa78] sm:$0xff]  ;;  %v14700_v63 = vcombine.low %v491_v33, %v495_v49  ;;  %v14709_v15 = vcombine.high %v499_v52, %v503_v55 }
 0x4ac   :  { %v14711_v0 = vcombine.high %v500_v59, %v504_v62  ;;  %v14710_v5 = vcombine.low %v500_v59, %v504_v62  ;;  %v555_v62 = vld [vmem:[#allocation2 + $0xc10] sm:$0xff] }
 0x4ae   :  { %10028 = vmatpush1.bf16.msra.mxu0 %v14652_v1  ;;  %10372 = vmatpush1.bf16.msra.mxu1 %v14654_v42  ;;  %v511_v1 = vld [vmem:[#allocation2 + $0xab0] sm:$0xff]  ;;  %v508_v42 = vld [vmem:[#allocation2 + $0xa98] sm:$0xff] }
 0x4af   :  { %10029 = vmatprep.subr.bf16.mxu0 %v14661_v3  ;;  %10373 = vmatprep.subr.bf16.mxu1 %v14663_v4  ;;  %v512_v3 = vld [vmem:[#allocation2 + $0xab8] sm:$0xff]  ;;  %v14708_v4 = vcombine.low %v499_v52, %v503_v55  ;;  %v14717_v6 = vcombine.high %v507_v45, %v511_v1 }
 0x4b0   :  { %v14719_v7 = vcombine.high %v508_v42, %v512_v3  ;;  %v14718_v12 = vcombine.low %v508_v42, %v512_v3  ;;  %v563_v3 = vld [vmem:[#allocation2 + $0xc50] sm:$0xff] }
 0x4b2   :  { %10030 = vmatpush1.bf16.msra.mxu0 %v14660_v8  ;;  %10374 = vmatpush1.bf16.msra.mxu1 %v14662_v9  ;;  %v519_v8 = vld [vmem:[#allocation2 + $0xaf0] sm:$0xff]  ;;  %v516_v9 = vld [vmem:[#allocation2 + $0xad8] sm:$0xff] }
 0x4b3   :  { %10031 = vmatprep.subr.bf16.mxu0 %v14669_v10  ;;  %10375 = vmatprep.subr.bf16.mxu1 %v14671_v50  ;;  %v520_v10 = vld [vmem:[#allocation2 + $0xaf8] sm:$0xff]  ;;  %v14716_v50 = vcombine.low %v507_v45, %v511_v1  ;;  %v14725_v18 = vcombine.high %v515_v29, %v519_v8 }
 0x4b4   :  { %v14727_v19 = vcombine.high %v516_v9, %v520_v10  ;;  %v14726_v25 = vcombine.low %v516_v9, %v520_v10  ;;  %v571_v10 = vld [vmem:[#allocation2 + $0xc90] sm:$0xff] }
 0x4b6   :  { %10032 = vmatpush1.bf16.msra.mxu0 %v14668_v48  ;;  %10376 = vmatpush1.bf16.msra.mxu1 %v14670_v32  ;;  %v527_v48 = vld [vmem:[#allocation2 + $0xb30] sm:$0xff]  ;;  %v524_v32 = vld [vmem:[#allocation2 + $0xb18] sm:$0xff] }
 0x4b7   :  { %10033 = vmatprep.subr.bf16.mxu0 %v14677_v60  ;;  %10377 = vmatprep.subr.bf16.mxu1 %v14679_v23  ;;  %v528_v60 = vld [vmem:[#allocation2 + $0xb38] sm:$0xff]  ;;  %v14724_v23 = vcombine.low %v515_v29, %v519_v8  ;;  %v14733_v26 = vcombine.high %v523_v20, %v527_v48 }
 0x4b8   :  { %v14735_v27 = vcombine.high %v524_v32, %v528_v60  ;;  %v14734_v30 = vcombine.low %v524_v32, %v528_v60  ;;  %v579_v60 = vld [vmem:[#allocation2 + $0xcd0] sm:$0xff] }
 0x4ba   :  { %10034 = vmatpush1.bf16.msra.mxu0 %v14676_v31  ;;  %10378 = vmatpush1.bf16.msra.mxu1 %v14678_v34  ;;  %v535_v31 = vld [vmem:[#allocation2 + $0xb70] sm:$0xff]  ;;  %v532_v34 = vld [vmem:[#allocation2 + $0xb58] sm:$0xff] }
 0x4bb   :  { %10035 = vmatprep.subr.bf16.mxu0 %v14685_v35  ;;  %10379 = vmatprep.subr.bf16.mxu1 %v14687_v36  ;;  %v536_v35 = vld [vmem:[#allocation2 + $0xb78] sm:$0xff]  ;;  %v14732_v36 = vcombine.low %v523_v20, %v527_v48  ;;  %v14741_v22 = vcombine.high %v531_v28, %v535_v31 }
 0x4bc   :  { %v14743_v37 = vcombine.high %v532_v34, %v536_v35  ;;  %v14742_v33 = vcombine.low %v532_v34, %v536_v35  ;;  %v587_v35 = vld [vmem:[#allocation2 + $0xd10] sm:$0xff] }
 0x4be   :  { %10036 = vmatpush1.bf16.msra.mxu0 %v14684_v40  ;;  %10380 = vmatpush1.bf16.msra.mxu1 %v14686_v41  ;;  %v543_v40 = vld [vmem:[#allocation2 + $0xbb0] sm:$0xff]  ;;  %v540_v41 = vld [vmem:[#allocation2 + $0xb98] sm:$0xff] }
 0x4bf   :  { %10037 = vmatprep.subr.bf16.mxu0 %v14693_v43  ;;  %10381 = vmatprep.subr.bf16.mxu1 %v14695_v47  ;;  %v544_v43 = vld [vmem:[#allocation2 + $0xbb8] sm:$0xff]  ;;  %v14740_v47 = vcombine.low %v531_v28, %v535_v31  ;;  %v14749_v49 = vcombine.high %v539_v39, %v543_v40 }
 0x4c0   :  { %v14751_v38 = vcombine.high %v540_v41, %v544_v43  ;;  %v14750_v52 = vcombine.low %v540_v41, %v544_v43  ;;  %v595_v43 = vld [vmem:[#allocation2 + $0xd50] sm:$0xff] }
 0x4c2   :  { %10038 = vmatpush1.bf16.msra.mxu0 %v14692_v56  ;;  %10382 = vmatpush1.bf16.msra.mxu1 %v14694_v57  ;;  %v551_v56 = vld [vmem:[#allocation2 + $0xbf0] sm:$0xff]  ;;  %v548_v57 = vld [vmem:[#allocation2 + $0xbd8] sm:$0xff] }
 0x4c3   :  { %10039 = vmatprep.subr.bf16.mxu0 %v14701_v16  ;;  %10383 = vmatprep.subr.bf16.mxu1 %v14703_v17  ;;  %v552_v16 = vld [vmem:[#allocation2 + $0xbf8] sm:$0xff]  ;;  %v14748_v17 = vcombine.low %v539_v39, %v543_v40  ;;  %v14757_v55 = vcombine.high %v547_v51, %v551_v56 }
 0x4c4   :  { %v14759_v59 = vcombine.high %v548_v57, %v552_v16  ;;  %v14758_v45 = vcombine.low %v548_v57, %v552_v16 }
 0x4c6   :  { %10040 = vmatpush1.bf16.msra.mxu0 %v14700_v63  ;;  %10384 = vmatpush1.bf16.msra.mxu1 %v14702_v13  ;;  %v559_v63 = vld [vmem:[#allocation2 + $0xc30] sm:$0xff]  ;;  %v556_v13 = vld [vmem:[#allocation2 + $0xc18] sm:$0xff] }
 0x4c7   :  { %10041 = vmatprep.subr.bf16.mxu0 %v14709_v15  ;;  %10385 = vmatprep.subr.bf16.mxu1 %v14711_v0  ;;  %v560_v15 = vld [vmem:[#allocation2 + $0xc38] sm:$0xff]  ;;  %v14756_v0 = vcombine.low %v547_v51, %v551_v56  ;;  %v14765_v1 = vcombine.high %v555_v62, %v559_v63  ;;  %v10625_v56 = vld [vmem:[#allocation6] sm:$0xff] }
 0x4c8   :  { %v14767_v42 = vcombine.high %v556_v13, %v560_v15  ;;  %v14766_v29 = vcombine.low %v556_v13, %v560_v15  ;;  %v604_v15 = vld [vmem:[#allocation2 + $0xd98] sm:$0xff] }
 0x4ca   :  { %10042 = vmatpush1.bf16.msra.mxu0 %v14708_v4  ;;  %10386 = vmatpush1.bf16.msra.mxu1 %v14710_v5  ;;  %v567_v4 = vld [vmem:[#allocation2 + $0xc70] sm:$0xff]  ;;  %v564_v5 = vld [vmem:[#allocation2 + $0xc58] sm:$0xff] }
 0x4cb   :  { %10043 = vmatprep.subr.bf16.mxu0 %v14717_v6  ;;  %10387 = vmatprep.subr.bf16.mxu1 %v14719_v7  ;;  %v568_v6 = vld [vmem:[#allocation2 + $0xc78] sm:$0xff]  ;;  %v14764_v7 = vcombine.low %v555_v62, %v559_v63  ;;  %v14773_v8 = vcombine.high %v563_v3, %v567_v4  ;;  %v603_v62 = vld [vmem:[#allocation2 + $0xd90] sm:$0xff] }
 0x4cc   :  { %v14775_v9 = vcombine.high %v564_v5, %v568_v6  ;;  %v14774_v20 = vcombine.low %v564_v5, %v568_v6  ;;  %v607_v63 = vld [vmem:[#allocation2 + $0xdb0] sm:$0xff] }
 0x4cd   :  { %v14813_v5 = vcombine.high %v603_v62, %v607_v63 }
 0x4ce   :  { %10044 = vmatpush1.bf16.msra.mxu0 %v14716_v50  ;;  %10388 = vmatpush1.bf16.msra.mxu1 %v14718_v12  ;;  %v575_v50 = vld [vmem:[#allocation2 + $0xcb0] sm:$0xff]  ;;  %v572_v12 = vld [vmem:[#allocation2 + $0xc98] sm:$0xff] }
 0x4cf   :  { %10045 = vmatprep.subr.bf16.mxu0 %v14725_v18  ;;  %10389 = vmatprep.subr.bf16.mxu1 %v14727_v19  ;;  %v576_v18 = vld [vmem:[#allocation2 + $0xcb8] sm:$0xff]  ;;  %v14772_v19 = vcombine.low %v563_v3, %v567_v4  ;;  %v14781_v48 = vcombine.high %v571_v10, %v575_v50  ;;  %v14780_v28 = vcombine.low %v571_v10, %v575_v50 }
 0x4d0   :  { %v14783_v32 = vcombine.high %v572_v12, %v576_v18 }
 0x4d2   :  { %10046 = vmatpush1.bf16.msra.mxu0 %v14724_v23  ;;  %10390 = vmatpush1.bf16.msra.mxu1 %v14726_v25  ;;  %v583_v23 = vld [vmem:[#allocation2 + $0xcf0] sm:$0xff]  ;;  %v580_v25 = vld [vmem:[#allocation2 + $0xcd8] sm:$0xff] }
 0x4d3   :  { %10047 = vmatprep.subr.bf16.mxu0 %v14733_v26  ;;  %10391 = vmatprep.subr.bf16.mxu1 %v14735_v27  ;;  %v584_v26 = vld [vmem:[#allocation2 + $0xcf8] sm:$0xff]  ;;  %v10627_v27 = vlaneseq  ;;  %v14789_v31 = vcombine.high %v579_v60, %v583_v23  ;;  %v14788_v39 = vcombine.low %v579_v60, %v583_v23  ;;  %v14812_v60 = vcombine.low %v603_v62, %v607_v63 }
 0x4d4   :  { %v14791_v34 = vcombine.high %v580_v25, %v584_v26 }
 0x4d6   :  { %10048 = vmatpush1.bf16.msra.mxu0 %v14732_v36  ;;  %10392 = vmatpush1.bf16.msra.mxu1 %v14734_v30  ;;  %v591_v36 = vld [vmem:[#allocation2 + $0xd30] sm:$0xff]  ;;  %v588_v30 = vld [vmem:[#allocation2 + $0xd18] sm:$0xff] }
 0x4d7   :  { %10049 = vmatprep.subr.bf16.mxu0 %v14741_v22  ;;  %10393 = vmatprep.subr.bf16.mxu1 %v14743_v37  ;;  %v592_v22 = vld [vmem:[#allocation2 + $0xd38] sm:$0xff]  ;;  %v17356_v37 = vshrl.u32 %v10627_v27, 7  ;;  %v14797_v40 = vcombine.high %v587_v35, %v591_v36  ;;  %v14796_v51 = vcombine.low %v587_v35, %v591_v36 }
 0x4d8   :  { %v14799_v41 = vcombine.high %v588_v30, %v592_v22 }
 0x4d9   :  { %v17362_v57 = vsub.s32 2, %v17356_v37  ;;  %v17365_v16 = vsub.s32 1, %v17356_v37 }
 0x4da   :  { %10050 = vmatpush1.bf16.msra.mxu0 %v14740_v47  ;;  %10394 = vmatpush1.bf16.msra.mxu1 %v14742_v33  ;;  %v599_v47 = vld [vmem:[#allocation2 + $0xd70] sm:$0xff]  ;;  %v17359_v33 = vsub.s32 0, %v17356_v37 }
 0x4db   :  { %10051 = vmatprep.subr.bf16.mxu0 %v14749_v49  ;;  %10395 = vmatprep.subr.bf16.mxu1 %v14751_v38  ;;  %v596_v49 = vld [vmem:[#allocation2 + $0xd58] sm:$0xff] }
 0x4dc   :  { %v600_v38 = vld [vmem:[#allocation2 + $0xd78] sm:$0xff]  ;;  %v10630_v13 = vrot.slane %v10625_v56, %v17359_v33 }
 0x4dd   :  { %v14806_v4 = vcombine.low %v596_v49, %v600_v38 }
 0x4de   :  { %10052 = vmatpush1.bf16.msra.mxu0 %v14748_v17  ;;  %10396 = vmatpush1.bf16.msra.mxu1 %v14750_v52  ;;  %v14798_v17 = vcombine.low %v588_v30, %v592_v22  ;;  %v17368_v52 = vsub.s32 3, %v17356_v37 }
 0x4df   :  { %10053 = vmatprep.subr.bf16.mxu0 %v14757_v55  ;;  %10397 = vmatprep.subr.bf16.mxu1 %v14759_v59  ;;  %v14805_v55 = vcombine.high %v595_v43, %v599_v47  ;;  %v14807_v59 = vcombine.high %v596_v49, %v600_v38  ;;  %v620_v49 = vld [vmem:[#allocation2 + $0xe18] sm:$0xff] }
 0x4e0   :  { %v10642_v3 = vrot.slane %v10625_v56, %v17368_v52  ;;  %v624_v38 = vld [vmem:[#allocation2 + $0xe38] sm:$0xff] }
 0x4e2   :  { %10054 = vmatpush1.bf16.msra.mxu0 %v14756_v0  ;;  %10398 = vmatpush1.bf16.msra.mxu1 %v14758_v45  ;;  %v608_v0 = vld [vmem:[#allocation2 + $0xdb8] sm:$0xff]  ;;  %v10638_v45 = vrot.slane %v10625_v56, %v17362_v57 }
 0x4e3   :  { %10066 = vmatprep.subr.bf16.mxu0 %v14765_v1  ;;  %10410 = vmatprep.subr.bf16.mxu1 %v14767_v42  ;;  %v10634_v1 = vrot.slane %v10625_v56, %v17365_v16  ;;  %v14804_v42 = vcombine.low %v595_v43, %v599_v47  ;;  %v14814_v23 = vcombine.low %v604_v15, %v608_v0 }
 0x4e5   :  { %10056 = vmatmul.mubr.bf16.vlgmr.msra.gmra.mrb[4].mxu0 %v17227_v58  ;;  %10400 = vmatmul.mubr.bf16.vlgmr.msra.gmra.mrb[4].mxu1 %v17227_v58  ;;  %v14782_v58 = vcombine.low %v572_v12, %v576_v18  ;;  %v612_v12 = vld [vmem:[#allocation2 + $0xdd8] sm:$0xff] }
 0x4e6   :  { %10067 = vmatpush1.bf16.msra.mxu0 %v14764_v7  ;;  %10411 = vmatpush1.bf16.msra.mxu1 %v14766_v29  ;;  %v14815_v7 = vcombine.high %v604_v15, %v608_v0  ;;  %v611_v29 = vld [vmem:[#allocation2 + $0xdd0] sm:$0xff]  ;;  %v616_v18 = vld [vmem:[#allocation2 + $0xdf8] sm:$0xff] }
 0x4e7   :  { %10068 = vmatprep.subr.bf16.mxu0 %v14773_v8  ;;  %10412 = vmatprep.subr.bf16.mxu1 %v14775_v9  ;;  %v615_v8 = vld [vmem:[#allocation2 + $0xdf0] sm:$0xff]  ;;  %v14823_v22 = vcombine.high %v612_v12, %v616_v18  ;;  %v14822_v47 = vcombine.low %v612_v12, %v616_v18  ;;  %v640_v12 = vld [vmem:[#allocation2 + $0xeb8] sm:$0xff] }
 0x4e8   :  { %10098 = vmatprep.mubr.bf16.mxu0 %v17241_v2  ;;  %10442 = vmatprep.mubr.bf16.mxu1 %v17241_v2  ;;  %v14790_v2 = vcombine.low %v580_v25, %v584_v26  ;;  %v14820_v30 = vcombine.low %v611_v29, %v615_v8 }
 0x4ea   :  { %10069 = vmatpush1.bf16.msra.mxu0 %v14772_v19  ;;  %10413 = vmatpush1.bf16.msra.mxu1 %v14774_v20 }
 0x4eb   :  { %10070 = vmatprep.subr.bf16.mxu0 %v14781_v48  ;;  %10414 = vmatprep.subr.bf16.mxu1 %v14783_v32 }
 0x4ee   :  { %10071 = vmatpush1.bf16.msra.mxu0 %v14780_v28  ;;  %10415 = vmatpush1.bf16.msra.mxu1 %v14782_v58 }
 0x4ef   :  { %10072 = vmatprep.subr.bf16.mxu0 %v14789_v31  ;;  %10416 = vmatprep.subr.bf16.mxu1 %v14791_v34  ;;  %v14821_v31 = vcombine.high %v611_v29, %v615_v8 }
 0x4f2   :  { %10073 = vmatpush1.bf16.msra.mxu0 %v14788_v39  ;;  %10417 = vmatpush1.bf16.msra.mxu1 %v14790_v2  ;;  %v619_v39 = vld [vmem:[#allocation2 + $0xe10] sm:$0xff] }
 0x4f3   :  { %10074 = vmatprep.subr.bf16.mxu0 %v14797_v40  ;;  %10418 = vmatprep.subr.bf16.mxu1 %v14799_v41  ;;  %v623_v2 = vld [vmem:[#allocation2 + $0xe30] sm:$0xff] }
 0x4f6   :  { %10075 = vmatpush1.bf16.msra.mxu0 %v14796_v51  ;;  %10419 = vmatpush1.bf16.msra.mxu1 %v14798_v17 }
 0x4f7   :  { %10076 = vmatprep.subr.bf16.mxu0 %v14805_v55  ;;  %10420 = vmatprep.subr.bf16.mxu1 %v14807_v59 }
 0x4f8   :  { %v9584_v6 = vpop.f32.mrb[0].mxu0  ;;  %v9928_v10 = vpop.f32.mrb[0].mxu1 }
 0x4f9   :  { %v10667_v9 = vadd.f32 %v10630_v13, %v9584_v6  ;;  %v9586_v50 = vpop.f32.mrb[1].mxu0  ;;  %v10669_v19 = vadd.f32 %v10638_v45, %v9928_v10  ;;  %v9930_v48 = vpop.f32.mrb[1].mxu1  ;;  %v14828_v6 = vcombine.low %v619_v39, %v623_v2  ;;  %v639_v10 = vld [vmem:[#allocation2 + $0xeb0] sm:$0xff] }
 0x4fa   :  { %v10668_v20 = vadd.f32 %v10634_v1, %v9586_v50  ;;  %v9588_v32 = vpop.f32.mrb[2].mxu0  ;;  %10077 = vmatpush1.bf16.msra.mxu0 %v14804_v42  ;;  %v10670_v25 = vadd.f32 %v10642_v3, %v9930_v48  ;;  %v9932_v28 = vpop.f32.mrb[2].mxu1  ;;  %10421 = vmatpush1.bf16.msra.mxu1 %v14806_v4  ;;  %v631_v42 = vld [vmem:[#allocation2 + $0xe70] sm:$0xff]  ;;  %v628_v4 = vld [vmem:[#allocation2 + $0xe58] sm:$0xff] }
 0x4fb   :  { %v10675_v26 = vadd.f32 %v10630_v13, %v9588_v32  ;;  %v9590_v58 = vpop.f32.mrb[3].mxu0  ;;  %10078 = vmatprep.subr.bf16.mxu0 %v14813_v5  ;;  %v10677_v34 = vadd.f32 %v10638_v45, %v9932_v28  ;;  %v9934_v36 = vpop.f32.mrb[3].mxu1  ;;  %10422 = vmatprep.subr.bf16.mxu1 %v14815_v7  ;;  %v10683_v40 = vmax.f32 %v10667_v9, 0.0  ;;  %v10685_v51 = vmax.f32 %v10669_v19, 0.0  ;;  %v632_v5 = vld [vmem:[#allocation2 + $0xe78] sm:$0xff]  ;;  %v635_v9 = vld [vmem:[#allocation2 + $0xe90] sm:$0xff] }
 0x4fc   :  { %v10676_v35 = vadd.f32 %v10634_v1, %v9590_v58  ;;  %v10678_v43 = vadd.f32 %v10642_v3, %v9934_v36  ;;  %v10684_v56 = vmax.f32 %v10668_v20, 0.0  ;;  %v10686_v59 = vmax.f32 %v10670_v25, 0.0  ;;  %v627_v1 = vld [vmem:[#allocation2 + $0xe50] sm:$0xff]  ;;  %v636_v50 = vld [vmem:[#allocation2 + $0xe98] sm:$0xff] }
 0x4fd   :  { %v10691_v41 = vmax.f32 %v10675_v26, 0.0  ;;  %v10693_v17 = vmax.f32 %v10677_v34, 0.0  ;;  %v14829_v13 = vcombine.high %v619_v39, %v623_v2  ;;  %v14831_v45 = vcombine.high %v620_v49, %v624_v38  ;;  %v643_v32 = vld [vmem:[#allocation2 + $0xed0] sm:$0xff]  ;;  %v648_v25 = vld [vmem:[#allocation2 + $0xef8] sm:$0xff] }
 0x4fe   :  { %v10692_v55 = vmax.f32 %v10676_v35, 0.0  ;;  %10079 = vmatpush1.bf16.msra.mxu0 %v14812_v60  ;;  %v10694_v63 = vmax.f32 %v10678_v43, 0.0  ;;  %10423 = vmatpush1.bf16.msra.mxu1 %v14814_v23  ;;  %v14830_v7 = vcombine.low %v620_v49, %v624_v38  ;;  %v14837_v29 = vcombine.high %v627_v1, %v631_v42  ;;  %v647_v60 = vld [vmem:[#allocation2 + $0xef0] sm:$0xff]  ;;  %v644_v23 = vld [vmem:[#allocation2 + $0xed8] sm:$0xff] }
 0x4ff   :  { %v17374_v62 = vpack.c.bf16 %v10691_v41, %v10683_v40  ;;  %10080 = vmatprep.subr.bf16.mxu0 %v14821_v31  ;;  %v17376_v15 = vpack.c.bf16 %v10693_v17, %v10685_v51  ;;  %10424 = vmatprep.subr.bf16.mxu1 %v14823_v22  ;;  %v14839_v8 = vcombine.high %v628_v4, %v632_v5  ;;  %v651_v34 = vld [vmem:[#allocation2 + $0xf10] sm:$0xff]  ;;  %v652_v36 = vld [vmem:[#allocation2 + $0xf18] sm:$0xff] }
 0x500   :  { %v17378_v0 = vpack.c.bf16 %v10692_v55, %v10684_v56  ;;  %v17380_v3 = vpack.c.bf16 %v10694_v63, %v10686_v59  ;;  %v14836_v18 = vcombine.low %v627_v1, %v631_v42  ;;  %v14838_v19 = vcombine.low %v628_v4, %v632_v5  ;;  %v655_v35 = vld [vmem:[#allocation2 + $0xf30] sm:$0xff]  ;;  %v664_v49 = vld [vmem:[#allocation2 + $0xf78] sm:$0xff] }
 0x501   :  { %v14845_v20 = vcombine.high %v635_v9, %v639_v10  ;;  %v14847_v48 = vcombine.high %v636_v50, %v640_v12  ;;  %v14844_v26 = vcombine.low %v635_v9, %v639_v10  ;;  %v14846_v28 = vcombine.low %v636_v50, %v640_v12  ;;  %v659_v41 = vld [vmem:[#allocation2 + $0xf50] sm:$0xff]  ;;  %v668_v63 = vld [vmem:[#allocation2 + $0xf98] sm:$0xff] }
 0x502   :  { %10081 = vmatpush1.bf16.msra.mxu0 %v14820_v30  ;;  %10425 = vmatpush1.bf16.msra.mxu1 %v14822_v47  ;;  %v14853_v58 = vcombine.high %v643_v32, %v647_v60  ;;  %v14855_v31 = vcombine.high %v644_v23, %v648_v25  ;;  %v656_v30 = vld [vmem:[#allocation2 + $0xf38] sm:$0xff]  ;;  %v14852_v22 = vcombine.low %v643_v32, %v647_v60  ;;  %v663_v43 = vld [vmem:[#allocation2 + $0xf70] sm:$0xff] }
 0x503   :  { %10082 = vmatprep.subr.bf16.mxu0 %v14829_v13  ;;  %10426 = vmatprep.subr.bf16.mxu1 %v14831_v45  ;;  %v14854_v39 = vcombine.low %v644_v23, %v648_v25  ;;  %v14861_v2 = vcombine.high %v651_v34, %v655_v35  ;;  %v14863_v40 = vcombine.high %v652_v36, %v656_v30  ;;  %v660_v47 = vld [vmem:[#allocation2 + $0xf58] sm:$0xff]  ;;  %v667_v55 = vld [vmem:[#allocation2 + $0xf90] sm:$0xff] }
 0x504   :  { %v14860_v38 = vcombine.low %v651_v34, %v655_v35  ;;  %v14862_v51 = vcombine.low %v652_v36, %v656_v30  ;;  %v14869_v56 = vcombine.high %v659_v41, %v663_v43  ;;  %v14871_v17 = vcombine.high %v660_v47, %v664_v49  ;;  %v671_v59 = vld [vmem:[#allocation2 + $0xfb0] sm:$0xff]  ;;  %v672_v13 = vld [vmem:[#allocation2 + $0xfb8] sm:$0xff] }
 0x505   :  { %v14868_v45 = vcombine.low %v659_v41, %v663_v43  ;;  %v14870_v1 = vcombine.low %v660_v47, %v664_v49  ;;  %v14877_v42 = vcombine.high %v667_v55, %v671_v59  ;;  %v14879_v4 = vcombine.high %v668_v63, %v672_v13  ;;  %v675_v5 = vld [vmem:[#allocation2 + $0xfd0] sm:$0xff] }
 0x506   :  { %10083 = vmatpush1.bf16.msra.mxu0 %v14828_v6  ;;  %10427 = vmatpush1.bf16.msra.mxu1 %v14830_v7  ;;  %v679_v6 = vld [vmem:[#allocation2 + $0xff0] sm:$0xff]  ;;  %v676_v7 = vld [vmem:[#allocation2 + $0xfd8] sm:$0xff]  ;;  %v14878_v9 = vcombine.low %v668_v63, %v672_v13 }
 0x507   :  { %10084 = vmatprep.subr.bf16.mxu0 %v14837_v29  ;;  %10428 = vmatprep.subr.bf16.mxu1 %v14839_v8  ;;  %v680_v29 = vld [vmem:[#allocation2 + $0xff8] sm:$0xff]  ;;  %v14876_v8 = vcombine.low %v667_v55, %v671_v59  ;;  %v14885_v10 = vcombine.high %v675_v5, %v679_v6  ;;  %v683_v12 = vld [vmem:[#allocation2 + $0x1010] sm:$0xff] }
 0x508   :  { %v14887_v50 = vcombine.high %v676_v7, %v680_v29  ;;  %v14886_v32 = vcombine.low %v676_v7, %v680_v29  ;;  %v691_v25 = vld [vmem:[#allocation2 + $0x1050] sm:$0xff]  ;;  %v724_v29 = vld [vmem:[#allocation2 + $0x1158] sm:$0xff] }
 0x509   :  { %v699_v30 = vld [vmem:[#allocation2 + $0x1090] sm:$0xff] }
 0x50a   :  { %10085 = vmatpush1.bf16.msra.mxu0 %v14836_v18  ;;  %10429 = vmatpush1.bf16.msra.mxu1 %v14838_v19  ;;  %v687_v18 = vld [vmem:[#allocation2 + $0x1030] sm:$0xff]  ;;  %v684_v19 = vld [vmem:[#allocation2 + $0x1018] sm:$0xff] }
 0x50b   :  { %10086 = vmatprep.subr.bf16.mxu0 %v14845_v20  ;;  %10430 = vmatprep.subr.bf16.mxu1 %v14847_v48  ;;  %v688_v20 = vld [vmem:[#allocation2 + $0x1038] sm:$0xff]  ;;  %v14884_v48 = vcombine.low %v675_v5, %v679_v6  ;;  %v14893_v60 = vcombine.high %v683_v12, %v687_v18  ;;  %v707_v49 = vld [vmem:[#allocation2 + $0x10d0] sm:$0xff] }
 0x50c   :  { %v14895_v23 = vcombine.high %v684_v19, %v688_v20  ;;  %v14894_v34 = vcombine.low %v684_v19, %v688_v20  ;;  %v715_v63 = vld [vmem:[#allocation2 + $0x1110] sm:$0xff]  ;;  %v732_v20 = vld [vmem:[#allocation2 + $0x1198] sm:$0xff] }
 0x50d   :  { %v719_v13 = vld [vmem:[#allocation2 + $0x1130] sm:$0xff] }
 0x50e   :  { %10087 = vmatpush1.bf16.msra.mxu0 %v14844_v26  ;;  %10431 = vmatpush1.bf16.msra.mxu1 %v14846_v28  ;;  %v695_v26 = vld [vmem:[#allocation2 + $0x1070] sm:$0xff]  ;;  %v692_v28 = vld [vmem:[#allocation2 + $0x1058] sm:$0xff]  ;;  %v14925_v5 = vcombine.high %v715_v63, %v719_v13 }
 0x50f   :  { %10088 = vmatprep.subr.bf16.mxu0 %v14853_v58  ;;  %10432 = vmatprep.subr.bf16.mxu1 %v14855_v31  ;;  %v696_v58 = vld [vmem:[#allocation2 + $0x1078] sm:$0xff]  ;;  %v14892_v31 = vcombine.low %v683_v12, %v687_v18  ;;  %v14901_v35 = vcombine.high %v691_v25, %v695_v26  ;;  %v723_v6 = vld [vmem:[#allocation2 + $0x1150] sm:$0xff] }
 0x510   :  { %v14903_v36 = vcombine.high %v692_v28, %v696_v58  ;;  %v14902_v41 = vcombine.low %v692_v28, %v696_v58  ;;  %v727_v7 = vld [vmem:[#allocation2 + $0x1170] sm:$0xff]  ;;  %v740_v58 = vld [vmem:[#allocation2 + $0x11d8] sm:$0xff] }
 0x511   :  { %v731_v18 = vld [vmem:[#allocation2 + $0x1190] sm:$0xff] }
 0x512   :  { %10089 = vmatpush1.bf16.msra.mxu0 %v14852_v22  ;;  %10433 = vmatpush1.bf16.msra.mxu1 %v14854_v39  ;;  %v703_v22 = vld [vmem:[#allocation2 + $0x10b0] sm:$0xff]  ;;  %v700_v39 = vld [vmem:[#allocation2 + $0x1098] sm:$0xff] }
 0x513   :  { %10090 = vmatprep.subr.bf16.mxu0 %v14861_v2  ;;  %10434 = vmatprep.subr.bf16.mxu1 %v14863_v40  ;;  %v704_v2 = vld [vmem:[#allocation2 + $0x10b8] sm:$0xff]  ;;  %v14900_v40 = vcombine.low %v691_v25, %v695_v26  ;;  %v14909_v43 = vcombine.high %v699_v30, %v703_v22  ;;  %v735_v19 = vld [vmem:[#allocation2 + $0x11b0] sm:$0xff] }
 0x514   :  { %v14911_v47 = vcombine.high %v700_v39, %v704_v2  ;;  %v739_v26 = vld [vmem:[#allocation2 + $0x11d0] sm:$0xff] }
 0x515   :  { %v743_v28 = vld [vmem:[#allocation2 + $0x11f0] sm:$0xff] }
 0x516   :  { %10091 = vmatpush1.bf16.msra.mxu0 %v14860_v38  ;;  %10435 = vmatpush1.bf16.msra.mxu1 %v14862_v51  ;;  %v711_v38 = vld [vmem:[#allocation2 + $0x10f0] sm:$0xff]  ;;  %v708_v51 = vld [vmem:[#allocation2 + $0x10d8] sm:$0xff] }
 0x517   :  { %10092 = vmatprep.subr.bf16.mxu0 %v14869_v56  ;;  %10436 = vmatprep.subr.bf16.mxu1 %v14871_v17  ;;  %v712_v56 = vld [vmem:[#allocation2 + $0x10f8] sm:$0xff]  ;;  %v14908_v17 = vcombine.low %v699_v30, %v703_v22  ;;  %v14917_v55 = vcombine.high %v707_v49, %v711_v38  ;;  %v747_v22 = vld [vmem:[#allocation2 + $0x1210] sm:$0xff] }
 0x518   :  { %v14919_v59 = vcombine.high %v708_v51, %v712_v56 }
 0x51a   :  { %10093 = vmatpush1.bf16.msra.mxu0 %v14868_v45  ;;  %10437 = vmatpush1.bf16.msra.mxu1 %v14870_v1  ;;  %v716_v45 = vld [vmem:[#allocation2 + $0x1118] sm:$0xff] }
 0x51b   :  { %10094 = vmatprep.subr.bf16.mxu0 %v14877_v42  ;;  %10438 = vmatprep.subr.bf16.mxu1 %v14879_v4  ;;  %v720_v1 = vld [vmem:[#allocation2 + $0x1138] sm:$0xff]  ;;  %v14916_v42 = vcombine.low %v707_v49, %v711_v38  ;;  %v14918_v4 = vcombine.low %v708_v51, %v712_v56  ;;  %v755_v38 = vld [vmem:[#allocation2 + $0x1250] sm:$0xff] }
 0x51c   :  { %v759_v51 = vld [vmem:[#allocation2 + $0x1270] sm:$0xff]  ;;  %v756_v56 = vld [vmem:[#allocation2 + $0x1258] sm:$0xff] }
 0x51e   :  { %10095 = vmatpush1.bf16.msra.mxu0 %v14876_v8  ;;  %10439 = vmatpush1.bf16.msra.mxu1 %v14878_v9  ;;  %v728_v8 = vld [vmem:[#allocation2 + $0x1178] sm:$0xff]  ;;  %v14924_v9 = vcombine.low %v715_v63, %v719_v13  ;;  %v763_v13 = vld [vmem:[#allocation2 + $0x1290] sm:$0xff] }
 0x51f   :  { %10096 = vmatprep.subr.bf16.mxu0 %v14885_v10  ;;  %10440 = vmatprep.subr.bf16.mxu1 %v14887_v50  ;;  %v14926_v10 = vcombine.low %v716_v45, %v720_v1  ;;  %v14933_v50 = vcombine.high %v723_v6, %v727_v7  ;;  %v14935_v12 = vcombine.high %v724_v29, %v728_v8 }
 0x522   :  { %10097 = vmatpush1.bf16.msra.mxu0 %v14884_v48  ;;  %10441 = vmatpush1.bf16.msra.mxu1 %v14886_v32  ;;  %v736_v48 = vld [vmem:[#allocation2 + $0x11b8] sm:$0xff]  ;;  %v14932_v32 = vcombine.low %v723_v6, %v727_v7  ;;  %v771_v7 = vld [vmem:[#allocation2 + $0x12d0] sm:$0xff] }
 0x523   :  { %10109 = vmatprep.subr.bf16.mxu0 %v14893_v60  ;;  %10453 = vmatprep.subr.bf16.mxu1 %v14895_v23  ;;  %v14934_v60 = vcombine.low %v724_v29, %v728_v8  ;;  %v14941_v23 = vcombine.high %v731_v18, %v735_v19  ;;  %v14943_v25 = vcombine.high %v732_v20, %v736_v48  ;;  %v775_v29 = vld [vmem:[#allocation2 + $0x12f0] sm:$0xff]  ;;  %v772_v8 = vld [vmem:[#allocation2 + $0x12d8] sm:$0xff] }
 0x525   :  { %10099 = vmatmul.mubr.bf16.vlgmr.msra.gmra.mrb[4].mxu0 %v17249_v14  ;;  %10443 = vmatmul.mubr.bf16.vlgmr.msra.gmra.mrb[4].mxu1 %v17249_v14  ;;  %v14910_v14 = vcombine.low %v700_v39, %v704_v2  ;;  %v751_v39 = vld [vmem:[#allocation2 + $0x1230] sm:$0xff]  ;;  %v748_v2 = vld [vmem:[#allocation2 + $0x1218] sm:$0xff] }
 0x526   :  { %10110 = vmatpush1.bf16.msra.mxu0 %v14892_v31  ;;  %10454 = vmatpush1.bf16.msra.mxu1 %v14894_v34  ;;  %v744_v31 = vld [vmem:[#allocation2 + $0x11f8] sm:$0xff]  ;;  %v14940_v34 = vcombine.low %v731_v18, %v735_v19  ;;  %v779_v19 = vld [vmem:[#allocation2 + $0x1310] sm:$0xff] }
 0x527   :  { %10111 = vmatprep.subr.bf16.mxu0 %v14901_v35  ;;  %10455 = vmatprep.subr.bf16.mxu1 %v14903_v36  ;;  %v14942_v35 = vcombine.low %v732_v20, %v736_v48  ;;  %v14949_v36 = vcombine.high %v739_v26, %v743_v28  ;;  %v14951_v30 = vcombine.high %v740_v58, %v744_v31  ;;  %v783_v20 = vld [vmem:[#allocation2 + $0x1330] sm:$0xff]  ;;  %v780_v48 = vld [vmem:[#allocation2 + $0x1318] sm:$0xff] }
 0x528   :  { %10141 = vmatprep.mubr.bf16.mxu0 %v17263_v24  ;;  %10485 = vmatprep.mubr.bf16.mxu1 %v17263_v24  ;;  %v14927_v24 = vcombine.high %v716_v45, %v720_v1  ;;  %v767_v45 = vld [vmem:[#allocation2 + $0x12b0] sm:$0xff]  ;;  %v764_v1 = vld [vmem:[#allocation2 + $0x1298] sm:$0xff] }
 0x52a   :  { %10112 = vmatpush1.bf16.msra.mxu0 %v14900_v40  ;;  %10456 = vmatpush1.bf16.msra.mxu1 %v14902_v41  ;;  %v752_v40 = vld [vmem:[#allocation2 + $0x1238] sm:$0xff]  ;;  %v14948_v41 = vcombine.low %v739_v26, %v743_v28  ;;  %v787_v28 = vld [vmem:[#allocation2 + $0x1350] sm:$0xff] }
 0x52b   :  { %10113 = vmatprep.subr.bf16.mxu0 %v14909_v43  ;;  %10457 = vmatprep.subr.bf16.mxu1 %v14911_v47  ;;  %v14950_v43 = vcombine.low %v740_v58, %v744_v31  ;;  %v14957_v47 = vcombine.high %v747_v22, %v751_v39  ;;  %v14959_v49 = vcombine.high %v748_v2, %v752_v40  ;;  %v791_v58 = vld [vmem:[#allocation2 + $0x1370] sm:$0xff]  ;;  %v788_v31 = vld [vmem:[#allocation2 + $0x1358] sm:$0xff] }
 0x52e   :  { %10114 = vmatpush1.bf16.msra.mxu0 %v14908_v17  ;;  %10458 = vmatpush1.bf16.msra.mxu1 %v14910_v14  ;;  %v760_v17 = vld [vmem:[#allocation2 + $0x1278] sm:$0xff]  ;;  %v14956_v14 = vcombine.low %v747_v22, %v751_v39  ;;  %v795_v39 = vld [vmem:[#allocation2 + $0x1390] sm:$0xff] }
 0x52f   :  { %10115 = vmatprep.subr.bf16.mxu0 %v14917_v55  ;;  %10459 = vmatprep.subr.bf16.mxu1 %v14919_v59  ;;  %v14958_v55 = vcombine.low %v748_v2, %v752_v40  ;;  %v14965_v59 = vcombine.high %v755_v38, %v759_v51  ;;  %v14967_v63 = vcombine.high %v756_v56, %v760_v17  ;;  %v799_v2 = vld [vmem:[#allocation2 + $0x13b0] sm:$0xff]  ;;  %v796_v40 = vld [vmem:[#allocation2 + $0x1398] sm:$0xff] }
 0x532   :  { %10116 = vmatpush1.bf16.msra.mxu0 %v14916_v42  ;;  %10460 = vmatpush1.bf16.msra.mxu1 %v14918_v4  ;;  %v768_v42 = vld [vmem:[#allocation2 + $0x12b8] sm:$0xff]  ;;  %v14964_v4 = vcombine.low %v755_v38, %v759_v51  ;;  %v803_v51 = vld [vmem:[#allocation2 + $0x13d0] sm:$0xff] }
 0x533   :  { %10117 = vmatprep.subr.bf16.mxu0 %v14925_v5  ;;  %10461 = vmatprep.subr.bf16.mxu1 %v14927_v24  ;;  %v14966_v5 = vcombine.low %v756_v56, %v760_v17  ;;  %v14973_v24 = vcombine.high %v763_v13, %v767_v45  ;;  %v14975_v6 = vcombine.high %v764_v1, %v768_v42  ;;  %v807_v56 = vld [vmem:[#allocation2 + $0x13f0] sm:$0xff]  ;;  %v804_v17 = vld [vmem:[#allocation2 + $0x13d8] sm:$0xff] }
 0x536   :  { %10118 = vmatpush1.bf16.msra.mxu0 %v14924_v9  ;;  %10462 = vmatpush1.bf16.msra.mxu1 %v14926_v10  ;;  %v776_v9 = vld [vmem:[#allocation2 + $0x12f8] sm:$0xff]  ;;  %v14972_v10 = vcombine.low %v763_v13, %v767_v45  ;;  %v811_v45 = vld [vmem:[#allocation2 + $0x1410] sm:$0xff] }
 0x537   :  { %10119 = vmatprep.subr.bf16.mxu0 %v14933_v50  ;;  %10463 = vmatprep.subr.bf16.mxu1 %v14935_v12  ;;  %v14974_v50 = vcombine.low %v764_v1, %v768_v42  ;;  %v14981_v12 = vcombine.high %v771_v7, %v775_v29  ;;  %v14983_v18 = vcombine.high %v772_v8, %v776_v9  ;;  %v815_v1 = vld [vmem:[#allocation2 + $0x1430] sm:$0xff]  ;;  %v812_v42 = vld [vmem:[#allocation2 + $0x1418] sm:$0xff] }
 0x53a   :  { %10120 = vmatpush1.bf16.msra.mxu0 %v14932_v32  ;;  %10464 = vmatpush1.bf16.msra.mxu1 %v14934_v60  ;;  %v784_v32 = vld [vmem:[#allocation2 + $0x1338] sm:$0xff]  ;;  %v14980_v60 = vcombine.low %v771_v7, %v775_v29  ;;  %v819_v29 = vld [vmem:[#allocation2 + $0x1450] sm:$0xff] }
 0x53b   :  { %10121 = vmatprep.subr.bf16.mxu0 %v14941_v23  ;;  %10465 = vmatprep.subr.bf16.mxu1 %v14943_v25  ;;  %v14982_v23 = vcombine.low %v772_v8, %v776_v9  ;;  %v14989_v25 = vcombine.high %v779_v19, %v783_v20  ;;  %v14991_v26 = vcombine.high %v780_v48, %v784_v32  ;;  %v823_v8 = vld [vmem:[#allocation2 + $0x1470] sm:$0xff]  ;;  %v820_v9 = vld [vmem:[#allocation2 + $0x1458] sm:$0xff] }
 0x53e   :  { %10122 = vmatpush1.bf16.msra.mxu0 %v14940_v34  ;;  %10466 = vmatpush1.bf16.msra.mxu1 %v14942_v35  ;;  %v792_v34 = vld [vmem:[#allocation2 + $0x1378] sm:$0xff]  ;;  %v14988_v35 = vcombine.low %v779_v19, %v783_v20  ;;  %v827_v20 = vld [vmem:[#allocation2 + $0x1490] sm:$0xff] }
 0x53f   :  { %10123 = vmatprep.subr.bf16.mxu0 %v14949_v36  ;;  %10467 = vmatprep.subr.bf16.mxu1 %v14951_v30  ;;  %v14990_v36 = vcombine.low %v780_v48, %v784_v32  ;;  %v14997_v30 = vcombine.high %v787_v28, %v791_v58  ;;  %v14999_v22 = vcombine.high %v788_v31, %v792_v34  ;;  %v831_v48 = vld [vmem:[#allocation2 + $0x14b0] sm:$0xff]  ;;  %v828_v32 = vld [vmem:[#allocation2 + $0x1498] sm:$0xff] }
 0x542   :  { %10124 = vmatpush1.bf16.msra.mxu0 %v14948_v41  ;;  %10468 = vmatpush1.bf16.msra.mxu1 %v14950_v43  ;;  %v800_v41 = vld [vmem:[#allocation2 + $0x13b8] sm:$0xff]  ;;  %v14996_v43 = vcombine.low %v787_v28, %v791_v58  ;;  %v835_v58 = vld [vmem:[#allocation2 + $0x14d0] sm:$0xff] }
 0x543   :  { %10125 = vmatprep.subr.bf16.mxu0 %v14957_v47  ;;  %10469 = vmatprep.subr.bf16.mxu1 %v14959_v49  ;;  %v14998_v47 = vcombine.low %v788_v31, %v792_v34  ;;  %v15005_v49 = vcombine.high %v795_v39, %v799_v2  ;;  %v15007_v38 = vcombine.high %v796_v40, %v800_v41  ;;  %v839_v31 = vld [vmem:[#allocation2 + $0x14f0] sm:$0xff]  ;;  %v836_v34 = vld [vmem:[#allocation2 + $0x14d8] sm:$0xff] }
 0x546   :  { %10126 = vmatpush1.bf16.msra.mxu0 %v14956_v14  ;;  %10470 = vmatpush1.bf16.msra.mxu1 %v14958_v55  ;;  %v808_v14 = vld [vmem:[#allocation2 + $0x13f8] sm:$0xff]  ;;  %v15004_v55 = vcombine.low %v795_v39, %v799_v2  ;;  %v843_v39 = vld [vmem:[#allocation2 + $0x1510] sm:$0xff] }
 0x547   :  { %10127 = vmatprep.subr.bf16.mxu0 %v14965_v59  ;;  %10471 = vmatprep.subr.bf16.mxu1 %v14967_v63  ;;  %v15006_v59 = vcombine.low %v796_v40, %v800_v41  ;;  %v15013_v63 = vcombine.high %v803_v51, %v807_v56  ;;  %v15015_v13 = vcombine.high %v804_v17, %v808_v14  ;;  %v847_v2 = vld [vmem:[#allocation2 + $0x1530] sm:$0xff]  ;;  %v844_v40 = vld [vmem:[#allocation2 + $0x1518] sm:$0xff] }
 0x548   :  { %v848_v41 = vld [vmem:[#allocation2 + $0x1538] sm:$0xff] }
 0x54a   :  { %10128 = vmatpush1.bf16.msra.mxu0 %v14964_v4  ;;  %10472 = vmatpush1.bf16.msra.mxu1 %v14966_v5  ;;  %v816_v4 = vld [vmem:[#allocation2 + $0x1438] sm:$0xff]  ;;  %v15012_v5 = vcombine.low %v803_v51, %v807_v56  ;;  %v855_v51 = vld [vmem:[#allocation2 + $0x1570] sm:$0xff] }
 0x54b   :  { %10129 = vmatprep.subr.bf16.mxu0 %v14973_v24  ;;  %10473 = vmatprep.subr.bf16.mxu1 %v14975_v6  ;;  %v15014_v24 = vcombine.low %v804_v17, %v808_v14  ;;  %v15021_v6 = vcombine.high %v811_v45, %v815_v1  ;;  %v15023_v7 = vcombine.high %v812_v42, %v816_v4  ;;  %v852_v56 = vld [vmem:[#allocation2 + $0x1558] sm:$0xff] }
 0x54c   :  { %v856_v17 = vld [vmem:[#allocation2 + $0x1578] sm:$0xff]  ;;  %v15052_v14 = vcombine.low %v843_v39, %v847_v2 }
 0x54e   :  { %10130 = vmatpush1.bf16.msra.mxu0 %v14972_v10  ;;  %10474 = vmatpush1.bf16.msra.mxu1 %v14974_v50  ;;  %v824_v10 = vld [vmem:[#allocation2 + $0x1478] sm:$0xff]  ;;  %v15020_v50 = vcombine.low %v811_v45, %v815_v1  ;;  %v863_v45 = vld [vmem:[#allocation2 + $0x15b0] sm:$0xff] }
 0x54f   :  { %10131 = vmatprep.subr.bf16.mxu0 %v14981_v12  ;;  %10475 = vmatprep.subr.bf16.mxu1 %v14983_v18  ;;  %v15022_v12 = vcombine.low %v812_v42, %v816_v4  ;;  %v15029_v18 = vcombine.high %v819_v29, %v823_v8  ;;  %v15031_v19 = vcombine.high %v820_v9, %v824_v10  ;;  %v860_v1 = vld [vmem:[#allocation2 + $0x1598] sm:$0xff] }
 0x550   :  { %v864_v42 = vld [vmem:[#allocation2 + $0x15b8] sm:$0xff] }
 0x552   :  { %10132 = vmatpush1.bf16.msra.mxu0 %v14980_v60  ;;  %10476 = vmatpush1.bf16.msra.mxu1 %v14982_v23  ;;  %v832_v60 = vld [vmem:[#allocation2 + $0x14b8] sm:$0xff]  ;;  %v15028_v23 = vcombine.low %v819_v29, %v823_v8  ;;  %v871_v29 = vld [vmem:[#allocation2 + $0x15f0] sm:$0xff] }
 0x553   :  { %10133 = vmatprep.subr.bf16.mxu0 %v14989_v25  ;;  %10477 = vmatprep.subr.bf16.mxu1 %v14991_v26  ;;  %v15030_v25 = vcombine.low %v820_v9, %v824_v10  ;;  %v15037_v26 = vcombine.high %v827_v20, %v831_v48  ;;  %v15039_v28 = vcombine.high %v828_v32, %v832_v60  ;;  %v868_v8 = vld [vmem:[#allocation2 + $0x15d8] sm:$0xff] }
 0x554   :  { %v872_v9 = vld [vmem:[#allocation2 + $0x15f8] sm:$0xff] }
 0x556   :  { %10134 = vmatpush1.bf16.msra.mxu0 %v14988_v35  ;;  %10478 = vmatpush1.bf16.msra.mxu1 %v14990_v36  ;;  %v840_v35 = vld [vmem:[#allocation2 + $0x14f8] sm:$0xff]  ;;  %v15036_v36 = vcombine.low %v827_v20, %v831_v48  ;;  %v879_v20 = vld [vmem:[#allocation2 + $0x1630] sm:$0xff] }
 0x557   :  { %10135 = vmatprep.subr.bf16.mxu0 %v14997_v30  ;;  %10479 = vmatprep.subr.bf16.mxu1 %v14999_v22  ;;  %v15045_v30 = vcombine.high %v835_v58, %v839_v31  ;;  %v15047_v22 = vcombine.high %v836_v34, %v840_v35  ;;  %v876_v48 = vld [vmem:[#allocation2 + $0x1618] sm:$0xff] }
 0x55a   :  { %10136 = vmatpush1.bf16.msra.mxu0 %v14996_v43  ;;  %10480 = vmatpush1.bf16.msra.mxu1 %v14998_v47  ;;  %v15044_v43 = vcombine.low %v835_v58, %v839_v31  ;;  %v15046_v47 = vcombine.low %v836_v34, %v840_v35  ;;  %v887_v58 = vld [vmem:[#allocation2 + $0x1670] sm:$0xff]  ;;  %v884_v31 = vld [vmem:[#allocation2 + $0x1658] sm:$0xff] }
 0x55b   :  { %10137 = vmatprep.subr.bf16.mxu0 %v15005_v49  ;;  %10481 = vmatprep.subr.bf16.mxu1 %v15007_v38  ;;  %v15053_v49 = vcombine.high %v843_v39, %v847_v2  ;;  %v851_v38 = vld [vmem:[#allocation2 + $0x1550] sm:$0xff]  ;;  %v888_v34 = vld [vmem:[#allocation2 + $0x1678] sm:$0xff] }
 0x55c   :  { %v15060_v4 = vcombine.low %v851_v38, %v855_v51  ;;  %v895_v39 = vld [vmem:[#allocation2 + $0x16b0] sm:$0xff]  ;;  %v892_v2 = vld [vmem:[#allocation2 + $0x1698] sm:$0xff] }
 0x55e   :  { %10138 = vmatpush1.bf16.msra.mxu0 %v15004_v55  ;;  %10482 = vmatpush1.bf16.msra.mxu1 %v15006_v59  ;;  %v15054_v55 = vcombine.low %v844_v40, %v848_v41  ;;  %v15061_v59 = vcombine.high %v851_v38, %v855_v51  ;;  %v903_v38 = vld [vmem:[#allocation2 + $0x16f0] sm:$0xff]  ;;  %v900_v51 = vld [vmem:[#allocation2 + $0x16d8] sm:$0xff] }
 0x55f   :  { %10139 = vmatprep.subr.bf16.mxu0 %v15013_v63  ;;  %10483 = vmatprep.subr.bf16.mxu1 %v15015_v13  ;;  %v15063_v63 = vcombine.high %v852_v56, %v856_v17  ;;  %v859_v13 = vld [vmem:[#allocation2 + $0x1590] sm:$0xff] }
 0x560   :  { %v15068_v10 = vcombine.low %v859_v13, %v863_v45 }
 0x562   :  { %10140 = vmatpush1.bf16.msra.mxu0 %v15012_v5  ;;  %10484 = vmatpush1.bf16.msra.mxu1 %v15014_v24  ;;  %v15062_v5 = vcombine.low %v852_v56, %v856_v17  ;;  %v15069_v24 = vcombine.high %v859_v13, %v863_v45  ;;  %v904_v56 = vld [vmem:[#allocation2 + $0x16f8] sm:$0xff]  ;;  %v911_v13 = vld [vmem:[#allocation2 + $0x1730] sm:$0xff] }
 0x563   :  { %10152 = vmatprep.subr.bf16.mxu0 %v15021_v6  ;;  %10496 = vmatprep.subr.bf16.mxu1 %v15023_v7  ;;  %v15071_v6 = vcombine.high %v860_v1, %v864_v42  ;;  %v867_v7 = vld [vmem:[#allocation2 + $0x15d0] sm:$0xff]  ;;  %v908_v45 = vld [vmem:[#allocation2 + $0x1718] sm:$0xff] }
 0x565   :  { %10142 = vmatmul.mubr.bf16.vlgmr.msra.gmra.mrb[4].mxu0 %v17271_v46  ;;  %10486 = vmatmul.mubr.bf16.vlgmr.msra.gmra.mrb[4].mxu1 %v17271_v46  ;;  %v15038_v46 = vcombine.low %v828_v32, %v832_v60  ;;  %v880_v32 = vld [vmem:[#allocation2 + $0x1638] sm:$0xff]  ;;  %v15076_v60 = vcombine.low %v867_v7, %v871_v29 }
 0x566   :  { %10153 = vmatpush1.bf16.msra.mxu0 %v15020_v50  ;;  %10497 = vmatpush1.bf16.msra.mxu1 %v15022_v12  ;;  %v15070_v50 = vcombine.low %v860_v1, %v864_v42  ;;  %v15077_v12 = vcombine.high %v867_v7, %v871_v29  ;;  %v912_v1 = vld [vmem:[#allocation2 + $0x1738] sm:$0xff]  ;;  %v919_v7 = vld [vmem:[#allocation2 + $0x1770] sm:$0xff] }
 0x567   :  { %10154 = vmatprep.subr.bf16.mxu0 %v15029_v18  ;;  %10498 = vmatprep.subr.bf16.mxu1 %v15031_v19  ;;  %v15079_v18 = vcombine.high %v868_v8, %v872_v9  ;;  %v875_v19 = vld [vmem:[#allocation2 + $0x1610] sm:$0xff]  ;;  %v916_v29 = vld [vmem:[#allocation2 + $0x1758] sm:$0xff] }
 0x568   :  { %10184 = vmatprep.mubr.bf16.mxu0 %v17285_v53  ;;  %10528 = vmatprep.mubr.bf16.mxu1 %v17285_v53  ;;  %v15055_v53 = vcombine.high %v844_v40, %v848_v41  ;;  %v15084_v35 = vcombine.low %v875_v19, %v879_v20  ;;  %v896_v40 = vld [vmem:[#allocation2 + $0x16b8] sm:$0xff] }
 0x56a   :  { %10155 = vmatpush1.bf16.msra.mxu0 %v15028_v23  ;;  %10499 = vmatpush1.bf16.msra.mxu1 %v15030_v25  ;;  %v15078_v23 = vcombine.low %v868_v8, %v872_v9  ;;  %v15085_v25 = vcombine.high %v875_v19, %v879_v20  ;;  %v920_v8 = vld [vmem:[#allocation2 + $0x1778] sm:$0xff]  ;;  %v927_v19 = vld [vmem:[#allocation2 + $0x17b0] sm:$0xff] }
 0x56b   :  { %10156 = vmatprep.subr.bf16.mxu0 %v15037_v26  ;;  %10500 = vmatprep.subr.bf16.mxu1 %v15039_v28  ;;  %v15087_v26 = vcombine.high %v876_v48, %v880_v32  ;;  %v883_v28 = vld [vmem:[#allocation2 + $0x1650] sm:$0xff]  ;;  %v924_v20 = vld [vmem:[#allocation2 + $0x1798] sm:$0xff] }
 0x56c   :  { %v15092_v41 = vcombine.low %v883_v28, %v887_v58 }
 0x56e   :  { %10157 = vmatpush1.bf16.msra.mxu0 %v15036_v36  ;;  %10501 = vmatpush1.bf16.msra.mxu1 %v15038_v46  ;;  %v15086_v36 = vcombine.low %v876_v48, %v880_v32  ;;  %v15093_v46 = vcombine.high %v883_v28, %v887_v58  ;;  %v928_v48 = vld [vmem:[#allocation2 + $0x17b8] sm:$0xff]  ;;  %v935_v28 = vld [vmem:[#allocation2 + $0x17f0] sm:$0xff] }
 0x56f   :  { %10158 = vmatprep.subr.bf16.mxu0 %v15045_v30  ;;  %10502 = vmatprep.subr.bf16.mxu1 %v15047_v22  ;;  %v15095_v30 = vcombine.high %v884_v31, %v888_v34  ;;  %v891_v22 = vld [vmem:[#allocation2 + $0x1690] sm:$0xff]  ;;  %v932_v58 = vld [vmem:[#allocation2 + $0x17d8] sm:$0xff] }
 0x570   :  { %v15100_v17 = vcombine.low %v891_v22, %v895_v39 }
 0x572   :  { %10159 = vmatpush1.bf16.msra.mxu0 %v15044_v43  ;;  %10503 = vmatpush1.bf16.msra.mxu1 %v15046_v47  ;;  %v15094_v43 = vcombine.low %v884_v31, %v888_v34  ;;  %v15101_v47 = vcombine.high %v891_v22, %v895_v39  ;;  %v936_v31 = vld [vmem:[#allocation2 + $0x17f8] sm:$0xff]  ;;  %v943_v22 = vld [vmem:[#allocation2 + $0x1830] sm:$0xff] }
 0x573   :  { %10160 = vmatprep.subr.bf16.mxu0 %v15053_v49  ;;  %10504 = vmatprep.subr.bf16.mxu1 %v15055_v53  ;;  %v15103_v49 = vcombine.high %v892_v2, %v896_v40  ;;  %v899_v53 = vld [vmem:[#allocation2 + $0x16d0] sm:$0xff]  ;;  %v940_v39 = vld [vmem:[#allocation2 + $0x1818] sm:$0xff] }
 0x574   :  { %v15108_v42 = vcombine.low %v899_v53, %v903_v38 }
 0x576   :  { %10161 = vmatpush1.bf16.msra.mxu0 %v15052_v14  ;;  %10505 = vmatpush1.bf16.msra.mxu1 %v15054_v55  ;;  %v15102_v14 = vcombine.low %v892_v2, %v896_v40  ;;  %v15109_v55 = vcombine.high %v899_v53, %v903_v38  ;;  %v944_v2 = vld [vmem:[#allocation2 + $0x1838] sm:$0xff]  ;;  %v951_v53 = vld [vmem:[#allocation2 + $0x1870] sm:$0xff] }
 0x577   :  { %10162 = vmatprep.subr.bf16.mxu0 %v15061_v59  ;;  %10506 = vmatprep.subr.bf16.mxu1 %v15063_v63  ;;  %v15111_v59 = vcombine.high %v900_v51, %v904_v56  ;;  %v907_v63 = vld [vmem:[#allocation2 + $0x1710] sm:$0xff]  ;;  %v948_v38 = vld [vmem:[#allocation2 + $0x1858] sm:$0xff] }
 0x578   :  { %v15116_v9 = vcombine.low %v907_v63, %v911_v13 }
 0x57a   :  { %10163 = vmatpush1.bf16.msra.mxu0 %v15060_v4  ;;  %10507 = vmatpush1.bf16.msra.mxu1 %v15062_v5  ;;  %v15110_v4 = vcombine.low %v900_v51, %v904_v56  ;;  %v15117_v5 = vcombine.high %v907_v63, %v911_v13  ;;  %v952_v51 = vld [vmem:[#allocation2 + $0x1878] sm:$0xff]  ;;  %v959_v63 = vld [vmem:[#allocation2 + $0x18b0] sm:$0xff] }
 0x57b   :  { %10164 = vmatprep.subr.bf16.mxu0 %v15069_v24  ;;  %10508 = vmatprep.subr.bf16.mxu1 %v15071_v6  ;;  %v15119_v24 = vcombine.high %v908_v45, %v912_v1  ;;  %v915_v6 = vld [vmem:[#allocation2 + $0x1750] sm:$0xff]  ;;  %v956_v13 = vld [vmem:[#allocation2 + $0x1898] sm:$0xff] }
 0x57c   :  { %v15124_v32 = vcombine.low %v915_v6, %v919_v7 }
 0x57e   :  { %10165 = vmatpush1.bf16.msra.mxu0 %v15068_v10  ;;  %10509 = vmatpush1.bf16.msra.mxu1 %v15070_v50  ;;  %v15118_v10 = vcombine.low %v908_v45, %v912_v1  ;;  %v15125_v50 = vcombine.high %v915_v6, %v919_v7  ;;  %v960_v45 = vld [vmem:[#allocation2 + $0x18b8] sm:$0xff]  ;;  %v967_v6 = vld [vmem:[#allocation2 + $0x18f0] sm:$0xff] }
 0x57f   :  { %10166 = vmatprep.subr.bf16.mxu0 %v15077_v12  ;;  %10510 = vmatprep.subr.bf16.mxu1 %v15079_v18  ;;  %v15127_v12 = vcombine.high %v916_v29, %v920_v8  ;;  %v923_v18 = vld [vmem:[#allocation2 + $0x1790] sm:$0xff]  ;;  %v964_v7 = vld [vmem:[#allocation2 + $0x18d8] sm:$0xff] }
 0x580   :  { %v15132_v34 = vcombine.low %v923_v18, %v927_v19 }
 0x582   :  { %10167 = vmatpush1.bf16.msra.mxu0 %v15076_v60  ;;  %10511 = vmatpush1.bf16.msra.mxu1 %v15078_v23  ;;  %v15126_v60 = vcombine.low %v916_v29, %v920_v8  ;;  %v15133_v23 = vcombine.high %v923_v18, %v927_v19  ;;  %v968_v29 = vld [vmem:[#allocation2 + $0x18f8] sm:$0xff] }
 0x583   :  { %10168 = vmatprep.subr.bf16.mxu0 %v15085_v25  ;;  %10512 = vmatprep.subr.bf16.mxu1 %v15087_v26  ;;  %v15135_v25 = vcombine.high %v924_v20, %v928_v48  ;;  %v931_v26 = vld [vmem:[#allocation2 + $0x17d0] sm:$0xff]  ;;  %v972_v18 = vld [vmem:[#allocation2 + $0x1918] sm:$0xff] }
 0x584   :  { %v15140_v40 = vcombine.low %v931_v26, %v935_v28  ;;  %v976_v19 = vld [vmem:[#allocation2 + $0x1938] sm:$0xff] }
 0x586   :  { %10169 = vmatpush1.bf16.msra.mxu0 %v15084_v35  ;;  %10513 = vmatpush1.bf16.msra.mxu1 %v15086_v36  ;;  %v15134_v35 = vcombine.low %v924_v20, %v928_v48  ;;  %v15141_v36 = vcombine.high %v931_v26, %v935_v28  ;;  %v15174_v48 = vcombine.low %v964_v7, %v968_v29  ;;  %v984_v26 = vld [vmem:[#allocation2 + $0x1978] sm:$0xff] }
 0x587   :  { %10170 = vmatprep.subr.bf16.mxu0 %v15093_v46  ;;  %10514 = vmatprep.subr.bf16.mxu1 %v15095_v30  ;;  %v15143_v46 = vcombine.high %v932_v58, %v936_v31  ;;  %v939_v30 = vld [vmem:[#allocation2 + $0x1810] sm:$0xff] }
 0x588   :  { %v15148_v56 = vcombine.low %v939_v30, %v943_v22 }
 0x58a   :  { %10171 = vmatpush1.bf16.msra.mxu0 %v15092_v41  ;;  %10515 = vmatpush1.bf16.msra.mxu1 %v15094_v43  ;;  %v15142_v41 = vcombine.low %v932_v58, %v936_v31  ;;  %v15149_v43 = vcombine.high %v939_v30, %v943_v22  ;;  %v15182_v58 = vcombine.low %v972_v18, %v976_v19  ;;  %v992_v30 = vld [vmem:[#allocation2 + $0x19b8] sm:$0xff] }
 0x58b   :  { %10172 = vmatprep.subr.bf16.mxu0 %v15101_v47  ;;  %10516 = vmatprep.subr.bf16.mxu1 %v15103_v49  ;;  %v15151_v47 = vcombine.high %v940_v39, %v944_v2  ;;  %v947_v49 = vld [vmem:[#allocation2 + $0x1850] sm:$0xff] }
 0x58c   :  { %v15156_v1 = vcombine.low %v947_v49, %v951_v53 }
 0x58e   :  { %10173 = vmatpush1.bf16.msra.mxu0 %v15100_v17  ;;  %10517 = vmatpush1.bf16.msra.mxu1 %v15102_v14  ;;  %v15150_v17 = vcombine.low %v940_v39, %v944_v2  ;;  %v15157_v14 = vcombine.high %v947_v49, %v951_v53  ;;  %v1000_v49 = vld [vmem:[#allocation2 + $0x19f8] sm:$0xff] }
 0x58f   :  { %10174 = vmatprep.subr.bf16.mxu0 %v15109_v55  ;;  %10518 = vmatprep.subr.bf16.mxu1 %v15111_v59  ;;  %v15159_v55 = vcombine.high %v948_v38, %v952_v51  ;;  %v955_v59 = vld [vmem:[#allocation2 + $0x1890] sm:$0xff] }
 0x590   :  { %v15164_v8 = vcombine.low %v955_v59, %v959_v63 }
 0x592   :  { %10175 = vmatpush1.bf16.msra.mxu0 %v15108_v42  ;;  %10519 = vmatpush1.bf16.msra.mxu1 %v15110_v4  ;;  %v15158_v42 = vcombine.low %v948_v38, %v952_v51  ;;  %v15165_v4 = vcombine.high %v955_v59, %v959_v63  ;;  %v1008_v59 = vld [vmem:[#allocation2 + $0x1a38] sm:$0xff] }
 0x593   :  { %10176 = vmatprep.subr.bf16.mxu0 %v15117_v5  ;;  %10520 = vmatprep.subr.bf16.mxu1 %v15119_v24  ;;  %v15167_v5 = vcombine.high %v956_v13, %v960_v45  ;;  %v963_v24 = vld [vmem:[#allocation2 + $0x18d0] sm:$0xff] }
 0x594   :  { %v15172_v20 = vcombine.low %v963_v24, %v967_v6 }
 0x596   :  { %10177 = vmatpush1.bf16.msra.mxu0 %v15116_v9  ;;  %10521 = vmatpush1.bf16.msra.mxu1 %v15118_v10  ;;  %v15173_v9 = vcombine.high %v963_v24, %v967_v6  ;;  %v15175_v10 = vcombine.high %v964_v7, %v968_v29  ;;  %v1016_v24 = vld [vmem:[#allocation2 + $0x1a78] sm:$0xff] }
 0x597   :  { %10178 = vmatprep.subr.bf16.mxu0 %v15125_v50  ;;  %10522 = vmatprep.subr.bf16.mxu1 %v15127_v12  ;;  %v971_v50 = vld [vmem:[#allocation2 + $0x1910] sm:$0xff] }
 0x598   :  { %v975_v12 = vld [vmem:[#allocation2 + $0x1930] sm:$0xff] }
 0x599   :  { %v15180_v28 = vcombine.low %v971_v50, %v975_v12 }
 0x59a   :  { %10179 = vmatpush1.bf16.msra.mxu0 %v15124_v32  ;;  %10523 = vmatpush1.bf16.msra.mxu1 %v15126_v60  ;;  %v15181_v32 = vcombine.high %v971_v50, %v975_v12  ;;  %v979_v60 = vld [vmem:[#allocation2 + $0x1950] sm:$0xff]  ;;  %v1024_v50 = vld [vmem:[#allocation2 + $0x1ab8] sm:$0xff] }
 0x59b   :  { %10180 = vmatprep.subr.bf16.mxu0 %v15133_v23  ;;  %10524 = vmatprep.subr.bf16.mxu1 %v15135_v25  ;;  %v983_v23 = vld [vmem:[#allocation2 + $0x1970] sm:$0xff]  ;;  %v980_v25 = vld [vmem:[#allocation2 + $0x1958] sm:$0xff] }
 0x59c   :  { %v15189_v31 = vcombine.high %v979_v60, %v983_v23  ;;  %v15188_v22 = vcombine.low %v979_v60, %v983_v23  ;;  %v15190_v39 = vcombine.low %v980_v25, %v984_v26  ;;  %v1032_v60 = vld [vmem:[#allocation2 + $0x1af8] sm:$0xff] }
 0x59e   :  { %10181 = vmatpush1.bf16.msra.mxu0 %v15132_v34  ;;  %10525 = vmatpush1.bf16.msra.mxu1 %v15134_v35  ;;  %v15191_v34 = vcombine.high %v980_v25, %v984_v26  ;;  %v987_v35 = vld [vmem:[#allocation2 + $0x1990] sm:$0xff] }
 0x59f   :  { %10182 = vmatprep.subr.bf16.mxu0 %v15141_v36  ;;  %10526 = vmatprep.subr.bf16.mxu1 %v15143_v46  ;;  %v991_v36 = vld [vmem:[#allocation2 + $0x19b0] sm:$0xff]  ;;  %v988_v46 = vld [vmem:[#allocation2 + $0x1998] sm:$0xff] }
 0x5a0   :  { %v15197_v2 = vcombine.high %v987_v35, %v991_v36  ;;  %v15196_v53 = vcombine.low %v987_v35, %v991_v36  ;;  %v15198_v38 = vcombine.low %v988_v46, %v992_v30  ;;  %v1040_v35 = vld [vmem:[#allocation2 + $0x1b38] sm:$0xff] }
 0x5a2   :  { %10183 = vmatpush1.bf16.msra.mxu0 %v15140_v40  ;;  %10527 = vmatpush1.bf16.msra.mxu1 %v15142_v41  ;;  %v15199_v40 = vcombine.high %v988_v46, %v992_v30  ;;  %v995_v41 = vld [vmem:[#allocation2 + $0x19d0] sm:$0xff] }
 0x5a3   :  { %10195 = vmatprep.subr.bf16.mxu0 %v15149_v43  ;;  %10539 = vmatprep.subr.bf16.mxu1 %v15151_v47  ;;  %v999_v43 = vld [vmem:[#allocation2 + $0x19f0] sm:$0xff]  ;;  %v996_v47 = vld [vmem:[#allocation2 + $0x19d8] sm:$0xff] }
 0x5a4   :  { %v15205_v51 = vcombine.high %v995_v41, %v999_v43  ;;  %v15204_v63 = vcombine.low %v995_v41, %v999_v43  ;;  %v1048_v41 = vld [vmem:[#allocation2 + $0x1b78] sm:$0xff] }
 0x5a5   :  { %10185 = vmatmul.mubr.bf16.vlgmr.msra.gmra.mrb[4].mxu0 %v17293_v11  ;;  %10529 = vmatmul.mubr.bf16.vlgmr.msra.gmra.mrb[4].mxu1 %v17293_v11  ;;  %v15166_v11 = vcombine.low %v956_v13, %v960_v45  ;;  %v15206_v13 = vcombine.low %v996_v47, %v1000_v49 }
 0x5a6   :  { %10196 = vmatpush1.bf16.msra.mxu0 %v15148_v56  ;;  %10540 = vmatpush1.bf16.msra.mxu1 %v15150_v17  ;;  %v15207_v56 = vcombine.high %v996_v47, %v1000_v49  ;;  %v1003_v17 = vld [vmem:[#allocation2 + $0x1a10] sm:$0xff] }
 0x5a7   :  { %10197 = vmatprep.subr.bf16.mxu0 %v15157_v14  ;;  %10541 = vmatprep.subr.bf16.mxu1 %v15159_v55  ;;  %v1007_v14 = vld [vmem:[#allocation2 + $0x1a30] sm:$0xff]  ;;  %v1004_v55 = vld [vmem:[#allocation2 + $0x1a18] sm:$0xff] }
 0x5a8   :  { %10227 = vmatprep.mubr.bf16.mxu0 %v17307_v61  ;;  %10571 = vmatprep.mubr.bf16.mxu1 %v17307_v61  ;;  %v15183_v61 = vcombine.high %v972_v18, %v976_v19  ;;  %v15213_v45 = vcombine.high %v1003_v17, %v1007_v14  ;;  %v15212_v6 = vcombine.low %v1003_v17, %v1007_v14  ;;  %v1056_v17 = vld [vmem:[#allocation2 + $0x1bb8] sm:$0xff] }
 0x5a9   :  { %v15214_v7 = vcombine.low %v1004_v55, %v1008_v59 }
 0x5aa   :  { %10198 = vmatpush1.bf16.msra.mxu0 %v15156_v1  ;;  %10542 = vmatpush1.bf16.msra.mxu1 %v15158_v42  ;;  %v15215_v1 = vcombine.high %v1004_v55, %v1008_v59  ;;  %v1011_v42 = vld [vmem:[#allocation2 + $0x1a50] sm:$0xff] }
 0x5ab   :  { %10199 = vmatprep.subr.bf16.mxu0 %v15165_v4  ;;  %10543 = vmatprep.subr.bf16.mxu1 %v15167_v5  ;;  %v1015_v4 = vld [vmem:[#allocation2 + $0x1a70] sm:$0xff]  ;;  %v1012_v5 = vld [vmem:[#allocation2 + $0x1a58] sm:$0xff] }
 0x5ac   :  { %v15221_v29 = vcombine.high %v1011_v42, %v1015_v4  ;;  %v15220_v12 = vcombine.low %v1011_v42, %v1015_v4  ;;  %v15222_v18 = vcombine.low %v1012_v5, %v1016_v24  ;;  %v1064_v42 = vld [vmem:[#allocation2 + $0x1bf8] sm:$0xff] }
 0x5ae   :  { %10200 = vmatpush1.bf16.msra.mxu0 %v15164_v8  ;;  %10544 = vmatpush1.bf16.msra.mxu1 %v15166_v11  ;;  %v15223_v8 = vcombine.high %v1012_v5, %v1016_v24  ;;  %v1019_v11 = vld [vmem:[#allocation2 + $0x1a90] sm:$0xff] }
 0x5af   :  { %10201 = vmatprep.subr.bf16.mxu0 %v15173_v9  ;;  %10545 = vmatprep.subr.bf16.mxu1 %v15175_v10  ;;  %v1023_v9 = vld [vmem:[#allocation2 + $0x1ab0] sm:$0xff]  ;;  %v1020_v10 = vld [vmem:[#allocation2 + $0x1a98] sm:$0xff] }
 0x5b0   :  { %v15229_v19 = vcombine.high %v1019_v11, %v1023_v9  ;;  %v15228_v23 = vcombine.low %v1019_v11, %v1023_v9  ;;  %v15230_v25 = vcombine.low %v1020_v10, %v1024_v50  ;;  %v1072_v11 = vld [vmem:[#allocation2 + $0x1c38] sm:$0xff] }
 0x5b2   :  { %10202 = vmatpush1.bf16.msra.mxu0 %v15172_v20  ;;  %10546 = vmatpush1.bf16.msra.mxu1 %v15174_v48  ;;  %v15231_v20 = vcombine.high %v1020_v10, %v1024_v50  ;;  %v1027_v48 = vld [vmem:[#allocation2 + $0x1ad0] sm:$0xff] }
 0x5b3   :  { %10203 = vmatprep.subr.bf16.mxu0 %v15181_v32  ;;  %10547 = vmatprep.subr.bf16.mxu1 %v15183_v61  ;;  %v1031_v32 = vld [vmem:[#allocation2 + $0x1af0] sm:$0xff]  ;;  %v1028_v61 = vld [vmem:[#allocation2 + $0x1ad8] sm:$0xff] }
 0x5b4   :  { %v15237_v26 = vcombine.high %v1027_v48, %v1031_v32  ;;  %v15236_v36 = vcombine.low %v1027_v48, %v1031_v32  ;;  %v15238_v46 = vcombine.low %v1028_v61, %v1032_v60  ;;  %v1080_v48 = vld [vmem:[#allocation2 + $0x1c78] sm:$0xff] }
 0x5b6   :  { %10204 = vmatpush1.bf16.msra.mxu0 %v15180_v28  ;;  %10548 = vmatpush1.bf16.msra.mxu1 %v15182_v58  ;;  %v15239_v28 = vcombine.high %v1028_v61, %v1032_v60  ;;  %v1035_v58 = vld [vmem:[#allocation2 + $0x1b10] sm:$0xff] }
 0x5b7   :  { %10205 = vmatprep.subr.bf16.mxu0 %v15189_v31  ;;  %10549 = vmatprep.subr.bf16.mxu1 %v15191_v34  ;;  %v1039_v31 = vld [vmem:[#allocation2 + $0x1b30] sm:$0xff]  ;;  %v1036_v34 = vld [vmem:[#allocation2 + $0x1b18] sm:$0xff] }
 0x5b8   :  { %v15245_v30 = vcombine.high %v1035_v58, %v1039_v31  ;;  %v15244_v43 = vcombine.low %v1035_v58, %v1039_v31  ;;  %v15246_v47 = vcombine.low %v1036_v34, %v1040_v35  ;;  %v1088_v58 = vld [vmem:[#allocation2 + $0x1cb8] sm:$0xff] }
 0x5ba   :  { %10206 = vmatpush1.bf16.msra.mxu0 %v15188_v22  ;;  %10550 = vmatpush1.bf16.msra.mxu1 %v15190_v39  ;;  %v15247_v22 = vcombine.high %v1036_v34, %v1040_v35  ;;  %v1043_v39 = vld [vmem:[#allocation2 + $0x1b50] sm:$0xff] }
 0x5bb   :  { %10207 = vmatprep.subr.bf16.mxu0 %v15197_v2  ;;  %10551 = vmatprep.subr.bf16.mxu1 %v15199_v40  ;;  %v1047_v2 = vld [vmem:[#allocation2 + $0x1b70] sm:$0xff]  ;;  %v1044_v40 = vld [vmem:[#allocation2 + $0x1b58] sm:$0xff] }
 0x5bc   :  { %v15253_v49 = vcombine.high %v1043_v39, %v1047_v2  ;;  %v15252_v14 = vcombine.low %v1043_v39, %v1047_v2  ;;  %v15254_v55 = vcombine.low %v1044_v40, %v1048_v41  ;;  %v1096_v39 = vld [vmem:[#allocation2 + $0x1cf8] sm:$0xff] }
 0x5be   :  { %10208 = vmatpush1.bf16.msra.mxu0 %v15196_v53  ;;  %10552 = vmatpush1.bf16.msra.mxu1 %v15198_v38  ;;  %v15255_v53 = vcombine.high %v1044_v40, %v1048_v41  ;;  %v1051_v38 = vld [vmem:[#allocation2 + $0x1b90] sm:$0xff] }
 0x5bf   :  { %10209 = vmatprep.subr.bf16.mxu0 %v15205_v51  ;;  %10553 = vmatprep.subr.bf16.mxu1 %v15207_v56  ;;  %v1055_v51 = vld [vmem:[#allocation2 + $0x1bb0] sm:$0xff]  ;;  %v1052_v56 = vld [vmem:[#allocation2 + $0x1b98] sm:$0xff] }
 0x5c0   :  { %v15261_v59 = vcombine.high %v1051_v38, %v1055_v51  ;;  %v15260_v4 = vcombine.low %v1051_v38, %v1055_v51  ;;  %v15262_v5 = vcombine.low %v1052_v56, %v1056_v17 }
 0x5c2   :  { %10210 = vmatpush1.bf16.msra.mxu0 %v15204_v63  ;;  %10554 = vmatpush1.bf16.msra.mxu1 %v15206_v13  ;;  %v15263_v63 = vcombine.high %v1052_v56, %v1056_v17  ;;  %v1059_v13 = vld [vmem:[#allocation2 + $0x1bd0] sm:$0xff] }
 0x5c3   :  { %10211 = vmatprep.subr.bf16.mxu0 %v15213_v45  ;;  %10555 = vmatprep.subr.bf16.mxu1 %v15215_v1  ;;  %v1063_v45 = vld [vmem:[#allocation2 + $0x1bf0] sm:$0xff]  ;;  %v1060_v1 = vld [vmem:[#allocation2 + $0x1bd8] sm:$0xff] }
 0x5c4   :  { %v15269_v24 = vcombine.high %v1059_v13, %v1063_v45  ;;  %v15268_v9 = vcombine.low %v1059_v13, %v1063_v45  ;;  %v15270_v10 = vcombine.low %v1060_v1, %v1064_v42  ;;  %v1107_v17 = vld [vmem:[#allocation2 + $0x1d50] sm:$0xff] }
 0x5c6   :  { %10212 = vmatpush1.bf16.msra.mxu0 %v15212_v6  ;;  %10556 = vmatpush1.bf16.msra.mxu1 %v15214_v7  ;;  %v15271_v6 = vcombine.high %v1060_v1, %v1064_v42  ;;  %v1067_v7 = vld [vmem:[#allocation2 + $0x1c10] sm:$0xff] }
 0x5c7   :  { %10213 = vmatprep.subr.bf16.mxu0 %v15221_v29  ;;  %10557 = vmatprep.subr.bf16.mxu1 %v15223_v8  ;;  %v1071_v29 = vld [vmem:[#allocation2 + $0x1c30] sm:$0xff]  ;;  %v1068_v8 = vld [vmem:[#allocation2 + $0x1c18] sm:$0xff] }
 0x5c8   :  { %v15277_v50 = vcombine.high %v1067_v7, %v1071_v29  ;;  %v15276_v32 = vcombine.low %v1067_v7, %v1071_v29  ;;  %v15278_v61 = vcombine.low %v1068_v8, %v1072_v11  ;;  %v1115_v42 = vld [vmem:[#allocation2 + $0x1d90] sm:$0xff] }
 0x5ca   :  { %10214 = vmatpush1.bf16.msra.mxu0 %v15220_v12  ;;  %10558 = vmatpush1.bf16.msra.mxu1 %v15222_v18  ;;  %v15279_v12 = vcombine.high %v1068_v8, %v1072_v11  ;;  %v1075_v18 = vld [vmem:[#allocation2 + $0x1c50] sm:$0xff] }
 0x5cb   :  { %10215 = vmatprep.subr.bf16.mxu0 %v15229_v19  ;;  %10559 = vmatprep.subr.bf16.mxu1 %v15231_v20  ;;  %v1079_v19 = vld [vmem:[#allocation2 + $0x1c70] sm:$0xff]  ;;  %v1076_v20 = vld [vmem:[#allocation2 + $0x1c58] sm:$0xff] }
 0x5cc   :  { %v15285_v60 = vcombine.high %v1075_v18, %v1079_v19  ;;  %v15284_v31 = vcombine.low %v1075_v18, %v1079_v19  ;;  %v15286_v34 = vcombine.low %v1076_v20, %v1080_v48  ;;  %v1123_v11 = vld [vmem:[#allocation2 + $0x1dd0] sm:$0xff] }
 0x5ce   :  { %10216 = vmatpush1.bf16.msra.mxu0 %v15228_v23  ;;  %10560 = vmatpush1.bf16.msra.mxu1 %v15230_v25  ;;  %v15287_v23 = vcombine.high %v1076_v20, %v1080_v48  ;;  %v1083_v25 = vld [vmem:[#allocation2 + $0x1c90] sm:$0xff] }
 0x5cf   :  { %10217 = vmatprep.subr.bf16.mxu0 %v15237_v26  ;;  %10561 = vmatprep.subr.bf16.mxu1 %v15239_v28  ;;  %v1087_v26 = vld [vmem:[#allocation2 + $0x1cb0] sm:$0xff]  ;;  %v1084_v28 = vld [vmem:[#allocation2 + $0x1c98] sm:$0xff] }
 0x5d0   :  { %v15293_v35 = vcombine.high %v1083_v25, %v1087_v26  ;;  %v15292_v2 = vcombine.low %v1083_v25, %v1087_v26  ;;  %v1131_v48 = vld [vmem:[#allocation2 + $0x1e10] sm:$0xff] }
 0x5d2   :  { %10218 = vmatpush1.bf16.msra.mxu0 %v15236_v36  ;;  %10562 = vmatpush1.bf16.msra.mxu1 %v15238_v46  ;;  %v15295_v36 = vcombine.high %v1084_v28, %v1088_v58  ;;  %v1091_v46 = vld [vmem:[#allocation2 + $0x1cd0] sm:$0xff] }
 0x5d3   :  { %10219 = vmatprep.subr.bf16.mxu0 %v15245_v30  ;;  %10563 = vmatprep.subr.bf16.mxu1 %v15247_v22  ;;  %v1095_v30 = vld [vmem:[#allocation2 + $0x1cf0] sm:$0xff]  ;;  %v1092_v22 = vld [vmem:[#allocation2 + $0x1cd8] sm:$0xff] }
 0x5d4   :  { %v15301_v40 = vcombine.high %v1091_v46, %v1095_v30  ;;  %v15303_v41 = vcombine.high %v1092_v22, %v1096_v39  ;;  %v15300_v38 = vcombine.low %v1091_v46, %v1095_v30  ;;  %v15302_v51 = vcombine.low %v1092_v22, %v1096_v39  ;;  %v1147_v39 = vld [vmem:[#allocation2 + $0x1e90] sm:$0xff] }
 0x5d6   :  { %10220 = vmatpush1.bf16.msra.mxu0 %v15244_v43  ;;  %10564 = vmatpush1.bf16.msra.mxu1 %v15246_v47  ;;  %v1099_v43 = vld [vmem:[#allocation2 + $0x1d10] sm:$0xff] }
 0x5d7   :  { %10221 = vmatprep.subr.bf16.mxu0 %v15253_v49  ;;  %10565 = vmatprep.subr.bf16.mxu1 %v15255_v53  ;;  %v1103_v47 = vld [vmem:[#allocation2 + $0x1d30] sm:$0xff]  ;;  %v1100_v49 = vld [vmem:[#allocation2 + $0x1d18] sm:$0xff] }
 0x5d8   :  { %v1104_v53 = vld [vmem:[#allocation2 + $0x1d38] sm:$0xff]  ;;  %v15309_v56 = vcombine.high %v1099_v43, %v1103_v47 }
 0x5d9   :  { %v15310_v13 = vcombine.low %v1100_v49, %v1104_v53 }
 0x5da   :  { %10222 = vmatpush1.bf16.msra.mxu0 %v15252_v14  ;;  %10566 = vmatpush1.bf16.msra.mxu1 %v15254_v55  ;;  %v1111_v14 = vld [vmem:[#allocation2 + $0x1d70] sm:$0xff]  ;;  %v1108_v55 = vld [vmem:[#allocation2 + $0x1d58] sm:$0xff] }
 0x5db   :  { %10223 = vmatprep.subr.bf16.mxu0 %v15261_v59  ;;  %10567 = vmatprep.subr.bf16.mxu1 %v15263_v63  ;;  %v1112_v59 = vld [vmem:[#allocation2 + $0x1d78] sm:$0xff]  ;;  %v15308_v63 = vcombine.low %v1099_v43, %v1103_v47  ;;  %v15317_v45 = vcombine.high %v1107_v17, %v1111_v14 }
 0x5dc   :  { %v15319_v1 = vcombine.high %v1108_v55, %v1112_v59  ;;  %v15318_v7 = vcombine.low %v1108_v55, %v1112_v59  ;;  %v1163_v59 = vld [vmem:[#allocation2 + $0x1f10] sm:$0xff] }
 0x5de   :  { %10224 = vmatpush1.bf16.msra.mxu0 %v15260_v4  ;;  %10568 = vmatpush1.bf16.msra.mxu1 %v15262_v5  ;;  %v1119_v4 = vld [vmem:[#allocation2 + $0x1db0] sm:$0xff]  ;;  %v1116_v5 = vld [vmem:[#allocation2 + $0x1d98] sm:$0xff] }
 0x5df   :  { %10225 = vmatprep.subr.bf16.mxu0 %v15269_v24  ;;  %10569 = vmatprep.subr.bf16.mxu1 %v15271_v6  ;;  %v1120_v24 = vld [vmem:[#allocation2 + $0x1db8] sm:$0xff]  ;;  %v15316_v6 = vcombine.low %v1107_v17, %v1111_v14  ;;  %v15325_v29 = vcombine.high %v1115_v42, %v1119_v4 }
 0x5e0   :  { %v15327_v8 = vcombine.high %v1116_v5, %v1120_v24  ;;  %v15326_v18 = vcombine.low %v1116_v5, %v1120_v24  ;;  %v1171_v24 = vld [vmem:[#allocation2 + $0x1f50] sm:$0xff] }
 0x5e2   :  { %10226 = vmatpush1.bf16.msra.mxu0 %v15268_v9  ;;  %10570 = vmatpush1.bf16.msra.mxu1 %v15270_v10  ;;  %v1127_v9 = vld [vmem:[#allocation2 + $0x1df0] sm:$0xff]  ;;  %v1124_v10 = vld [vmem:[#allocation2 + $0x1dd8] sm:$0xff] }
 0x5e3   :  { %10238 = vmatprep.subr.bf16.mxu0 %v15277_v50  ;;  %10582 = vmatprep.subr.bf16.mxu1 %v15279_v12  ;;  %v1128_v50 = vld [vmem:[#allocation2 + $0x1df8] sm:$0xff]  ;;  %v15324_v12 = vcombine.low %v1115_v42, %v1119_v4  ;;  %v15333_v19 = vcombine.high %v1123_v11, %v1127_v9 }
 0x5e4   :  { %v15335_v20 = vcombine.high %v1124_v10, %v1128_v50  ;;  %v15334_v25 = vcombine.low %v1124_v10, %v1128_v50  ;;  %v1179_v50 = vld [vmem:[#allocation2 + $0x1f90] sm:$0xff] }
 0x5e5   :  { %10228 = vmatmul.mubr.bf16.vlgmr.msra.gmra.mrb[4].mxu0 %v17315_v54  ;;  %10572 = vmatmul.mubr.bf16.vlgmr.msra.gmra.mrb[4].mxu1 %v17315_v54  ;;  %v15294_v54 = vcombine.low %v1084_v28, %v1088_v58  ;;  %v1139_v58 = vld [vmem:[#allocation2 + $0x1e50] sm:$0xff] }
 0x5e6   :  { %10239 = vmatpush1.bf16.msra.mxu0 %v15276_v32  ;;  %10583 = vmatpush1.bf16.msra.mxu1 %v15278_v61  ;;  %v1135_v32 = vld [vmem:[#allocation2 + $0x1e30] sm:$0xff]  ;;  %v1132_v61 = vld [vmem:[#allocation2 + $0x1e18] sm:$0xff] }
 0x5e7   :  { %10240 = vmatprep.subr.bf16.mxu0 %v15285_v60  ;;  %10584 = vmatprep.subr.bf16.mxu1 %v15287_v23  ;;  %v1136_v60 = vld [vmem:[#allocation2 + $0x1e38] sm:$0xff]  ;;  %v15332_v23 = vcombine.low %v1123_v11, %v1127_v9  ;;  %v15341_v26 = vcombine.high %v1131_v48, %v1135_v32 }
 0x5e8   :  { %10270 = vmatprep.mubr.bf16.mxu0 %v17329_v44  ;;  %10614 = vmatprep.mubr.bf16.mxu1 %v17329_v44  ;;  %v15311_v44 = vcombine.high %v1100_v49, %v1104_v53  ;;  %v15343_v28 = vcombine.high %v1132_v61, %v1136_v60  ;;  %v15342_v46 = vcombine.low %v1132_v61, %v1136_v60  ;;  %v1155_v53 = vld [vmem:[#allocation2 + $0x1ed0] sm:$0xff] }
 0x5e9   :  { %v1187_v60 = vld [vmem:[#allocation2 + $0x1fd0] sm:$0xff] }
 0x5ea   :  { %10241 = vmatpush1.bf16.msra.mxu0 %v15284_v31  ;;  %10585 = vmatpush1.bf16.msra.mxu1 %v15286_v34  ;;  %v1143_v31 = vld [vmem:[#allocation2 + $0x1e70] sm:$0xff]  ;;  %v1140_v34 = vld [vmem:[#allocation2 + $0x1e58] sm:$0xff] }
 0x5eb   :  { %10242 = vmatprep.subr.bf16.mxu0 %v15293_v35  ;;  %10586 = vmatprep.subr.bf16.mxu1 %v15295_v36  ;;  %v1144_v35 = vld [vmem:[#allocation2 + $0x1e78] sm:$0xff]  ;;  %v15340_v36 = vcombine.low %v1131_v48, %v1135_v32  ;;  %v15349_v30 = vcombine.high %v1139_v58, %v1143_v31 }
 0x5ec   :  { %v15351_v22 = vcombine.high %v1140_v34, %v1144_v35  ;;  %v15350_v43 = vcombine.low %v1140_v34, %v1144_v35 }
 0x5ee   :  { %10243 = vmatpush1.bf16.msra.mxu0 %v15292_v2  ;;  %10587 = vmatpush1.bf16.msra.mxu1 %v15294_v54  ;;  %v1151_v2 = vld [vmem:[#allocation2 + $0x1eb0] sm:$0xff]  ;;  %v1148_v54 = vld [vmem:[#allocation2 + $0x1e98] sm:$0xff] }
 0x5ef   :  { %10244 = vmatprep.subr.bf16.mxu0 %v15301_v40  ;;  %10588 = vmatprep.subr.bf16.mxu1 %v15303_v41  ;;  %v1152_v40 = vld [vmem:[#allocation2 + $0x1eb8] sm:$0xff]  ;;  %v15348_v41 = vcombine.low %v1139_v58, %v1143_v31  ;;  %v15357_v47 = vcombine.high %v1147_v39, %v1151_v2 }
 0x5f0   :  { %v15359_v49 = vcombine.high %v1148_v54, %v1152_v40  ;;  %v15358_v17 = vcombine.low %v1148_v54, %v1152_v40  ;;  %v16106_v54 = vld [vmem:[#allocation7 + $0x2c] ss:$16 sps:$4 sm:$0xff]   ;;  %v16101_v40 = vld [vmem:[#allocation7 + $0x20] ss:$16 sps:$4 sm:$0xff]  }
 0x5f2   :  { %10245 = vmatpush1.bf16.msra.mxu0 %v15300_v38  ;;  %10589 = vmatpush1.bf16.msra.mxu1 %v15302_v51  ;;  %v1159_v38 = vld [vmem:[#allocation2 + $0x1ef0] sm:$0xff]  ;;  %v1156_v51 = vld [vmem:[#allocation2 + $0x1ed8] sm:$0xff] }
 0x5f3   :  { %10246 = vmatprep.subr.bf16.mxu0 %v15309_v56  ;;  %10590 = vmatprep.subr.bf16.mxu1 %v15311_v44  ;;  %v1160_v56 = vld [vmem:[#allocation2 + $0x1ef8] sm:$0xff]  ;;  %v15356_v44 = vcombine.low %v1147_v39, %v1151_v2  ;;  %v15365_v14 = vcombine.high %v1155_v53, %v1159_v38  ;;  %v16098_v39 = vld [vmem:[#allocation7 + $0x8] ss:$16 sps:$4 sm:$0xff]  }
 0x5f4   :  { %v15367_v55 = vcombine.high %v1156_v51, %v1160_v56  ;;  %v15366_v42 = vcombine.low %v1156_v51, %v1160_v56  ;;  %v16103_v2 = vld [vmem:[#allocation7 + $0x24] ss:$16 sps:$4 sm:$0xff]   ;;  %v16113_v51 = vld [vmem:[#allocation7 + $0x60] ss:$16 sps:$4 sm:$0xff]   ;;  %v16116_v56 = vld [vmem:[#allocation7 + $0x68] ss:$16 sps:$4 sm:$0xff]  }
 0x5f6   :  { %10247 = vmatpush1.bf16.msra.mxu0 %v15308_v63  ;;  %10591 = vmatpush1.bf16.msra.mxu1 %v15310_v13  ;;  %v1167_v63 = vld [vmem:[#allocation2 + $0x1f30] sm:$0xff]  ;;  %v1164_v13 = vld [vmem:[#allocation2 + $0x1f18] sm:$0xff] }
 0x5f7   :  { %10248 = vmatprep.subr.bf16.mxu0 %v15317_v45  ;;  %10592 = vmatprep.subr.bf16.mxu1 %v15319_v1  ;;  %v1168_v45 = vld [vmem:[#allocation2 + $0x1f38] sm:$0xff]  ;;  %v15364_v1 = vcombine.low %v1155_v53, %v1159_v38  ;;  %v15373_v4 = vcombine.high %v1163_v59, %v1167_v63  ;;  %v16110_v53 = vld [vmem:[#allocation7 + $0x48] ss:$16 sps:$4 sm:$0xff]  }
 0x5f8   :  { %v15375_v5 = vcombine.high %v1164_v13, %v1168_v45  ;;  %v15374_v11 = vcombine.low %v1164_v13, %v1168_v45  ;;  %v16115_v38 = vld [vmem:[#allocation7 + $0x64] ss:$16 sps:$4 sm:$0xff]   ;;  %v16128_v13 = vld [vmem:[#allocation7 + $0xa8] ss:$16 sps:$4 sm:$0xff]  }
 0x5f9   :  { %v16133_v45 = vld [vmem:[#allocation7 + $0xc4] ss:$16 sps:$4 sm:$0xff]  }
 0x5fa   :  { %10249 = vmatpush1.bf16.msra.mxu0 %v15316_v6  ;;  %10593 = vmatpush1.bf16.msra.mxu1 %v15318_v7  ;;  %v1175_v6 = vld [vmem:[#allocation2 + $0x1f70] sm:$0xff]  ;;  %v1172_v7 = vld [vmem:[#allocation2 + $0x1f58] sm:$0xff] }
 0x5fb   :  { %10250 = vmatprep.subr.bf16.mxu0 %v15325_v29  ;;  %10594 = vmatprep.subr.bf16.mxu1 %v15327_v8  ;;  %v1176_v29 = vld [vmem:[#allocation2 + $0x1f78] sm:$0xff]  ;;  %v15372_v8 = vcombine.low %v1163_v59, %v1167_v63  ;;  %v15381_v9 = vcombine.high %v1171_v24, %v1175_v6  ;;  %v16130_v59 = vld [vmem:[#allocation7 + $0xac] ss:$16 sps:$4 sm:$0xff]  }
 0x5fc   :  { %v15383_v10 = vcombine.high %v1172_v7, %v1176_v29  ;;  %v15382_v48 = vcombine.low %v1172_v7, %v1176_v29  ;;  %v16125_v63 = vld [vmem:[#allocation7 + $0xa0] ss:$16 sps:$4 sm:$0xff]   ;;  %v16140_v7 = vld [vmem:[#allocation7 + $0xe8] ss:$16 sps:$4 sm:$0xff]   ;;  %v16145_v29 = vld [vmem:[#allocation7 + $0x104] ss:$16 sps:$4 sm:$0xff]  }
 0x5fe   :  { %10251 = vmatpush1.bf16.msra.mxu0 %v15324_v12  ;;  %10595 = vmatpush1.bf16.msra.mxu1 %v15326_v18  ;;  %v1183_v12 = vld [vmem:[#allocation2 + $0x1fb0] sm:$0xff]  ;;  %v1180_v18 = vld [vmem:[#allocation2 + $0x1f98] sm:$0xff] }
 0x5ff   :  { %10252 = vmatprep.subr.bf16.mxu0 %v15333_v19  ;;  %10596 = vmatprep.subr.bf16.mxu1 %v15335_v20  ;;  %v1184_v19 = vld [vmem:[#allocation2 + $0x1fb8] sm:$0xff]  ;;  %v15380_v20 = vcombine.low %v1171_v24, %v1175_v6  ;;  %v15389_v32 = vcombine.high %v1179_v50, %v1183_v12  ;;  %v16142_v24 = vld [vmem:[#allocation7 + $0xec] ss:$16 sps:$4 sm:$0xff]  }
 0x600   :  { %v15391_v61 = vcombine.high %v1180_v18, %v1184_v19  ;;  %v15390_v58 = vcombine.low %v1180_v18, %v1184_v19  ;;  %v16137_v6 = vld [vmem:[#allocation7 + $0xe0] ss:$16 sps:$4 sm:$0xff]   ;;  %v16152_v18 = vld [vmem:[#allocation7 + $0x128] ss:$16 sps:$4 sm:$0xff]   ;;  %v16157_v19 = vld [vmem:[#allocation7 + $0x144] ss:$16 sps:$4 sm:$0xff]  }
 0x602   :  { %10253 = vmatpush1.bf16.msra.mxu0 %v15332_v23  ;;  %10597 = vmatpush1.bf16.msra.mxu1 %v15334_v25  ;;  %v1191_v23 = vld [vmem:[#allocation2 + $0x1ff0] sm:$0xff]  ;;  %v1188_v25 = vld [vmem:[#allocation2 + $0x1fd8] sm:$0xff] }
 0x603   :  { %10254 = vmatprep.subr.bf16.mxu0 %v15341_v26  ;;  %10598 = vmatprep.subr.bf16.mxu1 %v15343_v28  ;;  %v1192_v26 = vld [vmem:[#allocation2 + $0x1ff8] sm:$0xff]  ;;  %v15388_v28 = vcombine.low %v1179_v50, %v1183_v12  ;;  %v15397_v31 = vcombine.high %v1187_v60, %v1191_v23  ;;  %v15396_v35 = vcombine.low %v1187_v60, %v1191_v23  ;;  %v16154_v50 = vld [vmem:[#allocation7 + $0x12c] ss:$16 sps:$4 sm:$0xff]  }
 0x604   :  { %v15399_v34 = vcombine.high %v1188_v25, %v1192_v26  ;;  %v16149_v12 = vld [vmem:[#allocation7 + $0x120] ss:$16 sps:$4 sm:$0xff]   ;;  %v16166_v60 = vld [vmem:[#allocation7 + $0x16c] ss:$16 sps:$4 sm:$0xff]  }
 0x605   :  { %v16161_v23 = vld [vmem:[#allocation7 + $0x160] ss:$16 sps:$4 sm:$0xff]  }
 0x606   :  { %10255 = vmatpush1.bf16.msra.mxu0 %v15340_v36  ;;  %10599 = vmatpush1.bf16.msra.mxu1 %v15342_v46  ;;  %v15398_v36 = vcombine.low %v1188_v25, %v1192_v26  ;;  %v16097_v46 = vld [vmem:[#allocation7 + $0x4] ss:$16 sps:$4 sm:$0xff]   ;;  %v16164_v25 = vld [vmem:[#allocation7 + $0x168] ss:$16 sps:$4 sm:$0xff]  }
 0x607   :  { %10256 = vmatprep.subr.bf16.mxu0 %v15349_v30  ;;  %10600 = vmatprep.subr.bf16.mxu1 %v15351_v22  ;;  %v16100_v30 = vld [vmem:[#allocation7 + $0xc] ss:$16 sps:$4 sm:$0xff]   ;;  %v16095_v22 = vld [vmem:[#allocation7] ss:$16 sps:$4 sm:$0xff]   ;;  %v16169_v26 = vld [vmem:[#allocation7 + $0x184] ss:$16 sps:$4 sm:$0xff]  }
 0x60a   :  { %10257 = vmatpush1.bf16.msra.mxu0 %v15348_v41  ;;  %10601 = vmatpush1.bf16.msra.mxu1 %v15350_v43  ;;  %v16104_v41 = vld [vmem:[#allocation7 + $0x28] ss:$16 sps:$4 sm:$0xff]   ;;  %v16109_v43 = vld [vmem:[#allocation7 + $0x44] ss:$16 sps:$4 sm:$0xff]  }
 0x60b   :  { %10258 = vmatprep.subr.bf16.mxu0 %v15357_v47  ;;  %10602 = vmatprep.subr.bf16.mxu1 %v15359_v49  ;;  %v16112_v47 = vld [vmem:[#allocation7 + $0x4c] ss:$16 sps:$4 sm:$0xff]   ;;  %v16107_v49 = vld [vmem:[#allocation7 + $0x40] ss:$16 sps:$4 sm:$0xff]  }
 0x60e   :  { %10259 = vmatpush1.bf16.msra.mxu0 %v15356_v44  ;;  %10603 = vmatpush1.bf16.msra.mxu1 %v15358_v17  ;;  %v16121_v44 = vld [vmem:[#allocation7 + $0x84] ss:$16 sps:$4 sm:$0xff]   ;;  %v16124_v17 = vld [vmem:[#allocation7 + $0x8c] ss:$16 sps:$4 sm:$0xff]  }
 0x60f   :  { %10260 = vmatprep.subr.bf16.mxu0 %v15365_v14  ;;  %10604 = vmatprep.subr.bf16.mxu1 %v15367_v55  ;;  %v16122_v14 = vld [vmem:[#allocation7 + $0x88] ss:$16 sps:$4 sm:$0xff]   ;;  %v16127_v55 = vld [vmem:[#allocation7 + $0xa4] ss:$16 sps:$4 sm:$0xff]  }
 0x612   :  { %10261 = vmatpush1.bf16.msra.mxu0 %v15364_v1  ;;  %10605 = vmatpush1.bf16.msra.mxu1 %v15366_v42  ;;  %v16136_v1 = vld [vmem:[#allocation7 + $0xcc] ss:$16 sps:$4 sm:$0xff]   ;;  %v16131_v42 = vld [vmem:[#allocation7 + $0xc0] ss:$16 sps:$4 sm:$0xff]  }
 0x613   :  { %10262 = vmatprep.subr.bf16.mxu0 %v15373_v4  ;;  %10606 = vmatprep.subr.bf16.mxu1 %v15375_v5  ;;  %v16134_v4 = vld [vmem:[#allocation7 + $0xc8] ss:$16 sps:$4 sm:$0xff]   ;;  %v16139_v5 = vld [vmem:[#allocation7 + $0xe4] ss:$16 sps:$4 sm:$0xff]  }
 0x616   :  { %10263 = vmatpush1.bf16.msra.mxu0 %v15372_v8  ;;  %10607 = vmatpush1.bf16.msra.mxu1 %v15374_v11  ;;  %v16148_v8 = vld [vmem:[#allocation7 + $0x10c] ss:$16 sps:$4 sm:$0xff]   ;;  %v16143_v11 = vld [vmem:[#allocation7 + $0x100] ss:$16 sps:$4 sm:$0xff]  }
 0x617   :  { %10264 = vmatprep.subr.bf16.mxu0 %v15381_v9  ;;  %10608 = vmatprep.subr.bf16.mxu1 %v15383_v10  ;;  %v16146_v9 = vld [vmem:[#allocation7 + $0x108] ss:$16 sps:$4 sm:$0xff]   ;;  %v16151_v10 = vld [vmem:[#allocation7 + $0x124] ss:$16 sps:$4 sm:$0xff]  }
 0x61a   :  { %10265 = vmatpush1.bf16.msra.mxu0 %v15380_v20  ;;  %10609 = vmatpush1.bf16.msra.mxu1 %v15382_v48  ;;  %v16160_v20 = vld [vmem:[#allocation7 + $0x14c] ss:$16 sps:$4 sm:$0xff]   ;;  %v16155_v48 = vld [vmem:[#allocation7 + $0x140] ss:$16 sps:$4 sm:$0xff]  }
 0x61b   :  { %10266 = vmatprep.subr.bf16.mxu0 %v15389_v32  ;;  %10610 = vmatprep.subr.bf16.mxu1 %v15391_v61  ;;  %v16158_v32 = vld [vmem:[#allocation7 + $0x148] ss:$16 sps:$4 sm:$0xff]   ;;  %v16163_v61 = vld [vmem:[#allocation7 + $0x164] ss:$16 sps:$4 sm:$0xff]  }
 0x61e   :  { %10267 = vmatpush1.bf16.msra.mxu0 %v15388_v28  ;;  %10611 = vmatpush1.bf16.msra.mxu1 %v15390_v58  ;;  %v16172_v28 = vld [vmem:[#allocation7 + $0x18c] ss:$16 sps:$4 sm:$0xff]   ;;  %v16167_v58 = vld [vmem:[#allocation7 + $0x180] ss:$16 sps:$4 sm:$0xff]  }
 0x61f   :  { %10268 = vmatprep.subr.bf16.mxu0 %v15397_v31  ;;  %10612 = vmatprep.subr.bf16.mxu1 %v15399_v34  ;;  %v16170_v31 = vld [vmem:[#allocation7 + $0x188] ss:$16 sps:$4 sm:$0xff]   ;;  %v16175_v34 = vld [vmem:[#allocation7 + $0x1a4] ss:$16 sps:$4 sm:$0xff]  }
 0x622   :  { %10269 = vmatpush1.bf16.msra.mxu0 %v15396_v35  ;;  %10613 = vmatpush1.bf16.msra.mxu1 %v15398_v36  ;;  %v16178_v35 = vld [vmem:[#allocation7 + $0x1ac] ss:$16 sps:$4 sm:$0xff]   ;;  %v16173_v36 = vld [vmem:[#allocation7 + $0x1a0] ss:$16 sps:$4 sm:$0xff]  }
 0x623   :  { %12265 = vmatprep.subr.bf16.mxu0 %v16097_v46  ;;  %12437 = vmatprep.subr.bf16.mxu1 %v16100_v30  ;;  %v16176_v46 = vld [vmem:[#allocation7 + $0x1a8] ss:$16 sps:$4 sm:$0xff]   ;;  %v16181_v30 = vld [vmem:[#allocation7 + $0x1c4] ss:$16 sps:$4 sm:$0xff]  }
 0x625   :  { %10271 = vmatmul.mubr.bf16.vlgmr.msra.gmra.mrb[4].mxu0 %v17337_v21  ;;  %10615 = vmatmul.mubr.bf16.vlgmr.msra.gmra.mrb[4].mxu1 %v17337_v21  ;;  %v16118_v21 = vld [vmem:[#allocation7 + $0x6c] ss:$16 sps:$4 sm:$0xff]  }
 0x626   :  { %12266 = vmatpush1.bf16.msra.mxu0 %v16095_v22  ;;  %12297 = vmatprep.mubr.bf16.mxu0 %v17378_v0  ;;  %v16184_v22 = vld [vmem:[#allocation7 + $0x1cc] ss:$16 sps:$4 sm:$0xff]  }
 0x627   :  { %12438 = vmatpush1.bf16.msra.mxu1 %v16098_v39  ;;  %12469 = vmatprep.mubr.bf16.mxu1 %v17378_v0  ;;  %v16119_v0 = vld [vmem:[#allocation7 + $0x80] ss:$16 sps:$4 sm:$0xff]  }
 0x628   :  { %12267 = vmatprep.subr.bf16.mxu0 %v16103_v2  ;;  %12439 = vmatprep.subr.bf16.mxu1 %v16106_v54  ;;  %v16179_v39 = vld [vmem:[#allocation7 + $0x1c0] ss:$16 sps:$4 sm:$0xff]   ;;  %v16182_v2 = vld [vmem:[#allocation7 + $0x1c8] ss:$16 sps:$4 sm:$0xff]   ;;  %v16187_v54 = vld [vmem:[#allocation7 + $0x1e4] ss:$16 sps:$4 sm:$0xff]  }
 0x62a   :  { %12268 = vmatpush1.bf16.msra.mxu0 %v16101_v40  ;;  %v16190_v40 = vld [vmem:[#allocation7 + $0x1ec] ss:$16 sps:$4 sm:$0xff]  }
 0x62b   :  { %12440 = vmatpush1.bf16.msra.mxu1 %v16104_v41  ;;  %12269 = vmatprep.subr.bf16.mxu0 %v16109_v43  ;;  %v16185_v41 = vld [vmem:[#allocation7 + $0x1e0] ss:$16 sps:$4 sm:$0xff]   ;;  %v16188_v43 = vld [vmem:[#allocation7 + $0x1e8] ss:$16 sps:$4 sm:$0xff]  }
 0x62c   :  { %12441 = vmatprep.subr.bf16.mxu1 %v16112_v47  ;;  %v16193_v47 = vld [vmem:[#allocation7 + $0x204] ss:$16 sps:$4 sm:$0xff]  }
 0x62e   :  { %12270 = vmatpush1.bf16.msra.mxu0 %v16107_v49  ;;  %v16196_v49 = vld [vmem:[#allocation7 + $0x20c] ss:$16 sps:$4 sm:$0xff]  }
 0x62f   :  { %12442 = vmatpush1.bf16.msra.mxu1 %v16110_v53  ;;  %12271 = vmatprep.subr.bf16.mxu0 %v16115_v38  ;;  %v16191_v53 = vld [vmem:[#allocation7 + $0x200] ss:$16 sps:$4 sm:$0xff]   ;;  %v16194_v38 = vld [vmem:[#allocation7 + $0x208] ss:$16 sps:$4 sm:$0xff]  }
 0x630   :  { %12443 = vmatprep.subr.bf16.mxu1 %v16118_v21  ;;  %v16199_v21 = vld [vmem:[#allocation7 + $0x224] ss:$16 sps:$4 sm:$0xff]  }
 0x632   :  { %12272 = vmatpush1.bf16.msra.mxu0 %v16113_v51  ;;  %v16202_v51 = vld [vmem:[#allocation7 + $0x22c] ss:$16 sps:$4 sm:$0xff]  }
 0x633   :  { %12444 = vmatpush1.bf16.msra.mxu1 %v16116_v56  ;;  %12273 = vmatprep.subr.bf16.mxu0 %v16121_v44  ;;  %v16197_v56 = vld [vmem:[#allocation7 + $0x220] ss:$16 sps:$4 sm:$0xff]   ;;  %v16200_v44 = vld [vmem:[#allocation7 + $0x228] ss:$16 sps:$4 sm:$0xff]  }
 0x634   :  { %12445 = vmatprep.subr.bf16.mxu1 %v16124_v17  ;;  %v16205_v17 = vld [vmem:[#allocation7 + $0x244] ss:$16 sps:$4 sm:$0xff]  }
 0x636   :  { %12274 = vmatpush1.bf16.msra.mxu0 %v16119_v0  ;;  %v16208_v0 = vld [vmem:[#allocation7 + $0x24c] ss:$16 sps:$4 sm:$0xff]  }
 0x637   :  { %12446 = vmatpush1.bf16.msra.mxu1 %v16122_v14  ;;  %12275 = vmatprep.subr.bf16.mxu0 %v16127_v55  ;;  %v16203_v14 = vld [vmem:[#allocation7 + $0x240] ss:$16 sps:$4 sm:$0xff]   ;;  %v16206_v55 = vld [vmem:[#allocation7 + $0x248] ss:$16 sps:$4 sm:$0xff]  }
 0x638   :  { %12447 = vmatprep.subr.bf16.mxu1 %v16130_v59  ;;  %v16211_v59 = vld [vmem:[#allocation7 + $0x264] ss:$16 sps:$4 sm:$0xff]  }
 0x63a   :  { %12276 = vmatpush1.bf16.msra.mxu0 %v16125_v63  ;;  %v16209_v63 = vld [vmem:[#allocation7 + $0x260] ss:$16 sps:$4 sm:$0xff]  }
 0x63b   :  { %12448 = vmatpush1.bf16.msra.mxu1 %v16128_v13  ;;  %12277 = vmatprep.subr.bf16.mxu0 %v16133_v45  ;;  %v16212_v13 = vld [vmem:[#allocation7 + $0x268] ss:$16 sps:$4 sm:$0xff]   ;;  %v16217_v45 = vld [vmem:[#allocation7 + $0x284] ss:$16 sps:$4 sm:$0xff]  }
 0x63c   :  { %12449 = vmatprep.subr.bf16.mxu1 %v16136_v1  ;;  %v16220_v1 = vld [vmem:[#allocation7 + $0x28c] ss:$16 sps:$4 sm:$0xff]  }
 0x63e   :  { %12278 = vmatpush1.bf16.msra.mxu0 %v16131_v42  ;;  %v16218_v42 = vld [vmem:[#allocation7 + $0x288] ss:$16 sps:$4 sm:$0xff]  }
 0x63f   :  { %12450 = vmatpush1.bf16.msra.mxu1 %v16134_v4  ;;  %12279 = vmatprep.subr.bf16.mxu0 %v16139_v5  ;;  %v16223_v4 = vld [vmem:[#allocation7 + $0x2a4] ss:$16 sps:$4 sm:$0xff]   ;;  %v16226_v5 = vld [vmem:[#allocation7 + $0x2ac] ss:$16 sps:$4 sm:$0xff]  }
 0x640   :  { %12451 = vmatprep.subr.bf16.mxu1 %v16142_v24  ;;  %v16221_v24 = vld [vmem:[#allocation7 + $0x2a0] ss:$16 sps:$4 sm:$0xff]  }
 0x642   :  { %12280 = vmatpush1.bf16.msra.mxu0 %v16137_v6  ;;  %v16224_v6 = vld [vmem:[#allocation7 + $0x2a8] ss:$16 sps:$4 sm:$0xff]  }
 0x643   :  { %12452 = vmatpush1.bf16.msra.mxu1 %v16140_v7  ;;  %12281 = vmatprep.subr.bf16.mxu0 %v16145_v29  ;;  %v16229_v7 = vld [vmem:[#allocation7 + $0x2c4] ss:$16 sps:$4 sm:$0xff]   ;;  %v16232_v29 = vld [vmem:[#allocation7 + $0x2cc] ss:$16 sps:$4 sm:$0xff]  }
 0x644   :  { %12453 = vmatprep.subr.bf16.mxu1 %v16148_v8  ;;  %v16227_v8 = vld [vmem:[#allocation7 + $0x2c0] ss:$16 sps:$4 sm:$0xff]  }
 0x646   :  { %12282 = vmatpush1.bf16.msra.mxu0 %v16143_v11  ;;  %v16230_v11 = vld [vmem:[#allocation7 + $0x2c8] ss:$16 sps:$4 sm:$0xff]  }
 0x647   :  { %12454 = vmatpush1.bf16.msra.mxu1 %v16146_v9  ;;  %12283 = vmatprep.subr.bf16.mxu0 %v16151_v10  ;;  %v16235_v9 = vld [vmem:[#allocation7 + $0x2e4] ss:$16 sps:$4 sm:$0xff]   ;;  %v16238_v10 = vld [vmem:[#allocation7 + $0x2ec] ss:$16 sps:$4 sm:$0xff]  }
 0x648   :  { %12455 = vmatprep.subr.bf16.mxu1 %v16154_v50  ;;  %v16233_v50 = vld [vmem:[#allocation7 + $0x2e0] ss:$16 sps:$4 sm:$0xff]  }
 0x64a   :  { %12284 = vmatpush1.bf16.msra.mxu0 %v16149_v12  ;;  %v16236_v12 = vld [vmem:[#allocation7 + $0x2e8] ss:$16 sps:$4 sm:$0xff]  }
 0x64b   :  { %12456 = vmatpush1.bf16.msra.mxu1 %v16152_v18  ;;  %12285 = vmatprep.subr.bf16.mxu0 %v16157_v19  ;;  %v16241_v18 = vld [vmem:[#allocation7 + $0x304] ss:$16 sps:$4 sm:$0xff]   ;;  %v16244_v19 = vld [vmem:[#allocation7 + $0x30c] ss:$16 sps:$4 sm:$0xff]  }
 0x64c   :  { %12457 = vmatprep.subr.bf16.mxu1 %v16160_v20  ;;  %v16239_v20 = vld [vmem:[#allocation7 + $0x300] ss:$16 sps:$4 sm:$0xff]  }
 0x64e   :  { %12286 = vmatpush1.bf16.msra.mxu0 %v16155_v48  ;;  %v16242_v48 = vld [vmem:[#allocation7 + $0x308] ss:$16 sps:$4 sm:$0xff]  }
 0x64f   :  { %12458 = vmatpush1.bf16.msra.mxu1 %v16158_v32  ;;  %12287 = vmatprep.subr.bf16.mxu0 %v16163_v61  ;;  %v16247_v32 = vld [vmem:[#allocation7 + $0x324] ss:$16 sps:$4 sm:$0xff]   ;;  %v16250_v61 = vld [vmem:[#allocation7 + $0x32c] ss:$16 sps:$4 sm:$0xff]  }
 0x650   :  { %12459 = vmatprep.subr.bf16.mxu1 %v16166_v60  ;;  %v16245_v60 = vld [vmem:[#allocation7 + $0x320] ss:$16 sps:$4 sm:$0xff]  }
 0x652   :  { %12288 = vmatpush1.bf16.msra.mxu0 %v16161_v23  ;;  %v16248_v23 = vld [vmem:[#allocation7 + $0x328] ss:$16 sps:$4 sm:$0xff]  }
 0x653   :  { %12460 = vmatpush1.bf16.msra.mxu1 %v16164_v25  ;;  %12289 = vmatprep.subr.bf16.mxu0 %v16169_v26  ;;  %v16253_v25 = vld [vmem:[#allocation7 + $0x344] ss:$16 sps:$4 sm:$0xff]   ;;  %v16256_v26 = vld [vmem:[#allocation7 + $0x34c] ss:$16 sps:$4 sm:$0xff]  }
 0x654   :  { %12461 = vmatprep.subr.bf16.mxu1 %v16172_v28  ;;  %v16251_v28 = vld [vmem:[#allocation7 + $0x340] ss:$16 sps:$4 sm:$0xff]  }
 0x656   :  { %12290 = vmatpush1.bf16.msra.mxu0 %v16167_v58  ;;  %v16254_v58 = vld [vmem:[#allocation7 + $0x348] ss:$16 sps:$4 sm:$0xff]  }
 0x657   :  { %12462 = vmatpush1.bf16.msra.mxu1 %v16170_v31  ;;  %12291 = vmatprep.subr.bf16.mxu0 %v16175_v34  ;;  %v16259_v31 = vld [vmem:[#allocation7 + $0x364] ss:$16 sps:$4 sm:$0xff]   ;;  %v16262_v34 = vld [vmem:[#allocation7 + $0x36c] ss:$16 sps:$4 sm:$0xff]  }
 0x658   :  { %12463 = vmatprep.subr.bf16.mxu1 %v16178_v35  ;;  %v16257_v35 = vld [vmem:[#allocation7 + $0x360] ss:$16 sps:$4 sm:$0xff]  }
 0x65a   :  { %12292 = vmatpush1.bf16.msra.mxu0 %v16173_v36  ;;  %v16260_v36 = vld [vmem:[#allocation7 + $0x368] ss:$16 sps:$4 sm:$0xff]  }
 0x65b   :  { %12464 = vmatpush1.bf16.msra.mxu1 %v16176_v46  ;;  %12293 = vmatprep.subr.bf16.mxu0 %v16181_v30  ;;  %v16265_v46 = vld [vmem:[#allocation7 + $0x384] ss:$16 sps:$4 sm:$0xff]   ;;  %v16268_v30 = vld [vmem:[#allocation7 + $0x38c] ss:$16 sps:$4 sm:$0xff]  }
 0x65c   :  { %12465 = vmatprep.subr.bf16.mxu1 %v16184_v22  ;;  %v16263_v22 = vld [vmem:[#allocation7 + $0x380] ss:$16 sps:$4 sm:$0xff]  }
 0x65e   :  { %12294 = vmatpush1.bf16.msra.mxu0 %v16179_v39  ;;  %v16266_v39 = vld [vmem:[#allocation7 + $0x388] ss:$16 sps:$4 sm:$0xff]  }
 0x65f   :  { %12466 = vmatpush1.bf16.msra.mxu1 %v16182_v2  ;;  %12295 = vmatprep.subr.bf16.mxu0 %v16187_v54  ;;  %v16271_v2 = vld [vmem:[#allocation7 + $0x3a4] ss:$16 sps:$4 sm:$0xff]   ;;  %v16274_v54 = vld [vmem:[#allocation7 + $0x3ac] ss:$16 sps:$4 sm:$0xff]  }
 0x660   :  { %12467 = vmatprep.subr.bf16.mxu1 %v16190_v40  ;;  %v16269_v40 = vld [vmem:[#allocation7 + $0x3a0] ss:$16 sps:$4 sm:$0xff]  }
 0x662   :  { %12296 = vmatpush1.bf16.msra.mxu0 %v16185_v41  ;;  %v16272_v41 = vld [vmem:[#allocation7 + $0x3a8] ss:$16 sps:$4 sm:$0xff]  }
 0x663   :  { %12468 = vmatpush1.bf16.msra.mxu1 %v16188_v43  ;;  %12308 = vmatprep.subr.bf16.mxu0 %v16193_v47  ;;  %v16277_v43 = vld [vmem:[#allocation7 + $0x3c4] ss:$16 sps:$4 sm:$0xff]   ;;  %v16280_v47 = vld [vmem:[#allocation7 + $0x3cc] ss:$16 sps:$4 sm:$0xff]  }
 0x664   :  { %12480 = vmatprep.subr.bf16.mxu1 %v16196_v49  ;;  %v16275_v49 = vld [vmem:[#allocation7 + $0x3c0] ss:$16 sps:$4 sm:$0xff]  }
 0x665   :  { %12298 = vmatmul.mubr.bf16.vlgmr.msra.gmra.mrb[8].mxu0 %v17374_v62 }
 0x666   :  { %12470 = vmatmul.mubr.bf16.vlgmr.msra.gmra.mrb[8].mxu1 %v17374_v62  ;;  %12309 = vmatpush1.bf16.msra.mxu0 %v16191_v53  ;;  %v16214_v62 = vld [vmem:[#allocation7 + $0x26c] ss:$16 sps:$4 sm:$0xff]   ;;  %v16278_v53 = vld [vmem:[#allocation7 + $0x3c8] ss:$16 sps:$4 sm:$0xff]  }
 0x667   :  { %12340 = vmatprep.mubr.bf16.mxu0 %v17380_v3  ;;  %12481 = vmatpush1.bf16.msra.mxu1 %v16194_v38  ;;  %v16283_v38 = vld [vmem:[#allocation7 + $0x3e4] ss:$16 sps:$4 sm:$0xff]  }
 0x668   :  { %12512 = vmatprep.mubr.bf16.mxu1 %v17380_v3  ;;  %12310 = vmatprep.subr.bf16.mxu0 %v16199_v21  ;;  %v16215_v3 = vld [vmem:[#allocation7 + $0x280] ss:$16 sps:$4 sm:$0xff]   ;;  %v16286_v21 = vld [vmem:[#allocation7 + $0x3ec] ss:$16 sps:$4 sm:$0xff]  }
 0x669   :  { %12482 = vmatprep.subr.bf16.mxu1 %v16202_v51  ;;  %v16281_v51 = vld [vmem:[#allocation7 + $0x3e0] ss:$16 sps:$4 sm:$0xff]  }
 0x66a   :  { %12311 = vmatpush1.bf16.msra.mxu0 %v16197_v56  ;;  %v16284_v56 = vld [vmem:[#allocation7 + $0x3e8] ss:$16 sps:$4 sm:$0xff]  }
 0x66b   :  { %12483 = vmatpush1.bf16.msra.mxu1 %v16200_v44  ;;  %12312 = vmatprep.subr.bf16.mxu0 %v16205_v17  ;;  %v16289_v44 = vld [vmem:[#allocation7 + $0x404] ss:$16 sps:$4 sm:$0xff]   ;;  %v16292_v17 = vld [vmem:[#allocation7 + $0x40c] ss:$16 sps:$4 sm:$0xff]  }
 0x66c   :  { %12484 = vmatprep.subr.bf16.mxu1 %v16208_v0  ;;  %v16287_v0 = vld [vmem:[#allocation7 + $0x400] ss:$16 sps:$4 sm:$0xff]  }
 0x66e   :  { %12313 = vmatpush1.bf16.msra.mxu0 %v16203_v14  ;;  %v16290_v14 = vld [vmem:[#allocation7 + $0x408] ss:$16 sps:$4 sm:$0xff]  }
 0x66f   :  { %12485 = vmatpush1.bf16.msra.mxu1 %v16206_v55  ;;  %12314 = vmatprep.subr.bf16.mxu0 %v16211_v59  ;;  %v16295_v55 = vld [vmem:[#allocation7 + $0x424] ss:$16 sps:$4 sm:$0xff]   ;;  %v16298_v59 = vld [vmem:[#allocation7 + $0x42c] ss:$16 sps:$4 sm:$0xff]  }
 0x670   :  { %12486 = vmatprep.subr.bf16.mxu1 %v16214_v62  ;;  %v16293_v62 = vld [vmem:[#allocation7 + $0x420] ss:$16 sps:$4 sm:$0xff]  }
 0x672   :  { %12315 = vmatpush1.bf16.msra.mxu0 %v16209_v63  ;;  %v16296_v63 = vld [vmem:[#allocation7 + $0x428] ss:$16 sps:$4 sm:$0xff]  }
 0x673   :  { %12487 = vmatpush1.bf16.msra.mxu1 %v16212_v13  ;;  %12316 = vmatprep.subr.bf16.mxu0 %v16217_v45  ;;  %v16301_v13 = vld [vmem:[#allocation7 + $0x444] ss:$16 sps:$4 sm:$0xff]   ;;  %v16304_v45 = vld [vmem:[#allocation7 + $0x44c] ss:$16 sps:$4 sm:$0xff]  }
 0x674   :  { %12488 = vmatprep.subr.bf16.mxu1 %v16220_v1  ;;  %v16299_v1 = vld [vmem:[#allocation7 + $0x440] ss:$16 sps:$4 sm:$0xff]  }
 0x676   :  { %12317 = vmatpush1.bf16.msra.mxu0 %v16215_v3  ;;  %v16302_v3 = vld [vmem:[#allocation7 + $0x448] ss:$16 sps:$4 sm:$0xff]  }
 0x677   :  { %12489 = vmatpush1.bf16.msra.mxu1 %v16218_v42  ;;  %12318 = vmatprep.subr.bf16.mxu0 %v16223_v4  ;;  %v16307_v42 = vld [vmem:[#allocation7 + $0x464] ss:$16 sps:$4 sm:$0xff]   ;;  %v16310_v4 = vld [vmem:[#allocation7 + $0x46c] ss:$16 sps:$4 sm:$0xff]  }
 0x678   :  { %12490 = vmatprep.subr.bf16.mxu1 %v16226_v5  ;;  %v16305_v5 = vld [vmem:[#allocation7 + $0x460] ss:$16 sps:$4 sm:$0xff]  }
 0x67a   :  { %12319 = vmatpush1.bf16.msra.mxu0 %v16221_v24  ;;  %v16313_v24 = vld [vmem:[#allocation7 + $0x484] ss:$16 sps:$4 sm:$0xff]  }
 0x67b   :  { %12491 = vmatpush1.bf16.msra.mxu1 %v16224_v6  ;;  %12320 = vmatprep.subr.bf16.mxu0 %v16229_v7  ;;  %v16316_v6 = vld [vmem:[#allocation7 + $0x48c] ss:$16 sps:$4 sm:$0xff]   ;;  %v16311_v7 = vld [vmem:[#allocation7 + $0x480] ss:$16 sps:$4 sm:$0xff]  }
 0x67c   :  { %12492 = vmatprep.subr.bf16.mxu1 %v16232_v29  ;;  %v16314_v29 = vld [vmem:[#allocation7 + $0x488] ss:$16 sps:$4 sm:$0xff]  }
 0x67e   :  { %12321 = vmatpush1.bf16.msra.mxu0 %v16227_v8  ;;  %v16319_v8 = vld [vmem:[#allocation7 + $0x4a4] ss:$16 sps:$4 sm:$0xff]  }
 0x67f   :  { %12493 = vmatpush1.bf16.msra.mxu1 %v16230_v11  ;;  %12322 = vmatprep.subr.bf16.mxu0 %v16235_v9  ;;  %v16322_v11 = vld [vmem:[#allocation7 + $0x4ac] ss:$16 sps:$4 sm:$0xff]   ;;  %v16317_v9 = vld [vmem:[#allocation7 + $0x4a0] ss:$16 sps:$4 sm:$0xff]  }
 0x680   :  { %12494 = vmatprep.subr.bf16.mxu1 %v16238_v10  ;;  %v16320_v10 = vld [vmem:[#allocation7 + $0x4a8] ss:$16 sps:$4 sm:$0xff]  }
 0x682   :  { %12323 = vmatpush1.bf16.msra.mxu0 %v16233_v50  ;;  %v16325_v50 = vld [vmem:[#allocation7 + $0x4c4] ss:$16 sps:$4 sm:$0xff]  }
 0x683   :  { %12495 = vmatpush1.bf16.msra.mxu1 %v16236_v12  ;;  %12324 = vmatprep.subr.bf16.mxu0 %v16241_v18  ;;  %v16328_v12 = vld [vmem:[#allocation7 + $0x4cc] ss:$16 sps:$4 sm:$0xff]   ;;  %v16323_v18 = vld [vmem:[#allocation7 + $0x4c0] ss:$16 sps:$4 sm:$0xff]  }
 0x684   :  { %12496 = vmatprep.subr.bf16.mxu1 %v16244_v19  ;;  %v16326_v19 = vld [vmem:[#allocation7 + $0x4c8] ss:$16 sps:$4 sm:$0xff]  }
 0x686   :  { %12325 = vmatpush1.bf16.msra.mxu0 %v16239_v20  ;;  %v16331_v20 = vld [vmem:[#allocation7 + $0x4e4] ss:$16 sps:$4 sm:$0xff]  }
 0x687   :  { %12497 = vmatpush1.bf16.msra.mxu1 %v16242_v48  ;;  %12326 = vmatprep.subr.bf16.mxu0 %v16247_v32  ;;  %v16334_v48 = vld [vmem:[#allocation7 + $0x4ec] ss:$16 sps:$4 sm:$0xff]   ;;  %v16329_v32 = vld [vmem:[#allocation7 + $0x4e0] ss:$16 sps:$4 sm:$0xff]  }
 0x688   :  { %12498 = vmatprep.subr.bf16.mxu1 %v16250_v61  ;;  %v16332_v61 = vld [vmem:[#allocation7 + $0x4e8] ss:$16 sps:$4 sm:$0xff]  }
 0x68a   :  { %12327 = vmatpush1.bf16.msra.mxu0 %v16245_v60  ;;  %v16337_v60 = vld [vmem:[#allocation7 + $0x504] ss:$16 sps:$4 sm:$0xff]  }
 0x68b   :  { %12499 = vmatpush1.bf16.msra.mxu1 %v16248_v23  ;;  %12328 = vmatprep.subr.bf16.mxu0 %v16253_v25  ;;  %v16340_v23 = vld [vmem:[#allocation7 + $0x50c] ss:$16 sps:$4 sm:$0xff]   ;;  %v16335_v25 = vld [vmem:[#allocation7 + $0x500] ss:$16 sps:$4 sm:$0xff]  }
 0x68c   :  { %12500 = vmatprep.subr.bf16.mxu1 %v16256_v26  ;;  %v16338_v26 = vld [vmem:[#allocation7 + $0x508] ss:$16 sps:$4 sm:$0xff]  }
 0x68e   :  { %12329 = vmatpush1.bf16.msra.mxu0 %v16251_v28  ;;  %v16343_v28 = vld [vmem:[#allocation7 + $0x524] ss:$16 sps:$4 sm:$0xff]  }
 0x68f   :  { %12501 = vmatpush1.bf16.msra.mxu1 %v16254_v58  ;;  %12330 = vmatprep.subr.bf16.mxu0 %v16259_v31  ;;  %v16346_v58 = vld [vmem:[#allocation7 + $0x52c] ss:$16 sps:$4 sm:$0xff]   ;;  %v16341_v31 = vld [vmem:[#allocation7 + $0x520] ss:$16 sps:$4 sm:$0xff]  }
 0x690   :  { %12502 = vmatprep.subr.bf16.mxu1 %v16262_v34  ;;  %v16344_v34 = vld [vmem:[#allocation7 + $0x528] ss:$16 sps:$4 sm:$0xff]  }
 0x692   :  { %12331 = vmatpush1.bf16.msra.mxu0 %v16257_v35  ;;  %v16349_v35 = vld [vmem:[#allocation7 + $0x544] ss:$16 sps:$4 sm:$0xff]  }
 0x693   :  { %12503 = vmatpush1.bf16.msra.mxu1 %v16260_v36  ;;  %12332 = vmatprep.subr.bf16.mxu0 %v16265_v46  ;;  %v16352_v36 = vld [vmem:[#allocation7 + $0x54c] ss:$16 sps:$4 sm:$0xff]   ;;  %v16347_v46 = vld [vmem:[#allocation7 + $0x540] ss:$16 sps:$4 sm:$0xff]  }
 0x694   :  { %12504 = vmatprep.subr.bf16.mxu1 %v16268_v30  ;;  %v16350_v30 = vld [vmem:[#allocation7 + $0x548] ss:$16 sps:$4 sm:$0xff]  }
 0x696   :  { %12333 = vmatpush1.bf16.msra.mxu0 %v16263_v22  ;;  %v16355_v22 = vld [vmem:[#allocation7 + $0x564] ss:$16 sps:$4 sm:$0xff]  }
 0x697   :  { %12505 = vmatpush1.bf16.msra.mxu1 %v16266_v39  ;;  %12334 = vmatprep.subr.bf16.mxu0 %v16271_v2  ;;  %v16358_v39 = vld [vmem:[#allocation7 + $0x56c] ss:$16 sps:$4 sm:$0xff]   ;;  %v16353_v2 = vld [vmem:[#allocation7 + $0x560] ss:$16 sps:$4 sm:$0xff]  }
 0x698   :  { %12506 = vmatprep.subr.bf16.mxu1 %v16274_v54  ;;  %v16356_v54 = vld [vmem:[#allocation7 + $0x568] ss:$16 sps:$4 sm:$0xff]  }
 0x69a   :  { %12335 = vmatpush1.bf16.msra.mxu0 %v16269_v40  ;;  %v16361_v40 = vld [vmem:[#allocation7 + $0x584] ss:$16 sps:$4 sm:$0xff]  }
 0x69b   :  { %12507 = vmatpush1.bf16.msra.mxu1 %v16272_v41  ;;  %12336 = vmatprep.subr.bf16.mxu0 %v16277_v43  ;;  %v16364_v41 = vld [vmem:[#allocation7 + $0x58c] ss:$16 sps:$4 sm:$0xff]   ;;  %v16359_v43 = vld [vmem:[#allocation7 + $0x580] ss:$16 sps:$4 sm:$0xff]  }
 0x69c   :  { %12508 = vmatprep.subr.bf16.mxu1 %v16280_v47  ;;  %v16362_v47 = vld [vmem:[#allocation7 + $0x588] ss:$16 sps:$4 sm:$0xff]  }
 0x69e   :  { %12337 = vmatpush1.bf16.msra.mxu0 %v16275_v49  ;;  %v16367_v49 = vld [vmem:[#allocation7 + $0x5a4] ss:$16 sps:$4 sm:$0xff]  }
 0x69f   :  { %12509 = vmatpush1.bf16.msra.mxu1 %v16278_v53  ;;  %12338 = vmatprep.subr.bf16.mxu0 %v16283_v38  ;;  %v16370_v53 = vld [vmem:[#allocation7 + $0x5ac] ss:$16 sps:$4 sm:$0xff]   ;;  %v16365_v38 = vld [vmem:[#allocation7 + $0x5a0] ss:$16 sps:$4 sm:$0xff]  }
 0x6a0   :  { %12510 = vmatprep.subr.bf16.mxu1 %v16286_v21  ;;  %v16368_v21 = vld [vmem:[#allocation7 + $0x5a8] ss:$16 sps:$4 sm:$0xff]  }
 0x6a2   :  { %12339 = vmatpush1.bf16.msra.mxu0 %v16281_v51  ;;  %v16373_v51 = vld [vmem:[#allocation7 + $0x5c4] ss:$16 sps:$4 sm:$0xff]  }
 0x6a3   :  { %12511 = vmatpush1.bf16.msra.mxu1 %v16284_v56  ;;  %12351 = vmatprep.subr.bf16.mxu0 %v16289_v44  ;;  %v16376_v56 = vld [vmem:[#allocation7 + $0x5cc] ss:$16 sps:$4 sm:$0xff]   ;;  %v16371_v44 = vld [vmem:[#allocation7 + $0x5c0] ss:$16 sps:$4 sm:$0xff]  }
 0x6a4   :  { %12523 = vmatprep.subr.bf16.mxu1 %v16292_v17  ;;  %v16374_v17 = vld [vmem:[#allocation7 + $0x5c8] ss:$16 sps:$4 sm:$0xff]  }
 0x6a5   :  { %12341 = vmatmul.mubr.bf16.vlgmr.msra.gmra.mrb[8].mxu0 %v17376_v15 }
 0x6a6   :  { %12513 = vmatmul.mubr.bf16.vlgmr.msra.gmra.mrb[8].mxu1 %v17376_v15  ;;  %12352 = vmatpush1.bf16.msra.mxu0 %v16287_v0  ;;  %v16308_v15 = vld [vmem:[#allocation7 + $0x468] ss:$16 sps:$4 sm:$0xff]   ;;  %v16379_v0 = vld [vmem:[#allocation7 + $0x5e4] ss:$16 sps:$4 sm:$0xff]  }
 0x6a7   :  { %12524 = vmatpush1.bf16.msra.mxu1 %v16290_v14  ;;  %12353 = vmatprep.subr.bf16.mxu0 %v16295_v55  ;;  %v16382_v14 = vld [vmem:[#allocation7 + $0x5ec] ss:$16 sps:$4 sm:$0xff]   ;;  %v16377_v55 = vld [vmem:[#allocation7 + $0x5e0] ss:$16 sps:$4 sm:$0xff]  }
 0x6a8   :  { %12525 = vmatprep.subr.bf16.mxu1 %v16298_v59  ;;  %v16380_v59 = vld [vmem:[#allocation7 + $0x5e8] ss:$16 sps:$4 sm:$0xff]  }
 0x6aa   :  { %12354 = vmatpush1.bf16.msra.mxu0 %v16293_v62  ;;  %v16385_v62 = vld [vmem:[#allocation7 + $0x604] ss:$16 sps:$4 sm:$0xff]  }
 0x6ab   :  { %12526 = vmatpush1.bf16.msra.mxu1 %v16296_v63  ;;  %12355 = vmatprep.subr.bf16.mxu0 %v16301_v13  ;;  %v16388_v63 = vld [vmem:[#allocation7 + $0x60c] ss:$16 sps:$4 sm:$0xff]   ;;  %v10645_v13 = vsub.s32 4, %v17356_v37 }
 0x6ac   :  { %12527 = vmatprep.subr.bf16.mxu1 %v16304_v45  ;;  %v10653_v45 = vsub.s32 6, %v17356_v37 }
 0x6ae   :  { %12356 = vmatpush1.bf16.msra.mxu0 %v16299_v1  ;;  %v10649_v1 = vsub.s32 5, %v17356_v37 }
 0x6af   :  { %12528 = vmatpush1.bf16.msra.mxu1 %v16302_v3  ;;  %12357 = vmatprep.subr.bf16.mxu0 %v16307_v42  ;;  %v10657_v3 = vsub.s32 7, %v17356_v37  ;;  %v16717_v42 = vld [vmem:[#allocation6] sm:$0xff] }
 0x6b0   :  { %12529 = vmatprep.subr.bf16.mxu1 %v16310_v4  ;;  %v10646_v4 = vrot.slane %v16717_v42, %v10645_v13  ;;  %v16421_v13 = vld [vmem:[#allocation7 + $0x6c4] ss:$16 sps:$4 sm:$0xff]  }
 0x6b2   :  { %12358 = vmatpush1.bf16.msra.mxu0 %v16305_v5  ;;  %v10654_v5 = vrot.slane %v16717_v42, %v10653_v45  ;;  %v16424_v45 = vld [vmem:[#allocation7 + $0x6cc] ss:$16 sps:$4 sm:$0xff]  }
 0x6b3   :  { %12530 = vmatpush1.bf16.msra.mxu1 %v16308_v15  ;;  %12359 = vmatprep.subr.bf16.mxu0 %v16313_v24  ;;  %v10650_v15 = vrot.slane %v16717_v42, %v10649_v1  ;;  %v10658_v24 = vrot.slane %v16717_v42, %v10657_v3  ;;  %v16419_v1 = vld [vmem:[#allocation7 + $0x6c0] ss:$16 sps:$4 sm:$0xff]   ;;  %v16422_v3 = vld [vmem:[#allocation7 + $0x6c8] ss:$16 sps:$4 sm:$0xff]   ;;  %v16427_v42 = vld [vmem:[#allocation7 + $0x6e4] ss:$16 sps:$4 sm:$0xff]  }
 0x6b4   :  { %12531 = vmatprep.subr.bf16.mxu1 %v16316_v6 }
 0x6b6   :  { %12360 = vmatpush1.bf16.msra.mxu0 %v16311_v7 }
 0x6b7   :  { %12532 = vmatpush1.bf16.msra.mxu1 %v16314_v29  ;;  %12361 = vmatprep.subr.bf16.mxu0 %v16319_v8 }
 0x6b8   :  { %12533 = vmatprep.subr.bf16.mxu1 %v16322_v11 }
 0x6ba   :  { %12362 = vmatpush1.bf16.msra.mxu0 %v16317_v9 }
 0x6bb   :  { %12534 = vmatpush1.bf16.msra.mxu1 %v16320_v10  ;;  %12363 = vmatprep.subr.bf16.mxu0 %v16325_v50 }
 0x6bc   :  { %12535 = vmatprep.subr.bf16.mxu1 %v16328_v12 }
 0x6be   :  { %12364 = vmatpush1.bf16.msra.mxu0 %v16323_v18 }
 0x6bf   :  { %12536 = vmatpush1.bf16.msra.mxu1 %v16326_v19  ;;  %12365 = vmatprep.subr.bf16.mxu0 %v16331_v20 }
 0x6c0   :  { %12537 = vmatprep.subr.bf16.mxu1 %v16334_v48 }
 0x6c2   :  { %12366 = vmatpush1.bf16.msra.mxu0 %v16329_v32 }
 0x6c3   :  { %12538 = vmatpush1.bf16.msra.mxu1 %v16332_v61  ;;  %12367 = vmatprep.subr.bf16.mxu0 %v16337_v60 }
 0x6c4   :  { %12539 = vmatprep.subr.bf16.mxu1 %v16340_v23 }
 0x6c6   :  { %12368 = vmatpush1.bf16.msra.mxu0 %v16335_v25 }
 0x6c7   :  { %12540 = vmatpush1.bf16.msra.mxu1 %v16338_v26  ;;  %12369 = vmatprep.subr.bf16.mxu0 %v16343_v28 }
 0x6c8   :  { %12541 = vmatprep.subr.bf16.mxu1 %v16346_v58 }
 0x6ca   :  { %12370 = vmatpush1.bf16.msra.mxu0 %v16341_v31 }
 0x6cb   :  { %12542 = vmatpush1.bf16.msra.mxu1 %v16344_v34  ;;  %12371 = vmatprep.subr.bf16.mxu0 %v16349_v35 }
 0x6cc   :  { %12543 = vmatprep.subr.bf16.mxu1 %v16352_v36 }
 0x6ce   :  { %12372 = vmatpush1.bf16.msra.mxu0 %v16347_v46 }
 0x6cf   :  { %12544 = vmatpush1.bf16.msra.mxu1 %v16350_v30  ;;  %12373 = vmatprep.subr.bf16.mxu0 %v16355_v22  ;;  %v16383_v30 = vld [vmem:[#allocation7 + $0x600] ss:$16 sps:$4 sm:$0xff]   ;;  %v16386_v22 = vld [vmem:[#allocation7 + $0x608] ss:$16 sps:$4 sm:$0xff]  }
 0x6d0   :  { %12545 = vmatprep.subr.bf16.mxu1 %v16358_v39 }
 0x6d2   :  { %12374 = vmatpush1.bf16.msra.mxu0 %v16353_v2  ;;  %v16391_v2 = vld [vmem:[#allocation7 + $0x624] ss:$16 sps:$4 sm:$0xff]  }
 0x6d3   :  { %12546 = vmatpush1.bf16.msra.mxu1 %v16356_v54  ;;  %12375 = vmatprep.subr.bf16.mxu0 %v16361_v40  ;;  %v16394_v54 = vld [vmem:[#allocation7 + $0x62c] ss:$16 sps:$4 sm:$0xff]   ;;  %v16389_v40 = vld [vmem:[#allocation7 + $0x620] ss:$16 sps:$4 sm:$0xff]  }
 0x6d4   :  { %12547 = vmatprep.subr.bf16.mxu1 %v16364_v41  ;;  %v16392_v41 = vld [vmem:[#allocation7 + $0x628] ss:$16 sps:$4 sm:$0xff]  }
 0x6d6   :  { %12376 = vmatpush1.bf16.msra.mxu0 %v16359_v43  ;;  %v16397_v43 = vld [vmem:[#allocation7 + $0x644] ss:$16 sps:$4 sm:$0xff]  }
 0x6d7   :  { %12548 = vmatpush1.bf16.msra.mxu1 %v16362_v47  ;;  %12377 = vmatprep.subr.bf16.mxu0 %v16367_v49  ;;  %v16400_v47 = vld [vmem:[#allocation7 + $0x64c] ss:$16 sps:$4 sm:$0xff]   ;;  %v16395_v49 = vld [vmem:[#allocation7 + $0x640] ss:$16 sps:$4 sm:$0xff]  }
 0x6d8   :  { %12549 = vmatprep.subr.bf16.mxu1 %v16370_v53  ;;  %v16398_v53 = vld [vmem:[#allocation7 + $0x648] ss:$16 sps:$4 sm:$0xff]  }
 0x6da   :  { %12378 = vmatpush1.bf16.msra.mxu0 %v16365_v38  ;;  %v16403_v38 = vld [vmem:[#allocation7 + $0x664] ss:$16 sps:$4 sm:$0xff]  }
 0x6db   :  { %12550 = vmatpush1.bf16.msra.mxu1 %v16368_v21  ;;  %12379 = vmatprep.subr.bf16.mxu0 %v16373_v51  ;;  %v16406_v21 = vld [vmem:[#allocation7 + $0x66c] ss:$16 sps:$4 sm:$0xff]   ;;  %v16401_v51 = vld [vmem:[#allocation7 + $0x660] ss:$16 sps:$4 sm:$0xff]  }
 0x6dc   :  { %12551 = vmatprep.subr.bf16.mxu1 %v16376_v56  ;;  %v16404_v56 = vld [vmem:[#allocation7 + $0x668] ss:$16 sps:$4 sm:$0xff]  }
 0x6de   :  { %12380 = vmatpush1.bf16.msra.mxu0 %v16371_v44  ;;  %v16409_v44 = vld [vmem:[#allocation7 + $0x684] ss:$16 sps:$4 sm:$0xff]  }
 0x6df   :  { %12552 = vmatpush1.bf16.msra.mxu1 %v16374_v17  ;;  %12381 = vmatprep.subr.bf16.mxu0 %v16379_v0  ;;  %v16412_v17 = vld [vmem:[#allocation7 + $0x68c] ss:$16 sps:$4 sm:$0xff]   ;;  %v16407_v0 = vld [vmem:[#allocation7 + $0x680] ss:$16 sps:$4 sm:$0xff]  }
 0x6e0   :  { %12553 = vmatprep.subr.bf16.mxu1 %v16382_v14  ;;  %v16410_v14 = vld [vmem:[#allocation7 + $0x688] ss:$16 sps:$4 sm:$0xff]  }
 0x6e2   :  { %12382 = vmatpush1.bf16.msra.mxu0 %v16377_v55  ;;  %v16415_v55 = vld [vmem:[#allocation7 + $0x6a4] ss:$16 sps:$4 sm:$0xff]  }
 0x6e3   :  { %12554 = vmatpush1.bf16.msra.mxu1 %v16380_v59  ;;  %12394 = vmatprep.subr.bf16.mxu0 %v16385_v62  ;;  %v16418_v59 = vld [vmem:[#allocation7 + $0x6ac] ss:$16 sps:$4 sm:$0xff]   ;;  %v16413_v62 = vld [vmem:[#allocation7 + $0x6a0] ss:$16 sps:$4 sm:$0xff]  }
 0x6e4   :  { %12566 = vmatprep.subr.bf16.mxu1 %v16388_v63  ;;  %v16416_v63 = vld [vmem:[#allocation7 + $0x6a8] ss:$16 sps:$4 sm:$0xff]  }
 0x6f8   :  { %v10272_v6 = vpop.f32.mrb[4].mxu0  ;;  %v10616_v29 = vpop.f32.mrb[4].mxu1 }
 0x6f9   :  { %v10671_v7 = vadd.f32 %v10646_v4, %v10272_v6  ;;  %v10274_v8 = vpop.f32.mrb[5].mxu0  ;;  %v10673_v11 = vadd.f32 %v10654_v5, %v10616_v29  ;;  %v10618_v10 = vpop.f32.mrb[5].mxu1  ;;  %v16436_v6 = vld [vmem:[#allocation7 + $0x70c] ss:$16 sps:$4 sm:$0xff]   ;;  %v16434_v29 = vld [vmem:[#allocation7 + $0x708] ss:$16 sps:$4 sm:$0xff]  }
 0x6fa   :  { %v10672_v9 = vadd.f32 %v10650_v15, %v10274_v8  ;;  %v10276_v50 = vpop.f32.mrb[6].mxu0  ;;  %v10674_v12 = vadd.f32 %v10658_v24, %v10618_v10  ;;  %v10620_v19 = vpop.f32.mrb[6].mxu1  ;;  %v16439_v8 = vld [vmem:[#allocation7 + $0x724] ss:$16 sps:$4 sm:$0xff]   ;;  %v16440_v10 = vld [vmem:[#allocation7 + $0x728] ss:$16 sps:$4 sm:$0xff]  }
 0x6fb   :  { %v10679_v18 = vadd.f32 %v10646_v4, %v10276_v50  ;;  %v10278_v20 = vpop.f32.mrb[7].mxu0  ;;  %v10681_v48 = vadd.f32 %v10654_v5, %v10620_v19  ;;  %v10622_v37 = vpop.f32.mrb[7].mxu1  ;;  %v10687_v61 = vmax.f32 %v10671_v7, 0.0  ;;  %v10689_v25 = vmax.f32 %v10673_v11, 0.0  ;;  %v16430_v4 = vld [vmem:[#allocation7 + $0x6ec] ss:$16 sps:$4 sm:$0xff]  }
 0x6fc   :  { %v10680_v32 = vadd.f32 %v10650_v15, %v10278_v20  ;;  %v10682_v23 = vadd.f32 %v10658_v24, %v10622_v37  ;;  %v10688_v26 = vmax.f32 %v10672_v9, 0.0  ;;  %v10690_v31 = vmax.f32 %v10674_v12, 0.0  ;;  %v16425_v5 = vld [vmem:[#allocation7 + $0x6e0] ss:$16 sps:$4 sm:$0xff]   ;;  %v16428_v15 = vld [vmem:[#allocation7 + $0x6e8] ss:$16 sps:$4 sm:$0xff]  }
 0x6fd   :  { %v10695_v60 = vmax.f32 %v10679_v18, 0.0  ;;  %v10697_v28 = vmax.f32 %v10681_v48, 0.0  ;;  %v16433_v24 = vld [vmem:[#allocation7 + $0x704] ss:$16 sps:$4 sm:$0xff]   ;;  %v16431_v7 = vld [vmem:[#allocation7 + $0x700] ss:$16 sps:$4 sm:$0xff]  }
 0x6fe   :  { %v10696_v58 = vmax.f32 %v10680_v32, 0.0  ;;  %v10698_v35 = vmax.f32 %v10682_v23, 0.0  ;;  %v16442_v11 = vld [vmem:[#allocation7 + $0x72c] ss:$16 sps:$4 sm:$0xff]   ;;  %v16437_v9 = vld [vmem:[#allocation7 + $0x720] ss:$16 sps:$4 sm:$0xff]  }
 0x6ff   :  { %v10703_v34 = vpack.c.bf16 %v10695_v60, %v10687_v61  ;;  %v17412_v36 = vpack.c.bf16 %v10697_v28, %v10689_v25  ;;  %v16445_v50 = vld [vmem:[#allocation7 + $0x744] ss:$16 sps:$4 sm:$0xff]   ;;  %v16448_v12 = vld [vmem:[#allocation7 + $0x74c] ss:$16 sps:$4 sm:$0xff]   ;;  %v16443_v18 = vld [vmem:[#allocation7 + $0x740] ss:$16 sps:$4 sm:$0xff]  }
 0x700   :  { %v10704_v46 = vpack.c.bf16 %v10696_v58, %v10688_v26  ;;  %v10706_v39 = vpack.c.bf16 %v10698_v35, %v10690_v31  ;;  %v16446_v19 = vld [vmem:[#allocation7 + $0x748] ss:$16 sps:$4 sm:$0xff]   ;;  %v16451_v20 = vld [vmem:[#allocation7 + $0x764] ss:$16 sps:$4 sm:$0xff]   ;;  %v16454_v48 = vld [vmem:[#allocation7 + $0x76c] ss:$16 sps:$4 sm:$0xff]  }
 0x701   :  { %v16449_v32 = vld [vmem:[#allocation7 + $0x760] ss:$16 sps:$4 sm:$0xff]   ;;  %v16452_v37 = vld [vmem:[#allocation7 + $0x768] ss:$16 sps:$4 sm:$0xff]   ;;  %v16457_v61 = vld [vmem:[#allocation7 + $0x784] ss:$16 sps:$4 sm:$0xff]  }
 0x702   :  { %12383 = vmatprep.mubr.bf16.mxu0 %v10704_v46  ;;  %12555 = vmatprep.mubr.bf16.mxu1 %v10704_v46  ;;  %v16460_v60 = vld [vmem:[#allocation7 + $0x78c] ss:$16 sps:$4 sm:$0xff]   ;;  %v16455_v23 = vld [vmem:[#allocation7 + $0x780] ss:$16 sps:$4 sm:$0xff]   ;;  %v16458_v25 = vld [vmem:[#allocation7 + $0x788] ss:$16 sps:$4 sm:$0xff]  }
 0x703   :  { %12384 = vmatmul.mubr.bf16.vlgmr.msra.gmra.mrb[8].mxu0 %v10703_v34  ;;  %12556 = vmatmul.mubr.bf16.vlgmr.msra.gmra.mrb[8].mxu1 %v10703_v34  ;;  %v16463_v26 = vld [vmem:[#allocation7 + $0x7a4] ss:$16 sps:$4 sm:$0xff]   ;;  %v16466_v28 = vld [vmem:[#allocation7 + $0x7ac] ss:$16 sps:$4 sm:$0xff]   ;;  %v16461_v58 = vld [vmem:[#allocation7 + $0x7a0] ss:$16 sps:$4 sm:$0xff]  }
 0x704   :  { %12395 = vmatpush1.bf16.msra.mxu0 %v16383_v30  ;;  %12567 = vmatpush1.bf16.msra.mxu1 %v16386_v22  ;;  %v16464_v31 = vld [vmem:[#allocation7 + $0x7a8] ss:$16 sps:$4 sm:$0xff]   ;;  %v16469_v34 = vld [vmem:[#allocation7 + $0x7c4] ss:$16 sps:$4 sm:$0xff]   ;;  %v16472_v35 = vld [vmem:[#allocation7 + $0x7cc] ss:$16 sps:$4 sm:$0xff]  }
 0x705   :  { %12426 = vmatprep.mubr.bf16.mxu0 %v10706_v39  ;;  %12598 = vmatprep.mubr.bf16.mxu1 %v10706_v39  ;;  %v16467_v46 = vld [vmem:[#allocation7 + $0x7c0] ss:$16 sps:$4 sm:$0xff]   ;;  %v16470_v30 = vld [vmem:[#allocation7 + $0x7c8] ss:$16 sps:$4 sm:$0xff]   ;;  %v16475_v22 = vld [vmem:[#allocation7 + $0x7e4] ss:$16 sps:$4 sm:$0xff]  }
 0x706   :  { %12396 = vmatprep.subr.bf16.mxu0 %v16391_v2  ;;  %12568 = vmatprep.subr.bf16.mxu1 %v16394_v54  ;;  %v16478_v39 = vld [vmem:[#allocation7 + $0x7ec] ss:$16 sps:$4 sm:$0xff]   ;;  %v16473_v2 = vld [vmem:[#allocation7 + $0x7e0] ss:$16 sps:$4 sm:$0xff]   ;;  %v16476_v54 = vld [vmem:[#allocation7 + $0x7e8] ss:$16 sps:$4 sm:$0xff]  }
 0x708   :  { %12397 = vmatpush1.bf16.msra.mxu0 %v16389_v40  ;;  %12569 = vmatpush1.bf16.msra.mxu1 %v16392_v41  ;;  %v16481_v40 = vld [vmem:[#allocation10 + $0x4] ss:$16 sps:$4 sm:$0xff]   ;;  %v16484_v41 = vld [vmem:[#allocation10 + $0xc] ss:$16 sps:$4 sm:$0xff]  }
 0x709   :  { %12398 = vmatprep.subr.bf16.mxu0 %v16397_v43  ;;  %12570 = vmatprep.subr.bf16.mxu1 %v16400_v47  ;;  %v16479_v43 = vld [vmem:[#allocation10] ss:$16 sps:$4 sm:$0xff]   ;;  %v16482_v47 = vld [vmem:[#allocation10 + $0x8] ss:$16 sps:$4 sm:$0xff]  }
 0x70c   :  { %12399 = vmatpush1.bf16.msra.mxu0 %v16395_v49  ;;  %12571 = vmatpush1.bf16.msra.mxu1 %v16398_v53  ;;  %v16487_v49 = vld [vmem:[#allocation10 + $0x24] ss:$16 sps:$4 sm:$0xff]   ;;  %v16490_v53 = vld [vmem:[#allocation10 + $0x2c] ss:$16 sps:$4 sm:$0xff]  }
 0x70d   :  { %12400 = vmatprep.subr.bf16.mxu0 %v16403_v38  ;;  %12572 = vmatprep.subr.bf16.mxu1 %v16406_v21  ;;  %v16485_v38 = vld [vmem:[#allocation10 + $0x20] ss:$16 sps:$4 sm:$0xff]   ;;  %v16488_v21 = vld [vmem:[#allocation10 + $0x28] ss:$16 sps:$4 sm:$0xff]  }
 0x710   :  { %12401 = vmatpush1.bf16.msra.mxu0 %v16401_v51  ;;  %12573 = vmatpush1.bf16.msra.mxu1 %v16404_v56  ;;  %v16493_v51 = vld [vmem:[#allocation10 + $0x44] ss:$16 sps:$4 sm:$0xff]   ;;  %v16496_v56 = vld [vmem:[#allocation10 + $0x4c] ss:$16 sps:$4 sm:$0xff]  }
 0x711   :  { %12402 = vmatprep.subr.bf16.mxu0 %v16409_v44  ;;  %12574 = vmatprep.subr.bf16.mxu1 %v16412_v17  ;;  %v16491_v44 = vld [vmem:[#allocation10 + $0x40] ss:$16 sps:$4 sm:$0xff]   ;;  %v16494_v17 = vld [vmem:[#allocation10 + $0x48] ss:$16 sps:$4 sm:$0xff]  }
 0x714   :  { %12403 = vmatpush1.bf16.msra.mxu0 %v16407_v0  ;;  %12575 = vmatpush1.bf16.msra.mxu1 %v16410_v14  ;;  %v16499_v0 = vld [vmem:[#allocation10 + $0x64] ss:$16 sps:$4 sm:$0xff]   ;;  %v16502_v14 = vld [vmem:[#allocation10 + $0x6c] ss:$16 sps:$4 sm:$0xff]  }
 0x715   :  { %12404 = vmatprep.subr.bf16.mxu0 %v16415_v55  ;;  %12576 = vmatprep.subr.bf16.mxu1 %v16418_v59  ;;  %v16497_v55 = vld [vmem:[#allocation10 + $0x60] ss:$16 sps:$4 sm:$0xff]   ;;  %v16505_v59 = vld [vmem:[#allocation10 + $0x84] ss:$16 sps:$4 sm:$0xff]  }
 0x718   :  { %12405 = vmatpush1.bf16.msra.mxu0 %v16413_v62  ;;  %12577 = vmatpush1.bf16.msra.mxu1 %v16416_v63  ;;  %v16508_v62 = vld [vmem:[#allocation10 + $0x8c] ss:$16 sps:$4 sm:$0xff]   ;;  %v16503_v63 = vld [vmem:[#allocation10 + $0x80] ss:$16 sps:$4 sm:$0xff]  }
 0x719   :  { %12406 = vmatprep.subr.bf16.mxu0 %v16421_v13  ;;  %12578 = vmatprep.subr.bf16.mxu1 %v16424_v45  ;;  %v16506_v13 = vld [vmem:[#allocation10 + $0x88] ss:$16 sps:$4 sm:$0xff]   ;;  %v16511_v45 = vld [vmem:[#allocation10 + $0xa4] ss:$16 sps:$4 sm:$0xff]  }
 0x71c   :  { %12407 = vmatpush1.bf16.msra.mxu0 %v16419_v1  ;;  %12579 = vmatpush1.bf16.msra.mxu1 %v16422_v3  ;;  %v16514_v1 = vld [vmem:[#allocation10 + $0xac] ss:$16 sps:$4 sm:$0xff]   ;;  %v16509_v3 = vld [vmem:[#allocation10 + $0xa0] ss:$16 sps:$4 sm:$0xff]  }
 0x71d   :  { %12408 = vmatprep.subr.bf16.mxu0 %v16427_v42  ;;  %12580 = vmatprep.subr.bf16.mxu1 %v16430_v4  ;;  %v16512_v42 = vld [vmem:[#allocation10 + $0xa8] ss:$16 sps:$4 sm:$0xff]   ;;  %v16517_v4 = vld [vmem:[#allocation10 + $0xc4] ss:$16 sps:$4 sm:$0xff]  }
 0x720   :  { %12409 = vmatpush1.bf16.msra.mxu0 %v16425_v5  ;;  %12581 = vmatpush1.bf16.msra.mxu1 %v16428_v15  ;;  %v16520_v5 = vld [vmem:[#allocation10 + $0xcc] ss:$16 sps:$4 sm:$0xff]   ;;  %v16515_v15 = vld [vmem:[#allocation10 + $0xc0] ss:$16 sps:$4 sm:$0xff]  }
 0x721   :  { %12410 = vmatprep.subr.bf16.mxu0 %v16433_v24  ;;  %12582 = vmatprep.subr.bf16.mxu1 %v16436_v6  ;;  %v16518_v24 = vld [vmem:[#allocation10 + $0xc8] ss:$16 sps:$4 sm:$0xff]   ;;  %v16523_v6 = vld [vmem:[#allocation10 + $0xe4] ss:$16 sps:$4 sm:$0xff]  }
 0x724   :  { %12411 = vmatpush1.bf16.msra.mxu0 %v16431_v7  ;;  %12583 = vmatpush1.bf16.msra.mxu1 %v16434_v29  ;;  %v16526_v7 = vld [vmem:[#allocation10 + $0xec] ss:$16 sps:$4 sm:$0xff]   ;;  %v16521_v29 = vld [vmem:[#allocation10 + $0xe0] ss:$16 sps:$4 sm:$0xff]  }
 0x725   :  { %12412 = vmatprep.subr.bf16.mxu0 %v16439_v8  ;;  %12584 = vmatprep.subr.bf16.mxu1 %v16442_v11  ;;  %v16524_v8 = vld [vmem:[#allocation10 + $0xe8] ss:$16 sps:$4 sm:$0xff]   ;;  %v16529_v11 = vld [vmem:[#allocation10 + $0x104] ss:$16 sps:$4 sm:$0xff]  }
 0x728   :  { %12413 = vmatpush1.bf16.msra.mxu0 %v16437_v9  ;;  %12585 = vmatpush1.bf16.msra.mxu1 %v16440_v10  ;;  %v16532_v9 = vld [vmem:[#allocation10 + $0x10c] ss:$16 sps:$4 sm:$0xff]   ;;  %v16527_v10 = vld [vmem:[#allocation10 + $0x100] ss:$16 sps:$4 sm:$0xff]  }
 0x729   :  { %12414 = vmatprep.subr.bf16.mxu0 %v16445_v50  ;;  %12586 = vmatprep.subr.bf16.mxu1 %v16448_v12  ;;  %v16530_v50 = vld [vmem:[#allocation10 + $0x108] ss:$16 sps:$4 sm:$0xff]   ;;  %v16535_v12 = vld [vmem:[#allocation10 + $0x124] ss:$16 sps:$4 sm:$0xff]  }
 0x72c   :  { %12415 = vmatpush1.bf16.msra.mxu0 %v16443_v18  ;;  %12587 = vmatpush1.bf16.msra.mxu1 %v16446_v19  ;;  %v16538_v18 = vld [vmem:[#allocation10 + $0x12c] ss:$16 sps:$4 sm:$0xff]   ;;  %v16533_v19 = vld [vmem:[#allocation10 + $0x120] ss:$16 sps:$4 sm:$0xff]  }
 0x72d   :  { %12416 = vmatprep.subr.bf16.mxu0 %v16451_v20  ;;  %12588 = vmatprep.subr.bf16.mxu1 %v16454_v48  ;;  %v16536_v20 = vld [vmem:[#allocation10 + $0x128] ss:$16 sps:$4 sm:$0xff]   ;;  %v16541_v48 = vld [vmem:[#allocation10 + $0x144] ss:$16 sps:$4 sm:$0xff]  }
 0x730   :  { %12417 = vmatpush1.bf16.msra.mxu0 %v16449_v32  ;;  %12589 = vmatpush1.bf16.msra.mxu1 %v16452_v37  ;;  %v16544_v32 = vld [vmem:[#allocation10 + $0x14c] ss:$16 sps:$4 sm:$0xff]   ;;  %v16539_v37 = vld [vmem:[#allocation10 + $0x140] ss:$16 sps:$4 sm:$0xff]  }
 0x731   :  { %12418 = vmatprep.subr.bf16.mxu0 %v16457_v61  ;;  %12590 = vmatprep.subr.bf16.mxu1 %v16460_v60  ;;  %v16542_v61 = vld [vmem:[#allocation10 + $0x148] ss:$16 sps:$4 sm:$0xff]   ;;  %v16547_v60 = vld [vmem:[#allocation10 + $0x164] ss:$16 sps:$4 sm:$0xff]  }
 0x734   :  { %12419 = vmatpush1.bf16.msra.mxu0 %v16455_v23  ;;  %12591 = vmatpush1.bf16.msra.mxu1 %v16458_v25  ;;  %v16550_v23 = vld [vmem:[#allocation10 + $0x16c] ss:$16 sps:$4 sm:$0xff]   ;;  %v16545_v25 = vld [vmem:[#allocation10 + $0x160] ss:$16 sps:$4 sm:$0xff]  }
 0x735   :  { %12420 = vmatprep.subr.bf16.mxu0 %v16463_v26  ;;  %12592 = vmatprep.subr.bf16.mxu1 %v16466_v28  ;;  %v16548_v26 = vld [vmem:[#allocation10 + $0x168] ss:$16 sps:$4 sm:$0xff]   ;;  %v16553_v28 = vld [vmem:[#allocation10 + $0x184] ss:$16 sps:$4 sm:$0xff]  }
 0x738   :  { %12421 = vmatpush1.bf16.msra.mxu0 %v16461_v58  ;;  %12593 = vmatpush1.bf16.msra.mxu1 %v16464_v31  ;;  %v16556_v58 = vld [vmem:[#allocation10 + $0x18c] ss:$16 sps:$4 sm:$0xff]   ;;  %v16551_v31 = vld [vmem:[#allocation10 + $0x180] ss:$16 sps:$4 sm:$0xff]  }
 0x739   :  { %12422 = vmatprep.subr.bf16.mxu0 %v16469_v34  ;;  %12594 = vmatprep.subr.bf16.mxu1 %v16472_v35  ;;  %v16554_v34 = vld [vmem:[#allocation10 + $0x188] ss:$16 sps:$4 sm:$0xff]   ;;  %v16559_v35 = vld [vmem:[#allocation10 + $0x1a4] ss:$16 sps:$4 sm:$0xff]  }
 0x73c   :  { %12423 = vmatpush1.bf16.msra.mxu0 %v16467_v46  ;;  %12595 = vmatpush1.bf16.msra.mxu1 %v16470_v30  ;;  %v16562_v46 = vld [vmem:[#allocation10 + $0x1ac] ss:$16 sps:$4 sm:$0xff]   ;;  %v16557_v30 = vld [vmem:[#allocation10 + $0x1a0] ss:$16 sps:$4 sm:$0xff]  }
 0x73d   :  { %12424 = vmatprep.subr.bf16.mxu0 %v16475_v22  ;;  %12596 = vmatprep.subr.bf16.mxu1 %v16478_v39  ;;  %v16560_v22 = vld [vmem:[#allocation10 + $0x1a8] ss:$16 sps:$4 sm:$0xff]   ;;  %v16565_v39 = vld [vmem:[#allocation10 + $0x1c4] ss:$16 sps:$4 sm:$0xff]  }
 0x740   :  { %12425 = vmatpush1.bf16.msra.mxu0 %v16473_v2  ;;  %12597 = vmatpush1.bf16.msra.mxu1 %v16476_v54  ;;  %v16568_v2 = vld [vmem:[#allocation10 + $0x1cc] ss:$16 sps:$4 sm:$0xff]   ;;  %v16563_v54 = vld [vmem:[#allocation10 + $0x1c0] ss:$16 sps:$4 sm:$0xff]  }
 0x741   :  { %13411 = vmatprep.subr.bf16.mxu0 %v16481_v40  ;;  %13497 = vmatprep.subr.bf16.mxu1 %v16484_v41  ;;  %v16566_v40 = vld [vmem:[#allocation10 + $0x1c8] ss:$16 sps:$4 sm:$0xff]   ;;  %v16571_v41 = vld [vmem:[#allocation10 + $0x1e4] ss:$16 sps:$4 sm:$0xff]  }
 0x743   :  { %12427 = vmatmul.mubr.bf16.vlgmr.msra.gmra.mrb[8].mxu0 %v17412_v36  ;;  %12599 = vmatmul.mubr.bf16.vlgmr.msra.gmra.mrb[8].mxu1 %v17412_v36  ;;  %v16500_v36 = vld [vmem:[#allocation10 + $0x68] ss:$16 sps:$4 sm:$0xff]  }
 0x744   :  { %13412 = vmatpush1.bf16.msra.mxu0 %v16479_v43  ;;  %13498 = vmatpush1.bf16.msra.mxu1 %v16482_v47  ;;  %v16574_v43 = vld [vmem:[#allocation10 + $0x1ec] ss:$16 sps:$4 sm:$0xff]   ;;  %v16569_v47 = vld [vmem:[#allocation10 + $0x1e0] ss:$16 sps:$4 sm:$0xff]  }
 0x745   :  { %13413 = vmatprep.subr.bf16.mxu0 %v16487_v49  ;;  %13499 = vmatprep.subr.bf16.mxu1 %v16490_v53  ;;  %v16572_v49 = vld [vmem:[#allocation10 + $0x1e8] ss:$16 sps:$4 sm:$0xff]   ;;  %v16577_v53 = vld [vmem:[#allocation10 + $0x204] ss:$16 sps:$4 sm:$0xff]  }
 0x748   :  { %13414 = vmatpush1.bf16.msra.mxu0 %v16485_v38  ;;  %13500 = vmatpush1.bf16.msra.mxu1 %v16488_v21  ;;  %v16580_v38 = vld [vmem:[#allocation10 + $0x20c] ss:$16 sps:$4 sm:$0xff]  }
 0x749   :  { %13415 = vmatprep.subr.bf16.mxu0 %v16493_v51  ;;  %13501 = vmatprep.subr.bf16.mxu1 %v16496_v56  ;;  %v10963_v21 = vld [vmem:[#allocation9] sm:$0xf] }
 0x74a   :  { %v10968_v51 = vrot.slane %v10963_v21, %v17359_v33  ;;  %v10976_v56 = vrot.slane %v10963_v21, %v17362_v57 }
 0x74c   :  { %13416 = vmatpush1.bf16.msra.mxu0 %v16491_v44  ;;  %13502 = vmatpush1.bf16.msra.mxu1 %v16494_v17  ;;  %v10972_v44 = vrot.slane %v10963_v21, %v17365_v16  ;;  %v10980_v17 = vrot.slane %v10963_v21, %v17368_v52  ;;  %v16619_v21 = vld [vmem:[#allocation10 + $0x2e4] ss:$16 sps:$4 sm:$0xff]  }
 0x74d   :  { %13417 = vmatprep.subr.bf16.mxu0 %v16499_v0  ;;  %13503 = vmatprep.subr.bf16.mxu1 %v16502_v14 }
 0x750   :  { %13418 = vmatpush1.bf16.msra.mxu0 %v16497_v55  ;;  %13504 = vmatpush1.bf16.msra.mxu1 %v16500_v36 }
 0x751   :  { %13419 = vmatprep.subr.bf16.mxu0 %v16505_v59  ;;  %13505 = vmatprep.subr.bf16.mxu1 %v16508_v62 }
 0x754   :  { %13420 = vmatpush1.bf16.msra.mxu0 %v16503_v63  ;;  %13506 = vmatpush1.bf16.msra.mxu1 %v16506_v13 }
 0x755   :  { %13421 = vmatprep.subr.bf16.mxu0 %v16511_v45  ;;  %13507 = vmatprep.subr.bf16.mxu1 %v16514_v1 }
 0x758   :  { %13422 = vmatpush1.bf16.msra.mxu0 %v16509_v3  ;;  %13508 = vmatpush1.bf16.msra.mxu1 %v16512_v42 }
 0x759   :  { %13423 = vmatprep.subr.bf16.mxu0 %v16517_v4  ;;  %13509 = vmatprep.subr.bf16.mxu1 %v16520_v5 }
 0x75c   :  { %13424 = vmatpush1.bf16.msra.mxu0 %v16515_v15  ;;  %13510 = vmatpush1.bf16.msra.mxu1 %v16518_v24 }
 0x75d   :  { %13425 = vmatprep.subr.bf16.mxu0 %v16523_v6  ;;  %13511 = vmatprep.subr.bf16.mxu1 %v16526_v7 }
 0x760   :  { %13426 = vmatpush1.bf16.msra.mxu0 %v16521_v29  ;;  %13512 = vmatpush1.bf16.msra.mxu1 %v16524_v8 }
 0x761   :  { %13427 = vmatprep.subr.bf16.mxu0 %v16529_v11  ;;  %13513 = vmatprep.subr.bf16.mxu1 %v16532_v9 }
 0x764   :  { %13428 = vmatpush1.bf16.msra.mxu0 %v16527_v10  ;;  %13514 = vmatpush1.bf16.msra.mxu1 %v16530_v50 }
 0x765   :  { %13429 = vmatprep.subr.bf16.mxu0 %v16535_v12  ;;  %13515 = vmatprep.subr.bf16.mxu1 %v16538_v18 }
 0x768   :  { %13430 = vmatpush1.bf16.msra.mxu0 %v16533_v19  ;;  %13516 = vmatpush1.bf16.msra.mxu1 %v16536_v20 }
 0x769   :  { %13431 = vmatprep.subr.bf16.mxu0 %v16541_v48  ;;  %13517 = vmatprep.subr.bf16.mxu1 %v16544_v32  ;;  %v16575_v48 = vld [vmem:[#allocation10 + $0x200] ss:$16 sps:$4 sm:$0xff]   ;;  %v16578_v32 = vld [vmem:[#allocation10 + $0x208] ss:$16 sps:$4 sm:$0xff]  }
 0x76c   :  { %13432 = vmatpush1.bf16.msra.mxu0 %v16539_v37  ;;  %13518 = vmatpush1.bf16.msra.mxu1 %v16542_v61  ;;  %v16583_v37 = vld [vmem:[#allocation10 + $0x224] ss:$16 sps:$4 sm:$0xff]   ;;  %v16586_v61 = vld [vmem:[#allocation10 + $0x22c] ss:$16 sps:$4 sm:$0xff]  }
 0x76d   :  { %13433 = vmatprep.subr.bf16.mxu0 %v16547_v60  ;;  %13519 = vmatprep.subr.bf16.mxu1 %v16550_v23  ;;  %v16581_v60 = vld [vmem:[#allocation10 + $0x220] ss:$16 sps:$4 sm:$0xff]   ;;  %v16584_v23 = vld [vmem:[#allocation10 + $0x228] ss:$16 sps:$4 sm:$0xff]  }
 0x770   :  { %13434 = vmatpush1.bf16.msra.mxu0 %v16545_v25  ;;  %13520 = vmatpush1.bf16.msra.mxu1 %v16548_v26  ;;  %v16589_v25 = vld [vmem:[#allocation10 + $0x244] ss:$16 sps:$4 sm:$0xff]   ;;  %v16592_v26 = vld [vmem:[#allocation10 + $0x24c] ss:$16 sps:$4 sm:$0xff]  }
 0x771   :  { %13435 = vmatprep.subr.bf16.mxu0 %v16553_v28  ;;  %13521 = vmatprep.subr.bf16.mxu1 %v16556_v58  ;;  %v16587_v28 = vld [vmem:[#allocation10 + $0x240] ss:$16 sps:$4 sm:$0xff]   ;;  %v16590_v58 = vld [vmem:[#allocation10 + $0x248] ss:$16 sps:$4 sm:$0xff]  }
 0x774   :  { %13436 = vmatpush1.bf16.msra.mxu0 %v16551_v31  ;;  %13522 = vmatpush1.bf16.msra.mxu1 %v16554_v34  ;;  %v16595_v31 = vld [vmem:[#allocation10 + $0x264] ss:$16 sps:$4 sm:$0xff]   ;;  %v16598_v34 = vld [vmem:[#allocation10 + $0x26c] ss:$16 sps:$4 sm:$0xff]  }
 0x775   :  { %13437 = vmatprep.subr.bf16.mxu0 %v16559_v35  ;;  %13523 = vmatprep.subr.bf16.mxu1 %v16562_v46  ;;  %v16593_v35 = vld [vmem:[#allocation10 + $0x260] ss:$16 sps:$4 sm:$0xff]   ;;  %v16596_v46 = vld [vmem:[#allocation10 + $0x268] ss:$16 sps:$4 sm:$0xff]  }
 0x778   :  { %13438 = vmatpush1.bf16.msra.mxu0 %v16557_v30  ;;  %13524 = vmatpush1.bf16.msra.mxu1 %v16560_v22  ;;  %v16601_v30 = vld [vmem:[#allocation10 + $0x284] ss:$16 sps:$4 sm:$0xff]   ;;  %v16604_v22 = vld [vmem:[#allocation10 + $0x28c] ss:$16 sps:$4 sm:$0xff]  }
 0x779   :  { %13439 = vmatprep.subr.bf16.mxu0 %v16565_v39  ;;  %13525 = vmatprep.subr.bf16.mxu1 %v16568_v2  ;;  %v16599_v39 = vld [vmem:[#allocation10 + $0x280] ss:$16 sps:$4 sm:$0xff]   ;;  %v16602_v2 = vld [vmem:[#allocation10 + $0x288] ss:$16 sps:$4 sm:$0xff]  }
 0x77c   :  { %13440 = vmatpush1.bf16.msra.mxu0 %v16563_v54  ;;  %13526 = vmatpush1.bf16.msra.mxu1 %v16566_v40  ;;  %v16607_v54 = vld [vmem:[#allocation10 + $0x2a4] ss:$16 sps:$4 sm:$0xff]   ;;  %v16610_v40 = vld [vmem:[#allocation10 + $0x2ac] ss:$16 sps:$4 sm:$0xff]  }
 0x77d   :  { %13441 = vmatprep.subr.bf16.mxu0 %v16571_v41  ;;  %13527 = vmatprep.subr.bf16.mxu1 %v16574_v43  ;;  %v16605_v41 = vld [vmem:[#allocation10 + $0x2a0] ss:$16 sps:$4 sm:$0xff]   ;;  %v16608_v43 = vld [vmem:[#allocation10 + $0x2a8] ss:$16 sps:$4 sm:$0xff]  }
 0x780   :  { %13442 = vmatpush1.bf16.msra.mxu0 %v16569_v47  ;;  %13528 = vmatpush1.bf16.msra.mxu1 %v16572_v49  ;;  %v16613_v47 = vld [vmem:[#allocation10 + $0x2c4] ss:$16 sps:$4 sm:$0xff]   ;;  %v16616_v49 = vld [vmem:[#allocation10 + $0x2cc] ss:$16 sps:$4 sm:$0xff]  }
 0x781   :  { %13454 = vmatprep.subr.bf16.mxu0 %v16577_v53  ;;  %13540 = vmatprep.subr.bf16.mxu1 %v16580_v38  ;;  %v16611_v53 = vld [vmem:[#allocation10 + $0x2c0] ss:$16 sps:$4 sm:$0xff]   ;;  %v16614_v38 = vld [vmem:[#allocation10 + $0x2c8] ss:$16 sps:$4 sm:$0xff]  }
 0x816   :  { %v12428_v0 = vpop.f32.mrb[8].mxu0  ;;  %v12600_v14 = vpop.f32.mrb[8].mxu1 }
 0x817   :  { %v15863_v55 = vadd.f32 %v12428_v0, %v10968_v51  ;;  %v15867_v36 = vadd.f32 %v12600_v14, %v10976_v56  ;;  %v12430_v59 = vpop.f32.mrb[9].mxu0  ;;  %v12602_v62 = vpop.f32.mrb[9].mxu1  ;;  %v16628_v0 = vld [vmem:[#allocation10 + $0x30c] ss:$16 sps:$4 sm:$0xff]   ;;  %v16623_v14 = vld [vmem:[#allocation10 + $0x300] ss:$16 sps:$4 sm:$0xff]  }
 0x818   :  { %v15864_v63 = vadd.f32 %v12430_v59, %v10972_v44  ;;  %v15868_v13 = vadd.f32 %v12602_v62, %v10980_v17  ;;  %v12432_v45 = vpop.f32.mrb[10].mxu0  ;;  %v12604_v1 = vpop.f32.mrb[10].mxu1  ;;  %v16634_v59 = vld [vmem:[#allocation10 + $0x32c] ss:$16 sps:$4 sm:$0xff]   ;;  %v16629_v62 = vld [vmem:[#allocation10 + $0x320] ss:$16 sps:$4 sm:$0xff]  }
 0x819   :  { %v15865_v3 = vadd.f32 %v12432_v45, %v10968_v51  ;;  %v15869_v42 = vadd.f32 %v12604_v1, %v10976_v56  ;;  %v12434_v4 = vpop.f32.mrb[11].mxu0  ;;  %v12606_v5 = vpop.f32.mrb[11].mxu1  ;;  %v12609_v6 = vmax.f32 %v15863_v55, 0.0  ;;  %v12611_v7 = vmax.f32 %v15867_v36, 0.0  ;;  %v16622_v51 = vld [vmem:[#allocation10 + $0x2ec] ss:$16 sps:$4 sm:$0xff]  }
 0x81a   :  { %v15866_v15 = vadd.f32 %v12434_v4, %v10972_v44  ;;  %v15870_v24 = vadd.f32 %v12606_v5, %v10980_v17  ;;  %v12610_v11 = vmax.f32 %v15864_v63, 0.0  ;;  %v12612_v9 = vmax.f32 %v15868_v13, 0.0  ;;  %v16617_v56 = vld [vmem:[#allocation10 + $0x2e0] ss:$16 sps:$4 sm:$0xff]   ;;  %v16620_v44 = vld [vmem:[#allocation10 + $0x2e8] ss:$16 sps:$4 sm:$0xff]  }
 0x81b   :  { %v12613_v29 = vmax.f32 %v15865_v3, 0.0  ;;  %v12615_v8 = vmax.f32 %v15869_v42, 0.0  ;;  %v16625_v17 = vld [vmem:[#allocation10 + $0x304] ss:$16 sps:$4 sm:$0xff]   ;;  %v16626_v55 = vld [vmem:[#allocation10 + $0x308] ss:$16 sps:$4 sm:$0xff]  }
 0x81c   :  { %v12614_v10 = vmax.f32 %v15866_v15, 0.0  ;;  %v12616_v50 = vmax.f32 %v15870_v24, 0.0  ;;  %v16631_v36 = vld [vmem:[#allocation10 + $0x324] ss:$16 sps:$4 sm:$0xff]   ;;  %v16632_v63 = vld [vmem:[#allocation10 + $0x328] ss:$16 sps:$4 sm:$0xff]  }
 0x81d   :  { %v12617_v12 = vpack.c.bf16 %v12613_v29, %v12609_v6  ;;  %v17420_v18 = vpack.c.bf16 %v12615_v8, %v12611_v7  ;;  %v16637_v13 = vld [vmem:[#allocation10 + $0x344] ss:$16 sps:$4 sm:$0xff]   ;;  %v16640_v45 = vld [vmem:[#allocation10 + $0x34c] ss:$16 sps:$4 sm:$0xff]   ;;  %v16635_v1 = vld [vmem:[#allocation10 + $0x340] ss:$16 sps:$4 sm:$0xff]  }
 0x81e   :  { %v12618_v19 = vpack.c.bf16 %v12614_v10, %v12610_v11  ;;  %v12620_v20 = vpack.c.bf16 %v12616_v50, %v12612_v9  ;;  %v16638_v3 = vld [vmem:[#allocation10 + $0x348] ss:$16 sps:$4 sm:$0xff]   ;;  %v16643_v42 = vld [vmem:[#allocation10 + $0x364] ss:$16 sps:$4 sm:$0xff]   ;;  %v16646_v4 = vld [vmem:[#allocation10 + $0x36c] ss:$16 sps:$4 sm:$0xff]  }
 0x81f   :  { %v16641_v5 = vld [vmem:[#allocation10 + $0x360] ss:$16 sps:$4 sm:$0xff]   ;;  %v16644_v15 = vld [vmem:[#allocation10 + $0x368] ss:$16 sps:$4 sm:$0xff]   ;;  %v16649_v24 = vld [vmem:[#allocation10 + $0x384] ss:$16 sps:$4 sm:$0xff]  }
 0x820   :  { %13443 = vmatprep.mubr.bf16.mxu0 %v12618_v19  ;;  %13529 = vmatprep.mubr.bf16.mxu1 %v12618_v19  ;;  %v16652_v6 = vld [vmem:[#allocation10 + $0x38c] ss:$16 sps:$4 sm:$0xff]   ;;  %v16647_v7 = vld [vmem:[#allocation10 + $0x380] ss:$16 sps:$4 sm:$0xff]   ;;  %v16650_v29 = vld [vmem:[#allocation10 + $0x388] ss:$16 sps:$4 sm:$0xff]  }
 0x821   :  { %13444 = vmatmul.mubr.bf16.vlgmr.msra.gmra.mrb[12].mxu0 %v12617_v12  ;;  %13530 = vmatmul.mubr.bf16.vlgmr.msra.gmra.mrb[12].mxu1 %v12617_v12  ;;  %v16655_v8 = vld [vmem:[#allocation10 + $0x3a4] ss:$16 sps:$4 sm:$0xff]   ;;  %v16658_v11 = vld [vmem:[#allocation10 + $0x3ac] ss:$16 sps:$4 sm:$0xff]   ;;  %v16653_v9 = vld [vmem:[#allocation10 + $0x3a0] ss:$16 sps:$4 sm:$0xff]  }
 0x822   :  { %13455 = vmatpush1.bf16.msra.mxu0 %v16575_v48  ;;  %13541 = vmatpush1.bf16.msra.mxu1 %v16578_v32  ;;  %v16656_v10 = vld [vmem:[#allocation10 + $0x3a8] ss:$16 sps:$4 sm:$0xff]   ;;  %v16661_v50 = vld [vmem:[#allocation10 + $0x3c4] ss:$16 sps:$4 sm:$0xff]   ;;  %v16664_v12 = vld [vmem:[#allocation10 + $0x3cc] ss:$16 sps:$4 sm:$0xff]  }
 0x823   :  { %13486 = vmatprep.mubr.bf16.mxu0 %v12620_v20  ;;  %13572 = vmatprep.mubr.bf16.mxu1 %v12620_v20  ;;  %v16659_v19 = vld [vmem:[#allocation10 + $0x3c0] ss:$16 sps:$4 sm:$0xff]   ;;  %v16662_v20 = vld [vmem:[#allocation10 + $0x3c8] ss:$16 sps:$4 sm:$0xff]   ;;  %v16667_v48 = vld [vmem:[#allocation10 + $0x3e4] ss:$16 sps:$4 sm:$0xff]  }
 0x824   :  { %13456 = vmatprep.subr.bf16.mxu0 %v16583_v37  ;;  %13542 = vmatprep.subr.bf16.mxu1 %v16586_v61  ;;  %v16670_v32 = vld [vmem:[#allocation10 + $0x3ec] ss:$16 sps:$4 sm:$0xff]   ;;  %v16665_v37 = vld [vmem:[#allocation10 + $0x3e0] ss:$16 sps:$4 sm:$0xff]   ;;  %v16668_v61 = vld [vmem:[#allocation10 + $0x3e8] ss:$16 sps:$4 sm:$0xff]  }
 0x826   :  { %13457 = vmatpush1.bf16.msra.mxu0 %v16581_v60  ;;  %13543 = vmatpush1.bf16.msra.mxu1 %v16584_v23  ;;  %v16671_v60 = vld [vmem:[#allocation13 + $0x40] sm:$0xff]  }
 0x827   :  { %13458 = vmatprep.subr.bf16.mxu0 %v16589_v25  ;;  %13544 = vmatprep.subr.bf16.mxu1 %v16592_v26  ;;  %v16672_v23 = vld [vmem:[#allocation13 + $0xc0] sm:$0xff]  }
 0x828   :  { %v16673_v25 = vld [vmem:[#allocation13] sm:$0xff]  }
 0x829   :  { %v16674_v26 = vld [vmem:[#allocation13 + $0x80] sm:$0xff]  }
 0x82a   :  { %13459 = vmatpush1.bf16.msra.mxu0 %v16587_v28  ;;  %13545 = vmatpush1.bf16.msra.mxu1 %v16590_v58  ;;  %v16675_v28 = vld [vmem:[#allocation13 + $0x48] sm:$0xff]  }
 0x82b   :  { %13460 = vmatprep.subr.bf16.mxu0 %v16595_v31  ;;  %13546 = vmatprep.subr.bf16.mxu1 %v16598_v34  ;;  %v16676_v58 = vld [vmem:[#allocation13 + $0xc8] sm:$0xff]  }
 0x82c   :  { %v16677_v31 = vld [vmem:[#allocation13 + $0x8] sm:$0xff]  }
 0x82d   :  { %v16678_v34 = vld [vmem:[#allocation13 + $0x88] sm:$0xff]  }
 0x82e   :  { %13461 = vmatpush1.bf16.msra.mxu0 %v16593_v35  ;;  %13547 = vmatpush1.bf16.msra.mxu1 %v16596_v46  ;;  %v16679_v35 = vld [vmem:[#allocation13 + $0x50] sm:$0xff]  }
 0x82f   :  { %13462 = vmatprep.subr.bf16.mxu0 %v16601_v30  ;;  %13548 = vmatprep.subr.bf16.mxu1 %v16604_v22  ;;  %v16680_v46 = vld [vmem:[#allocation13 + $0xd0] sm:$0xff]  }
 0x830   :  { %v16681_v30 = vld [vmem:[#allocation13 + $0x10] sm:$0xff]  }
 0x831   :  { %v16682_v22 = vld [vmem:[#allocation13 + $0x90] sm:$0xff]  }
 0x832   :  { %13463 = vmatpush1.bf16.msra.mxu0 %v16599_v39  ;;  %13549 = vmatpush1.bf16.msra.mxu1 %v16602_v2  ;;  %v16683_v39 = vld [vmem:[#allocation13 + $0x58] sm:$0xff]  }
 0x833   :  { %13464 = vmatprep.subr.bf16.mxu0 %v16607_v54  ;;  %13550 = vmatprep.subr.bf16.mxu1 %v16610_v40  ;;  %v16684_v2 = vld [vmem:[#allocation13 + $0xd8] sm:$0xff]   ;;  %v16687_v40 = vld [vmem:[#allocation13 + $0x60] sm:$0xff]  }
 0x834   :  { %v16685_v54 = vld [vmem:[#allocation13 + $0x18] sm:$0xff]  }
 0x836   :  { %13465 = vmatpush1.bf16.msra.mxu0 %v16605_v41  ;;  %13551 = vmatpush1.bf16.msra.mxu1 %v16608_v43  ;;  %v16688_v41 = vld [vmem:[#allocation13 + $0xe0] sm:$0xff]  }
 0x837   :  { %13466 = vmatprep.subr.bf16.mxu0 %v16613_v47  ;;  %13552 = vmatprep.subr.bf16.mxu1 %v16616_v49  ;;  %v16689_v43 = vld [vmem:[#allocation13 + $0x20] sm:$0xff]   ;;  %v16691_v49 = vld [vmem:[#allocation13 + $0x68] sm:$0xff]  }
 0x838   :  { %v16690_v47 = vld [vmem:[#allocation13 + $0xa0] sm:$0xff]  }
 0x83a   :  { %13467 = vmatpush1.bf16.msra.mxu0 %v16611_v53  ;;  %13553 = vmatpush1.bf16.msra.mxu1 %v16614_v38  ;;  %v16692_v53 = vld [vmem:[#allocation13 + $0xe8] sm:$0xff]  }
 0x83b   :  { %13468 = vmatprep.subr.bf16.mxu0 %v16619_v21  ;;  %13554 = vmatprep.subr.bf16.mxu1 %v16622_v51  ;;  %v16693_v38 = vld [vmem:[#allocation13 + $0x28] sm:$0xff]   ;;  %v16695_v51 = vld [vmem:[#allocation13 + $0x70] sm:$0xff]  }
 0x83c   :  { %v16694_v21 = vld [vmem:[#allocation13 + $0xa8] sm:$0xff]  }
 0x83e   :  { %13469 = vmatpush1.bf16.msra.mxu0 %v16617_v56  ;;  %13555 = vmatpush1.bf16.msra.mxu1 %v16620_v44  ;;  %v16696_v56 = vld [vmem:[#allocation13 + $0xf0] sm:$0xff]  }
 0x83f   :  { %13470 = vmatprep.subr.bf16.mxu0 %v16625_v17  ;;  %13556 = vmatprep.subr.bf16.mxu1 %v16628_v0  ;;  %v16697_v44 = vld [vmem:[#allocation13 + $0x30] sm:$0xff]   ;;  %v16699_v0 = vld [vmem:[#allocation13 + $0x78] sm:$0xff]  }
 0x840   :  { %v16698_v17 = vld [vmem:[#allocation13 + $0xb0] sm:$0xff]  }
 0x842   :  { %13471 = vmatpush1.bf16.msra.mxu0 %v16623_v14  ;;  %13557 = vmatpush1.bf16.msra.mxu1 %v16626_v55  ;;  %v16700_v14 = vld [vmem:[#allocation13 + $0xf8] sm:$0xff]  }
 0x843   :  { %13472 = vmatprep.subr.bf16.mxu0 %v16631_v36  ;;  %13558 = vmatprep.subr.bf16.mxu1 %v16634_v59  ;;  %v16701_v55 = vld [vmem:[#allocation13 + $0x38] sm:$0xff]  }
 0x844   :  { %v16702_v36 = vld [vmem:[#allocation13 + $0xb8] sm:$0xff]  }
 0x845   :  { %v12749_v59 = vld [vmem:[#allocation12] sm:$0xf] }
 0x846   :  { %13473 = vmatpush1.bf16.msra.mxu0 %v16629_v62  ;;  %13559 = vmatpush1.bf16.msra.mxu1 %v16632_v63  ;;  %v12754_v62 = vrot.slane %v12749_v59, %v17359_v33  ;;  %v12762_v63 = vrot.slane %v12749_v59, %v17362_v57 }
 0x847   :  { %13474 = vmatprep.subr.bf16.mxu0 %v16637_v13  ;;  %13560 = vmatprep.subr.bf16.mxu1 %v16640_v45  ;;  %v12758_v13 = vrot.slane %v12749_v59, %v17365_v16  ;;  %v12766_v45 = vrot.slane %v12749_v59, %v17368_v52 }
 0x84a   :  { %13475 = vmatpush1.bf16.msra.mxu0 %v16635_v1  ;;  %13561 = vmatpush1.bf16.msra.mxu1 %v16638_v3 }
 0x84b   :  { %13476 = vmatprep.subr.bf16.mxu0 %v16643_v42  ;;  %13562 = vmatprep.subr.bf16.mxu1 %v16646_v4 }
 0x84e   :  { %13477 = vmatpush1.bf16.msra.mxu0 %v16641_v5  ;;  %13563 = vmatpush1.bf16.msra.mxu1 %v16644_v15 }
 0x84f   :  { %13478 = vmatprep.subr.bf16.mxu0 %v16649_v24  ;;  %13564 = vmatprep.subr.bf16.mxu1 %v16652_v6 }
 0x852   :  { %13479 = vmatpush1.bf16.msra.mxu0 %v16647_v7  ;;  %13565 = vmatpush1.bf16.msra.mxu1 %v16650_v29 }
 0x853   :  { %13480 = vmatprep.subr.bf16.mxu0 %v16655_v8  ;;  %13566 = vmatprep.subr.bf16.mxu1 %v16658_v11 }
 0x856   :  { %13481 = vmatpush1.bf16.msra.mxu0 %v16653_v9  ;;  %13567 = vmatpush1.bf16.msra.mxu1 %v16656_v10 }
 0x857   :  { %13482 = vmatprep.subr.bf16.mxu0 %v16661_v50  ;;  %13568 = vmatprep.subr.bf16.mxu1 %v16664_v12 }
 0x85a   :  { %13483 = vmatpush1.bf16.msra.mxu0 %v16659_v19  ;;  %13569 = vmatpush1.bf16.msra.mxu1 %v16662_v20 }
 0x85b   :  { %13484 = vmatprep.subr.bf16.mxu0 %v16667_v48  ;;  %13570 = vmatprep.subr.bf16.mxu1 %v16670_v32 }
 0x85e   :  { %13485 = vmatpush1.bf16.msra.mxu0 %v16665_v37  ;;  %13571 = vmatpush1.bf16.msra.mxu1 %v16668_v61 }
 0x85f   :  { %15819 = vmatprep.subr.bf16.mxu0 %v16671_v60  ;;  %15841 = vmatprep.subr.bf16.mxu1 %v16672_v23 }
 0x861   :  { %13487 = vmatmul.mubr.bf16.vlgmr.msra.gmra.mrb[12].mxu0 %v17420_v18  ;;  %13573 = vmatmul.mubr.bf16.vlgmr.msra.gmra.mrb[12].mxu1 %v17420_v18  ;;  %v16686_v18 = vld [vmem:[#allocation13 + $0x98] sm:$0xff]  }
 0x862   :  { %15820 = vmatpush3.bf16.msra.mxu0 %v16673_v25  ;;  %15842 = vmatpush3.bf16.msra.mxu1 %v16674_v26 }
 0x863   :  { %15821 = vmatprep.subr.bf16.mxu0 %v16675_v28  ;;  %15843 = vmatprep.subr.bf16.mxu1 %v16676_v58  ;;  %v15784_v28 = vld [vmem:[#allocation15] ss:$0 sm:$0xff] }
 0x866   :  { %15822 = vmatpush3.bf16.msra.mxu0 %v16677_v31  ;;  %15844 = vmatpush3.bf16.msra.mxu1 %v16678_v34 }
 0x867   :  { %15823 = vmatprep.subr.bf16.mxu0 %v16679_v35  ;;  %15845 = vmatprep.subr.bf16.mxu1 %v16680_v46 }
 0x86a   :  { %15824 = vmatpush3.bf16.msra.mxu0 %v16681_v30  ;;  %15846 = vmatpush3.bf16.msra.mxu1 %v16682_v22 }
 0x86b   :  { %15825 = vmatprep.subr.bf16.mxu0 %v16683_v39  ;;  %15847 = vmatprep.subr.bf16.mxu1 %v16684_v2 }
 0x86e   :  { %15826 = vmatpush3.bf16.msra.mxu0 %v16685_v54  ;;  %15848 = vmatpush3.bf16.msra.mxu1 %v16686_v18 }
 0x86f   :  { %15827 = vmatprep.subr.bf16.mxu0 %v16687_v40  ;;  %15849 = vmatprep.subr.bf16.mxu1 %v16688_v41 }
 0x872   :  { %15828 = vmatpush3.bf16.msra.mxu0 %v16689_v43  ;;  %15850 = vmatpush3.bf16.msra.mxu1 %v16690_v47 }
 0x873   :  { %15829 = vmatprep.subr.bf16.mxu0 %v16691_v49  ;;  %15851 = vmatprep.subr.bf16.mxu1 %v16692_v53 }
 0x876   :  { %15830 = vmatpush3.bf16.msra.mxu0 %v16693_v38  ;;  %15852 = vmatpush3.bf16.msra.mxu1 %v16694_v21 }
 0x877   :  { %15831 = vmatprep.subr.bf16.mxu0 %v16695_v51  ;;  %15853 = vmatprep.subr.bf16.mxu1 %v16696_v56  ;;  %v13941_v56 = vand.u32 127, %v10627_v27 }
 0x879   :  { %vm13942_vm0 = vcmp.ge.s32.totalorder %v13941_v56, 10  ;;  %vm13943_vm1 = vcmp.lt.s32.totalorder %v13941_v56, 30 }
 0x87a   :  { %15832 = vmatpush3.bf16.msra.mxu0 %v16697_v44  ;;  %15854 = vmatpush3.bf16.msra.mxu1 %v16698_v17  ;;  %vm13944_vm2 = vmand %vm13942_vm0, %vm13943_vm1 }
 0x87b   :  { %15833 = vmatprep.subr.bf16.mxu0 %v16699_v0  ;;  %15855 = vmatprep.subr.bf16.mxu1 %v16700_v14 }
 0x87e   :  { %15834 = vmatpush3.bf16.msra.mxu0 %v16701_v55  ;;  %15856 = vmatpush3.bf16.msra.mxu1 %v16702_v36 }
 0x934   :  { %v13488_v1 = vpop.f32.mrb[12].mxu0  ;;  %v13574_v3 = vpop.f32.mrb[12].mxu1 }
 0x935   :  { %v15871_v42 = vadd.f32 %v13488_v1, %v12754_v62  ;;  %v15875_v4 = vadd.f32 %v13574_v3, %v12762_v63  ;;  %v13490_v5 = vpop.f32.mrb[13].mxu0  ;;  %v13576_v15 = vpop.f32.mrb[13].mxu1 }
 0x936   :  { %v15872_v24 = vadd.f32 %v13490_v5, %v12758_v13  ;;  %v15876_v6 = vadd.f32 %v13576_v15, %v12766_v45  ;;  %v13492_v7 = vpop.f32.mrb[14].mxu0  ;;  %v13578_v29 = vpop.f32.mrb[14].mxu1 }
 0x937   :  { %v15873_v8 = vadd.f32 %v13492_v7, %v12754_v62  ;;  %v15877_v11 = vadd.f32 %v13578_v29, %v12762_v63  ;;  %v13494_v9 = vpop.f32.mrb[15].mxu0  ;;  %v13580_v33 = vpop.f32.mrb[15].mxu1  ;;  %v13583_v50 = vmax.f32 %v15871_v42, 0.0  ;;  %v13585_v16 = vmax.f32 %v15875_v4, 0.0 }
 0x938   :  { %v15874_v10 = vadd.f32 %v13494_v9, %v12758_v13  ;;  %v15878_v57 = vadd.f32 %v13580_v33, %v12766_v45  ;;  %v13584_v19 = vmax.f32 %v15872_v24, 0.0  ;;  %v13586_v20 = vmax.f32 %v15876_v6, 0.0 }
 0x939   :  { %v13587_v12 = vmax.f32 %v15873_v8, 0.0  ;;  %v13589_v52 = vmax.f32 %v15877_v11, 0.0 }
 0x93a   :  { %v13588_v48 = vmax.f32 %v15874_v10, 0.0  ;;  %v13590_v32 = vmax.f32 %v15878_v57, 0.0 }
 0x93b   :  { %v13591_v37 = vpack.c.bf16 %v13587_v12, %v13583_v50  ;;  %v13593_v61 = vpack.c.bf16 %v13589_v52, %v13585_v16 }
 0x93c   :  { %v13592_v60 = vpack.c.bf16 %v13588_v48, %v13584_v19  ;;  %v13594_v23 = vpack.c.bf16 %v13590_v32, %v13586_v20 }
 0x93e   :  { %13890 = vmatprep.mubr.bf16.mxu0 %v13592_v60  ;;  %13931 = vmatprep.mubr.bf16.mxu1 %v13594_v23 }
 0x93f   :  { %13891 = vmatmul.mubr.bf16.vlgmr.msra.gmra.mrb[16].mxu0 %v13591_v37  ;;  %13932 = vmatmul.mubr.bf16.vlgmr.msra.gmra.mrb[16].mxu1 %v13593_v61 }
 0xa12   :  { %v15835_v25 = vpop.f32.mrb[16].mxu0  ;;  %v15857_v26 = vpop.f32.mrb[16].mxu1 }
 0xa13   :  { %v15836_v58 = vpop.f32.mrb[17].mxu0  ;;  %v15858_v31 = vpop.f32.mrb[17].mxu1 }
 0xa14   :  { %v15837_v34 = vadd.f32 %v15836_v58, %v15835_v25  ;;  %v15859_v35 = vadd.f32 %v15858_v31, %v15857_v26  ;;  %v15838_v46 = vpop.f32.mrb[18].mxu0  ;;  %v15860_v30 = vpop.f32.mrb[18].mxu1 }
 0xa15   :  { %v15839_v22 = vpop.f32.mrb[19].mxu0  ;;  %v15861_v39 = vpop.f32.mrb[19].mxu1 }
 0xa16   :  { %v13893_v2 = vadd.f32 %v15837_v34, %v15784_v28  ;;  %v15840_v54 = vadd.f32 %v15839_v22, %v15838_v46  ;;  %v15862_v18 = vadd.f32 %v15861_v39, %v15860_v30 }
 0xa18   :  { %v13934_v40 = vadd.f32 %v15859_v35, %v13893_v2  ;;  %v13896_v41 = vadd.f32 %v15840_v54, %v15784_v28 }
 0xa1a   :  { %v15817_v43 = vmul.f32 -1.442695, %v13934_v40  ;;  %v13937_v47 = vadd.f32 %v15862_v18, %v13896_v41 }
 0xa1c   :  { %16703 = vpow2.f32 %v15817_v43  ;;  %v15818_v49 = vmul.f32 -1.442695, %v13937_v47 }
 0xa1e   :  { %16705 = vpow2.f32 %v15818_v49 }
 0xa26   :  { %v16704_v53 = vpop.eup %16703 }
 0xa27   :  { %v13951_v38 = vadd.f32 1.0, %v16704_v53 }
 0xa28   :  { %v16706_v21 = vpop.eup %16705 }
 0xa29   :  { %16707 = vrcp.f32 %v13951_v38  ;;  %v13952_v51 = vadd.f32 1.0, %v16706_v21 }
 0xa2b   :  { %16709 = vrcp.f32 %v13952_v51 }
 0xa33   :  { %v16708_v44 = vpop.eup %16707 }
 0xa34   :  { %v13957_v17 = vsel %vm13944_vm2, %v16708_v44, %v13934_v40 }
 0xa35   :  { %v16710_v0 = vpop.eup %16709  ;;  %13959 = vst [vmem:[%s17446_s11] sm:$0xff] %v13957_v17 }
 0xa36   :  { %v13958_v14 = vsel %vm13944_vm2, %v16710_v0, %v13937_v47 }
 0xa37   :  { %13960 = vst [vmem:[%s17446_s11 + $0x8] sm:$0xff] %v13958_v14 }
 0xa38   :  { %13965 = vsyncpa [#allocation3], 1 }
 0xa39   :  { %13966 = vsyncpa [#allocation5], 1 }
 0xa3a   :  { %13967 = vsyncpa [#allocation8], 1 }
 0xa3b   :  { %13968 = vsyncpa [#allocation11], 1 }
 0xa3c   :  { %13969 = vsyncpa [#allocation14], 1 }

</bundles_post_ra>
